<compile_context>
chip_gen: v7x
topology: tpu7x:2x2x1
jax: 0.10.0
libtpu: 0.0.40
codegen_flags: <defaults>
</compile_context>

<pallas_src>
import functools
import math

import jax
import jax.numpy as jnp
from jax import lax
from jax.experimental import pallas as pl
from jax.experimental.pallas import tpu as pltpu  # noqa: F401  (TPU backend namespace)


# ----------------------------------------------------------------------------
# Fused kernel: whole forward in one invocation (all refs are full arrays in
# VMEM; no grid, no pipelining -> each weight is DMA'd exactly once).
# ----------------------------------------------------------------------------
def _fused_kernel(num_heads,
                  text_ref, proto_ref,
                  wt2c_ref, bt2c_ref, wi2c_ref, bi2c_ref,
                  wq1_ref, bq1_ref, wkv1_ref, bkv1_ref, wo1_ref, bo1_ref,
                  wq2_ref, bq2_ref, wkv2_ref, bkv2_ref, wo2_ref, bo2_ref,
                  wfa_ref, wfb_ref, bfu_ref,
                  out_ref):
    f32 = jnp.float32
    bf16 = jnp.bfloat16
    E = wq1_ref.shape[0]                 # common_dim
    hd = E // num_heads                  # head_dim (lane-aligned: 128)

    def mm(x, w_ref):
        # MXU matmul: bf16 operands, f32 accumulation.
        return jnp.dot(x.astype(bf16), w_ref[...], preferred_element_type=f32)

    # ---- projections into the common space (computed once) ------------------
    tc = mm(text_ref[...], wt2c_ref) + bt2c_ref[...]    # (NC, E) text_to_common
    pc = mm(proto_ref[...], wi2c_ref) + bi2c_ref[...]   # (NC, E) image_to_common

    # ---- one nn.MultiheadAttention (batch = 1, no mask, no dropout) ---------
    def mha(q_in, kv_in, wq_ref, bq_ref, wkv_ref, bkv_ref, wo_ref, bo_ref):
        # 1/sqrt(head_dim) is pre-folded into wq/bq at weight-prep time.
        q = mm(q_in, wq_ref) + bq_ref[...]           # (L, E), already scaled
        kv = mm(kv_in, wkv_ref) + bkv_ref[...]       # (S, 2E)
        k = kv[:, :E]
        v = kv[:, E:]
        out = None
        for h in range(num_heads):                   # static unroll; 128-aligned slices
            sl = slice(h * hd, (h + 1) * hd)
            qh = q[:, sl]
            kh = k[:, sl]
            vh = v[:, sl]
            # q @ k^T without materializing a transposed key tile.
            s = lax.dot_general(qh.astype(bf16), kh.astype(bf16),
                                (((1,), (1,)), ((), ())),
                                preferred_element_type=f32)          # (L, S)
            s = s - jnp.max(s, axis=-1, keepdims=True)
            e = jnp.exp(s)
            a = e / jnp.sum(e, axis=-1, keepdims=True)               # softmax, f32
            ctx_h = jnp.dot(a.astype(bf16), vh.astype(bf16),
                            preferred_element_type=f32)              # (L, hd)
            # Per-head accumulation of the out-projection (no lane concat).
            part = jnp.dot(ctx_h.astype(bf16), wo_ref[sl, :],
                           preferred_element_type=f32)               # (L, E)
            out = part if out is None else out + part
        return out + bo_ref[...]

    attn_t2i = mha(tc, pc, wq1_ref, bq1_ref, wkv1_ref, bkv1_ref, wo1_ref, bo1_ref)
    attn_i2t = mha(pc, tc, wq2_ref, bq2_ref, wkv2_ref, bkv2_ref, wo2_ref, bo2_ref)

    # fusion_layer(cat([attn_t2i, attn_i2t], -1)) computed with the weight
    # split in halves so no in-kernel concat of activations is needed.
    fused = mm(attn_t2i, wfa_ref) + mm(attn_i2t, wfb_ref) + bfu_ref[...]
    out_ref[...] = fused.astype(out_ref.dtype)


# ----------------------------------------------------------------------------
# One-time weight preparation (done at init, cached by the caller):
#   * torch (out, in) Linear weights -> (in, out), cast to bf16 for the MXU
#   * packed in_proj (3E, E) split into Wq and [Wk; Wv]
#   * 1/sqrt(head_dim) folded into Wq AND bq
#   * fusion weight split into its two E-wide halves
# ----------------------------------------------------------------------------
def prepare_params(params, num_heads):
    f32, bf16 = jnp.float32, jnp.bfloat16
    E = params['w_t2c'].shape[0]                     # common_dim
    hd = E // num_heads
    scale = 1.0 / math.sqrt(hd)

    def wT(w):       # torch Linear weight (out, in) -> (in, out), bf16 for the MXU
        return jnp.asarray(w, f32).T.astype(bf16)

    def brow(b):     # bias -> (1, dim) f32 row
        return jnp.asarray(b, f32)[None, :]

    def mha_weights(w_in, b_in, w_o, b_o):
        wq, wk, wv = w_in[:E], w_in[E:2 * E], w_in[2 * E:]
        bq, bk, bv = b_in[:E], b_in[E:2 * E], b_in[2 * E:]
        wkv = jnp.concatenate([wk, wv], axis=0)      # (2E, E)
        bkv = jnp.concatenate([bk, bv], axis=0)      # (2E,)
        # Fold the attention scale into the whole Q projection (weight + bias).
        return (wT(wq * scale), brow(bq * scale),
                wT(wkv), brow(bkv),
                wT(w_o), brow(b_o))

    w_f = params['w_f']                              # (FD, 2E)
    prepped = dict(
        protos=jnp.asarray(params['class_emb'], f32),
        wt2c=wT(params['w_t2c']), bt2c=brow(params['b_t2c']),
        wi2c=wT(params['w_i2c']), bi2c=brow(params['b_i2c']),
        mha1=mha_weights(params['w_in1'], params['b_in1'], params['w_o1'], params['b_o1']),
        mha2=mha_weights(params['w_in2'], params['b_in2'], params['w_o2'], params['b_o2']),
        wfa=wT(w_f[:, :E]), wfb=wT(w_f[:, E:]), bfu=brow(params['b_f']),
    )
    return jax.block_until_ready(prepped)


# ----------------------------------------------------------------------------
# Forward: a single pallas_call, all inputs as whole-array VMEM blocks.
# (For much larger num_classes, reintroduce a row-block grid over the queries;
#  at these sizes the kernel is weight-DMA bound and one step is optimal.)
# ----------------------------------------------------------------------------
def learnable_prototypes_forward(text_features, prepped, num_heads):
    NC = text_features.shape[0]
    FD = prepped['bfu'].shape[1]
    return pl.pallas_call(
        functools.partial(_fused_kernel, num_heads),
        out_shape=jax.ShapeDtypeStruct((NC, FD), jnp.float32),
        # No grid / BlockSpecs: every operand is a single whole-array VMEM
        # block (single-buffered, one DMA each).  No dimension_semantics:
        # splitting a memory-bound kernel across TensorCores would only
        # duplicate the weight stream.
    )(text_features.astype(jnp.float32),
      prepped['protos'],
      prepped['wt2c'], prepped['bt2c'], prepped['wi2c'], prepped['bi2c'],
      *prepped['mha1'], *prepped['mha2'],
      prepped['wfa'], prepped['wfb'], prepped['bfu'])


# ----------------------------------------------------------------------------
# Pure-JAX f32 reference (mirrors the PyTorch forward) for validation.
# ----------------------------------------------------------------------------
def reference_forward(text_features, P, num_heads):
    E = P['w_t2c'].shape[0]
    protos = P['class_emb']
    tc = text_features @ P['w_t2c'].T + P['b_t2c']
    pc = protos @ P['w_i2c'].T + P['b_i2c']

    def mha(q_in, kv_in, w_in, b_in, w_o, b_o):
        hd = E // num_heads
        wq, wk, wv = w_in[:E], w_in[E:2 * E], w_in[2 * E:]
        bq, bk, bv = b_in[:E], b_in[E:2 * E], b_in[2 * E:]
        q = q_in @ wq.T + bq
        k = kv_in @ wk.T + bk
        v = kv_in @ wv.T + bv
        L, S = q.shape[0], k.shape[0]
        qh = q.reshape(L, num_heads, hd).transpose(1, 0, 2)
        kh = k.reshape(S, num_heads, hd).transpose(1, 0, 2)
        vh = v.reshape(S, num_heads, hd).transpose(1, 0, 2)
        s = jnp.einsum('hld,hsd->hls', qh, kh) / jnp.sqrt(jnp.float32(hd))
        a = jax.nn.softmax(s, axis=-1)
        ctx = jnp.einsum('hls,hsd->hld', a, vh).transpose(1, 0, 2).reshape(L, E)
        return ctx @ w_o.T + b_o

    attn_t2i = mha(tc, pc, P['w_in1'], P['b_in1'], P['w_o1'], P['b_o1'])
    attn_i2t = mha(pc, tc, P['w_in2'], P['b_in2'], P['w_o2'], P['b_o2'])
    cat = jnp.concatenate([attn_t2i, attn_i2t], axis=-1)
    return cat @ P['w_f'].T + P['b_f']


if __name__ == "__main__":
    # Module-default dims (feat_dim=256, text_feat_dim=768, common_dim=512,
    # num_heads=4); num_classes bumped 7 -> 8 for sublane-aligned rows.
    # All lane dims are multiples of 128; head_dim = 512/4 = 128.
    NC = 8      # num_classes
    FD = 256    # feat_dim
    TD = 768    # text_feat_dim
    E = 512     # common_dim
    H = 4       # num_heads

    key = jax.random.PRNGKey(0)
    ks = jax.random.split(key, 16)

    def nrm(k, shape, scale=0.05):
        return (jax.random.normal(k, shape) * scale).astype(jnp.float32)

    P = dict(
        class_emb=nrm(ks[0], (NC, FD), 1.0),                       # class_embeddings.weight
        w_t2c=nrm(ks[1], (E, TD)), b_t2c=nrm(ks[2], (E,)),         # text_to_common
        w_i2c=nrm(ks[3], (E, FD)), b_i2c=nrm(ks[4], (E,)),         # image_to_common
        w_in1=nrm(ks[5], (3 * E, E)), b_in1=nrm(ks[6], (3 * E,)),  # text_to_image_attention
        w_o1=nrm(ks[7], (E, E)), b_o1=nrm(ks[8], (E,)),
        w_in2=nrm(ks[9], (3 * E, E)), b_in2=nrm(ks[10], (3 * E,)), # image_to_text_attention
        w_o2=nrm(ks[11], (E, E)), b_o2=nrm(ks[12], (E,)),
        w_f=nrm(ks[13], (FD, 2 * E)), b_f=nrm(ks[14], (FD,)),      # fusion_layer
    )
    text_features = jax.random.normal(ks[15], (NC, TD), dtype=jnp.float32)

    # One-time weight prep (would be cached on the module / in jit constants).
    prepped = prepare_params(P, num_heads=H)

    out = learnable_prototypes_forward(text_features, prepped, num_heads=H)
    out = jax.block_until_ready(out)

    with jax.default_matmul_precision("highest"):
        ref = reference_forward(text_features, P, num_heads=H)
    ref = jax.block_until_ready(ref)

    assert out.shape == (NC, FD), out.shape
    # bf16 MXU operands (f32 accumulation) across four chained matmul stages +
    # attention vs. an f32 "highest"-precision reference: check the relative
    # Frobenius error (robust, still catches any structural/indexing bug).
    max_err = float(jnp.max(jnp.abs(out - ref)))
    rel_err = float(jnp.linalg.norm(out - ref) / jnp.linalg.norm(ref))
    assert rel_err < 3e-2, f"relative error too high: {rel_err} (max abs {max_err})"
    print("KERNEL_OK")
</pallas_src>

<mosaic_0001>
module attributes {stable_mosaic.version = 11 : i64} {
  func.func @_fused_kernel(%arg0: memref<8x768xf32, #tpu.memory_space<vmem>>, %arg1: memref<8x256xf32, #tpu.memory_space<vmem>>, %arg2: memref<768x512xbf16, #tpu.memory_space<vmem>>, %arg3: memref<1x512xf32, #tpu.memory_space<vmem>>, %arg4: memref<256x512xbf16, #tpu.memory_space<vmem>>, %arg5: memref<1x512xf32, #tpu.memory_space<vmem>>, %arg6: memref<512x512xbf16, #tpu.memory_space<vmem>>, %arg7: memref<1x512xf32, #tpu.memory_space<vmem>>, %arg8: memref<512x1024xbf16, #tpu.memory_space<vmem>>, %arg9: memref<1x1024xf32, #tpu.memory_space<vmem>>, %arg10: memref<512x512xbf16, #tpu.memory_space<vmem>>, %arg11: memref<1x512xf32, #tpu.memory_space<vmem>>, %arg12: memref<512x512xbf16, #tpu.memory_space<vmem>>, %arg13: memref<1x512xf32, #tpu.memory_space<vmem>>, %arg14: memref<512x1024xbf16, #tpu.memory_space<vmem>>, %arg15: memref<1x1024xf32, #tpu.memory_space<vmem>>, %arg16: memref<512x512xbf16, #tpu.memory_space<vmem>>, %arg17: memref<1x512xf32, #tpu.memory_space<vmem>>, %arg18: memref<512x256xbf16, #tpu.memory_space<vmem>>, %arg19: memref<512x256xbf16, #tpu.memory_space<vmem>>, %arg20: memref<1x256xf32, #tpu.memory_space<vmem>>, %arg21: memref<8x256xf32, #tpu.memory_space<vmem>>) attributes {dimension_semantics = [], scalar_prefetch = 0 : i64, scratch_operands = 0 : i64, tpu.core_type = #tpu.core_type<tc>} {
    %c0 = arith.constant 0 : index
    %c0_0 = arith.constant 0 : index
    %0 = vector.load %arg0[%c0, %c0_0] : memref<8x768xf32, #tpu.memory_space<vmem>>, vector<8x768xf32>
    %1 = arith.truncf %0 : vector<8x768xf32> to vector<8x768xbf16>
    %c0_1 = arith.constant 0 : index
    %c0_2 = arith.constant 0 : index
    %2 = vector.load %arg2[%c0_1, %c0_2] : memref<768x512xbf16, #tpu.memory_space<vmem>>, vector<768x512xbf16>
    %cst = arith.constant dense<0.000000e+00> : vector<8x512xf32>
    %3 = tpu.matmul %1, %2, %cst {dimension_numbers = #tpu.dot_dimension_numbers<[1], [0], [0], [1], [0, 0, 1, 1], [], []>} : vector<8x768xbf16>, vector<768x512xbf16>, vector<8x512xf32> -> vector<8x512xf32>
    %c0_3 = arith.constant 0 : index
    %c0_4 = arith.constant 0 : index
    %4 = vector.load %arg3[%c0_3, %c0_4] : memref<1x512xf32, #tpu.memory_space<vmem>>, vector<1x512xf32>
    %5 = vector.broadcast %4 : vector<1x512xf32> to vector<8x512xf32>
    %6 = arith.addf %3, %5 : vector<8x512xf32>
    %c0_5 = arith.constant 0 : index
    %c0_6 = arith.constant 0 : index
    %7 = vector.load %arg1[%c0_5, %c0_6] : memref<8x256xf32, #tpu.memory_space<vmem>>, vector<8x256xf32>
    %8 = arith.truncf %7 : vector<8x256xf32> to vector<8x256xbf16>
    %c0_7 = arith.constant 0 : index
    %c0_8 = arith.constant 0 : index
    %9 = vector.load %arg4[%c0_7, %c0_8] : memref<256x512xbf16, #tpu.memory_space<vmem>>, vector<256x512xbf16>
    %cst_9 = arith.constant dense<0.000000e+00> : vector<8x512xf32>
    %10 = tpu.matmul %8, %9, %cst_9 {dimension_numbers = #tpu.dot_dimension_numbers<[1], [0], [0], [1], [0, 0, 1, 1], [], []>} : vector<8x256xbf16>, vector<256x512xbf16>, vector<8x512xf32> -> vector<8x512xf32>
    %c0_10 = arith.constant 0 : index
    %c0_11 = arith.constant 0 : index
    %11 = vector.load %arg5[%c0_10, %c0_11] : memref<1x512xf32, #tpu.memory_space<vmem>>, vector<1x512xf32>
    %12 = vector.broadcast %11 : vector<1x512xf32> to vector<8x512xf32>
    %13 = arith.addf %10, %12 : vector<8x512xf32>
    %14 = arith.truncf %6 : vector<8x512xf32> to vector<8x512xbf16>
    %c0_12 = arith.constant 0 : index
    %c0_13 = arith.constant 0 : index
    %15 = vector.load %arg6[%c0_12, %c0_13] : memref<512x512xbf16, #tpu.memory_space<vmem>>, vector<512x512xbf16>
    %cst_14 = arith.constant dense<0.000000e+00> : vector<8x512xf32>
    %16 = tpu.matmul %14, %15, %cst_14 {dimension_numbers = #tpu.dot_dimension_numbers<[1], [0], [0], [1], [0, 0, 1, 1], [], []>} : vector<8x512xbf16>, vector<512x512xbf16>, vector<8x512xf32> -> vector<8x512xf32>
    %c0_15 = arith.constant 0 : index
    %c0_16 = arith.constant 0 : index
    %17 = vector.load %arg7[%c0_15, %c0_16] : memref<1x512xf32, #tpu.memory_space<vmem>>, vector<1x512xf32>
    %18 = vector.broadcast %17 : vector<1x512xf32> to vector<8x512xf32>
    %19 = arith.addf %16, %18 : vector<8x512xf32>
    %20 = arith.truncf %13 : vector<8x512xf32> to vector<8x512xbf16>
    %c0_17 = arith.constant 0 : index
    %c0_18 = arith.constant 0 : index
    %21 = vector.load %arg8[%c0_17, %c0_18] : memref<512x1024xbf16, #tpu.memory_space<vmem>>, vector<512x1024xbf16>
    %cst_19 = arith.constant dense<0.000000e+00> : vector<8x1024xf32>
    %22 = tpu.matmul %20, %21, %cst_19 {dimension_numbers = #tpu.dot_dimension_numbers<[1], [0], [0], [1], [0, 0, 1, 1], [], []>} : vector<8x512xbf16>, vector<512x1024xbf16>, vector<8x1024xf32> -> vector<8x1024xf32>
    %c0_20 = arith.constant 0 : index
    %c0_21 = arith.constant 0 : index
    %23 = vector.load %arg9[%c0_20, %c0_21] : memref<1x1024xf32, #tpu.memory_space<vmem>>, vector<1x1024xf32>
    %24 = vector.broadcast %23 : vector<1x1024xf32> to vector<8x1024xf32>
    %25 = arith.addf %22, %24 : vector<8x1024xf32>
    %26 = vector.extract_strided_slice %25 {offsets = [0, 0], sizes = [8, 512], strides = [1, 1]} : vector<8x1024xf32> to vector<8x512xf32>
    %27 = vector.extract_strided_slice %25 {offsets = [0, 512], sizes = [8, 512], strides = [1, 1]} : vector<8x1024xf32> to vector<8x512xf32>
    %28 = vector.extract_strided_slice %19 {offsets = [0, 0], sizes = [8, 128], strides = [1, 1]} : vector<8x512xf32> to vector<8x128xf32>
    %29 = vector.extract_strided_slice %26 {offsets = [0, 0], sizes = [8, 128], strides = [1, 1]} : vector<8x512xf32> to vector<8x128xf32>
    %30 = vector.extract_strided_slice %27 {offsets = [0, 0], sizes = [8, 128], strides = [1, 1]} : vector<8x512xf32> to vector<8x128xf32>
    %31 = arith.truncf %28 : vector<8x128xf32> to vector<8x128xbf16>
    %32 = arith.truncf %29 : vector<8x128xf32> to vector<8x128xbf16>
    %cst_22 = arith.constant dense<0.000000e+00> : vector<8x8xf32>
    %33 = tpu.matmul %31, %32, %cst_22 {dimension_numbers = #tpu.dot_dimension_numbers<[1], [1], [0], [0], [0, 0, 1, 0], [], []>} : vector<8x128xbf16>, vector<8x128xbf16>, vector<8x8xf32> -> vector<8x8xf32>
    %cst_23 = arith.constant dense<0xFF800000> : vector<8xf32>
    %34 = vector.multi_reduction <maximumf>, %33, %cst_23 [1] : vector<8x8xf32> to vector<8xf32>
    %35 = vector.shape_cast %34 : vector<8xf32> to vector<8x1xf32>
    %36 = vector.broadcast %35 : vector<8x1xf32> to vector<8x8xf32>
    %37 = arith.subf %33, %36 : vector<8x8xf32>
    %38 = math.exp %37 : vector<8x8xf32>
    %cst_24 = arith.constant dense<0.000000e+00> : vector<8xf32>
    %39 = vector.multi_reduction <add>, %38, %cst_24 [1] : vector<8x8xf32> to vector<8xf32>
    %40 = vector.shape_cast %39 : vector<8xf32> to vector<8x1xf32>
    %41 = vector.broadcast %40 : vector<8x1xf32> to vector<8x8xf32>
    %42 = arith.divf %38, %41 : vector<8x8xf32>
    %43 = arith.truncf %42 : vector<8x8xf32> to vector<8x8xbf16>
    %44 = arith.truncf %30 : vector<8x128xf32> to vector<8x128xbf16>
    %cst_25 = arith.constant dense<0.000000e+00> : vector<8x128xf32>
    %45 = tpu.matmul %43, %44, %cst_25 {dimension_numbers = #tpu.dot_dimension_numbers<[1], [0], [0], [1], [0, 0, 1, 1], [], []>} : vector<8x8xbf16>, vector<8x128xbf16>, vector<8x128xf32> -> vector<8x128xf32>
    %46 = arith.truncf %45 : vector<8x128xf32> to vector<8x128xbf16>
    %c0_26 = arith.constant 0 : index
    %c0_27 = arith.constant 0 : index
    %47 = vector.load %arg10[%c0_26, %c0_27] : memref<512x512xbf16, #tpu.memory_space<vmem>>, vector<128x512xbf16>
    %cst_28 = arith.constant dense<0.000000e+00> : vector<8x512xf32>
    %48 = tpu.matmul %46, %47, %cst_28 {dimension_numbers = #tpu.dot_dimension_numbers<[1], [0], [0], [1], [0, 0, 1, 1], [], []>} : vector<8x128xbf16>, vector<128x512xbf16>, vector<8x512xf32> -> vector<8x512xf32>
    %49 = vector.extract_strided_slice %19 {offsets = [0, 128], sizes = [8, 128], strides = [1, 1]} : vector<8x512xf32> to vector<8x128xf32>
    %50 = vector.extract_strided_slice %26 {offsets = [0, 128], sizes = [8, 128], strides = [1, 1]} : vector<8x512xf32> to vector<8x128xf32>
    %51 = vector.extract_strided_slice %27 {offsets = [0, 128], sizes = [8, 128], strides = [1, 1]} : vector<8x512xf32> to vector<8x128xf32>
    %52 = arith.truncf %49 : vector<8x128xf32> to vector<8x128xbf16>
    %53 = arith.truncf %50 : vector<8x128xf32> to vector<8x128xbf16>
    %cst_29 = arith.constant dense<0.000000e+00> : vector<8x8xf32>
    %54 = tpu.matmul %52, %53, %cst_29 {dimension_numbers = #tpu.dot_dimension_numbers<[1], [1], [0], [0], [0, 0, 1, 0], [], []>} : vector<8x128xbf16>, vector<8x128xbf16>, vector<8x8xf32> -> vector<8x8xf32>
    %cst_30 = arith.constant dense<0xFF800000> : vector<8xf32>
    %55 = vector.multi_reduction <maximumf>, %54, %cst_30 [1] : vector<8x8xf32> to vector<8xf32>
    %56 = vector.shape_cast %55 : vector<8xf32> to vector<8x1xf32>
    %57 = vector.broadcast %56 : vector<8x1xf32> to vector<8x8xf32>
    %58 = arith.subf %54, %57 : vector<8x8xf32>
    %59 = math.exp %58 : vector<8x8xf32>
    %cst_31 = arith.constant dense<0.000000e+00> : vector<8xf32>
    %60 = vector.multi_reduction <add>, %59, %cst_31 [1] : vector<8x8xf32> to vector<8xf32>
    %61 = vector.shape_cast %60 : vector<8xf32> to vector<8x1xf32>
    %62 = vector.broadcast %61 : vector<8x1xf32> to vector<8x8xf32>
    %63 = arith.divf %59, %62 : vector<8x8xf32>
    %64 = arith.truncf %63 : vector<8x8xf32> to vector<8x8xbf16>
    %65 = arith.truncf %51 : vector<8x128xf32> to vector<8x128xbf16>
    %cst_32 = arith.constant dense<0.000000e+00> : vector<8x128xf32>
    %66 = tpu.matmul %64, %65, %cst_32 {dimension_numbers = #tpu.dot_dimension_numbers<[1], [0], [0], [1], [0, 0, 1, 1], [], []>} : vector<8x8xbf16>, vector<8x128xbf16>, vector<8x128xf32> -> vector<8x128xf32>
    %67 = arith.truncf %66 : vector<8x128xf32> to vector<8x128xbf16>
    %c128 = arith.constant 128 : index
    %c0_33 = arith.constant 0 : index
    %68 = vector.load %arg10[%c128, %c0_33] : memref<512x512xbf16, #tpu.memory_space<vmem>>, vector<128x512xbf16>
    %cst_34 = arith.constant dense<0.000000e+00> : vector<8x512xf32>
    %69 = tpu.matmul %67, %68, %cst_34 {dimension_numbers = #tpu.dot_dimension_numbers<[1], [0], [0], [1], [0, 0, 1, 1], [], []>} : vector<8x128xbf16>, vector<128x512xbf16>, vector<8x512xf32> -> vector<8x512xf32>
    %70 = arith.addf %48, %69 : vector<8x512xf32>
    %71 = vector.extract_strided_slice %19 {offsets = [0, 256], sizes = [8, 128], strides = [1, 1]} : vector<8x512xf32> to vector<8x128xf32>
    %72 = vector.extract_strided_slice %26 {offsets = [0, 256], sizes = [8, 128], strides = [1, 1]} : vector<8x512xf32> to vector<8x128xf32>
    %73 = vector.extract_strided_slice %27 {offsets = [0, 256], sizes = [8, 128], strides = [1, 1]} : vector<8x512xf32> to vector<8x128xf32>
    %74 = arith.truncf %71 : vector<8x128xf32> to vector<8x128xbf16>
    %75 = arith.truncf %72 : vector<8x128xf32> to vector<8x128xbf16>
    %cst_35 = arith.constant dense<0.000000e+00> : vector<8x8xf32>
    %76 = tpu.matmul %74, %75, %cst_35 {dimension_numbers = #tpu.dot_dimension_numbers<[1], [1], [0], [0], [0, 0, 1, 0], [], []>} : vector<8x128xbf16>, vector<8x128xbf16>, vector<8x8xf32> -> vector<8x8xf32>
    %cst_36 = arith.constant dense<0xFF800000> : vector<8xf32>
    %77 = vector.multi_reduction <maximumf>, %76, %cst_36 [1] : vector<8x8xf32> to vector<8xf32>
    %78 = vector.shape_cast %77 : vector<8xf32> to vector<8x1xf32>
    %79 = vector.broadcast %78 : vector<8x1xf32> to vector<8x8xf32>
    %80 = arith.subf %76, %79 : vector<8x8xf32>
    %81 = math.exp %80 : vector<8x8xf32>
    %cst_37 = arith.constant dense<0.000000e+00> : vector<8xf32>
    %82 = vector.multi_reduction <add>, %81, %cst_37 [1] : vector<8x8xf32> to vector<8xf32>
    %83 = vector.shape_cast %82 : vector<8xf32> to vector<8x1xf32>
    %84 = vector.broadcast %83 : vector<8x1xf32> to vector<8x8xf32>
    %85 = arith.divf %81, %84 : vector<8x8xf32>
    %86 = arith.truncf %85 : vector<8x8xf32> to vector<8x8xbf16>
    %87 = arith.truncf %73 : vector<8x128xf32> to vector<8x128xbf16>
    %cst_38 = arith.constant dense<0.000000e+00> : vector<8x128xf32>
    %88 = tpu.matmul %86, %87, %cst_38 {dimension_numbers = #tpu.dot_dimension_numbers<[1], [0], [0], [1], [0, 0, 1, 1], [], []>} : vector<8x8xbf16>, vector<8x128xbf16>, vector<8x128xf32> -> vector<8x128xf32>
    %89 = arith.truncf %88 : vector<8x128xf32> to vector<8x128xbf16>
    %c256 = arith.constant 256 : index
    %c0_39 = arith.constant 0 : index
    %90 = vector.load %arg10[%c256, %c0_39] : memref<512x512xbf16, #tpu.memory_space<vmem>>, vector<128x512xbf16>
    %cst_40 = arith.constant dense<0.000000e+00> : vector<8x512xf32>
    %91 = tpu.matmul %89, %90, %cst_40 {dimension_numbers = #tpu.dot_dimension_numbers<[1], [0], [0], [1], [0, 0, 1, 1], [], []>} : vector<8x128xbf16>, vector<128x512xbf16>, vector<8x512xf32> -> vector<8x512xf32>
    %92 = arith.addf %70, %91 : vector<8x512xf32>
    %93 = vector.extract_strided_slice %19 {offsets = [0, 384], sizes = [8, 128], strides = [1, 1]} : vector<8x512xf32> to vector<8x128xf32>
    %94 = vector.extract_strided_slice %26 {offsets = [0, 384], sizes = [8, 128], strides = [1, 1]} : vector<8x512xf32> to vector<8x128xf32>
    %95 = vector.extract_strided_slice %27 {offsets = [0, 384], sizes = [8, 128], strides = [1, 1]} : vector<8x512xf32> to vector<8x128xf32>
    %96 = arith.truncf %93 : vector<8x128xf32> to vector<8x128xbf16>
    %97 = arith.truncf %94 : vector<8x128xf32> to vector<8x128xbf16>
    %cst_41 = arith.constant dense<0.000000e+00> : vector<8x8xf32>
    %98 = tpu.matmul %96, %97, %cst_41 {dimension_numbers = #tpu.dot_dimension_numbers<[1], [1], [0], [0], [0, 0, 1, 0], [], []>} : vector<8x128xbf16>, vector<8x128xbf16>, vector<8x8xf32> -> vector<8x8xf32>
    %cst_42 = arith.constant dense<0xFF800000> : vector<8xf32>
    %99 = vector.multi_reduction <maximumf>, %98, %cst_42 [1] : vector<8x8xf32> to vector<8xf32>
    %100 = vector.shape_cast %99 : vector<8xf32> to vector<8x1xf32>
    %101 = vector.broadcast %100 : vector<8x1xf32> to vector<8x8xf32>
    %102 = arith.subf %98, %101 : vector<8x8xf32>
    %103 = math.exp %102 : vector<8x8xf32>
    %cst_43 = arith.constant dense<0.000000e+00> : vector<8xf32>
    %104 = vector.multi_reduction <add>, %103, %cst_43 [1] : vector<8x8xf32> to vector<8xf32>
    %105 = vector.shape_cast %104 : vector<8xf32> to vector<8x1xf32>
    %106 = vector.broadcast %105 : vector<8x1xf32> to vector<8x8xf32>
    %107 = arith.divf %103, %106 : vector<8x8xf32>
    %108 = arith.truncf %107 : vector<8x8xf32> to vector<8x8xbf16>
    %109 = arith.truncf %95 : vector<8x128xf32> to vector<8x128xbf16>
    %cst_44 = arith.constant dense<0.000000e+00> : vector<8x128xf32>
    %110 = tpu.matmul %108, %109, %cst_44 {dimension_numbers = #tpu.dot_dimension_numbers<[1], [0], [0], [1], [0, 0, 1, 1], [], []>} : vector<8x8xbf16>, vector<8x128xbf16>, vector<8x128xf32> -> vector<8x128xf32>
    %111 = arith.truncf %110 : vector<8x128xf32> to vector<8x128xbf16>
    %c384 = arith.constant 384 : index
    %c0_45 = arith.constant 0 : index
    %112 = vector.load %arg10[%c384, %c0_45] : memref<512x512xbf16, #tpu.memory_space<vmem>>, vector<128x512xbf16>
    %cst_46 = arith.constant dense<0.000000e+00> : vector<8x512xf32>
    %113 = tpu.matmul %111, %112, %cst_46 {dimension_numbers = #tpu.dot_dimension_numbers<[1], [0], [0], [1], [0, 0, 1, 1], [], []>} : vector<8x128xbf16>, vector<128x512xbf16>, vector<8x512xf32> -> vector<8x512xf32>
    %114 = arith.addf %92, %113 : vector<8x512xf32>
    %c0_47 = arith.constant 0 : index
    %c0_48 = arith.constant 0 : index
    %115 = vector.load %arg11[%c0_47, %c0_48] : memref<1x512xf32, #tpu.memory_space<vmem>>, vector<1x512xf32>
    %116 = vector.broadcast %115 : vector<1x512xf32> to vector<8x512xf32>
    %117 = arith.addf %114, %116 : vector<8x512xf32>
    %118 = arith.truncf %13 : vector<8x512xf32> to vector<8x512xbf16>
    %c0_49 = arith.constant 0 : index
    %c0_50 = arith.constant 0 : index
    %119 = vector.load %arg12[%c0_49, %c0_50] : memref<512x512xbf16, #tpu.memory_space<vmem>>, vector<512x512xbf16>
    %cst_51 = arith.constant dense<0.000000e+00> : vector<8x512xf32>
    %120 = tpu.matmul %118, %119, %cst_51 {dimension_numbers = #tpu.dot_dimension_numbers<[1], [0], [0], [1], [0, 0, 1, 1], [], []>} : vector<8x512xbf16>, vector<512x512xbf16>, vector<8x512xf32> -> vector<8x512xf32>
    %c0_52 = arith.constant 0 : index
    %c0_53 = arith.constant 0 : index
    %121 = vector.load %arg13[%c0_52, %c0_53] : memref<1x512xf32, #tpu.memory_space<vmem>>, vector<1x512xf32>
    %122 = vector.broadcast %121 : vector<1x512xf32> to vector<8x512xf32>
    %123 = arith.addf %120, %122 : vector<8x512xf32>
    %124 = arith.truncf %6 : vector<8x512xf32> to vector<8x512xbf16>
    %c0_54 = arith.constant 0 : index
    %c0_55 = arith.constant 0 : index
    %125 = vector.load %arg14[%c0_54, %c0_55] : memref<512x1024xbf16, #tpu.memory_space<vmem>>, vector<512x1024xbf16>
    %cst_56 = arith.constant dense<0.000000e+00> : vector<8x1024xf32>
    %126 = tpu.matmul %124, %125, %cst_56 {dimension_numbers = #tpu.dot_dimension_numbers<[1], [0], [0], [1], [0, 0, 1, 1], [], []>} : vector<8x512xbf16>, vector<512x1024xbf16>, vector<8x1024xf32> -> vector<8x1024xf32>
    %c0_57 = arith.constant 0 : index
    %c0_58 = arith.constant 0 : index
    %127 = vector.load %arg15[%c0_57, %c0_58] : memref<1x1024xf32, #tpu.memory_space<vmem>>, vector<1x1024xf32>
    %128 = vector.broadcast %127 : vector<1x1024xf32> to vector<8x1024xf32>
    %129 = arith.addf %126, %128 : vector<8x1024xf32>
    %130 = vector.extract_strided_slice %129 {offsets = [0, 0], sizes = [8, 512], strides = [1, 1]} : vector<8x1024xf32> to vector<8x512xf32>
    %131 = vector.extract_strided_slice %129 {offsets = [0, 512], sizes = [8, 512], strides = [1, 1]} : vector<8x1024xf32> to vector<8x512xf32>
    %132 = vector.extract_strided_slice %123 {offsets = [0, 0], sizes = [8, 128], strides = [1, 1]} : vector<8x512xf32> to vector<8x128xf32>
    %133 = vector.extract_strided_slice %130 {offsets = [0, 0], sizes = [8, 128], strides = [1, 1]} : vector<8x512xf32> to vector<8x128xf32>
    %134 = vector.extract_strided_slice %131 {offsets = [0, 0], sizes = [8, 128], strides = [1, 1]} : vector<8x512xf32> to vector<8x128xf32>
    %135 = arith.truncf %132 : vector<8x128xf32> to vector<8x128xbf16>
    %136 = arith.truncf %133 : vector<8x128xf32> to vector<8x128xbf16>
    %cst_59 = arith.constant dense<0.000000e+00> : vector<8x8xf32>
    %137 = tpu.matmul %135, %136, %cst_59 {dimension_numbers = #tpu.dot_dimension_numbers<[1], [1], [0], [0], [0, 0, 1, 0], [], []>} : vector<8x128xbf16>, vector<8x128xbf16>, vector<8x8xf32> -> vector<8x8xf32>
    %cst_60 = arith.constant dense<0xFF800000> : vector<8xf32>
    %138 = vector.multi_reduction <maximumf>, %137, %cst_60 [1] : vector<8x8xf32> to vector<8xf32>
    %139 = vector.shape_cast %138 : vector<8xf32> to vector<8x1xf32>
    %140 = vector.broadcast %139 : vector<8x1xf32> to vector<8x8xf32>
    %141 = arith.subf %137, %140 : vector<8x8xf32>
    %142 = math.exp %141 : vector<8x8xf32>
    %cst_61 = arith.constant dense<0.000000e+00> : vector<8xf32>
    %143 = vector.multi_reduction <add>, %142, %cst_61 [1] : vector<8x8xf32> to vector<8xf32>
    %144 = vector.shape_cast %143 : vector<8xf32> to vector<8x1xf32>
    %145 = vector.broadcast %144 : vector<8x1xf32> to vector<8x8xf32>
    %146 = arith.divf %142, %145 : vector<8x8xf32>
    %147 = arith.truncf %146 : vector<8x8xf32> to vector<8x8xbf16>
    %148 = arith.truncf %134 : vector<8x128xf32> to vector<8x128xbf16>
    %cst_62 = arith.constant dense<0.000000e+00> : vector<8x128xf32>
    %149 = tpu.matmul %147, %148, %cst_62 {dimension_numbers = #tpu.dot_dimension_numbers<[1], [0], [0], [1], [0, 0, 1, 1], [], []>} : vector<8x8xbf16>, vector<8x128xbf16>, vector<8x128xf32> -> vector<8x128xf32>
    %150 = arith.truncf %149 : vector<8x128xf32> to vector<8x128xbf16>
    %c0_63 = arith.constant 0 : index
    %c0_64 = arith.constant 0 : index
    %151 = vector.load %arg16[%c0_63, %c0_64] : memref<512x512xbf16, #tpu.memory_space<vmem>>, vector<128x512xbf16>
    %cst_65 = arith.constant dense<0.000000e+00> : vector<8x512xf32>
    %152 = tpu.matmul %150, %151, %cst_65 {dimension_numbers = #tpu.dot_dimension_numbers<[1], [0], [0], [1], [0, 0, 1, 1], [], []>} : vector<8x128xbf16>, vector<128x512xbf16>, vector<8x512xf32> -> vector<8x512xf32>
    %153 = vector.extract_strided_slice %123 {offsets = [0, 128], sizes = [8, 128], strides = [1, 1]} : vector<8x512xf32> to vector<8x128xf32>
    %154 = vector.extract_strided_slice %130 {offsets = [0, 128], sizes = [8, 128], strides = [1, 1]} : vector<8x512xf32> to vector<8x128xf32>
    %155 = vector.extract_strided_slice %131 {offsets = [0, 128], sizes = [8, 128], strides = [1, 1]} : vector<8x512xf32> to vector<8x128xf32>
    %156 = arith.truncf %153 : vector<8x128xf32> to vector<8x128xbf16>
    %157 = arith.truncf %154 : vector<8x128xf32> to vector<8x128xbf16>
    %cst_66 = arith.constant dense<0.000000e+00> : vector<8x8xf32>
    %158 = tpu.matmul %156, %157, %cst_66 {dimension_numbers = #tpu.dot_dimension_numbers<[1], [1], [0], [0], [0, 0, 1, 0], [], []>} : vector<8x128xbf16>, vector<8x128xbf16>, vector<8x8xf32> -> vector<8x8xf32>
    %cst_67 = arith.constant dense<0xFF800000> : vector<8xf32>
    %159 = vector.multi_reduction <maximumf>, %158, %cst_67 [1] : vector<8x8xf32> to vector<8xf32>
    %160 = vector.shape_cast %159 : vector<8xf32> to vector<8x1xf32>
    %161 = vector.broadcast %160 : vector<8x1xf32> to vector<8x8xf32>
    %162 = arith.subf %158, %161 : vector<8x8xf32>
    %163 = math.exp %162 : vector<8x8xf32>
    %cst_68 = arith.constant dense<0.000000e+00> : vector<8xf32>
    %164 = vector.multi_reduction <add>, %163, %cst_68 [1] : vector<8x8xf32> to vector<8xf32>
    %165 = vector.shape_cast %164 : vector<8xf32> to vector<8x1xf32>
    %166 = vector.broadcast %165 : vector<8x1xf32> to vector<8x8xf32>
    %167 = arith.divf %163, %166 : vector<8x8xf32>
    %168 = arith.truncf %167 : vector<8x8xf32> to vector<8x8xbf16>
    %169 = arith.truncf %155 : vector<8x128xf32> to vector<8x128xbf16>
    %cst_69 = arith.constant dense<0.000000e+00> : vector<8x128xf32>
    %170 = tpu.matmul %168, %169, %cst_69 {dimension_numbers = #tpu.dot_dimension_numbers<[1], [0], [0], [1], [0, 0, 1, 1], [], []>} : vector<8x8xbf16>, vector<8x128xbf16>, vector<8x128xf32> -> vector<8x128xf32>
    %171 = arith.truncf %170 : vector<8x128xf32> to vector<8x128xbf16>
    %c128_70 = arith.constant 128 : index
    %c0_71 = arith.constant 0 : index
    %172 = vector.load %arg16[%c128_70, %c0_71] : memref<512x512xbf16, #tpu.memory_space<vmem>>, vector<128x512xbf16>
    %cst_72 = arith.constant dense<0.000000e+00> : vector<8x512xf32>
    %173 = tpu.matmul %171, %172, %cst_72 {dimension_numbers = #tpu.dot_dimension_numbers<[1], [0], [0], [1], [0, 0, 1, 1], [], []>} : vector<8x128xbf16>, vector<128x512xbf16>, vector<8x512xf32> -> vector<8x512xf32>
    %174 = arith.addf %152, %173 : vector<8x512xf32>
    %175 = vector.extract_strided_slice %123 {offsets = [0, 256], sizes = [8, 128], strides = [1, 1]} : vector<8x512xf32> to vector<8x128xf32>
    %176 = vector.extract_strided_slice %130 {offsets = [0, 256], sizes = [8, 128], strides = [1, 1]} : vector<8x512xf32> to vector<8x128xf32>
    %177 = vector.extract_strided_slice %131 {offsets = [0, 256], sizes = [8, 128], strides = [1, 1]} : vector<8x512xf32> to vector<8x128xf32>
    %178 = arith.truncf %175 : vector<8x128xf32> to vector<8x128xbf16>
    %179 = arith.truncf %176 : vector<8x128xf32> to vector<8x128xbf16>
    %cst_73 = arith.constant dense<0.000000e+00> : vector<8x8xf32>
    %180 = tpu.matmul %178, %179, %cst_73 {dimension_numbers = #tpu.dot_dimension_numbers<[1], [1], [0], [0], [0, 0, 1, 0], [], []>} : vector<8x128xbf16>, vector<8x128xbf16>, vector<8x8xf32> -> vector<8x8xf32>
    %cst_74 = arith.constant dense<0xFF800000> : vector<8xf32>
    %181 = vector.multi_reduction <maximumf>, %180, %cst_74 [1] : vector<8x8xf32> to vector<8xf32>
    %182 = vector.shape_cast %181 : vector<8xf32> to vector<8x1xf32>
    %183 = vector.broadcast %182 : vector<8x1xf32> to vector<8x8xf32>
    %184 = arith.subf %180, %183 : vector<8x8xf32>
    %185 = math.exp %184 : vector<8x8xf32>
    %cst_75 = arith.constant dense<0.000000e+00> : vector<8xf32>
    %186 = vector.multi_reduction <add>, %185, %cst_75 [1] : vector<8x8xf32> to vector<8xf32>
    %187 = vector.shape_cast %186 : vector<8xf32> to vector<8x1xf32>
    %188 = vector.broadcast %187 : vector<8x1xf32> to vector<8x8xf32>
    %189 = arith.divf %185, %188 : vector<8x8xf32>
    %190 = arith.truncf %189 : vector<8x8xf32> to vector<8x8xbf16>
    %191 = arith.truncf %177 : vector<8x128xf32> to vector<8x128xbf16>
    %cst_76 = arith.constant dense<0.000000e+00> : vector<8x128xf32>
    %192 = tpu.matmul %190, %191, %cst_76 {dimension_numbers = #tpu.dot_dimension_numbers<[1], [0], [0], [1], [0, 0, 1, 1], [], []>} : vector<8x8xbf16>, vector<8x128xbf16>, vector<8x128xf32> -> vector<8x128xf32>
    %193 = arith.truncf %192 : vector<8x128xf32> to vector<8x128xbf16>
    %c256_77 = arith.constant 256 : index
    %c0_78 = arith.constant 0 : index
    %194 = vector.load %arg16[%c256_77, %c0_78] : memref<512x512xbf16, #tpu.memory_space<vmem>>, vector<128x512xbf16>
    %cst_79 = arith.constant dense<0.000000e+00> : vector<8x512xf32>
    %195 = tpu.matmul %193, %194, %cst_79 {dimension_numbers = #tpu.dot_dimension_numbers<[1], [0], [0], [1], [0, 0, 1, 1], [], []>} : vector<8x128xbf16>, vector<128x512xbf16>, vector<8x512xf32> -> vector<8x512xf32>
    %196 = arith.addf %174, %195 : vector<8x512xf32>
    %197 = vector.extract_strided_slice %123 {offsets = [0, 384], sizes = [8, 128], strides = [1, 1]} : vector<8x512xf32> to vector<8x128xf32>
    %198 = vector.extract_strided_slice %130 {offsets = [0, 384], sizes = [8, 128], strides = [1, 1]} : vector<8x512xf32> to vector<8x128xf32>
    %199 = vector.extract_strided_slice %131 {offsets = [0, 384], sizes = [8, 128], strides = [1, 1]} : vector<8x512xf32> to vector<8x128xf32>
    %200 = arith.truncf %197 : vector<8x128xf32> to vector<8x128xbf16>
    %201 = arith.truncf %198 : vector<8x128xf32> to vector<8x128xbf16>
    %cst_80 = arith.constant dense<0.000000e+00> : vector<8x8xf32>
    %202 = tpu.matmul %200, %201, %cst_80 {dimension_numbers = #tpu.dot_dimension_numbers<[1], [1], [0], [0], [0, 0, 1, 0], [], []>} : vector<8x128xbf16>, vector<8x128xbf16>, vector<8x8xf32> -> vector<8x8xf32>
    %cst_81 = arith.constant dense<0xFF800000> : vector<8xf32>
    %203 = vector.multi_reduction <maximumf>, %202, %cst_81 [1] : vector<8x8xf32> to vector<8xf32>
    %204 = vector.shape_cast %203 : vector<8xf32> to vector<8x1xf32>
    %205 = vector.broadcast %204 : vector<8x1xf32> to vector<8x8xf32>
    %206 = arith.subf %202, %205 : vector<8x8xf32>
    %207 = math.exp %206 : vector<8x8xf32>
    %cst_82 = arith.constant dense<0.000000e+00> : vector<8xf32>
    %208 = vector.multi_reduction <add>, %207, %cst_82 [1] : vector<8x8xf32> to vector<8xf32>
    %209 = vector.shape_cast %208 : vector<8xf32> to vector<8x1xf32>
    %210 = vector.broadcast %209 : vector<8x1xf32> to vector<8x8xf32>
    %211 = arith.divf %207, %210 : vector<8x8xf32>
    %212 = arith.truncf %211 : vector<8x8xf32> to vector<8x8xbf16>
    %213 = arith.truncf %199 : vector<8x128xf32> to vector<8x128xbf16>
    %cst_83 = arith.constant dense<0.000000e+00> : vector<8x128xf32>
    %214 = tpu.matmul %212, %213, %cst_83 {dimension_numbers = #tpu.dot_dimension_numbers<[1], [0], [0], [1], [0, 0, 1, 1], [], []>} : vector<8x8xbf16>, vector<8x128xbf16>, vector<8x128xf32> -> vector<8x128xf32>
    %215 = arith.truncf %214 : vector<8x128xf32> to vector<8x128xbf16>
    %c384_84 = arith.constant 384 : index
    %c0_85 = arith.constant 0 : index
    %216 = vector.load %arg16[%c384_84, %c0_85] : memref<512x512xbf16, #tpu.memory_space<vmem>>, vector<128x512xbf16>
    %cst_86 = arith.constant dense<0.000000e+00> : vector<8x512xf32>
    %217 = tpu.matmul %215, %216, %cst_86 {dimension_numbers = #tpu.dot_dimension_numbers<[1], [0], [0], [1], [0, 0, 1, 1], [], []>} : vector<8x128xbf16>, vector<128x512xbf16>, vector<8x512xf32> -> vector<8x512xf32>
    %218 = arith.addf %196, %217 : vector<8x512xf32>
    %c0_87 = arith.constant 0 : index
    %c0_88 = arith.constant 0 : index
    %219 = vector.load %arg17[%c0_87, %c0_88] : memref<1x512xf32, #tpu.memory_space<vmem>>, vector<1x512xf32>
    %220 = vector.broadcast %219 : vector<1x512xf32> to vector<8x512xf32>
    %221 = arith.addf %218, %220 : vector<8x512xf32>
    %222 = arith.truncf %117 : vector<8x512xf32> to vector<8x512xbf16>
    %c0_89 = arith.constant 0 : index
    %c0_90 = arith.constant 0 : index
    %223 = vector.load %arg18[%c0_89, %c0_90] : memref<512x256xbf16, #tpu.memory_space<vmem>>, vector<512x256xbf16>
    %cst_91 = arith.constant dense<0.000000e+00> : vector<8x256xf32>
    %224 = tpu.matmul %222, %223, %cst_91 {dimension_numbers = #tpu.dot_dimension_numbers<[1], [0], [0], [1], [0, 0, 1, 1], [], []>} : vector<8x512xbf16>, vector<512x256xbf16>, vector<8x256xf32> -> vector<8x256xf32>
    %225 = arith.truncf %221 : vector<8x512xf32> to vector<8x512xbf16>
    %c0_92 = arith.constant 0 : index
    %c0_93 = arith.constant 0 : index
    %226 = vector.load %arg19[%c0_92, %c0_93] : memref<512x256xbf16, #tpu.memory_space<vmem>>, vector<512x256xbf16>
    %cst_94 = arith.constant dense<0.000000e+00> : vector<8x256xf32>
    %227 = tpu.matmul %225, %226, %cst_94 {dimension_numbers = #tpu.dot_dimension_numbers<[1], [0], [0], [1], [0, 0, 1, 1], [], []>} : vector<8x512xbf16>, vector<512x256xbf16>, vector<8x256xf32> -> vector<8x256xf32>
    %228 = arith.addf %224, %227 : vector<8x256xf32>
    %c0_95 = arith.constant 0 : index
    %c0_96 = arith.constant 0 : index
    %229 = vector.load %arg20[%c0_95, %c0_96] : memref<1x256xf32, #tpu.memory_space<vmem>>, vector<1x256xf32>
    %230 = vector.broadcast %229 : vector<1x256xf32> to vector<8x256xf32>
    %231 = arith.addf %228, %230 : vector<8x256xf32>
    %c0_97 = arith.constant 0 : index
    %c0_98 = arith.constant 0 : index
    %232 = vector.load %arg21[%c0_97, %c0_98] : memref<8x256xf32, #tpu.memory_space<vmem>>, vector<8x256xf32>
    tpu.vector_store %arg21[%c0_97, %c0_98], %231 {strides = array<i32>} : memref<8x256xf32, #tpu.memory_space<vmem>>, vector<8x256xf32>,
    return
  }
}

</mosaic_0001>

<bundles_post_ra>
// kernel: tpu_custom_call.1
= control target key start
LH: loop header
LB: loop body
LE: loop exit
PB: predicated region body
PF: predicated region fallthrough
CT: control target
= control target key end

     0   :  { %s16151_s0 = inlined_call_operand.hbm [shape: f32[8,768], index: 0, kind: input, shape index: {}]   ;;  %s16152_s1 = inlined_call_operand.hbm [shape: f32[8,256], index: 1, kind: input, shape index: {}]   ;;  %s16153_s2 = inlined_call_operand.hbm [shape: bf16[768,512], index: 2, kind: input, shape index: {}]   ;;  %s16154_s3 = inlined_call_operand.hbm [shape: f32[1,512], index: 3, kind: input, shape index: {}]   ;;  %s16155_s4 = inlined_call_operand.hbm [shape: bf16[256,512], index: 4, kind: input, shape index: {}]   ;;  %s16156_s5 = inlined_call_operand.hbm [shape: f32[1,512], index: 5, kind: input, shape index: {}]   ;;  %s16157_s6 = inlined_call_operand.hbm [shape: bf16[512,512], index: 6, kind: input, shape index: {}]   ;;  %s16158_s7 = inlined_call_operand.vmem [shape: f32[1,512], index: 7, kind: input, shape index: {}]   ;;  %s16159_s8 = inlined_call_operand.hbm [shape: bf16[512,1024], index: 8, kind: input, shape index: {}]   ;;  %s16160_s9 = inlined_call_operand.vmem [shape: f32[1,1024], index: 9, kind: input, shape index: {}]   ;;  %s16161_s10 = inlined_call_operand.hbm [shape: bf16[512,512], index: 10, kind: input, shape index: {}]   ;;  %s16162_s11 = inlined_call_operand.vmem [shape: f32[1,512], index: 11, kind: input, shape index: {}]   ;;  %s16163_s12 = inlined_call_operand.hbm [shape: bf16[512,512], index: 12, kind: input, shape index: {}]   ;;  %s16164_s13 = inlined_call_operand.vmem [shape: f32[1,512], index: 13, kind: input, shape index: {}]   ;;  %s16165_s14 = inlined_call_operand.hbm [shape: bf16[512,1024], index: 14, kind: input, shape index: {}]   ;;  %s16166_s15 = inlined_call_operand.vmem [shape: f32[1,1024], index: 15, kind: input, shape index: {}]   ;;  %s16167_s16 = inlined_call_operand.hbm [shape: bf16[512,512], index: 16, kind: input, shape index: {}]   ;;  %s16168_s17 = inlined_call_operand.vmem [shape: f32[1,512], index: 17, kind: input, shape index: {}]   ;;  %s16169_s18 = inlined_call_operand.hbm [shape: bf16[512,256], index: 18, kind: input, shape index: {}]   ;;  %s16170_s19 = inlined_call_operand.hbm [shape: bf16[512,256], index: 19, kind: input, shape index: {}]   ;;  %s16171_s20 = inlined_call_operand.vmem [shape: f32[1,256], index: 20, kind: input, shape index: {}]   ;;  %s16172_s21 = inlined_call_operand.hbm [shape: f32[8,256], index: 21, kind: output, shape index: {}]  }
   0x1   :  { %16181 = sst [smem:[#allocation35_spill]] %s16151_s0 }
   0x2   :  { %16182 = sst [smem:[#allocation36_spill]] %s16152_s1 }
   0x3   :  { %16183 = sst [smem:[#allocation37_spill]] %s16153_s2 }
   0x4   :  { %16184 = sst [smem:[#allocation38_spill]] %s16154_s3 }
   0x5   :  { %16185 = sst [smem:[#allocation39_spill]] %s16155_s4 }
   0x6   :  { %16186 = sst [smem:[#allocation40_spill]] %s16156_s5 }
   0x7   :  { %16187 = sst [smem:[#allocation41_spill]] %s16172_s21 }
   0x8   :  { %26 = vsyncpa [#allocation3], 0 }
   0x9   :  { %27 = vsyncpa [#allocation6], 0 }
   0xa   :  { %28 = vsyncpa [#allocation9], 0 }
   0xb   :  { %29 = vsyncpa [#allocation12], 0 }
   0xc   :  { %30 = vsyncpa [#allocation15], 0 }
   0xd   :  { %31 = vsyncpa [#allocation18], 0 }
   0xe   :  { %32 = vsyncpa [#allocation21], 0 }
   0xf   :  { %33 = vsyncpa [#allocation24], 0 }
  0x10   :  { %34 = vsyncpa [#allocation4], 0  ;;  %s15344_s2 = smov [#allocation5]   ;;  %s15345_s26 = smov [#allocation8]  }
  0x11   :  { %s51_s25 = sshll.u32 %s15344_s2, 4  ;;  %s73_s27 = sshll.u32 %s15345_s26, 4  ;;  %s52_s25 = int_to_ptr.vmem [resolvable:$true] %s51_s25  ;;  %s74_s27 = int_to_ptr.vmem [resolvable:$true] %s73_s27 }
  0x12   :  { %s16188_s29 = sld [smem:[#allocation36_spill]] }
  0x18   :  { %s14996_s0 = scalar_lea.hbm %s16188_s29, 256 }
  0x19   :  { %p14997_p0 = scmp.ne.s32.totalorder %s16188_s29, %s14996_s0  ;;  %p15000_p1 = scmp.lt.u32.totalorder %s14996_s0, %s16188_s29 }
  0x1b   :  { %p15002_p2 = pnand %p15000_p1, %p14997_p0 }
  0x1d   :  { %15005 = shalt.err (!%p15002_p2)
}
  0x1e   :  { %s15006_s23 = scalar_lea.vmem %s52_s25, 256  ;;  %p15011_p4 = scmp.lt.s32.totalorder %s52_s25, %s52_s25 }
  0x1f   :  { %p15007_p3 = scmp.ne.s32.totalorder %s52_s25, %s15006_s23  ;;  %p15012_p5 = scmp.lt.s32.totalorder %s15006_s23, %s15006_s23 }
  0x21   :  { %p15013_p6 = por %p15012_p5, %p15011_p4 }
  0x23   :  { %p15014_p7 = pnand %p15013_p6, %p15007_p3 }
  0x25   :  { %15017 = shalt.err (!%p15014_p7)
}
  0x26   :  { %54 = dma.hbm_to_vmem [thread:$0]  %s16188_s29, 256, %s52_s25, [#allocation6]  }
  0x27   :  { %s16189_s3 = sld [smem:[#allocation38_spill]] }
  0x2d   :  { %s15018_s28 = scalar_lea.hbm %s16189_s3, 64 }
  0x2e   :  { %p15019_p8 = scmp.ne.s32.totalorder %s16189_s3, %s15018_s28  ;;  %p15022_p9 = scmp.lt.u32.totalorder %s15018_s28, %s16189_s3 }
  0x30   :  { %p15024_p10 = pnand %p15022_p9, %p15019_p8 }
  0x32   :  { %15027 = shalt.err (!%p15024_p10)
}
  0x33   :  { %s15028_s22 = scalar_lea.vmem %s74_s27, 64  ;;  %p15033_p12 = scmp.lt.s32.totalorder %s74_s27, %s74_s27 }
  0x34   :  { %p15029_p11 = scmp.ne.s32.totalorder %s74_s27, %s15028_s22  ;;  %p15034_p13 = scmp.lt.s32.totalorder %s15028_s22, %s15028_s22 }
  0x36   :  { %p15035_p0 = por %p15034_p13, %p15033_p12 }
  0x38   :  { %p15036_p1 = pnand %p15035_p0, %p15029_p11 }
  0x3a   :  { %15039 = shalt.err (!%p15036_p1)
}
  0x3b   :  { %76 = dma.hbm_to_vmem [thread:$0]  %s16189_s3, 64, %s74_s27, [#allocation9]  }
  0x3c   :  { %s15346_s23 = smov [#allocation11]   ;;  %s15347_s24 = smov [#allocation14]  }
  0x3d   :  { %s95_s1 = sshll.u32 %s15346_s23, 4  ;;  %s118_s2 = sshll.u32 %s15347_s24, 4  ;;  %s96_s1 = int_to_ptr.vmem [resolvable:$true] %s95_s1  ;;  %s15502_s2 = int_to_ptr.vmem [resolvable:$true] %s118_s2 }
  0x3e   :  { %s16190_s4 = sld [smem:[#allocation40_spill]] }
  0x44   :  { %s15040_s30 = scalar_lea.hbm %s16190_s4, 64 }
  0x45   :  { %p15041_p2 = scmp.ne.s32.totalorder %s16190_s4, %s15040_s30  ;;  %p15044_p3 = scmp.lt.u32.totalorder %s15040_s30, %s16190_s4 }
  0x47   :  { %p15046_p4 = pnand %p15044_p3, %p15041_p2 }
  0x49   :  { %15049 = shalt.err (!%p15046_p4)
}
  0x4a   :  { %s15050_s27 = scalar_lea.vmem %s96_s1, 64  ;;  %p15055_p6 = scmp.lt.s32.totalorder %s96_s1, %s96_s1 }
  0x4b   :  { %p15051_p5 = scmp.ne.s32.totalorder %s96_s1, %s15050_s27  ;;  %p15056_p7 = scmp.lt.s32.totalorder %s15050_s27, %s15050_s27 }
  0x4d   :  { %p15057_p8 = por %p15056_p7, %p15055_p6 }
  0x4f   :  { %p15058_p9 = pnand %p15057_p8, %p15051_p5 }
  0x51   :  { %15061 = shalt.err (!%p15058_p9)
}
  0x52   :  { %98 = dma.hbm_to_vmem [thread:$0]  %s16190_s4, 64, %s96_s1, [#allocation12]  }
  0x53   :  { %s15062_s24 = scalar_lea.hbm %s16159_s8, 32768 }
  0x54   :  { %p15063_p10 = scmp.ne.s32.totalorder %s16159_s8, %s15062_s24  ;;  %p15066_p11 = scmp.lt.u32.totalorder %s15062_s24, %s16159_s8 }
  0x56   :  { %p15068_p12 = pnand %p15066_p11, %p15063_p10 }
  0x58   :  { %15071 = shalt.err (!%p15068_p12)
}
  0x59   :  { %s15072_s0 = scalar_lea.vmem %s15502_s2, 32768  ;;  %p15077_p0 = scmp.lt.s32.totalorder %s15502_s2, %s15502_s2 }
  0x5a   :  { %p15073_p13 = scmp.ne.s32.totalorder %s15502_s2, %s15072_s0  ;;  %p15078_p1 = scmp.lt.s32.totalorder %s15072_s0, %s15072_s0 }
  0x5c   :  { %p15079_p2 = por %p15078_p1, %p15077_p0 }
  0x5e   :  { %p15080_p3 = pnand %p15079_p2, %p15073_p13 }
  0x60   :  { %15083 = shalt.err (!%p15080_p3)
}
  0x61   :  { %s16180_s1 = smov 512   ;;  %s15349_s4 = smov 32  }
  0x62   :  { %124 = dma.hbm_to_vmem [thread:$0]  %s16159_s8, 32768, %s15502_s2, [#allocation15], %s16180_s1, %s16180_s1, %s15349_s4  }
  0x63   :  { %s15350_s27 = smov [#allocation17]   ;;  %s15351_s25 = smov [#allocation20]  }
  0x64   :  { %s146_s3 = sshll.u32 %s15350_s27, 4  ;;  %s174_s29 = sshll.u32 %s15351_s25, 4  ;;  %s147_s3 = int_to_ptr.vmem [resolvable:$true] %s146_s3  ;;  %s15536_s29 = int_to_ptr.vmem [resolvable:$true] %s174_s29 }
  0x65   :  { %s15084_s26 = scalar_lea.hbm %s16163_s12, 16384 }
  0x66   :  { %p15085_p4 = scmp.ne.s32.totalorder %s16163_s12, %s15084_s26  ;;  %p15088_p5 = scmp.lt.u32.totalorder %s15084_s26, %s16163_s12 }
  0x68   :  { %p15090_p6 = pnand %p15088_p5, %p15085_p4 }
  0x6a   :  { %15093 = shalt.err (!%p15090_p6)
}
  0x6b   :  { %s15094_s8 = scalar_lea.vmem %s147_s3, 16384  ;;  %p15099_p8 = scmp.lt.s32.totalorder %s147_s3, %s147_s3 }
  0x6c   :  { %p15095_p7 = scmp.ne.s32.totalorder %s147_s3, %s15094_s8  ;;  %p15100_p9 = scmp.lt.s32.totalorder %s15094_s8, %s15094_s8 }
  0x6e   :  { %p15101_p10 = por %p15100_p9, %p15099_p8 }
  0x70   :  { %p15102_p11 = pnand %p15101_p10, %p15095_p7 }
  0x72   :  { %15105 = shalt.err (!%p15102_p11)
}
  0x73   :  { %s15352_s2 = smov 256   ;;  %s15353_s5 = smov 16  }
  0x74   :  { %152 = dma.hbm_to_vmem [thread:$0]  %s16163_s12, 16384, %s147_s3, [#allocation18], %s15352_s2, %s15352_s2, %s15353_s5  }
  0x75   :  { %s15106_s24 = scalar_lea.hbm %s16167_s16, 16384 }
  0x76   :  { %p15107_p12 = scmp.ne.s32.totalorder %s16167_s16, %s15106_s24  ;;  %p15110_p13 = scmp.lt.u32.totalorder %s15106_s24, %s16167_s16 }
  0x78   :  { %p15112_p0 = pnand %p15110_p13, %p15107_p12 }
  0x7a   :  { %15115 = shalt.err (!%p15112_p0)
}
  0x7b   :  { %s15116_s0 = scalar_lea.vmem %s15536_s29, 16384  ;;  %p15121_p2 = scmp.lt.s32.totalorder %s15536_s29, %s15536_s29 }
  0x7c   :  { %p15117_p1 = scmp.ne.s32.totalorder %s15536_s29, %s15116_s0  ;;  %p15122_p3 = scmp.lt.s32.totalorder %s15116_s0, %s15116_s0 }
  0x7e   :  { %p15123_p4 = por %p15122_p3, %p15121_p2 }
  0x80   :  { %p15124_p5 = pnand %p15123_p4, %p15117_p1 }
  0x82   :  { %15127 = shalt.err (!%p15124_p5)
}
  0x83   :  { %180 = dma.hbm_to_vmem [thread:$0]  %s16167_s16, 16384, %s15536_s29, [#allocation21], %s15352_s2, %s15352_s2, %s15353_s5  }
  0x84   :  { %s15354_s8 = smov [#allocation2]   ;;  %s15355_s27 = smov [#allocation7]  }
  0x85   :  { %s41_s22 = sshll.u32 %s15354_s8, 4  ;;  %s60_s25 = sshll.u32 %s15355_s27, 4  ;;  %s42_s22 = int_to_ptr.vmem [resolvable:$true] %s41_s22  ;;  %s15573_s25 = int_to_ptr.vmem [resolvable:$true] %s60_s25 }
  0x86   :  { %s16191_s26 = sld [smem:[#allocation35_spill]] }
  0x8c   :  { %s15128_s21 = scalar_lea.hbm %s16191_s26, 768 }
  0x8d   :  { %p15129_p6 = scmp.ne.s32.totalorder %s16191_s26, %s15128_s21  ;;  %p15132_p7 = scmp.lt.u32.totalorder %s15128_s21, %s16191_s26 }
  0x8f   :  { %p15134_p8 = pnand %p15132_p7, %p15129_p6 }
  0x91   :  { %15137 = shalt.err (!%p15134_p8)
}
  0x92   :  { %s15138_s16 = scalar_lea.vmem %s42_s22, 768  ;;  %p15143_p10 = scmp.lt.s32.totalorder %s42_s22, %s42_s22 }
  0x93   :  { %p15139_p9 = scmp.ne.s32.totalorder %s42_s22, %s15138_s16  ;;  %p15144_p11 = scmp.lt.s32.totalorder %s15138_s16, %s15138_s16 }
  0x95   :  { %p15145_p12 = por %p15144_p11, %p15143_p10 }
  0x97   :  { %p15146_p13 = pnand %p15145_p12, %p15139_p9 }
  0x99   :  { %15149 = shalt.err (!%p15146_p13)
}
  0x9a   :  { %44 = dma.hbm_to_vmem [thread:$0]  %s16191_s26, 768, %s42_s22, [#allocation3]  }
  0x9b   :  { %s16192_s27 = sld [smem:[#allocation37_spill]] }
  0xa1   :  { %s15150_s23 = scalar_lea.hbm %s16192_s27, 24576 }
  0xa2   :  { %p15151_p0 = scmp.ne.s32.totalorder %s16192_s27, %s15150_s23  ;;  %p15154_p1 = scmp.lt.u32.totalorder %s15150_s23, %s16192_s27 }
  0xa4   :  { %p15156_p2 = pnand %p15154_p1, %p15151_p0 }
  0xa6   :  { %15159 = shalt.err (!%p15156_p2)
}
  0xa7   :  { %s15160_s30 = scalar_lea.vmem %s15573_s25, 24576  ;;  %p15165_p4 = scmp.lt.s32.totalorder %s15573_s25, %s15573_s25 }
  0xa8   :  { %p15161_p3 = scmp.ne.s32.totalorder %s15573_s25, %s15160_s30  ;;  %p15166_p5 = scmp.lt.s32.totalorder %s15160_s30, %s15160_s30 }
  0xaa   :  { %p15167_p6 = por %p15166_p5, %p15165_p4 }
  0xac   :  { %p15168_p7 = pnand %p15167_p6, %p15161_p3 }
  0xae   :  { %15171 = shalt.err (!%p15168_p7)
}
  0xaf   :  { %66 = dma.hbm_to_vmem [thread:$0]  %s16192_s27, 24576, %s15573_s25, [#allocation6], %s15352_s2, %s15352_s2, %s15353_s5  }
  0xb0   :  { %s15356_s0 = smov [#allocation10]   ;;  %s15357_s29 = smov [#allocation13]  }
  0xb1   :  { %s82_s16 = sshll.u32 %s15356_s0, 4  ;;  %s104_s12 = sshll.u32 %s15357_s29, 4  ;;  %s83_s16 = int_to_ptr.vmem [resolvable:$true] %s82_s16  ;;  %s15607_s12 = int_to_ptr.vmem [resolvable:$true] %s104_s12 }
  0xb2   :  { %s16193_s23 = sld [smem:[#allocation39_spill]] }
  0xb8   :  { %s15172_s24 = scalar_lea.hbm %s16193_s23, 8192 }
  0xb9   :  { %p15173_p8 = scmp.ne.s32.totalorder %s16193_s23, %s15172_s24  ;;  %p15176_p9 = scmp.lt.u32.totalorder %s15172_s24, %s16193_s23 }
  0xbb   :  { %p15178_p10 = pnand %p15176_p9, %p15173_p8 }
  0xbd   :  { %15181 = shalt.err (!%p15178_p10)
}
  0xbe   :  { %s15182_s25 = scalar_lea.vmem %s83_s16, 8192  ;;  %p15187_p12 = scmp.lt.s32.totalorder %s83_s16, %s83_s16 }
  0xbf   :  { %p15183_p11 = scmp.ne.s32.totalorder %s83_s16, %s15182_s25  ;;  %p15188_p13 = scmp.lt.s32.totalorder %s15182_s25, %s15182_s25 }
  0xc1   :  { %p15189_p0 = por %p15188_p13, %p15187_p12 }
  0xc3   :  { %p15190_p1 = pnand %p15189_p0, %p15183_p11 }
  0xc5   :  { %15193 = shalt.err (!%p15190_p1)
}
  0xc6   :  { %88 = dma.hbm_to_vmem [thread:$0]  %s16193_s23, 8192, %s83_s16, [#allocation9], %s15352_s2, %s15352_s2, %s15353_s5  }
  0xc7   :  { %s15194_s29 = scalar_lea.hbm %s16157_s6, 16384 }
  0xc8   :  { %p15195_p2 = scmp.ne.s32.totalorder %s16157_s6, %s15194_s29  ;;  %p15198_p3 = scmp.lt.u32.totalorder %s15194_s29, %s16157_s6 }
  0xca   :  { %p15200_p4 = pnand %p15198_p3, %p15195_p2 }
  0xcc   :  { %15203 = shalt.err (!%p15200_p4)
}
  0xcd   :  { %s15204_s21 = scalar_lea.vmem %s15607_s12, 16384  ;;  %p15209_p6 = scmp.lt.s32.totalorder %s15607_s12, %s15607_s12 }
  0xce   :  { %p15205_p5 = scmp.ne.s32.totalorder %s15607_s12, %s15204_s21  ;;  %p15210_p7 = scmp.lt.s32.totalorder %s15204_s21, %s15204_s21 }
  0xd0   :  { %p15211_p8 = por %p15210_p7, %p15209_p6 }
  0xd2   :  { %p15212_p9 = pnand %p15211_p8, %p15205_p5 }
  0xd4   :  { %15215 = shalt.err (!%p15212_p9)
}
  0xd5   :  { %110 = dma.hbm_to_vmem [thread:$0]  %s16157_s6, 16384, %s15607_s12, [#allocation12], %s15352_s2, %s15352_s2, %s15353_s5  }
  0xd6   :  { %s15358_s28 = smov [#allocation16]   ;;  %s15359_s25 = smov [#allocation19]  }
  0xd7   :  { %s132_s30 = sshll.u32 %s15358_s28, 4  ;;  %s160_s27 = sshll.u32 %s15359_s25, 4  ;;  %s133_s30 = int_to_ptr.vmem [resolvable:$true] %s132_s30  ;;  %s15644_s27 = int_to_ptr.vmem [resolvable:$true] %s160_s27 }
  0xd8   :  { %s15216_s0 = scalar_lea.hbm %s16161_s10, 16384 }
  0xd9   :  { %p15217_p10 = scmp.ne.s32.totalorder %s16161_s10, %s15216_s0  ;;  %p15220_p11 = scmp.lt.u32.totalorder %s15216_s0, %s16161_s10 }
  0xdb   :  { %p15222_p12 = pnand %p15220_p11, %p15217_p10 }
  0xdd   :  { %15225 = shalt.err (!%p15222_p12)
}
  0xde   :  { %s15226_s6 = scalar_lea.vmem %s133_s30, 16384  ;;  %p15231_p0 = scmp.lt.s32.totalorder %s133_s30, %s133_s30 }
  0xdf   :  { %p15227_p13 = scmp.ne.s32.totalorder %s133_s30, %s15226_s6  ;;  %p15232_p1 = scmp.lt.s32.totalorder %s15226_s6, %s15226_s6 }
  0xe1   :  { %p15233_p2 = por %p15232_p1, %p15231_p0 }
  0xe3   :  { %p15234_p3 = pnand %p15233_p2, %p15227_p13 }
  0xe5   :  { %15237 = shalt.err (!%p15234_p3)
}
  0xe6   :  { %138 = dma.hbm_to_vmem [thread:$0]  %s16161_s10, 16384, %s133_s30, [#allocation15], %s15352_s2, %s15352_s2, %s15353_s5  }
  0xe7   :  { %s15238_s23 = scalar_lea.hbm %s16165_s14, 32768 }
  0xe8   :  { %p15239_p4 = scmp.ne.s32.totalorder %s16165_s14, %s15238_s23  ;;  %p15242_p5 = scmp.lt.u32.totalorder %s15238_s23, %s16165_s14 }
  0xea   :  { %p15244_p6 = pnand %p15242_p5, %p15239_p4 }
  0xec   :  { %15247 = shalt.err (!%p15244_p6)
}
  0xed   :  { %s15248_s0 = scalar_lea.vmem %s15644_s27, 32768  ;;  %p15253_p8 = scmp.lt.s32.totalorder %s15644_s27, %s15644_s27 }
  0xee   :  { %p15249_p7 = scmp.ne.s32.totalorder %s15644_s27, %s15248_s0  ;;  %p15254_p9 = scmp.lt.s32.totalorder %s15248_s0, %s15248_s0 }
  0xf0   :  { %p15255_p10 = por %p15254_p9, %p15253_p8 }
  0xf2   :  { %p15256_p11 = pnand %p15255_p10, %p15249_p7 }
  0xf4   :  { %15259 = shalt.err (!%p15256_p11)
}
  0xf5   :  { %s16194_s10 = smov 512   ;;  %s15360_s30 = smov [#allocation22]  }
  0xf6   :  { %166 = dma.hbm_to_vmem [thread:$0]  %s16165_s14, 32768, %s15644_s27, [#allocation18], %s16194_s10, %s16194_s10, %s15349_s4  }
  0xf7   :  { %s188_s29 = sshll.u32 %s15360_s30, 4  ;;  %s15260_s24 = scalar_lea.hbm %s16169_s18, 8192  ;;  %s189_s29 = int_to_ptr.vmem [resolvable:$true] %s188_s29 }
  0xf8   :  { %p15261_p12 = scmp.ne.s32.totalorder %s16169_s18, %s15260_s24  ;;  %p15264_p13 = scmp.lt.u32.totalorder %s15260_s24, %s16169_s18 }
  0xfa   :  { %p15266_p0 = pnand %p15264_p13, %p15261_p12 }
  0xfc   :  { %15269 = shalt.err (!%p15266_p0)
}
  0xfd   :  { %s15270_s16 = scalar_lea.vmem %s189_s29, 8192  ;;  %p15275_p2 = scmp.lt.s32.totalorder %s189_s29, %s189_s29 }
  0xfe   :  { %p15271_p1 = scmp.ne.s32.totalorder %s189_s29, %s15270_s16  ;;  %p15276_p3 = scmp.lt.s32.totalorder %s15270_s16, %s15270_s16 }
 0x100   :  { %p15277_p4 = por %p15276_p3, %p15275_p2 }
 0x102   :  { %p15278_p5 = pnand %p15277_p4, %p15271_p1 }
 0x104   :  { %15281 = shalt.err (!%p15278_p5)
}
 0x105   :  { %s15361_s14 = smov 128   ;;  %s15362_s4 = smov 8  }
 0x106   :  { %194 = dma.hbm_to_vmem [thread:$0]  %s16169_s18, 8192, %s189_s29, [#allocation21], %s15361_s14, %s15361_s14, %s15362_s4  }
 0x107   :  { %s15363_s28 = smov [#allocation23]   ;;  %s15282_s0 = scalar_lea.hbm %s16170_s19, 8192 }
 0x108   :  { %s200_s25 = sshll.u32 %s15363_s28, 4  ;;  %p15283_p6 = scmp.ne.s32.totalorder %s16170_s19, %s15282_s0  ;;  %s201_s25 = int_to_ptr.vmem [resolvable:$true] %s200_s25 }
 0x109   :  { %p15286_p7 = scmp.lt.u32.totalorder %s15282_s0, %s16170_s19 }
 0x10b   :  { %p15288_p8 = pnand %p15286_p7, %p15283_p6 }
 0x10d   :  { %15291 = shalt.err (!%p15288_p8)
}
 0x10e   :  { %s15292_s3 = scalar_lea.vmem %s201_s25, 8192  ;;  %p15297_p10 = scmp.lt.s32.totalorder %s201_s25, %s201_s25 }
 0x10f   :  { %p15293_p9 = scmp.ne.s32.totalorder %s201_s25, %s15292_s3  ;;  %p15298_p11 = scmp.lt.s32.totalorder %s15292_s3, %s15292_s3 }
 0x111   :  { %p15299_p12 = por %p15298_p11, %p15297_p10 }
 0x113   :  { %p15300_p13 = pnand %p15299_p12, %p15293_p9 }
 0x115   :  { %15303 = shalt.err (!%p15300_p13)
}
 0x116   :  { %206 = dma.hbm_to_vmem [thread:$0]  %s16170_s19, 8192, %s201_s25, [#allocation24], %s15361_s14, %s15361_s14, %s15362_s4  }
 0x117   :  { %15326 = dma.done.wait [#allocation3], 768  }
 0x118   :  { %15327 = vsyncadd [#allocation3], 4294966528 }
 0x119   :  { %15328 = dma.done.wait [#allocation6], 24832  }
 0x11a   :  { %15329 = vsyncadd [#allocation6], 4294942464 }
 0x11b   :  { %15330 = dma.done.wait [#allocation9], 8256  }
 0x11c   :  { %15331 = vsyncadd [#allocation9], 4294959040 }
 0x11d   :  { %15332 = dma.done.wait [#allocation12], 16448  }
 0x11e   :  { %15333 = vsyncadd [#allocation12], 4294950848 }
 0x11f   :  { %15334 = dma.done.wait [#allocation15], 49152  }
 0x120   :  { %15335 = vsyncadd [#allocation15], 4294918144 }
 0x121   :  { %15336 = dma.done.wait [#allocation18], 49152  }
 0x122   :  { %15337 = vsyncadd [#allocation18], 4294918144 }
 0x123   :  { %15338 = dma.done.wait [#allocation21], 24576  }
 0x124   :  { %15339 = vsyncadd [#allocation21], 4294942720 }
 0x125   :  { %15340 = dma.done.wait [#allocation24], 8192  }
 0x126   :  { %15341 = vsyncadd [#allocation24], 4294959104  ;;  %v13620_v0 = vld [vmem:[#allocation7 + $0x4] ss:$16 sps:$4 sm:$0xff]   ;;  %v13622_v1 = vld [vmem:[#allocation7 + $0xc] ss:$16 sps:$4 sm:$0xff]  }
 0x127   :  { %1438 = vmatprep.subr.bf16.mxu0 %v13620_v0  ;;  %v13624_v2 = vld [vmem:[#allocation7] ss:$16 sps:$4 sm:$0xff]   ;;  %v13625_v3 = vld [vmem:[#allocation7 + $0x8] ss:$16 sps:$4 sm:$0xff]   ;;  %1561 = vmatprep.subr.bf16.mxu1 %v13622_v1  ;;  %v13626_v4 = vld [vmem:[#allocation7 + $0x24] ss:$16 sps:$4 sm:$0xff]  }
 0x128   :  { %1439 = vmatpush1.bf16.msra.mxu0 %v13624_v2  ;;  %1562 = vmatpush1.bf16.msra.mxu1 %v13625_v3  ;;  %v13628_v5 = vld [vmem:[#allocation7 + $0x2c] ss:$16 sps:$4 sm:$0xff]   ;;  %v13630_v6 = vld [vmem:[#allocation7 + $0x20] ss:$16 sps:$4 sm:$0xff]   ;;  %v13631_v7 = vld [vmem:[#allocation7 + $0x28] ss:$16 sps:$4 sm:$0xff]  }
 0x129   :  { %1440 = vmatprep.subr.bf16.mxu0 %v13626_v4  ;;  %1563 = vmatprep.subr.bf16.mxu1 %v13628_v5  ;;  %v13632_v8 = vld [vmem:[#allocation7 + $0x44] ss:$16 sps:$4 sm:$0xff]   ;;  %v13634_v9 = vld [vmem:[#allocation7 + $0x4c] ss:$16 sps:$4 sm:$0xff]   ;;  %v13636_v10 = vld [vmem:[#allocation7 + $0x40] ss:$16 sps:$4 sm:$0xff]  }
 0x12a   :  { %v13637_v11 = vld [vmem:[#allocation7 + $0x48] ss:$16 sps:$4 sm:$0xff]   ;;  %v13638_v12 = vld [vmem:[#allocation7 + $0x64] ss:$16 sps:$4 sm:$0xff]   ;;  %v13640_v13 = vld [vmem:[#allocation7 + $0x6c] ss:$16 sps:$4 sm:$0xff]  }
 0x12b   :  { %v13642_v14 = vld [vmem:[#allocation7 + $0x60] ss:$16 sps:$4 sm:$0xff]   ;;  %v13643_v15 = vld [vmem:[#allocation7 + $0x68] ss:$16 sps:$4 sm:$0xff]   ;;  %v13644_v16 = vld [vmem:[#allocation7 + $0x84] ss:$16 sps:$4 sm:$0xff]  }
 0x12c   :  { %1441 = vmatpush1.bf16.msra.mxu0 %v13630_v6  ;;  %1564 = vmatpush1.bf16.msra.mxu1 %v13631_v7  ;;  %v13646_v17 = vld [vmem:[#allocation7 + $0x8c] ss:$16 sps:$4 sm:$0xff]   ;;  %v13648_v18 = vld [vmem:[#allocation7 + $0x80] ss:$16 sps:$4 sm:$0xff]   ;;  %v13649_v19 = vld [vmem:[#allocation7 + $0x88] ss:$16 sps:$4 sm:$0xff]  }
 0x12d   :  { %1442 = vmatprep.subr.bf16.mxu0 %v13632_v8  ;;  %1565 = vmatprep.subr.bf16.mxu1 %v13634_v9  ;;  %v13650_v20 = vld [vmem:[#allocation7 + $0xa4] ss:$16 sps:$4 sm:$0xff]   ;;  %v13652_v21 = vld [vmem:[#allocation7 + $0xac] ss:$16 sps:$4 sm:$0xff]   ;;  %v13654_v22 = vld [vmem:[#allocation7 + $0xa0] ss:$16 sps:$4 sm:$0xff]  }
 0x12e   :  { %v13655_v23 = vld [vmem:[#allocation7 + $0xa8] ss:$16 sps:$4 sm:$0xff]   ;;  %v13656_v24 = vld [vmem:[#allocation7 + $0xc4] ss:$16 sps:$4 sm:$0xff]   ;;  %v13658_v25 = vld [vmem:[#allocation7 + $0xcc] ss:$16 sps:$4 sm:$0xff]  }
 0x12f   :  { %v13660_v26 = vld [vmem:[#allocation7 + $0xc0] ss:$16 sps:$4 sm:$0xff]   ;;  %v13661_v27 = vld [vmem:[#allocation7 + $0xc8] ss:$16 sps:$4 sm:$0xff]   ;;  %v13662_v28 = vld [vmem:[#allocation7 + $0xe4] ss:$16 sps:$4 sm:$0xff]  }
 0x130   :  { %1443 = vmatpush1.bf16.msra.mxu0 %v13636_v10  ;;  %1566 = vmatpush1.bf16.msra.mxu1 %v13637_v11  ;;  %v13664_v29 = vld [vmem:[#allocation7 + $0xec] ss:$16 sps:$4 sm:$0xff]   ;;  %v13666_v30 = vld [vmem:[#allocation7 + $0xe0] ss:$16 sps:$4 sm:$0xff]   ;;  %v13667_v31 = vld [vmem:[#allocation7 + $0xe8] ss:$16 sps:$4 sm:$0xff]  }
 0x131   :  { %1444 = vmatprep.subr.bf16.mxu0 %v13638_v12  ;;  %1567 = vmatprep.subr.bf16.mxu1 %v13640_v13  ;;  %v13668_v32 = vld [vmem:[#allocation7 + $0x104] ss:$16 sps:$4 sm:$0xff]   ;;  %v13670_v33 = vld [vmem:[#allocation7 + $0x10c] ss:$16 sps:$4 sm:$0xff]   ;;  %v13672_v34 = vld [vmem:[#allocation7 + $0x100] ss:$16 sps:$4 sm:$0xff]  }
 0x132   :  { %v13673_v35 = vld [vmem:[#allocation7 + $0x108] ss:$16 sps:$4 sm:$0xff]   ;;  %v13674_v36 = vld [vmem:[#allocation7 + $0x124] ss:$16 sps:$4 sm:$0xff]   ;;  %v13676_v37 = vld [vmem:[#allocation7 + $0x12c] ss:$16 sps:$4 sm:$0xff]  }
 0x133   :  { %v13678_v38 = vld [vmem:[#allocation7 + $0x120] ss:$16 sps:$4 sm:$0xff]   ;;  %v13679_v39 = vld [vmem:[#allocation7 + $0x128] ss:$16 sps:$4 sm:$0xff]   ;;  %v13680_v40 = vld [vmem:[#allocation7 + $0x144] ss:$16 sps:$4 sm:$0xff]  }
 0x134   :  { %1445 = vmatpush1.bf16.msra.mxu0 %v13642_v14  ;;  %1568 = vmatpush1.bf16.msra.mxu1 %v13643_v15  ;;  %v13682_v41 = vld [vmem:[#allocation7 + $0x14c] ss:$16 sps:$4 sm:$0xff]   ;;  %v13684_v42 = vld [vmem:[#allocation7 + $0x140] ss:$16 sps:$4 sm:$0xff]   ;;  %v13685_v43 = vld [vmem:[#allocation7 + $0x148] ss:$16 sps:$4 sm:$0xff]  }
 0x135   :  { %1446 = vmatprep.subr.bf16.mxu0 %v13644_v16  ;;  %1569 = vmatprep.subr.bf16.mxu1 %v13646_v17  ;;  %v13686_v44 = vld [vmem:[#allocation7 + $0x164] ss:$16 sps:$4 sm:$0xff]   ;;  %v13688_v45 = vld [vmem:[#allocation7 + $0x16c] ss:$16 sps:$4 sm:$0xff]   ;;  %v13690_v47 = vld [vmem:[#allocation7 + $0x160] ss:$16 sps:$4 sm:$0xff]  }
 0x136   :  { %v253_v46 = vld [vmem:[#allocation2 + $0x8] sm:$0xff]  ;;  %v13692_v50 = vld [vmem:[#allocation7 + $0x184] ss:$16 sps:$4 sm:$0xff]   ;;  %v13696_v52 = vld [vmem:[#allocation7 + $0x180] ss:$16 sps:$4 sm:$0xff]   ;;  %vm15365_vm0 = vmmov 0  }
 0x137   :  { %v259_v48 = vpack.c.bf16 %v253_v46, %v253_v46  ;;  %v13691_v49 = vld [vmem:[#allocation7 + $0x168] ss:$16 sps:$4 sm:$0xff]   ;;  %v13694_v51 = vld [vmem:[#allocation7 + $0x18c] ss:$16 sps:$4 sm:$0xff]   ;;  %v13698_v54 = vld [vmem:[#allocation7 + $0x1a4] ss:$16 sps:$4 sm:$0xff]  }
 0x138   :  { %1447 = vmatpush1.bf16.msra.mxu0 %v13648_v18  ;;  %1570 = vmatpush1.bf16.msra.mxu1 %v13649_v19  ;;  %v13697_v53 = vld [vmem:[#allocation7 + $0x188] ss:$16 sps:$4 sm:$0xff]   ;;  %v13700_v55 = vld [vmem:[#allocation7 + $0x1ac] ss:$16 sps:$4 sm:$0xff]   ;;  %v13702_v56 = vld [vmem:[#allocation7 + $0x1a0] ss:$16 sps:$4 sm:$0xff]  }
 0x139   :  { %1448 = vmatprep.subr.bf16.mxu0 %v13650_v20  ;;  %1571 = vmatprep.subr.bf16.mxu1 %v13652_v21  ;;  %v13703_v57 = vld [vmem:[#allocation7 + $0x1a8] ss:$16 sps:$4 sm:$0xff]   ;;  %v13704_v58 = vld [vmem:[#allocation7 + $0x1c4] ss:$16 sps:$4 sm:$0xff]   ;;  %v13706_v59 = vld [vmem:[#allocation7 + $0x1cc] ss:$16 sps:$4 sm:$0xff]  }
 0x13a   :  { %1470 = vmatprep.mubr.bf16.mxu0 %v259_v48  ;;  %1593 = vmatprep.mubr.bf16.mxu1 %v259_v48  ;;  %v13708_v60 = vld [vmem:[#allocation7 + $0x1c0] ss:$16 sps:$4 sm:$0xff]   ;;  %v13709_v61 = vld [vmem:[#allocation7 + $0x1c8] ss:$16 sps:$4 sm:$0xff]   ;;  %v13710_v62 = vld [vmem:[#allocation7 + $0x1e4] ss:$16 sps:$4 sm:$0xff]  }
 0x13b   :  { %v13712_v63 = vld [vmem:[#allocation7 + $0x1ec] ss:$16 sps:$4 sm:$0xff]   ;;  %v13714_v0 = vld [vmem:[#allocation7 + $0x1e0] ss:$16 sps:$4 sm:$0xff]   ;;  %v13715_v1 = vld [vmem:[#allocation7 + $0x1e8] ss:$16 sps:$4 sm:$0xff]  }
 0x13c   :  { %1449 = vmatpush1.bf16.msra.mxu0 %v13654_v22  ;;  %1572 = vmatpush1.bf16.msra.mxu1 %v13655_v23  ;;  %v252_v2 = vld [vmem:[#allocation2] sm:$0xff]  ;;  %v13721_v4 = vld [vmem:[#allocation7 + $0x20c] ss:$16 sps:$4 sm:$0xff]   ;;  %v13719_v7 = vld [vmem:[#allocation7 + $0x208] ss:$16 sps:$4 sm:$0xff]   ;;  %vm5103_vm1 = vcmask 1043456  }
 0x13d   :  { %1450 = vmatprep.subr.bf16.mxu0 %v13656_v24  ;;  %1573 = vmatprep.subr.bf16.mxu1 %v13658_v25  ;;  %v13718_v3 = vld [vmem:[#allocation7 + $0x204] ss:$16 sps:$4 sm:$0xff]   ;;  %v258_v5 = vpack.c.bf16 %v252_v2, %v252_v2  ;;  %v13716_v6 = vld [vmem:[#allocation7 + $0x200] ss:$16 sps:$4 sm:$0xff]   ;;  %v13727_v9 = vld [vmem:[#allocation7 + $0x22c] ss:$16 sps:$4 sm:$0xff]  }
 0x13e   :  { %v13724_v8 = vld [vmem:[#allocation7 + $0x224] ss:$16 sps:$4 sm:$0xff]   ;;  %v13722_v10 = vld [vmem:[#allocation7 + $0x220] ss:$16 sps:$4 sm:$0xff]   ;;  %v13725_v11 = vld [vmem:[#allocation7 + $0x228] ss:$16 sps:$4 sm:$0xff]  }
 0x13f   :  { %v13730_v12 = vld [vmem:[#allocation7 + $0x244] ss:$16 sps:$4 sm:$0xff]   ;;  %v13733_v13 = vld [vmem:[#allocation7 + $0x24c] ss:$16 sps:$4 sm:$0xff]   ;;  %v13728_v14 = vld [vmem:[#allocation7 + $0x240] ss:$16 sps:$4 sm:$0xff]  }
 0x140   :  { %1451 = vmatpush1.bf16.msra.mxu0 %v13660_v26  ;;  %1574 = vmatpush1.bf16.msra.mxu1 %v13661_v27  ;;  %v13731_v15 = vld [vmem:[#allocation7 + $0x248] ss:$16 sps:$4 sm:$0xff]   ;;  %v13736_v16 = vld [vmem:[#allocation7 + $0x264] ss:$16 sps:$4 sm:$0xff]   ;;  %v13739_v17 = vld [vmem:[#allocation7 + $0x26c] ss:$16 sps:$4 sm:$0xff]  }
 0x141   :  { %1452 = vmatprep.subr.bf16.mxu0 %v13662_v28  ;;  %1575 = vmatprep.subr.bf16.mxu1 %v13664_v29  ;;  %v13734_v18 = vld [vmem:[#allocation7 + $0x260] ss:$16 sps:$4 sm:$0xff]   ;;  %v13737_v19 = vld [vmem:[#allocation7 + $0x268] ss:$16 sps:$4 sm:$0xff]   ;;  %v13742_v20 = vld [vmem:[#allocation7 + $0x284] ss:$16 sps:$4 sm:$0xff]  }
 0x142   :  { %v13745_v21 = vld [vmem:[#allocation7 + $0x28c] ss:$16 sps:$4 sm:$0xff]   ;;  %v13740_v22 = vld [vmem:[#allocation7 + $0x280] ss:$16 sps:$4 sm:$0xff]   ;;  %v13743_v23 = vld [vmem:[#allocation7 + $0x288] ss:$16 sps:$4 sm:$0xff]  }
 0x143   :  { %v13748_v24 = vld [vmem:[#allocation7 + $0x2a4] ss:$16 sps:$4 sm:$0xff]   ;;  %v13751_v25 = vld [vmem:[#allocation7 + $0x2ac] ss:$16 sps:$4 sm:$0xff]   ;;  %v13746_v26 = vld [vmem:[#allocation7 + $0x2a0] ss:$16 sps:$4 sm:$0xff]  }
 0x144   :  { %1453 = vmatpush1.bf16.msra.mxu0 %v13666_v30  ;;  %1576 = vmatpush1.bf16.msra.mxu1 %v13667_v31  ;;  %v13749_v27 = vld [vmem:[#allocation7 + $0x2a8] ss:$16 sps:$4 sm:$0xff]   ;;  %v13754_v28 = vld [vmem:[#allocation7 + $0x2c4] ss:$16 sps:$4 sm:$0xff]   ;;  %v13757_v29 = vld [vmem:[#allocation7 + $0x2cc] ss:$16 sps:$4 sm:$0xff]  }
 0x145   :  { %1454 = vmatprep.subr.bf16.mxu0 %v13668_v32  ;;  %1577 = vmatprep.subr.bf16.mxu1 %v13670_v33  ;;  %v255_v30 = vld [vmem:[#allocation2 + $0x18] sm:$0xff]  ;;  %v13752_v31 = vld [vmem:[#allocation7 + $0x2c0] ss:$16 sps:$4 sm:$0xff]   ;;  %v13778_v46 = vld [vmem:[#allocation7 + $0x344] ss:$16 sps:$4 sm:$0xff]   ;;  %vm5086_vm2 = vcmask 64512  }
 0x146   :  { %v261_v32 = vpack.c.bf16 %v255_v30, %v255_v30  ;;  %v13755_v33 = vld [vmem:[#allocation7 + $0x2c8] ss:$16 sps:$4 sm:$0xff]   ;;  %v13776_v48 = vld [vmem:[#allocation7 + $0x340] ss:$16 sps:$4 sm:$0xff]   ;;  %v13808_v2 = vld [vmem:[#allocation7 + $0x3e4] ss:$16 sps:$4 sm:$0xff]  }
 0x147   :  { %v13844_v30 = vld [vmem:[#allocation7 + $0x4a4] ss:$16 sps:$4 sm:$0xff]   ;;  %s15367_s14 = smov [#allocation25]  }
 0x148   :  { %1455 = vmatpush1.bf16.msra.mxu0 %v13672_v34  ;;  %1578 = vmatpush1.bf16.msra.mxu1 %v13673_v35  ;;  %v13760_v34 = vld [vmem:[#allocation7 + $0x2e4] ss:$16 sps:$4 sm:$0xff]   ;;  %v13763_v35 = vld [vmem:[#allocation7 + $0x2ec] ss:$16 sps:$4 sm:$0xff]   ;;  %s11944_s4 = sshll.u32 %s15367_s14, 4  ;;  %s11945_s4 = int_to_ptr.vmem [resolvable:$true] %s11944_s4 }
 0x149   :  { %1456 = vmatprep.subr.bf16.mxu0 %v13674_v36  ;;  %1579 = vmatprep.subr.bf16.mxu1 %v13676_v37  ;;  %v13758_v36 = vld [vmem:[#allocation7 + $0x2e0] ss:$16 sps:$4 sm:$0xff]   ;;  %v13761_v37 = vld [vmem:[#allocation7 + $0x2e8] ss:$16 sps:$4 sm:$0xff]   ;;  %p15309_p1 = scmp.lt.s32.totalorder %s11945_s4, %s11945_s4 }
 0x14c   :  { %1457 = vmatpush1.bf16.msra.mxu0 %v13678_v38  ;;  %1580 = vmatpush1.bf16.msra.mxu1 %v13679_v39  ;;  %v13766_v38 = vld [vmem:[#allocation7 + $0x304] ss:$16 sps:$4 sm:$0xff]   ;;  %v13769_v39 = vld [vmem:[#allocation7 + $0x30c] ss:$16 sps:$4 sm:$0xff]  }
 0x14d   :  { %1458 = vmatprep.subr.bf16.mxu0 %v13680_v40  ;;  %1581 = vmatprep.subr.bf16.mxu1 %v13682_v41  ;;  %v13764_v40 = vld [vmem:[#allocation7 + $0x300] ss:$16 sps:$4 sm:$0xff]   ;;  %v13767_v41 = vld [vmem:[#allocation7 + $0x308] ss:$16 sps:$4 sm:$0xff]  }
 0x150   :  { %1459 = vmatpush1.bf16.msra.mxu0 %v13684_v42  ;;  %1582 = vmatpush1.bf16.msra.mxu1 %v13685_v43  ;;  %v13772_v42 = vld [vmem:[#allocation7 + $0x324] ss:$16 sps:$4 sm:$0xff]   ;;  %v13775_v43 = vld [vmem:[#allocation7 + $0x32c] ss:$16 sps:$4 sm:$0xff]  }
 0x151   :  { %1460 = vmatprep.subr.bf16.mxu0 %v13686_v44  ;;  %1583 = vmatprep.subr.bf16.mxu1 %v13688_v45  ;;  %v13770_v44 = vld [vmem:[#allocation7 + $0x320] ss:$16 sps:$4 sm:$0xff]   ;;  %v13773_v45 = vld [vmem:[#allocation7 + $0x328] ss:$16 sps:$4 sm:$0xff]  }
 0x154   :  { %1461 = vmatpush1.bf16.msra.mxu0 %v13690_v47  ;;  %1584 = vmatpush1.bf16.msra.mxu1 %v13691_v49  ;;  %v13781_v47 = vld [vmem:[#allocation7 + $0x34c] ss:$16 sps:$4 sm:$0xff]   ;;  %v13779_v49 = vld [vmem:[#allocation7 + $0x348] ss:$16 sps:$4 sm:$0xff]  }
 0x155   :  { %1462 = vmatprep.subr.bf16.mxu0 %v13692_v50  ;;  %1585 = vmatprep.subr.bf16.mxu1 %v13694_v51  ;;  %v13784_v50 = vld [vmem:[#allocation7 + $0x364] ss:$16 sps:$4 sm:$0xff]   ;;  %v13787_v51 = vld [vmem:[#allocation7 + $0x36c] ss:$16 sps:$4 sm:$0xff]  }
 0x158   :  { %1463 = vmatpush1.bf16.msra.mxu0 %v13696_v52  ;;  %1586 = vmatpush1.bf16.msra.mxu1 %v13697_v53  ;;  %v13782_v52 = vld [vmem:[#allocation7 + $0x360] ss:$16 sps:$4 sm:$0xff]   ;;  %v13785_v53 = vld [vmem:[#allocation7 + $0x368] ss:$16 sps:$4 sm:$0xff]  }
 0x159   :  { %1464 = vmatprep.subr.bf16.mxu0 %v13698_v54  ;;  %1587 = vmatprep.subr.bf16.mxu1 %v13700_v55  ;;  %v13790_v54 = vld [vmem:[#allocation7 + $0x384] ss:$16 sps:$4 sm:$0xff]   ;;  %v13793_v55 = vld [vmem:[#allocation7 + $0x38c] ss:$16 sps:$4 sm:$0xff]  }
 0x15c   :  { %1465 = vmatpush1.bf16.msra.mxu0 %v13702_v56  ;;  %1588 = vmatpush1.bf16.msra.mxu1 %v13703_v57  ;;  %v13788_v56 = vld [vmem:[#allocation7 + $0x380] ss:$16 sps:$4 sm:$0xff]   ;;  %v13791_v57 = vld [vmem:[#allocation7 + $0x388] ss:$16 sps:$4 sm:$0xff]  }
 0x15d   :  { %1466 = vmatprep.subr.bf16.mxu0 %v13704_v58  ;;  %1589 = vmatprep.subr.bf16.mxu1 %v13706_v59  ;;  %v13796_v58 = vld [vmem:[#allocation7 + $0x3a4] ss:$16 sps:$4 sm:$0xff]   ;;  %v13799_v59 = vld [vmem:[#allocation7 + $0x3ac] ss:$16 sps:$4 sm:$0xff]  }
 0x160   :  { %1467 = vmatpush1.bf16.msra.mxu0 %v13708_v60  ;;  %1590 = vmatpush1.bf16.msra.mxu1 %v13709_v61  ;;  %v13794_v60 = vld [vmem:[#allocation7 + $0x3a0] ss:$16 sps:$4 sm:$0xff]   ;;  %v13797_v61 = vld [vmem:[#allocation7 + $0x3a8] ss:$16 sps:$4 sm:$0xff]  }
 0x161   :  { %1468 = vmatprep.subr.bf16.mxu0 %v13710_v62  ;;  %1591 = vmatprep.subr.bf16.mxu1 %v13712_v63  ;;  %v13802_v62 = vld [vmem:[#allocation7 + $0x3c4] ss:$16 sps:$4 sm:$0xff]   ;;  %v13805_v63 = vld [vmem:[#allocation7 + $0x3cc] ss:$16 sps:$4 sm:$0xff]  }
 0x164   :  { %1469 = vmatpush1.bf16.msra.mxu0 %v13714_v0  ;;  %1592 = vmatpush1.bf16.msra.mxu1 %v13715_v1  ;;  %v13800_v0 = vld [vmem:[#allocation7 + $0x3c0] ss:$16 sps:$4 sm:$0xff]   ;;  %v13803_v1 = vld [vmem:[#allocation7 + $0x3c8] ss:$16 sps:$4 sm:$0xff]  }
 0x165   :  { %1479 = vmatprep.subr.bf16.mxu0 %v13718_v3  ;;  %1602 = vmatprep.subr.bf16.mxu1 %v13721_v4  ;;  %v13811_v3 = vld [vmem:[#allocation7 + $0x3ec] ss:$16 sps:$4 sm:$0xff]   ;;  %v13806_v4 = vld [vmem:[#allocation7 + $0x3e0] ss:$16 sps:$4 sm:$0xff]  }
 0x167   :  { %1471 = vmatmul.mubr.bf16.vlgmr.msra.gmra.mrb[0].mxu0 %v258_v5  ;;  %1594 = vmatmul.mubr.bf16.vlgmr.msra.gmra.mrb[0].mxu1 %v258_v5  ;;  %v13809_v5 = vld [vmem:[#allocation7 + $0x3e8] ss:$16 sps:$4 sm:$0xff]  }
 0x168   :  { %1480 = vmatpush1.bf16.msra.mxu0 %v13716_v6  ;;  %1603 = vmatpush1.bf16.msra.mxu1 %v13719_v7  ;;  %v13814_v6 = vld [vmem:[#allocation7 + $0x404] ss:$16 sps:$4 sm:$0xff]  }
 0x169   :  { %1481 = vmatprep.subr.bf16.mxu0 %v13724_v8  ;;  %1604 = vmatprep.subr.bf16.mxu1 %v13727_v9  ;;  %v254_v7 = vld [vmem:[#allocation2 + $0x10] sm:$0xff]  ;;  %v13817_v8 = vld [vmem:[#allocation7 + $0x40c] ss:$16 sps:$4 sm:$0xff]  }
 0x16a   :  { %1511 = vmatprep.mubr.bf16.mxu0 %v261_v32  ;;  %1634 = vmatprep.mubr.bf16.mxu1 %v261_v32  ;;  %v13812_v9 = vld [vmem:[#allocation7 + $0x400] ss:$16 sps:$4 sm:$0xff]  }
 0x16b   :  { %v13842_v32 = vld [vmem:[#allocation7 + $0x4a0] ss:$16 sps:$4 sm:$0xff]  }
 0x16c   :  { %1482 = vmatpush1.bf16.msra.mxu0 %v13722_v10  ;;  %1605 = vmatpush1.bf16.msra.mxu1 %v13725_v11  ;;  %v260_v10 = vpack.c.bf16 %v254_v7, %v254_v7  ;;  %v13815_v11 = vld [vmem:[#allocation7 + $0x408] ss:$16 sps:$4 sm:$0xff]   ;;  %v13907_v7 = vld [vmem:[#allocation7 + $0x5ec] ss:$16 sps:$4 sm:$0xff]  }
 0x16d   :  { %1483 = vmatprep.subr.bf16.mxu0 %v13730_v12  ;;  %1606 = vmatprep.subr.bf16.mxu1 %v13733_v13  ;;  %v13820_v12 = vld [vmem:[#allocation7 + $0x424] ss:$16 sps:$4 sm:$0xff]   ;;  %v13823_v13 = vld [vmem:[#allocation7 + $0x42c] ss:$16 sps:$4 sm:$0xff]  }
 0x170   :  { %1484 = vmatpush1.bf16.msra.mxu0 %v13728_v14  ;;  %1607 = vmatpush1.bf16.msra.mxu1 %v13731_v15  ;;  %v257_v14 = vld [vmem:[#allocation2 + $0x28] sm:$0xff] }
 0x171   :  { %1485 = vmatprep.subr.bf16.mxu0 %v13736_v16  ;;  %1608 = vmatprep.subr.bf16.mxu1 %v13739_v17  ;;  %v263_v15 = vpack.c.bf16 %v257_v14, %v257_v14  ;;  %v13818_v16 = vld [vmem:[#allocation7 + $0x420] ss:$16 sps:$4 sm:$0xff]   ;;  %v13821_v17 = vld [vmem:[#allocation7 + $0x428] ss:$16 sps:$4 sm:$0xff]  }
 0x174   :  { %1486 = vmatpush1.bf16.msra.mxu0 %v13734_v18  ;;  %1609 = vmatpush1.bf16.msra.mxu1 %v13737_v19  ;;  %v13826_v18 = vld [vmem:[#allocation7 + $0x444] ss:$16 sps:$4 sm:$0xff]   ;;  %v13829_v19 = vld [vmem:[#allocation7 + $0x44c] ss:$16 sps:$4 sm:$0xff]  }
 0x175   :  { %1487 = vmatprep.subr.bf16.mxu0 %v13742_v20  ;;  %1610 = vmatprep.subr.bf16.mxu1 %v13745_v21  ;;  %v13824_v20 = vld [vmem:[#allocation7 + $0x440] ss:$16 sps:$4 sm:$0xff]   ;;  %v13827_v21 = vld [vmem:[#allocation7 + $0x448] ss:$16 sps:$4 sm:$0xff]  }
 0x178   :  { %1488 = vmatpush1.bf16.msra.mxu0 %v13740_v22  ;;  %1611 = vmatpush1.bf16.msra.mxu1 %v13743_v23  ;;  %v13832_v22 = vld [vmem:[#allocation7 + $0x464] ss:$16 sps:$4 sm:$0xff]   ;;  %v13835_v23 = vld [vmem:[#allocation7 + $0x46c] ss:$16 sps:$4 sm:$0xff]  }
 0x179   :  { %1489 = vmatprep.subr.bf16.mxu0 %v13748_v24  ;;  %1612 = vmatprep.subr.bf16.mxu1 %v13751_v25  ;;  %v13830_v24 = vld [vmem:[#allocation7 + $0x460] ss:$16 sps:$4 sm:$0xff]   ;;  %v13833_v25 = vld [vmem:[#allocation7 + $0x468] ss:$16 sps:$4 sm:$0xff]  }
 0x17c   :  { %1490 = vmatpush1.bf16.msra.mxu0 %v13746_v26  ;;  %1613 = vmatpush1.bf16.msra.mxu1 %v13749_v27  ;;  %v13838_v26 = vld [vmem:[#allocation7 + $0x484] ss:$16 sps:$4 sm:$0xff]   ;;  %v13841_v27 = vld [vmem:[#allocation7 + $0x48c] ss:$16 sps:$4 sm:$0xff]  }
 0x17d   :  { %1491 = vmatprep.subr.bf16.mxu0 %v13754_v28  ;;  %1614 = vmatprep.subr.bf16.mxu1 %v13757_v29  ;;  %v13836_v28 = vld [vmem:[#allocation7 + $0x480] ss:$16 sps:$4 sm:$0xff]   ;;  %v13839_v29 = vld [vmem:[#allocation7 + $0x488] ss:$16 sps:$4 sm:$0xff]  }
 0x180   :  { %1492 = vmatpush1.bf16.msra.mxu0 %v13752_v31  ;;  %1615 = vmatpush1.bf16.msra.mxu1 %v13755_v33  ;;  %v13847_v31 = vld [vmem:[#allocation7 + $0x4ac] ss:$16 sps:$4 sm:$0xff]   ;;  %v13845_v33 = vld [vmem:[#allocation7 + $0x4a8] ss:$16 sps:$4 sm:$0xff]  }
 0x181   :  { %1493 = vmatprep.subr.bf16.mxu0 %v13760_v34  ;;  %1616 = vmatprep.subr.bf16.mxu1 %v13763_v35  ;;  %v13850_v34 = vld [vmem:[#allocation7 + $0x4c4] ss:$16 sps:$4 sm:$0xff]   ;;  %v13853_v35 = vld [vmem:[#allocation7 + $0x4cc] ss:$16 sps:$4 sm:$0xff]  }
 0x184   :  { %1494 = vmatpush1.bf16.msra.mxu0 %v13758_v36  ;;  %1617 = vmatpush1.bf16.msra.mxu1 %v13761_v37  ;;  %v13848_v36 = vld [vmem:[#allocation7 + $0x4c0] ss:$16 sps:$4 sm:$0xff]   ;;  %v13851_v37 = vld [vmem:[#allocation7 + $0x4c8] ss:$16 sps:$4 sm:$0xff]  }
 0x185   :  { %1495 = vmatprep.subr.bf16.mxu0 %v13766_v38  ;;  %1618 = vmatprep.subr.bf16.mxu1 %v13769_v39  ;;  %v13856_v38 = vld [vmem:[#allocation7 + $0x4e4] ss:$16 sps:$4 sm:$0xff]   ;;  %v13859_v39 = vld [vmem:[#allocation7 + $0x4ec] ss:$16 sps:$4 sm:$0xff]  }
 0x188   :  { %1496 = vmatpush1.bf16.msra.mxu0 %v13764_v40  ;;  %1619 = vmatpush1.bf16.msra.mxu1 %v13767_v41  ;;  %v13854_v40 = vld [vmem:[#allocation7 + $0x4e0] ss:$16 sps:$4 sm:$0xff]   ;;  %v13857_v41 = vld [vmem:[#allocation7 + $0x4e8] ss:$16 sps:$4 sm:$0xff]  }
 0x189   :  { %1497 = vmatprep.subr.bf16.mxu0 %v13772_v42  ;;  %1620 = vmatprep.subr.bf16.mxu1 %v13775_v43  ;;  %v13862_v42 = vld [vmem:[#allocation7 + $0x504] ss:$16 sps:$4 sm:$0xff]   ;;  %v13865_v43 = vld [vmem:[#allocation7 + $0x50c] ss:$16 sps:$4 sm:$0xff]  }
 0x18c   :  { %1498 = vmatpush1.bf16.msra.mxu0 %v13770_v44  ;;  %1621 = vmatpush1.bf16.msra.mxu1 %v13773_v45  ;;  %v13860_v44 = vld [vmem:[#allocation7 + $0x500] ss:$16 sps:$4 sm:$0xff]   ;;  %v13863_v45 = vld [vmem:[#allocation7 + $0x508] ss:$16 sps:$4 sm:$0xff]  }
 0x18d   :  { %1499 = vmatprep.subr.bf16.mxu0 %v13778_v46  ;;  %1622 = vmatprep.subr.bf16.mxu1 %v13781_v47  ;;  %v13868_v46 = vld [vmem:[#allocation7 + $0x524] ss:$16 sps:$4 sm:$0xff]   ;;  %v13871_v47 = vld [vmem:[#allocation7 + $0x52c] ss:$16 sps:$4 sm:$0xff]  }
 0x190   :  { %1500 = vmatpush1.bf16.msra.mxu0 %v13776_v48  ;;  %1623 = vmatpush1.bf16.msra.mxu1 %v13779_v49  ;;  %v13866_v48 = vld [vmem:[#allocation7 + $0x520] ss:$16 sps:$4 sm:$0xff]   ;;  %v13869_v49 = vld [vmem:[#allocation7 + $0x528] ss:$16 sps:$4 sm:$0xff]  }
 0x191   :  { %1501 = vmatprep.subr.bf16.mxu0 %v13784_v50  ;;  %1624 = vmatprep.subr.bf16.mxu1 %v13787_v51  ;;  %v13874_v50 = vld [vmem:[#allocation7 + $0x544] ss:$16 sps:$4 sm:$0xff]   ;;  %v13877_v51 = vld [vmem:[#allocation7 + $0x54c] ss:$16 sps:$4 sm:$0xff]  }
 0x194   :  { %1502 = vmatpush1.bf16.msra.mxu0 %v13782_v52  ;;  %1625 = vmatpush1.bf16.msra.mxu1 %v13785_v53  ;;  %v13872_v52 = vld [vmem:[#allocation7 + $0x540] ss:$16 sps:$4 sm:$0xff]   ;;  %v13875_v53 = vld [vmem:[#allocation7 + $0x548] ss:$16 sps:$4 sm:$0xff]  }
 0x195   :  { %1503 = vmatprep.subr.bf16.mxu0 %v13790_v54  ;;  %1626 = vmatprep.subr.bf16.mxu1 %v13793_v55  ;;  %v13880_v54 = vld [vmem:[#allocation7 + $0x564] ss:$16 sps:$4 sm:$0xff]   ;;  %v13883_v55 = vld [vmem:[#allocation7 + $0x56c] ss:$16 sps:$4 sm:$0xff]  }
 0x198   :  { %1504 = vmatpush1.bf16.msra.mxu0 %v13788_v56  ;;  %1627 = vmatpush1.bf16.msra.mxu1 %v13791_v57  ;;  %v13878_v56 = vld [vmem:[#allocation7 + $0x560] ss:$16 sps:$4 sm:$0xff]   ;;  %v13881_v57 = vld [vmem:[#allocation7 + $0x568] ss:$16 sps:$4 sm:$0xff]  }
 0x199   :  { %1505 = vmatprep.subr.bf16.mxu0 %v13796_v58  ;;  %1628 = vmatprep.subr.bf16.mxu1 %v13799_v59  ;;  %v13886_v58 = vld [vmem:[#allocation7 + $0x584] ss:$16 sps:$4 sm:$0xff]   ;;  %v13889_v59 = vld [vmem:[#allocation7 + $0x58c] ss:$16 sps:$4 sm:$0xff]  }
 0x19c   :  { %1506 = vmatpush1.bf16.msra.mxu0 %v13794_v60  ;;  %1629 = vmatpush1.bf16.msra.mxu1 %v13797_v61  ;;  %v13884_v60 = vld [vmem:[#allocation7 + $0x580] ss:$16 sps:$4 sm:$0xff]   ;;  %v13887_v61 = vld [vmem:[#allocation7 + $0x588] ss:$16 sps:$4 sm:$0xff]  }
 0x19d   :  { %1507 = vmatprep.subr.bf16.mxu0 %v13802_v62  ;;  %1630 = vmatprep.subr.bf16.mxu1 %v13805_v63  ;;  %v13892_v62 = vld [vmem:[#allocation7 + $0x5a4] ss:$16 sps:$4 sm:$0xff]   ;;  %v13895_v63 = vld [vmem:[#allocation7 + $0x5ac] ss:$16 sps:$4 sm:$0xff]  }
 0x1a0   :  { %1508 = vmatpush1.bf16.msra.mxu0 %v13800_v0  ;;  %1631 = vmatpush1.bf16.msra.mxu1 %v13803_v1  ;;  %v13890_v0 = vld [vmem:[#allocation7 + $0x5a0] ss:$16 sps:$4 sm:$0xff]   ;;  %v13893_v1 = vld [vmem:[#allocation7 + $0x5a8] ss:$16 sps:$4 sm:$0xff]  }
 0x1a1   :  { %1509 = vmatprep.subr.bf16.mxu0 %v13808_v2  ;;  %1632 = vmatprep.subr.bf16.mxu1 %v13811_v3  ;;  %v13898_v2 = vld [vmem:[#allocation7 + $0x5c4] ss:$16 sps:$4 sm:$0xff]   ;;  %v13901_v3 = vld [vmem:[#allocation7 + $0x5cc] ss:$16 sps:$4 sm:$0xff]  }
 0x1a4   :  { %1510 = vmatpush1.bf16.msra.mxu0 %v13806_v4  ;;  %1633 = vmatpush1.bf16.msra.mxu1 %v13809_v5  ;;  %v13896_v4 = vld [vmem:[#allocation7 + $0x5c0] ss:$16 sps:$4 sm:$0xff]   ;;  %v13899_v5 = vld [vmem:[#allocation7 + $0x5c8] ss:$16 sps:$4 sm:$0xff]  }
 0x1a5   :  { %1520 = vmatprep.subr.bf16.mxu0 %v13814_v6  ;;  %1643 = vmatprep.subr.bf16.mxu1 %v13817_v8  ;;  %v13904_v6 = vld [vmem:[#allocation7 + $0x5e4] ss:$16 sps:$4 sm:$0xff]   ;;  %v13902_v8 = vld [vmem:[#allocation7 + $0x5e0] ss:$16 sps:$4 sm:$0xff]  }
 0x1a7   :  { %1512 = vmatmul.mubr.bf16.vlgmr.msra.gmra.mrb[0].mxu0 %v260_v10  ;;  %1635 = vmatmul.mubr.bf16.vlgmr.msra.gmra.mrb[0].mxu1 %v260_v10  ;;  %v256_v10 = vld [vmem:[#allocation2 + $0x20] sm:$0xff] }
 0x1a8   :  { %1521 = vmatpush1.bf16.msra.mxu0 %v13812_v9  ;;  %1644 = vmatpush1.bf16.msra.mxu1 %v13815_v11  ;;  %v13905_v9 = vld [vmem:[#allocation7 + $0x5e8] ss:$16 sps:$4 sm:$0xff]   ;;  %v262_v14 = vpack.c.bf16 %v256_v10, %v256_v10 }
 0x1a9   :  { %1522 = vmatprep.subr.bf16.mxu0 %v13820_v12  ;;  %1645 = vmatprep.subr.bf16.mxu1 %v13823_v13  ;;  %v13910_v11 = vld [vmem:[#allocation10 + $0x4] ss:$16 sps:$4 sm:$0xff]   ;;  %v13934_v12 = vld [vmem:[#allocation10 + $0xc] ss:$16 sps:$4 sm:$0xff]   ;;  %v13908_v13 = vld [vmem:[#allocation10] ss:$16 sps:$4 sm:$0xff]  }
 0x1aa   :  { %1552 = vmatprep.mubr.bf16.mxu0 %v263_v15  ;;  %1675 = vmatprep.mubr.bf16.mxu1 %v263_v15  ;;  %v13913_v15 = vld [vmem:[#allocation10 + $0x24] ss:$16 sps:$4 sm:$0xff]  }
 0x1ab   :  { %v13979_v10 = vld [vmem:[#allocation10 + $0x1e4] ss:$16 sps:$4 sm:$0xff]  }
 0x1ac   :  { %1523 = vmatpush1.bf16.msra.mxu0 %v13818_v16  ;;  %1646 = vmatpush1.bf16.msra.mxu1 %v13821_v17  ;;  %v1685_v16 = vld [vmem:[#allocation5 + $0x8] sm:$0xff] }
 0x1ad   :  { %1524 = vmatprep.subr.bf16.mxu0 %v13826_v18  ;;  %1647 = vmatprep.subr.bf16.mxu1 %v13829_v19  ;;  %v13932_v17 = vld [vmem:[#allocation10 + $0x8] ss:$16 sps:$4 sm:$0xff]   ;;  %v13940_v18 = vld [vmem:[#allocation10 + $0x2c] ss:$16 sps:$4 sm:$0xff]   ;;  %v1687_v19 = vpack.c.bf16 %v1685_v16, %v1685_v16  ;;  %v14009_v16 = vld [vmem:[#allocation13 + $0xc] ss:$16 sps:$4 sm:$0xff]  }
 0x1b0   :  { %1525 = vmatpush1.bf16.msra.mxu0 %v13824_v20  ;;  %1648 = vmatpush1.bf16.msra.mxu1 %v13827_v21  ;;  %v13911_v20 = vld [vmem:[#allocation10 + $0x20] ss:$16 sps:$4 sm:$0xff]   ;;  %v13916_v21 = vld [vmem:[#allocation10 + $0x44] ss:$16 sps:$4 sm:$0xff]  }
 0x1b1   :  { %1526 = vmatprep.subr.bf16.mxu0 %v13832_v22  ;;  %1649 = vmatprep.subr.bf16.mxu1 %v13835_v23  ;;  %v13938_v22 = vld [vmem:[#allocation10 + $0x28] ss:$16 sps:$4 sm:$0xff]   ;;  %v13946_v23 = vld [vmem:[#allocation10 + $0x4c] ss:$16 sps:$4 sm:$0xff]  }
 0x1b4   :  { %1527 = vmatpush1.bf16.msra.mxu0 %v13830_v24  ;;  %1650 = vmatpush1.bf16.msra.mxu1 %v13833_v25  ;;  %v13914_v24 = vld [vmem:[#allocation10 + $0x40] ss:$16 sps:$4 sm:$0xff]   ;;  %v13919_v25 = vld [vmem:[#allocation10 + $0x64] ss:$16 sps:$4 sm:$0xff]  }
 0x1b5   :  { %1528 = vmatprep.subr.bf16.mxu0 %v13838_v26  ;;  %1651 = vmatprep.subr.bf16.mxu1 %v13841_v27  ;;  %v13944_v26 = vld [vmem:[#allocation10 + $0x48] ss:$16 sps:$4 sm:$0xff]   ;;  %v13952_v27 = vld [vmem:[#allocation10 + $0x6c] ss:$16 sps:$4 sm:$0xff]  }
 0x1b8   :  { %1529 = vmatpush1.bf16.msra.mxu0 %v13836_v28  ;;  %1652 = vmatpush1.bf16.msra.mxu1 %v13839_v29  ;;  %v13917_v28 = vld [vmem:[#allocation10 + $0x60] ss:$16 sps:$4 sm:$0xff]   ;;  %v13922_v29 = vld [vmem:[#allocation10 + $0x84] ss:$16 sps:$4 sm:$0xff]  }
 0x1b9   :  { %1530 = vmatprep.subr.bf16.mxu0 %v13844_v30  ;;  %1653 = vmatprep.subr.bf16.mxu1 %v13847_v31  ;;  %v13950_v30 = vld [vmem:[#allocation10 + $0x68] ss:$16 sps:$4 sm:$0xff]   ;;  %v13958_v31 = vld [vmem:[#allocation10 + $0x8c] ss:$16 sps:$4 sm:$0xff]  }
 0x1bc   :  { %1531 = vmatpush1.bf16.msra.mxu0 %v13842_v32  ;;  %1654 = vmatpush1.bf16.msra.mxu1 %v13845_v33  ;;  %v13920_v32 = vld [vmem:[#allocation10 + $0x80] ss:$16 sps:$4 sm:$0xff]   ;;  %v13925_v33 = vld [vmem:[#allocation10 + $0xa4] ss:$16 sps:$4 sm:$0xff]  }
 0x1bd   :  { %1532 = vmatprep.subr.bf16.mxu0 %v13850_v34  ;;  %1655 = vmatprep.subr.bf16.mxu1 %v13853_v35  ;;  %v13956_v34 = vld [vmem:[#allocation10 + $0x88] ss:$16 sps:$4 sm:$0xff]   ;;  %v13964_v35 = vld [vmem:[#allocation10 + $0xac] ss:$16 sps:$4 sm:$0xff]  }
 0x1c0   :  { %1533 = vmatpush1.bf16.msra.mxu0 %v13848_v36  ;;  %1656 = vmatpush1.bf16.msra.mxu1 %v13851_v37  ;;  %v13923_v36 = vld [vmem:[#allocation10 + $0xa0] ss:$16 sps:$4 sm:$0xff]   ;;  %v13962_v37 = vld [vmem:[#allocation10 + $0xa8] ss:$16 sps:$4 sm:$0xff]  }
 0x1c1   :  { %1534 = vmatprep.subr.bf16.mxu0 %v13856_v38  ;;  %1657 = vmatprep.subr.bf16.mxu1 %v13859_v39  ;;  %v13928_v38 = vld [vmem:[#allocation10 + $0xc4] ss:$16 sps:$4 sm:$0xff]   ;;  %v13970_v39 = vld [vmem:[#allocation10 + $0xcc] ss:$16 sps:$4 sm:$0xff]  }
 0x1c4   :  { %1535 = vmatpush1.bf16.msra.mxu0 %v13854_v40  ;;  %1658 = vmatpush1.bf16.msra.mxu1 %v13857_v41  ;;  %v13926_v40 = vld [vmem:[#allocation10 + $0xc0] ss:$16 sps:$4 sm:$0xff]   ;;  %v13968_v41 = vld [vmem:[#allocation10 + $0xc8] ss:$16 sps:$4 sm:$0xff]  }
 0x1c5   :  { %1536 = vmatprep.subr.bf16.mxu0 %v13862_v42  ;;  %1659 = vmatprep.subr.bf16.mxu1 %v13865_v43  ;;  %v13931_v42 = vld [vmem:[#allocation10 + $0xe4] ss:$16 sps:$4 sm:$0xff]   ;;  %v13976_v43 = vld [vmem:[#allocation10 + $0xec] ss:$16 sps:$4 sm:$0xff]  }
 0x1c8   :  { %1537 = vmatpush1.bf16.msra.mxu0 %v13860_v44  ;;  %1660 = vmatpush1.bf16.msra.mxu1 %v13863_v45  ;;  %v13929_v44 = vld [vmem:[#allocation10 + $0xe0] ss:$16 sps:$4 sm:$0xff]   ;;  %v13974_v45 = vld [vmem:[#allocation10 + $0xe8] ss:$16 sps:$4 sm:$0xff]  }
 0x1c9   :  { %1538 = vmatprep.subr.bf16.mxu0 %v13868_v46  ;;  %1661 = vmatprep.subr.bf16.mxu1 %v13871_v47  ;;  %v13937_v46 = vld [vmem:[#allocation10 + $0x104] ss:$16 sps:$4 sm:$0xff]   ;;  %v13982_v47 = vld [vmem:[#allocation10 + $0x10c] ss:$16 sps:$4 sm:$0xff]  }
 0x1cc   :  { %1539 = vmatpush1.bf16.msra.mxu0 %v13866_v48  ;;  %1662 = vmatpush1.bf16.msra.mxu1 %v13869_v49  ;;  %v13935_v48 = vld [vmem:[#allocation10 + $0x100] ss:$16 sps:$4 sm:$0xff]   ;;  %v13980_v49 = vld [vmem:[#allocation10 + $0x108] ss:$16 sps:$4 sm:$0xff]  }
 0x1cd   :  { %1540 = vmatprep.subr.bf16.mxu0 %v13874_v50  ;;  %1663 = vmatprep.subr.bf16.mxu1 %v13877_v51  ;;  %v13943_v50 = vld [vmem:[#allocation10 + $0x124] ss:$16 sps:$4 sm:$0xff]   ;;  %v13985_v51 = vld [vmem:[#allocation10 + $0x12c] ss:$16 sps:$4 sm:$0xff]  }
 0x1d0   :  { %1541 = vmatpush1.bf16.msra.mxu0 %v13872_v52  ;;  %1664 = vmatpush1.bf16.msra.mxu1 %v13875_v53  ;;  %v13941_v52 = vld [vmem:[#allocation10 + $0x120] ss:$16 sps:$4 sm:$0xff]   ;;  %v13983_v53 = vld [vmem:[#allocation10 + $0x128] ss:$16 sps:$4 sm:$0xff]  }
 0x1d1   :  { %1542 = vmatprep.subr.bf16.mxu0 %v13880_v54  ;;  %1665 = vmatprep.subr.bf16.mxu1 %v13883_v55  ;;  %v13949_v54 = vld [vmem:[#allocation10 + $0x144] ss:$16 sps:$4 sm:$0xff]   ;;  %v13988_v55 = vld [vmem:[#allocation10 + $0x14c] ss:$16 sps:$4 sm:$0xff]  }
 0x1d4   :  { %1543 = vmatpush1.bf16.msra.mxu0 %v13878_v56  ;;  %1666 = vmatpush1.bf16.msra.mxu1 %v13881_v57  ;;  %v13947_v56 = vld [vmem:[#allocation10 + $0x140] ss:$16 sps:$4 sm:$0xff]   ;;  %v13986_v57 = vld [vmem:[#allocation10 + $0x148] ss:$16 sps:$4 sm:$0xff]  }
 0x1d5   :  { %1544 = vmatprep.subr.bf16.mxu0 %v13886_v58  ;;  %1667 = vmatprep.subr.bf16.mxu1 %v13889_v59  ;;  %v13955_v58 = vld [vmem:[#allocation10 + $0x164] ss:$16 sps:$4 sm:$0xff]   ;;  %v13991_v59 = vld [vmem:[#allocation10 + $0x16c] ss:$16 sps:$4 sm:$0xff]  }
 0x1d8   :  { %1545 = vmatpush1.bf16.msra.mxu0 %v13884_v60  ;;  %1668 = vmatpush1.bf16.msra.mxu1 %v13887_v61  ;;  %v13953_v60 = vld [vmem:[#allocation10 + $0x160] ss:$16 sps:$4 sm:$0xff]   ;;  %v13989_v61 = vld [vmem:[#allocation10 + $0x168] ss:$16 sps:$4 sm:$0xff]  }
 0x1d9   :  { %1546 = vmatprep.subr.bf16.mxu0 %v13892_v62  ;;  %1669 = vmatprep.subr.bf16.mxu1 %v13895_v63  ;;  %v13961_v62 = vld [vmem:[#allocation10 + $0x184] ss:$16 sps:$4 sm:$0xff]   ;;  %v13994_v63 = vld [vmem:[#allocation10 + $0x18c] ss:$16 sps:$4 sm:$0xff]  }
 0x1dc   :  { %1547 = vmatpush1.bf16.msra.mxu0 %v13890_v0  ;;  %1670 = vmatpush1.bf16.msra.mxu1 %v13893_v1  ;;  %v13959_v0 = vld [vmem:[#allocation10 + $0x180] ss:$16 sps:$4 sm:$0xff]   ;;  %v13992_v1 = vld [vmem:[#allocation10 + $0x188] ss:$16 sps:$4 sm:$0xff]  }
 0x1dd   :  { %1548 = vmatprep.subr.bf16.mxu0 %v13898_v2  ;;  %1671 = vmatprep.subr.bf16.mxu1 %v13901_v3  ;;  %v13967_v2 = vld [vmem:[#allocation10 + $0x1a4] ss:$16 sps:$4 sm:$0xff]   ;;  %v13997_v3 = vld [vmem:[#allocation10 + $0x1ac] ss:$16 sps:$4 sm:$0xff]  }
 0x1e0   :  { %1549 = vmatpush1.bf16.msra.mxu0 %v13896_v4  ;;  %1672 = vmatpush1.bf16.msra.mxu1 %v13899_v5  ;;  %v13965_v4 = vld [vmem:[#allocation10 + $0x1a0] ss:$16 sps:$4 sm:$0xff]   ;;  %v13995_v5 = vld [vmem:[#allocation10 + $0x1a8] ss:$16 sps:$4 sm:$0xff]  }
 0x1e1   :  { %1550 = vmatprep.subr.bf16.mxu0 %v13904_v6  ;;  %1673 = vmatprep.subr.bf16.mxu1 %v13907_v7  ;;  %v13973_v6 = vld [vmem:[#allocation10 + $0x1c4] ss:$16 sps:$4 sm:$0xff]   ;;  %v14000_v7 = vld [vmem:[#allocation10 + $0x1cc] ss:$16 sps:$4 sm:$0xff]  }
 0x1e4   :  { %1551 = vmatpush1.bf16.msra.mxu0 %v13902_v8  ;;  %1674 = vmatpush1.bf16.msra.mxu1 %v13905_v9  ;;  %v13971_v8 = vld [vmem:[#allocation10 + $0x1c0] ss:$16 sps:$4 sm:$0xff]   ;;  %v13998_v9 = vld [vmem:[#allocation10 + $0x1c8] ss:$16 sps:$4 sm:$0xff]  }
 0x1e5   :  { %2094 = vmatprep.subr.bf16.mxu0 %v13910_v11  ;;  %2135 = vmatprep.subr.bf16.mxu1 %v13934_v12  ;;  %v14003_v11 = vld [vmem:[#allocation10 + $0x1ec] ss:$16 sps:$4 sm:$0xff]   ;;  %v13977_v12 = vld [vmem:[#allocation10 + $0x1e0] ss:$16 sps:$4 sm:$0xff]  }
 0x1e7   :  { %1553 = vmatmul.mubr.bf16.vlgmr.msra.gmra.mrb[0].mxu0 %v262_v14  ;;  %1676 = vmatmul.mubr.bf16.vlgmr.msra.gmra.mrb[0].mxu1 %v262_v14  ;;  %v14001_v14 = vld [vmem:[#allocation10 + $0x1e8] ss:$16 sps:$4 sm:$0xff]  }
 0x1e8   :  { %2095 = vmatpush1.bf16.msra.mxu0 %v13908_v13  ;;  %2136 = vmatpush1.bf16.msra.mxu1 %v13932_v17  ;;  %v1684_v13 = vld [vmem:[#allocation5] sm:$0xff]  ;;  %v14004_v17 = vld [vmem:[#allocation13] ss:$16 sps:$4 sm:$0xff]  }
 0x1e9   :  { %2096 = vmatprep.subr.bf16.mxu0 %v13913_v15  ;;  %2137 = vmatprep.subr.bf16.mxu1 %v13940_v18  ;;  %v14006_v15 = vld [vmem:[#allocation13 + $0x4] ss:$16 sps:$4 sm:$0xff]   ;;  %v14007_v18 = vld [vmem:[#allocation13 + $0x8] ss:$16 sps:$4 sm:$0xff]  }
 0x1ea   :  { %2126 = vmatprep.mubr.bf16.mxu0 %v1687_v19  ;;  %2167 = vmatprep.mubr.bf16.mxu1 %v1687_v19  ;;  %v1686_v19 = vpack.c.bf16 %v1684_v13, %v1684_v13  ;;  %v14099_v13 = vld [vmem:[#allocation13 + $0x1ec] ss:$16 sps:$4 sm:$0xff]  }
 0x1ec   :  { %2097 = vmatpush1.bf16.msra.mxu0 %v13911_v20  ;;  %2138 = vmatpush1.bf16.msra.mxu1 %v13938_v22  ;;  %v14012_v20 = vld [vmem:[#allocation13 + $0x24] ss:$16 sps:$4 sm:$0xff]   ;;  %v14010_v22 = vld [vmem:[#allocation13 + $0x20] ss:$16 sps:$4 sm:$0xff]  }
 0x1ed   :  { %2098 = vmatprep.subr.bf16.mxu0 %v13916_v21  ;;  %2139 = vmatprep.subr.bf16.mxu1 %v13946_v23  ;;  %v14015_v21 = vld [vmem:[#allocation13 + $0x2c] ss:$16 sps:$4 sm:$0xff]   ;;  %v14013_v23 = vld [vmem:[#allocation13 + $0x28] ss:$16 sps:$4 sm:$0xff]  }
 0x1f0   :  { %2099 = vmatpush1.bf16.msra.mxu0 %v13914_v24  ;;  %2140 = vmatpush1.bf16.msra.mxu1 %v13944_v26  ;;  %v14018_v24 = vld [vmem:[#allocation13 + $0x44] ss:$16 sps:$4 sm:$0xff]   ;;  %v14016_v26 = vld [vmem:[#allocation13 + $0x40] ss:$16 sps:$4 sm:$0xff]  }
 0x1f1   :  { %2100 = vmatprep.subr.bf16.mxu0 %v13919_v25  ;;  %2141 = vmatprep.subr.bf16.mxu1 %v13952_v27  ;;  %v14021_v25 = vld [vmem:[#allocation13 + $0x4c] ss:$16 sps:$4 sm:$0xff]   ;;  %v14019_v27 = vld [vmem:[#allocation13 + $0x48] ss:$16 sps:$4 sm:$0xff]  }
 0x1f4   :  { %2101 = vmatpush1.bf16.msra.mxu0 %v13917_v28  ;;  %2142 = vmatpush1.bf16.msra.mxu1 %v13950_v30  ;;  %v14024_v28 = vld [vmem:[#allocation13 + $0x64] ss:$16 sps:$4 sm:$0xff]   ;;  %v14022_v30 = vld [vmem:[#allocation13 + $0x60] ss:$16 sps:$4 sm:$0xff]  }
 0x1f5   :  { %2102 = vmatprep.subr.bf16.mxu0 %v13922_v29  ;;  %2143 = vmatprep.subr.bf16.mxu1 %v13958_v31  ;;  %v14027_v29 = vld [vmem:[#allocation13 + $0x6c] ss:$16 sps:$4 sm:$0xff]   ;;  %v14025_v31 = vld [vmem:[#allocation13 + $0x68] ss:$16 sps:$4 sm:$0xff]  }
 0x1f8   :  { %2103 = vmatpush1.bf16.msra.mxu0 %v13920_v32  ;;  %2144 = vmatpush1.bf16.msra.mxu1 %v13956_v34  ;;  %v14030_v32 = vld [vmem:[#allocation13 + $0x84] ss:$16 sps:$4 sm:$0xff]   ;;  %v14028_v34 = vld [vmem:[#allocation13 + $0x80] ss:$16 sps:$4 sm:$0xff]  }
 0x1f9   :  { %2104 = vmatprep.subr.bf16.mxu0 %v13925_v33  ;;  %2145 = vmatprep.subr.bf16.mxu1 %v13964_v35  ;;  %v14033_v33 = vld [vmem:[#allocation13 + $0x8c] ss:$16 sps:$4 sm:$0xff]   ;;  %v14031_v35 = vld [vmem:[#allocation13 + $0x88] ss:$16 sps:$4 sm:$0xff]  }
 0x1fc   :  { %2105 = vmatpush1.bf16.msra.mxu0 %v13923_v36  ;;  %2146 = vmatpush1.bf16.msra.mxu1 %v13962_v37  ;;  %v14036_v36 = vld [vmem:[#allocation13 + $0xa4] ss:$16 sps:$4 sm:$0xff]   ;;  %v14039_v37 = vld [vmem:[#allocation13 + $0xac] ss:$16 sps:$4 sm:$0xff]  }
 0x1fd   :  { %2106 = vmatprep.subr.bf16.mxu0 %v13928_v38  ;;  %2147 = vmatprep.subr.bf16.mxu1 %v13970_v39  ;;  %v14034_v38 = vld [vmem:[#allocation13 + $0xa0] ss:$16 sps:$4 sm:$0xff]   ;;  %v14037_v39 = vld [vmem:[#allocation13 + $0xa8] ss:$16 sps:$4 sm:$0xff]  }
 0x200   :  { %2107 = vmatpush1.bf16.msra.mxu0 %v13926_v40  ;;  %2148 = vmatpush1.bf16.msra.mxu1 %v13968_v41  ;;  %v14042_v40 = vld [vmem:[#allocation13 + $0xc4] ss:$16 sps:$4 sm:$0xff]   ;;  %v14045_v41 = vld [vmem:[#allocation13 + $0xcc] ss:$16 sps:$4 sm:$0xff]  }
 0x201   :  { %2108 = vmatprep.subr.bf16.mxu0 %v13931_v42  ;;  %2149 = vmatprep.subr.bf16.mxu1 %v13976_v43  ;;  %v14040_v42 = vld [vmem:[#allocation13 + $0xc0] ss:$16 sps:$4 sm:$0xff]   ;;  %v14043_v43 = vld [vmem:[#allocation13 + $0xc8] ss:$16 sps:$4 sm:$0xff]  }
 0x204   :  { %2109 = vmatpush1.bf16.msra.mxu0 %v13929_v44  ;;  %2150 = vmatpush1.bf16.msra.mxu1 %v13974_v45  ;;  %v14048_v44 = vld [vmem:[#allocation13 + $0xe4] ss:$16 sps:$4 sm:$0xff]   ;;  %v14051_v45 = vld [vmem:[#allocation13 + $0xec] ss:$16 sps:$4 sm:$0xff]  }
 0x205   :  { %2110 = vmatprep.subr.bf16.mxu0 %v13937_v46  ;;  %2151 = vmatprep.subr.bf16.mxu1 %v13982_v47  ;;  %v14046_v46 = vld [vmem:[#allocation13 + $0xe0] ss:$16 sps:$4 sm:$0xff]   ;;  %v14049_v47 = vld [vmem:[#allocation13 + $0xe8] ss:$16 sps:$4 sm:$0xff]  }
 0x208   :  { %2111 = vmatpush1.bf16.msra.mxu0 %v13935_v48  ;;  %2152 = vmatpush1.bf16.msra.mxu1 %v13980_v49  ;;  %v14054_v48 = vld [vmem:[#allocation13 + $0x104] ss:$16 sps:$4 sm:$0xff]   ;;  %v14057_v49 = vld [vmem:[#allocation13 + $0x10c] ss:$16 sps:$4 sm:$0xff]  }
 0x209   :  { %2112 = vmatprep.subr.bf16.mxu0 %v13943_v50  ;;  %2153 = vmatprep.subr.bf16.mxu1 %v13985_v51  ;;  %v14052_v50 = vld [vmem:[#allocation13 + $0x100] ss:$16 sps:$4 sm:$0xff]   ;;  %v14055_v51 = vld [vmem:[#allocation13 + $0x108] ss:$16 sps:$4 sm:$0xff]  }
 0x20c   :  { %2113 = vmatpush1.bf16.msra.mxu0 %v13941_v52  ;;  %2154 = vmatpush1.bf16.msra.mxu1 %v13983_v53  ;;  %v14060_v52 = vld [vmem:[#allocation13 + $0x124] ss:$16 sps:$4 sm:$0xff]   ;;  %v14063_v53 = vld [vmem:[#allocation13 + $0x12c] ss:$16 sps:$4 sm:$0xff]  }
 0x20d   :  { %2114 = vmatprep.subr.bf16.mxu0 %v13949_v54  ;;  %2155 = vmatprep.subr.bf16.mxu1 %v13988_v55  ;;  %v14058_v54 = vld [vmem:[#allocation13 + $0x120] ss:$16 sps:$4 sm:$0xff]   ;;  %v14061_v55 = vld [vmem:[#allocation13 + $0x128] ss:$16 sps:$4 sm:$0xff]  }
 0x210   :  { %2115 = vmatpush1.bf16.msra.mxu0 %v13947_v56  ;;  %2156 = vmatpush1.bf16.msra.mxu1 %v13986_v57  ;;  %v14066_v56 = vld [vmem:[#allocation13 + $0x144] ss:$16 sps:$4 sm:$0xff]   ;;  %v14069_v57 = vld [vmem:[#allocation13 + $0x14c] ss:$16 sps:$4 sm:$0xff]  }
 0x211   :  { %2116 = vmatprep.subr.bf16.mxu0 %v13955_v58  ;;  %2157 = vmatprep.subr.bf16.mxu1 %v13991_v59  ;;  %v14064_v58 = vld [vmem:[#allocation13 + $0x140] ss:$16 sps:$4 sm:$0xff]   ;;  %v14067_v59 = vld [vmem:[#allocation13 + $0x148] ss:$16 sps:$4 sm:$0xff]  }
 0x214   :  { %2117 = vmatpush1.bf16.msra.mxu0 %v13953_v60  ;;  %2158 = vmatpush1.bf16.msra.mxu1 %v13989_v61  ;;  %v14072_v60 = vld [vmem:[#allocation13 + $0x164] ss:$16 sps:$4 sm:$0xff]   ;;  %v14075_v61 = vld [vmem:[#allocation13 + $0x16c] ss:$16 sps:$4 sm:$0xff]  }
 0x215   :  { %2118 = vmatprep.subr.bf16.mxu0 %v13961_v62  ;;  %2159 = vmatprep.subr.bf16.mxu1 %v13994_v63  ;;  %v14070_v62 = vld [vmem:[#allocation13 + $0x160] ss:$16 sps:$4 sm:$0xff]   ;;  %v14073_v63 = vld [vmem:[#allocation13 + $0x168] ss:$16 sps:$4 sm:$0xff]  }
 0x218   :  { %2119 = vmatpush1.bf16.msra.mxu0 %v13959_v0  ;;  %2160 = vmatpush1.bf16.msra.mxu1 %v13992_v1  ;;  %v14078_v0 = vld [vmem:[#allocation13 + $0x184] ss:$16 sps:$4 sm:$0xff]   ;;  %v14081_v1 = vld [vmem:[#allocation13 + $0x18c] ss:$16 sps:$4 sm:$0xff]  }
 0x219   :  { %2120 = vmatprep.subr.bf16.mxu0 %v13967_v2  ;;  %2161 = vmatprep.subr.bf16.mxu1 %v13997_v3  ;;  %v14076_v2 = vld [vmem:[#allocation13 + $0x180] ss:$16 sps:$4 sm:$0xff]   ;;  %v14079_v3 = vld [vmem:[#allocation13 + $0x188] ss:$16 sps:$4 sm:$0xff]  }
 0x21c   :  { %2121 = vmatpush1.bf16.msra.mxu0 %v13965_v4  ;;  %2162 = vmatpush1.bf16.msra.mxu1 %v13995_v5  ;;  %v14084_v4 = vld [vmem:[#allocation13 + $0x1a4] ss:$16 sps:$4 sm:$0xff]   ;;  %v14087_v5 = vld [vmem:[#allocation13 + $0x1ac] ss:$16 sps:$4 sm:$0xff]  }
 0x21d   :  { %2122 = vmatprep.subr.bf16.mxu0 %v13973_v6  ;;  %2163 = vmatprep.subr.bf16.mxu1 %v14000_v7  ;;  %v14082_v6 = vld [vmem:[#allocation13 + $0x1a0] ss:$16 sps:$4 sm:$0xff]   ;;  %v14085_v7 = vld [vmem:[#allocation13 + $0x1a8] ss:$16 sps:$4 sm:$0xff]  }
 0x220   :  { %2123 = vmatpush1.bf16.msra.mxu0 %v13971_v8  ;;  %2164 = vmatpush1.bf16.msra.mxu1 %v13998_v9  ;;  %v14090_v8 = vld [vmem:[#allocation13 + $0x1c4] ss:$16 sps:$4 sm:$0xff]   ;;  %v14093_v9 = vld [vmem:[#allocation13 + $0x1cc] ss:$16 sps:$4 sm:$0xff]  }
 0x221   :  { %2124 = vmatprep.subr.bf16.mxu0 %v13979_v10  ;;  %2165 = vmatprep.subr.bf16.mxu1 %v14003_v11  ;;  %v14088_v10 = vld [vmem:[#allocation13 + $0x1c0] ss:$16 sps:$4 sm:$0xff]   ;;  %v14091_v11 = vld [vmem:[#allocation13 + $0x1c8] ss:$16 sps:$4 sm:$0xff]  }
 0x224   :  { %2125 = vmatpush1.bf16.msra.mxu0 %v13977_v12  ;;  %2166 = vmatpush1.bf16.msra.mxu1 %v14001_v14  ;;  %v14096_v12 = vld [vmem:[#allocation13 + $0x1e4] ss:$16 sps:$4 sm:$0xff]   ;;  %v14094_v14 = vld [vmem:[#allocation13 + $0x1e0] ss:$16 sps:$4 sm:$0xff]  }
 0x225   :  { %2970 = vmatprep.subr.bf16.mxu0 %v14006_v15  ;;  %3052 = vmatprep.subr.bf16.mxu1 %v14009_v16  ;;  %v14097_v15 = vld [vmem:[#allocation13 + $0x1e8] ss:$16 sps:$4 sm:$0xff]   ;;  %v14102_v16 = vld [vmem:[#allocation13 + $0x204] ss:$16 sps:$4 sm:$0xff]  }
 0x227   :  { %2127 = vmatmul.mubr.bf16.vlgmr.msra.gmra.mrb[4].mxu0 %v1686_v19  ;;  %2168 = vmatmul.mubr.bf16.vlgmr.msra.gmra.mrb[4].mxu1 %v1686_v19 }
 0x228   :  { %2971 = vmatpush1.bf16.msra.mxu0 %v14004_v17  ;;  %3053 = vmatpush1.bf16.msra.mxu1 %v14007_v18  ;;  %v14105_v17 = vld [vmem:[#allocation13 + $0x20c] ss:$16 sps:$4 sm:$0xff]   ;;  %v458_v18 = vlaneseq }
 0x229   :  { %2972 = vmatprep.subr.bf16.mxu0 %v14012_v20  ;;  %3054 = vmatprep.subr.bf16.mxu1 %v14015_v21  ;;  %v456_v20 = vld [vmem:[#allocation8] sm:$0xf] }
 0x22a   :  { %v15705_v19 = vshrl.u32 %v458_v18, 7  ;;  %v14162_v18 = vld [vmem:[#allocation13 + $0x344] ss:$16 sps:$4 sm:$0xff]  }
 0x22c   :  { %2973 = vmatpush1.bf16.msra.mxu0 %v14010_v22  ;;  %3055 = vmatpush1.bf16.msra.mxu1 %v14013_v23  ;;  %v15708_v21 = vsub.s32 0, %v15705_v19  ;;  %v15711_v22 = vsub.s32 2, %v15705_v19  ;;  %v15714_v23 = vsub.s32 1, %v15705_v19 }
 0x22d   :  { %2974 = vmatprep.subr.bf16.mxu0 %v14018_v24  ;;  %3056 = vmatprep.subr.bf16.mxu1 %v14021_v25  ;;  %v15717_v24 = vsub.s32 3, %v15705_v19 }
 0x22e   :  { %v461_v25 = vrot.slane %v456_v20, %v15708_v21 }
 0x230   :  { %2975 = vmatpush1.bf16.msra.mxu0 %v14016_v26  ;;  %3057 = vmatpush1.bf16.msra.mxu1 %v14019_v27  ;;  %v469_v26 = vrot.slane %v456_v20, %v15711_v22  ;;  %v465_v27 = vrot.slane %v456_v20, %v15714_v23 }
 0x231   :  { %2976 = vmatprep.subr.bf16.mxu0 %v14024_v28  ;;  %3058 = vmatprep.subr.bf16.mxu1 %v14027_v29  ;;  %v473_v28 = vrot.slane %v456_v20, %v15717_v24  ;;  %v14165_v20 = vld [vmem:[#allocation13 + $0x34c] ss:$16 sps:$4 sm:$0xff]  }
 0x234   :  { %2977 = vmatpush1.bf16.msra.mxu0 %v14022_v30  ;;  %3059 = vmatpush1.bf16.msra.mxu1 %v14025_v31 }
 0x235   :  { %2978 = vmatprep.subr.bf16.mxu0 %v14030_v32  ;;  %3060 = vmatprep.subr.bf16.mxu1 %v14033_v33 }
 0x238   :  { %2979 = vmatpush1.bf16.msra.mxu0 %v14028_v34  ;;  %3061 = vmatpush1.bf16.msra.mxu1 %v14031_v35 }
 0x239   :  { %2980 = vmatprep.subr.bf16.mxu0 %v14036_v36  ;;  %3062 = vmatprep.subr.bf16.mxu1 %v14039_v37 }
 0x23c   :  { %2981 = vmatpush1.bf16.msra.mxu0 %v14034_v38  ;;  %3063 = vmatpush1.bf16.msra.mxu1 %v14037_v39 }
 0x23d   :  { %2982 = vmatprep.subr.bf16.mxu0 %v14042_v40  ;;  %3064 = vmatprep.subr.bf16.mxu1 %v14045_v41 }
 0x240   :  { %2983 = vmatpush1.bf16.msra.mxu0 %v14040_v42  ;;  %3065 = vmatpush1.bf16.msra.mxu1 %v14043_v43  ;;  %v14100_v42 = vld [vmem:[#allocation13 + $0x200] ss:$16 sps:$4 sm:$0xff]   ;;  %v14103_v43 = vld [vmem:[#allocation13 + $0x208] ss:$16 sps:$4 sm:$0xff]  }
 0x241   :  { %2984 = vmatprep.subr.bf16.mxu0 %v14048_v44  ;;  %3066 = vmatprep.subr.bf16.mxu1 %v14051_v45  ;;  %v14108_v44 = vld [vmem:[#allocation13 + $0x224] ss:$16 sps:$4 sm:$0xff]  }
 0x244   :  { %2985 = vmatpush1.bf16.msra.mxu0 %v14046_v46  ;;  %3067 = vmatpush1.bf16.msra.mxu1 %v14049_v47  ;;  %v14111_v46 = vld [vmem:[#allocation13 + $0x22c] ss:$16 sps:$4 sm:$0xff]  }
 0x245   :  { %2986 = vmatprep.subr.bf16.mxu0 %v14054_v48  ;;  %3068 = vmatprep.subr.bf16.mxu1 %v14057_v49  ;;  %v14106_v48 = vld [vmem:[#allocation13 + $0x220] ss:$16 sps:$4 sm:$0xff]   ;;  %v14109_v49 = vld [vmem:[#allocation13 + $0x228] ss:$16 sps:$4 sm:$0xff]  }
 0x248   :  { %2987 = vmatpush1.bf16.msra.mxu0 %v14052_v50  ;;  %3069 = vmatpush1.bf16.msra.mxu1 %v14055_v51  ;;  %v14114_v50 = vld [vmem:[#allocation13 + $0x244] ss:$16 sps:$4 sm:$0xff]   ;;  %v14117_v51 = vld [vmem:[#allocation13 + $0x24c] ss:$16 sps:$4 sm:$0xff]  }
 0x249   :  { %2988 = vmatprep.subr.bf16.mxu0 %v14060_v52  ;;  %3070 = vmatprep.subr.bf16.mxu1 %v14063_v53  ;;  %v14112_v52 = vld [vmem:[#allocation13 + $0x240] ss:$16 sps:$4 sm:$0xff]   ;;  %v14115_v53 = vld [vmem:[#allocation13 + $0x248] ss:$16 sps:$4 sm:$0xff]  }
 0x24c   :  { %2989 = vmatpush1.bf16.msra.mxu0 %v14058_v54  ;;  %3071 = vmatpush1.bf16.msra.mxu1 %v14061_v55  ;;  %v14120_v54 = vld [vmem:[#allocation13 + $0x264] ss:$16 sps:$4 sm:$0xff]   ;;  %v14123_v55 = vld [vmem:[#allocation13 + $0x26c] ss:$16 sps:$4 sm:$0xff]  }
 0x24d   :  { %2990 = vmatprep.subr.bf16.mxu0 %v14066_v56  ;;  %3072 = vmatprep.subr.bf16.mxu1 %v14069_v57  ;;  %v14118_v56 = vld [vmem:[#allocation13 + $0x260] ss:$16 sps:$4 sm:$0xff]   ;;  %v14121_v57 = vld [vmem:[#allocation13 + $0x268] ss:$16 sps:$4 sm:$0xff]  }
 0x250   :  { %2991 = vmatpush1.bf16.msra.mxu0 %v14064_v58  ;;  %3073 = vmatpush1.bf16.msra.mxu1 %v14067_v59  ;;  %v14126_v58 = vld [vmem:[#allocation13 + $0x284] ss:$16 sps:$4 sm:$0xff]   ;;  %v14129_v59 = vld [vmem:[#allocation13 + $0x28c] ss:$16 sps:$4 sm:$0xff]  }
 0x251   :  { %2992 = vmatprep.subr.bf16.mxu0 %v14072_v60  ;;  %3074 = vmatprep.subr.bf16.mxu1 %v14075_v61  ;;  %v14124_v60 = vld [vmem:[#allocation13 + $0x280] ss:$16 sps:$4 sm:$0xff]   ;;  %v14127_v61 = vld [vmem:[#allocation13 + $0x288] ss:$16 sps:$4 sm:$0xff]  }
 0x254   :  { %2993 = vmatpush1.bf16.msra.mxu0 %v14070_v62  ;;  %3075 = vmatpush1.bf16.msra.mxu1 %v14073_v63  ;;  %v14132_v62 = vld [vmem:[#allocation13 + $0x2a4] ss:$16 sps:$4 sm:$0xff]   ;;  %v14135_v63 = vld [vmem:[#allocation13 + $0x2ac] ss:$16 sps:$4 sm:$0xff]  }
 0x255   :  { %2994 = vmatprep.subr.bf16.mxu0 %v14078_v0  ;;  %3076 = vmatprep.subr.bf16.mxu1 %v14081_v1  ;;  %v14130_v0 = vld [vmem:[#allocation13 + $0x2a0] ss:$16 sps:$4 sm:$0xff]   ;;  %v14133_v1 = vld [vmem:[#allocation13 + $0x2a8] ss:$16 sps:$4 sm:$0xff]  }
 0x258   :  { %2995 = vmatpush1.bf16.msra.mxu0 %v14076_v2  ;;  %3077 = vmatpush1.bf16.msra.mxu1 %v14079_v3  ;;  %v14138_v2 = vld [vmem:[#allocation13 + $0x2c4] ss:$16 sps:$4 sm:$0xff]   ;;  %v14141_v3 = vld [vmem:[#allocation13 + $0x2cc] ss:$16 sps:$4 sm:$0xff]  }
 0x259   :  { %2996 = vmatprep.subr.bf16.mxu0 %v14084_v4  ;;  %3078 = vmatprep.subr.bf16.mxu1 %v14087_v5  ;;  %v14136_v4 = vld [vmem:[#allocation13 + $0x2c0] ss:$16 sps:$4 sm:$0xff]   ;;  %v14139_v5 = vld [vmem:[#allocation13 + $0x2c8] ss:$16 sps:$4 sm:$0xff]  }
 0x25c   :  { %2997 = vmatpush1.bf16.msra.mxu0 %v14082_v6  ;;  %3079 = vmatpush1.bf16.msra.mxu1 %v14085_v7  ;;  %v14144_v6 = vld [vmem:[#allocation13 + $0x2e4] ss:$16 sps:$4 sm:$0xff]   ;;  %v14147_v7 = vld [vmem:[#allocation13 + $0x2ec] ss:$16 sps:$4 sm:$0xff]  }
 0x25d   :  { %2998 = vmatprep.subr.bf16.mxu0 %v14090_v8  ;;  %3080 = vmatprep.subr.bf16.mxu1 %v14093_v9  ;;  %v14142_v8 = vld [vmem:[#allocation13 + $0x2e0] ss:$16 sps:$4 sm:$0xff]   ;;  %v14145_v9 = vld [vmem:[#allocation13 + $0x2e8] ss:$16 sps:$4 sm:$0xff]  }
 0x260   :  { %2999 = vmatpush1.bf16.msra.mxu0 %v14088_v10  ;;  %3081 = vmatpush1.bf16.msra.mxu1 %v14091_v11  ;;  %v14150_v10 = vld [vmem:[#allocation13 + $0x304] ss:$16 sps:$4 sm:$0xff]   ;;  %v14153_v11 = vld [vmem:[#allocation13 + $0x30c] ss:$16 sps:$4 sm:$0xff]  }
 0x261   :  { %3000 = vmatprep.subr.bf16.mxu0 %v14096_v12  ;;  %3082 = vmatprep.subr.bf16.mxu1 %v14099_v13  ;;  %v14148_v12 = vld [vmem:[#allocation13 + $0x300] ss:$16 sps:$4 sm:$0xff]   ;;  %v14151_v13 = vld [vmem:[#allocation13 + $0x308] ss:$16 sps:$4 sm:$0xff]  }
 0x264   :  { %3001 = vmatpush1.bf16.msra.mxu0 %v14094_v14  ;;  %3083 = vmatpush1.bf16.msra.mxu1 %v14097_v15  ;;  %v14156_v14 = vld [vmem:[#allocation13 + $0x324] ss:$16 sps:$4 sm:$0xff]   ;;  %v14159_v15 = vld [vmem:[#allocation13 + $0x32c] ss:$16 sps:$4 sm:$0xff]  }
 0x265   :  { %3011 = vmatprep.subr.bf16.mxu0 %v14102_v16  ;;  %3093 = vmatprep.subr.bf16.mxu1 %v14105_v17  ;;  %v14154_v16 = vld [vmem:[#allocation13 + $0x320] ss:$16 sps:$4 sm:$0xff]   ;;  %v14157_v17 = vld [vmem:[#allocation13 + $0x328] ss:$16 sps:$4 sm:$0xff]  }
 0x2ba   :  { %v1554_v29 = vpop.f32.mrb[0].mxu0  ;;  %v1677_v30 = vpop.f32.mrb[0].mxu1 }
 0x2bb   :  { %v13504_v31 = vadd.f32 %v1554_v29, %v461_v25  ;;  %v15723_v32 = vadd.f32 %v1677_v30, %v469_v26  ;;  %v1556_v33 = vpop.f32.mrb[1].mxu0  ;;  %v1679_v34 = vpop.f32.mrb[1].mxu1  ;;  %v14160_v25 = vld [vmem:[#allocation13 + $0x340] ss:$16 sps:$4 sm:$0xff]   ;;  %v14163_v26 = vld [vmem:[#allocation13 + $0x348] ss:$16 sps:$4 sm:$0xff]  }
 0x2bc   :  { %v13505_v35 = vadd.f32 %v1556_v33, %v465_v27  ;;  %v1558_v36 = vpop.f32.mrb[2].mxu0  ;;  %v1681_v37 = vpop.f32.mrb[2].mxu1  ;;  %v13507_v38 = vadd.f32 %v1679_v34, %v473_v28  ;;  %v14168_v27 = vld [vmem:[#allocation13 + $0x364] ss:$16 sps:$4 sm:$0xff]   ;;  %v14171_v28 = vld [vmem:[#allocation13 + $0x36c] ss:$16 sps:$4 sm:$0xff]  }
 0x2bd   :  { %v1559_v39 = vpop.f32.mrb[3].mxu0  ;;  %v1682_v40 = vpop.f32.mrb[3].mxu1  ;;  %v15727_v45 = vpack.c.bf16 %v13504_v31, %v13504_v31  ;;  %v14166_v29 = vld [vmem:[#allocation13 + $0x360] ss:$16 sps:$4 sm:$0xff]   ;;  %v14169_v30 = vld [vmem:[#allocation13 + $0x368] ss:$16 sps:$4 sm:$0xff]  }
 0x2be   :  { %v15725_v41 = vpack.c.bf16 %v13505_v35, %v13505_v35  ;;  %v15731_v47 = vpack.c.bf16 %v13507_v38, %v13507_v38  ;;  %v14174_v31 = vld [vmem:[#allocation13 + $0x384] ss:$16 sps:$4 sm:$0xff]   ;;  %v14177_v33 = vld [vmem:[#allocation13 + $0x38c] ss:$16 sps:$4 sm:$0xff]   ;;  %v14172_v34 = vld [vmem:[#allocation13 + $0x380] ss:$16 sps:$4 sm:$0xff]  }
 0x2bf   :  { %v14175_v35 = vld [vmem:[#allocation13 + $0x388] ss:$16 sps:$4 sm:$0xff]   ;;  %v14180_v36 = vld [vmem:[#allocation13 + $0x3a4] ss:$16 sps:$4 sm:$0xff]   ;;  %v14183_v37 = vld [vmem:[#allocation13 + $0x3ac] ss:$16 sps:$4 sm:$0xff]  }
 0x2c0   :  { %3002 = vmatprep.mubr.bf16.mxu0 %v15725_v41  ;;  %3084 = vmatprep.mubr.bf16.mxu1 %v15725_v41  ;;  %v14178_v38 = vld [vmem:[#allocation13 + $0x3a0] ss:$16 sps:$4 sm:$0xff]   ;;  %v14181_v39 = vld [vmem:[#allocation13 + $0x3a8] ss:$16 sps:$4 sm:$0xff]   ;;  %v14186_v40 = vld [vmem:[#allocation13 + $0x3c4] ss:$16 sps:$4 sm:$0xff]  }
 0x2c1   :  { %3003 = vmatmul.mubr.bf16.vlgmr.msra.gmra.mrb[8].mxu0 %v15727_v45  ;;  %3085 = vmatmul.mubr.bf16.vlgmr.msra.gmra.mrb[8].mxu1 %v15727_v45 }
 0x2c2   :  { %3012 = vmatpush1.bf16.msra.mxu0 %v14100_v42  ;;  %3094 = vmatpush1.bf16.msra.mxu1 %v14103_v43  ;;  %v14189_v42 = vld [vmem:[#allocation13 + $0x3cc] ss:$16 sps:$4 sm:$0xff]  }
 0x2c3   :  { %3043 = vmatprep.mubr.bf16.mxu0 %v15731_v47  ;;  %3125 = vmatprep.mubr.bf16.mxu1 %v15731_v47  ;;  %v15737_v43 = vld [vmem:[#allocation11] sm:$0xf] }
 0x2c4   :  { %3013 = vmatprep.subr.bf16.mxu0 %v14108_v44  ;;  %3095 = vmatprep.subr.bf16.mxu1 %v14111_v46  ;;  %v14184_v44 = vld [vmem:[#allocation13 + $0x3c0] ss:$16 sps:$4 sm:$0xff]   ;;  %v14187_v46 = vld [vmem:[#allocation13 + $0x3c8] ss:$16 sps:$4 sm:$0xff]  }
 0x2c6   :  { %3014 = vmatpush1.bf16.msra.mxu0 %v14106_v48  ;;  %3096 = vmatpush1.bf16.msra.mxu1 %v14109_v49  ;;  %v14192_v48 = vld [vmem:[#allocation13 + $0x3e4] ss:$16 sps:$4 sm:$0xff]   ;;  %v14195_v49 = vld [vmem:[#allocation13 + $0x3ec] ss:$16 sps:$4 sm:$0xff]  }
 0x2c7   :  { %3015 = vmatprep.subr.bf16.mxu0 %v14114_v50  ;;  %3097 = vmatprep.subr.bf16.mxu1 %v14117_v51  ;;  %v3138_v50 = vld [vmem:[#allocation14] sm:$0xff] }
 0x2c8   :  { %v3142_v51 = vld [vmem:[#allocation14 + $0x20] sm:$0xff] }
 0x2ca   :  { %3016 = vmatpush1.bf16.msra.mxu0 %v14112_v52  ;;  %3098 = vmatpush1.bf16.msra.mxu1 %v14115_v53  ;;  %v3139_v52 = vld [vmem:[#allocation14 + $0x8] sm:$0xff] }
 0x2cb   :  { %3017 = vmatprep.subr.bf16.mxu0 %v14120_v54  ;;  %3099 = vmatprep.subr.bf16.mxu1 %v14123_v55  ;;  %v3143_v53 = vld [vmem:[#allocation14 + $0x28] sm:$0xff]  ;;  %v1765_v54 = vrot.slane %v15737_v43, %v15711_v22  ;;  %v14190_v55 = vld [vmem:[#allocation13 + $0x3e0] ss:$16 sps:$4 sm:$0xff]  }
 0x2ce   :  { %3018 = vmatpush1.bf16.msra.mxu0 %v14118_v56  ;;  %3100 = vmatpush1.bf16.msra.mxu1 %v14121_v57  ;;  %v1761_v56 = vrot.slane %v15737_v43, %v15714_v23  ;;  %v1769_v57 = vrot.slane %v15737_v43, %v15717_v24 }
 0x2cf   :  { %3019 = vmatprep.subr.bf16.mxu0 %v14126_v58  ;;  %3101 = vmatprep.subr.bf16.mxu1 %v14129_v59  ;;  %v14193_v58 = vld [vmem:[#allocation13 + $0x3e8] ss:$16 sps:$4 sm:$0xff]   ;;  %v3146_v59 = vld [vmem:[#allocation14 + $0x40] sm:$0xff] }
 0x2d2   :  { %3020 = vmatpush1.bf16.msra.mxu0 %v14124_v60  ;;  %3102 = vmatpush1.bf16.msra.mxu1 %v14127_v61  ;;  %v3150_v60 = vld [vmem:[#allocation14 + $0x60] sm:$0xff] }
 0x2d3   :  { %3021 = vmatprep.subr.bf16.mxu0 %v14132_v62  ;;  %3103 = vmatprep.subr.bf16.mxu1 %v14135_v63  ;;  %v12345_v63 = vcombine.high %v3138_v50, %v3142_v51 }
 0x2d6   :  { %3022 = vmatpush1.bf16.msra.mxu0 %v14130_v0  ;;  %3104 = vmatpush1.bf16.msra.mxu1 %v14133_v1  ;;  %v12347_v0 = vcombine.high %v3139_v52, %v3143_v53  ;;  %v3147_v1 = vld [vmem:[#allocation14 + $0x48] sm:$0xff] }
 0x2d7   :  { %3023 = vmatprep.subr.bf16.mxu0 %v14138_v2  ;;  %3105 = vmatprep.subr.bf16.mxu1 %v14141_v3 }
 0x2da   :  { %3024 = vmatpush1.bf16.msra.mxu0 %v14136_v4  ;;  %3106 = vmatpush1.bf16.msra.mxu1 %v14139_v5  ;;  %v3151_v5 = vld [vmem:[#allocation14 + $0x68] sm:$0xff] }
 0x2db   :  { %3025 = vmatprep.subr.bf16.mxu0 %v14144_v6  ;;  %3107 = vmatprep.subr.bf16.mxu1 %v14147_v7 }
 0x2de   :  { %3026 = vmatpush1.bf16.msra.mxu0 %v14142_v8  ;;  %3108 = vmatpush1.bf16.msra.mxu1 %v14145_v9 }
 0x2df   :  { %3027 = vmatprep.subr.bf16.mxu0 %v14150_v10  ;;  %3109 = vmatprep.subr.bf16.mxu1 %v14153_v11 }
 0x2e2   :  { %3028 = vmatpush1.bf16.msra.mxu0 %v14148_v12  ;;  %3110 = vmatpush1.bf16.msra.mxu1 %v14151_v13  ;;  %v12344_v12 = vcombine.low %v3138_v50, %v3142_v51  ;;  %v12346_v13 = vcombine.low %v3139_v52, %v3143_v53  ;;  %v3178_v51 = vld [vmem:[#allocation14 + $0x140] sm:$0xff]  ;;  %v3179_v53 = vld [vmem:[#allocation14 + $0x148] sm:$0xff] }
 0x2e3   :  { %3029 = vmatprep.subr.bf16.mxu0 %v14156_v14  ;;  %3111 = vmatprep.subr.bf16.mxu1 %v14159_v15  ;;  %v15753_v14 = vpack.c.bf16 %v15723_v32, %v15723_v32  ;;  %v12353_v15 = vcombine.high %v3146_v59, %v3150_v60  ;;  %v3182_v52 = vld [vmem:[#allocation14 + $0x160] sm:$0xff] }
 0x2e6   :  { %3030 = vmatpush1.bf16.msra.mxu0 %v14154_v16  ;;  %3112 = vmatpush1.bf16.msra.mxu1 %v14157_v17  ;;  %v12355_v16 = vcombine.high %v3147_v1, %v3151_v5  ;;  %v3154_v17 = vld [vmem:[#allocation14 + $0x80] sm:$0xff] }
 0x2e7   :  { %3031 = vmatprep.subr.bf16.mxu0 %v14162_v18  ;;  %3113 = vmatprep.subr.bf16.mxu1 %v14165_v20  ;;  %v3158_v18 = vld [vmem:[#allocation14 + $0xa0] sm:$0xff]  ;;  %v3155_v20 = vld [vmem:[#allocation14 + $0x88] sm:$0xff] }
 0x2e8   :  { %v12361_v32 = vcombine.high %v3154_v17, %v3158_v18 }
 0x2ea   :  { %3032 = vmatpush1.bf16.msra.mxu0 %v14160_v25  ;;  %3114 = vmatpush1.bf16.msra.mxu1 %v14163_v26  ;;  %v3159_v25 = vld [vmem:[#allocation14 + $0xa8] sm:$0xff] }
 0x2eb   :  { %3033 = vmatprep.subr.bf16.mxu0 %v14168_v27  ;;  %3115 = vmatprep.subr.bf16.mxu1 %v14171_v28  ;;  %v12352_v27 = vcombine.low %v3146_v59, %v3150_v60  ;;  %v12354_v28 = vcombine.low %v3147_v1, %v3151_v5  ;;  %v3186_v59 = vld [vmem:[#allocation14 + $0x180] sm:$0xff] }
 0x2ec   :  { %v3190_v60 = vld [vmem:[#allocation14 + $0x1a0] sm:$0xff] }
 0x2ed   :  { %v3194_v5 = vld [vmem:[#allocation14 + $0x1c0] sm:$0xff] }
 0x2ee   :  { %3034 = vmatpush1.bf16.msra.mxu0 %v14166_v29  ;;  %3116 = vmatpush1.bf16.msra.mxu1 %v14169_v30  ;;  %v12363_v29 = vcombine.high %v3155_v20, %v3159_v25  ;;  %v3162_v30 = vld [vmem:[#allocation14 + $0xc0] sm:$0xff] }
 0x2ef   :  { %3035 = vmatprep.subr.bf16.mxu0 %v14174_v31  ;;  %3117 = vmatprep.subr.bf16.mxu1 %v14177_v33  ;;  %v3166_v31 = vld [vmem:[#allocation14 + $0xe0] sm:$0xff]  ;;  %v3163_v33 = vld [vmem:[#allocation14 + $0xc8] sm:$0xff] }
 0x2f2   :  { %3036 = vmatpush1.bf16.msra.mxu0 %v14172_v34  ;;  %3118 = vmatpush1.bf16.msra.mxu1 %v14175_v35  ;;  %v3167_v34 = vld [vmem:[#allocation14 + $0xe8] sm:$0xff]  ;;  %v12360_v35 = vcombine.low %v3154_v17, %v3158_v18 }
 0x2f3   :  { %3037 = vmatprep.subr.bf16.mxu0 %v14180_v36  ;;  %3119 = vmatprep.subr.bf16.mxu1 %v14183_v37  ;;  %v12362_v36 = vcombine.low %v3155_v20, %v3159_v25  ;;  %v12369_v37 = vcombine.high %v3162_v30, %v3166_v31  ;;  %v3203_v17 = vld [vmem:[#allocation14 + $0x208] sm:$0xff] }
 0x2f4   :  { %v3207_v18 = vld [vmem:[#allocation14 + $0x228] sm:$0xff] }
 0x2f6   :  { %3038 = vmatpush1.bf16.msra.mxu0 %v14178_v38  ;;  %3120 = vmatpush1.bf16.msra.mxu1 %v14181_v39  ;;  %v12371_v38 = vcombine.high %v3163_v33, %v3167_v34  ;;  %v3170_v39 = vld [vmem:[#allocation14 + $0x100] sm:$0xff] }
 0x2f7   :  { %3039 = vmatprep.subr.bf16.mxu0 %v14186_v40  ;;  %3121 = vmatprep.subr.bf16.mxu1 %v14189_v42  ;;  %v3174_v40 = vld [vmem:[#allocation14 + $0x120] sm:$0xff]  ;;  %v3171_v42 = vld [vmem:[#allocation14 + $0x108] sm:$0xff] }
 0x2fa   :  { %3040 = vmatpush1.bf16.msra.mxu0 %v14184_v44  ;;  %3122 = vmatpush1.bf16.msra.mxu1 %v14187_v46  ;;  %v15745_v61 = vpop.f32.mrb[4].mxu0  ;;  %v2169_v62 = vpop.f32.mrb[4].mxu1  ;;  %v3175_v44 = vld [vmem:[#allocation14 + $0x128] sm:$0xff]  ;;  %v12368_v46 = vcombine.low %v3162_v30, %v3166_v31 }
 0x2fb   :  { %3041 = vmatprep.subr.bf16.mxu0 %v14192_v48  ;;  %3123 = vmatprep.subr.bf16.mxu1 %v14195_v49  ;;  %v2130_v2 = vpop.f32.mrb[5].mxu0  ;;  %v15747_v3 = vadd.f32 %v2169_v62, %v1765_v54  ;;  %v2171_v4 = vpop.f32.mrb[5].mxu1  ;;  %v12370_v48 = vcombine.low %v3163_v33, %v3167_v34  ;;  %v12377_v49 = vcombine.high %v3170_v39, %v3174_v40  ;;  %v3183_v54 = vld [vmem:[#allocation14 + $0x168] sm:$0xff] }
 0x2fc   :  { %v2131_v6 = vadd.f32 %v2130_v2, %v1761_v56  ;;  %v2132_v7 = vpop.f32.mrb[6].mxu0  ;;  %v15749_v8 = vadd.f32 %v2171_v4, %v1769_v57  ;;  %v2173_v9 = vpop.f32.mrb[6].mxu1  ;;  %v12379_v50 = vcombine.high %v3171_v42, %v3175_v44  ;;  %v12378_v56 = vcombine.low %v3171_v42, %v3175_v44  ;;  %v3187_v62 = vld [vmem:[#allocation14 + $0x188] sm:$0xff] }
 0x2fd   :  { %v2133_v10 = vpop.f32.mrb[7].mxu0  ;;  %v2174_v11 = vpop.f32.mrb[7].mxu1  ;;  %v12385_v57 = vcombine.high %v3178_v51, %v3182_v52  ;;  %v12386_v1 = vcombine.low %v3179_v53, %v3183_v54  ;;  %v12393_v2 = vcombine.high %v3186_v59, %v3190_v60  ;;  %v3195_v7 = vld [vmem:[#allocation14 + $0x1c8] sm:$0xff]  ;;  %v12410_v34 = vcombine.low %v3203_v17, %v3207_v18 }
 0x2fe   :  { %3042 = vmatpush1.bf16.msra.mxu0 %v14190_v55  ;;  %3124 = vmatpush1.bf16.msra.mxu1 %v14193_v58  ;;  %v15755_v26 = vpack.c.bf16 %v2131_v6, %v2131_v6  ;;  %v12376_v55 = vcombine.low %v3170_v39, %v3174_v40  ;;  %v12387_v58 = vcombine.high %v3179_v53, %v3183_v54  ;;  %v3198_v6 = vld [vmem:[#allocation14 + $0x1e0] sm:$0xff]  ;;  %v3199_v9 = vld [vmem:[#allocation14 + $0x1e8] sm:$0xff] }
 0x2ff   :  { %4716 = vmatprep.subr.bf16.mxu0 %v12345_v63  ;;  %4798 = vmatprep.subr.bf16.mxu1 %v12347_v0  ;;  %v3191_v63 = vld [vmem:[#allocation14 + $0x1a8] sm:$0xff]  ;;  %v12384_v0 = vcombine.low %v3178_v51, %v3182_v52  ;;  %v12392_v10 = vcombine.low %v3186_v59, %v3190_v60  ;;  %v12400_v20 = vcombine.low %v3194_v5, %v3198_v6 }
 0x300   :  { %v12395_v4 = vcombine.high %v3187_v62, %v3191_v63  ;;  %v12394_v11 = vcombine.low %v3187_v62, %v3191_v63  ;;  %v12402_v25 = vcombine.low %v3195_v7, %v3199_v9  ;;  %v3211_v30 = vld [vmem:[#allocation14 + $0x248] sm:$0xff] }
 0x301   :  { %3044 = vmatmul.mubr.bf16.vlgmr.msra.gmra.mrb[8].mxu0 %v15753_v14  ;;  %3126 = vmatmul.mubr.bf16.vlgmr.msra.gmra.mrb[8].mxu1 %v15753_v14  ;;  %v3215_v31 = vld [vmem:[#allocation14 + $0x268] sm:$0xff] }
 0x302   :  { %4717 = vmatpush1.bf16.msra.mxu0 %v12344_v12  ;;  %4799 = vmatpush1.bf16.msra.mxu1 %v12346_v13  ;;  %v12401_v12 = vcombine.high %v3194_v5, %v3198_v6  ;;  %v12403_v13 = vcombine.high %v3195_v7, %v3199_v9  ;;  %v3219_v39 = vld [vmem:[#allocation14 + $0x288] sm:$0xff]  ;;  %v12418_v44 = vcombine.low %v3211_v30, %v3215_v31 }
 0x303   :  { %4718 = vmatprep.subr.bf16.mxu0 %v12353_v15  ;;  %4800 = vmatprep.subr.bf16.mxu1 %v12355_v16  ;;  %v3202_v15 = vld [vmem:[#allocation14 + $0x200] sm:$0xff]  ;;  %v3223_v40 = vld [vmem:[#allocation14 + $0x2a8] sm:$0xff] }
 0x304   :  { %4748 = vmatprep.mubr.bf16.mxu0 %v15755_v26  ;;  %4830 = vmatprep.mubr.bf16.mxu1 %v15755_v26  ;;  %v3206_v16 = vld [vmem:[#allocation14 + $0x220] sm:$0xff]  ;;  %v3227_v51 = vld [vmem:[#allocation14 + $0x2c8] sm:$0xff]  ;;  %v12426_v54 = vcombine.low %v3219_v39, %v3223_v40 }
 0x305   :  { %v12408_v33 = vcombine.low %v3202_v15, %v3206_v16  ;;  %v3231_v52 = vld [vmem:[#allocation14 + $0x2e8] sm:$0xff] }
 0x306   :  { %4719 = vmatpush1.bf16.msra.mxu0 %v12352_v27  ;;  %4801 = vmatpush1.bf16.msra.mxu1 %v12354_v28  ;;  %v12409_v27 = vcombine.high %v3202_v15, %v3206_v16  ;;  %v12411_v28 = vcombine.high %v3203_v17, %v3207_v18  ;;  %v3235_v59 = vld [vmem:[#allocation14 + $0x308] sm:$0xff]  ;;  %v12434_v63 = vcombine.low %v3227_v51, %v3231_v52 }
 0x307   :  { %4720 = vmatprep.subr.bf16.mxu0 %v12361_v32  ;;  %4802 = vmatprep.subr.bf16.mxu1 %v12363_v29  ;;  %v3210_v32 = vld [vmem:[#allocation14 + $0x240] sm:$0xff]  ;;  %v3239_v60 = vld [vmem:[#allocation14 + $0x328] sm:$0xff] }
 0x308   :  { %v3214_v29 = vld [vmem:[#allocation14 + $0x260] sm:$0xff]  ;;  %v3243_v5 = vld [vmem:[#allocation14 + $0x348] sm:$0xff]  ;;  %v12442_v9 = vcombine.low %v3235_v59, %v3239_v60 }
 0x309   :  { %v12416_v42 = vcombine.low %v3210_v32, %v3214_v29  ;;  %v3247_v6 = vld [vmem:[#allocation14 + $0x368] sm:$0xff] }
 0x30a   :  { %4721 = vmatpush1.bf16.msra.mxu0 %v12360_v35  ;;  %4803 = vmatpush1.bf16.msra.mxu1 %v12362_v36  ;;  %v12417_v35 = vcombine.high %v3210_v32, %v3214_v29  ;;  %v12419_v36 = vcombine.high %v3211_v30, %v3215_v31  ;;  %v3251_v15 = vld [vmem:[#allocation14 + $0x388] sm:$0xff]  ;;  %v12450_v18 = vcombine.low %v3243_v5, %v3247_v6 }
 0x30b   :  { %4722 = vmatprep.subr.bf16.mxu0 %v12369_v37  ;;  %4804 = vmatprep.subr.bf16.mxu1 %v12371_v38  ;;  %v3218_v37 = vld [vmem:[#allocation14 + $0x280] sm:$0xff]  ;;  %v3255_v16 = vld [vmem:[#allocation14 + $0x3a8] sm:$0xff]  ;;  %v1757_v30 = vrot.slane %v15737_v43, %v15708_v21 }
 0x30c   :  { %v3222_v38 = vld [vmem:[#allocation14 + $0x2a0] sm:$0xff]  ;;  %v3259_v32 = vld [vmem:[#allocation14 + $0x3c8] sm:$0xff] }
 0x30d   :  { %v12424_v53 = vcombine.low %v3218_v37, %v3222_v38  ;;  %v3263_v29 = vld [vmem:[#allocation14 + $0x3e8] sm:$0xff] }
 0x30e   :  { %4723 = vmatpush1.bf16.msra.mxu0 %v12368_v46  ;;  %4805 = vmatpush1.bf16.msra.mxu1 %v12370_v48  ;;  %v12425_v46 = vcombine.high %v3218_v37, %v3222_v38  ;;  %v12427_v48 = vcombine.high %v3219_v39, %v3223_v40  ;;  %v3270_v37 = vld [vmem:[#allocation14 + $0x420] sm:$0xff]  ;;  %v3267_v38 = vld [vmem:[#allocation14 + $0x408] sm:$0xff]  ;;  %v2129_v40 = vadd.f32 %v15745_v61, %v1757_v30 }
 0x30f   :  { %4724 = vmatprep.subr.bf16.mxu0 %v12377_v49  ;;  %4806 = vmatprep.subr.bf16.mxu1 %v12379_v50  ;;  %v3226_v49 = vld [vmem:[#allocation14 + $0x2c0] sm:$0xff]  ;;  %v3271_v39 = vld [vmem:[#allocation14 + $0x428] sm:$0xff] }
 0x310   :  { %v3230_v50 = vld [vmem:[#allocation14 + $0x2e0] sm:$0xff] }
 0x311   :  { %v12432_v62 = vcombine.low %v3226_v49, %v3230_v50 }
 0x312   :  { %4725 = vmatpush1.bf16.msra.mxu0 %v12376_v55  ;;  %4807 = vmatpush1.bf16.msra.mxu1 %v12378_v56  ;;  %v12433_v55 = vcombine.high %v3226_v49, %v3230_v50  ;;  %v12435_v56 = vcombine.high %v3227_v51, %v3231_v52  ;;  %v3278_v49 = vld [vmem:[#allocation14 + $0x460] sm:$0xff]  ;;  %v3275_v50 = vld [vmem:[#allocation14 + $0x448] sm:$0xff]  ;;  %v15764_v52 = vpack.c.bf16 %v2129_v40, %v2129_v40 }
 0x313   :  { %4726 = vmatprep.subr.bf16.mxu0 %v12385_v57  ;;  %4808 = vmatprep.subr.bf16.mxu1 %v12387_v58  ;;  %v3234_v57 = vld [vmem:[#allocation14 + $0x300] sm:$0xff]  ;;  %v3279_v51 = vld [vmem:[#allocation14 + $0x468] sm:$0xff] }
 0x314   :  { %v3238_v58 = vld [vmem:[#allocation14 + $0x320] sm:$0xff] }
 0x315   :  { %v12440_v7 = vcombine.low %v3234_v57, %v3238_v58 }
 0x316   :  { %4727 = vmatpush1.bf16.msra.mxu0 %v12384_v0  ;;  %4809 = vmatpush1.bf16.msra.mxu1 %v12386_v1  ;;  %v12441_v0 = vcombine.high %v3234_v57, %v3238_v58  ;;  %v12443_v1 = vcombine.high %v3235_v59, %v3239_v60  ;;  %v3286_v57 = vld [vmem:[#allocation14 + $0x4a0] sm:$0xff]  ;;  %v3283_v58 = vld [vmem:[#allocation14 + $0x488] sm:$0xff]  ;;  %v15768_v60 = vpack.c.bf16 %v15749_v8, %v15749_v8 }
 0x317   :  { %4728 = vmatprep.subr.bf16.mxu0 %v12393_v2  ;;  %4810 = vmatprep.subr.bf16.mxu1 %v12395_v4  ;;  %v3242_v2 = vld [vmem:[#allocation14 + $0x340] sm:$0xff]  ;;  %v3287_v59 = vld [vmem:[#allocation14 + $0x4a8] sm:$0xff] }
 0x318   :  { %v3246_v4 = vld [vmem:[#allocation14 + $0x360] sm:$0xff] }
 0x319   :  { %v12448_v17 = vcombine.low %v3242_v2, %v3246_v4 }
 0x31a   :  { %4729 = vmatpush1.bf16.msra.mxu0 %v12392_v10  ;;  %4811 = vmatpush1.bf16.msra.mxu1 %v12394_v11  ;;  %v12449_v10 = vcombine.high %v3242_v2, %v3246_v4  ;;  %v12451_v11 = vcombine.high %v3243_v5, %v3247_v6  ;;  %v3290_v2 = vld [vmem:[#allocation14 + $0x4c0] sm:$0xff]  ;;  %v3291_v5 = vld [vmem:[#allocation14 + $0x4c8] sm:$0xff] }
 0x31b   :  { %4730 = vmatprep.subr.bf16.mxu0 %v12401_v12  ;;  %4812 = vmatprep.subr.bf16.mxu1 %v12403_v13  ;;  %v3250_v12 = vld [vmem:[#allocation14 + $0x380] sm:$0xff]  ;;  %v3295_v6 = vld [vmem:[#allocation14 + $0x4e8] sm:$0xff] }
 0x31c   :  { %v3254_v13 = vld [vmem:[#allocation14 + $0x3a0] sm:$0xff] }
 0x31d   :  { %v12456_v31 = vcombine.low %v3250_v12, %v3254_v13  ;;  %v3294_v4 = vld [vmem:[#allocation14 + $0x4e0] sm:$0xff] }
 0x31e   :  { %4731 = vmatpush1.bf16.msra.mxu0 %v12400_v20  ;;  %4813 = vmatpush1.bf16.msra.mxu1 %v12402_v25  ;;  %v12457_v20 = vcombine.high %v3250_v12, %v3254_v13  ;;  %v12459_v25 = vcombine.high %v3251_v15, %v3255_v16  ;;  %v3302_v12 = vld [vmem:[#allocation14 + $0x520] sm:$0xff]  ;;  %v3299_v13 = vld [vmem:[#allocation14 + $0x508] sm:$0xff] }
 0x31f   :  { %4732 = vmatprep.subr.bf16.mxu0 %v12409_v27  ;;  %4814 = vmatprep.subr.bf16.mxu1 %v12411_v28  ;;  %v3258_v27 = vld [vmem:[#allocation14 + $0x3c0] sm:$0xff] }
 0x320   :  { %v3262_v28 = vld [vmem:[#allocation14 + $0x3e0] sm:$0xff] }
 0x322   :  { %4733 = vmatpush1.bf16.msra.mxu0 %v12408_v33  ;;  %4815 = vmatpush1.bf16.msra.mxu1 %v12410_v34  ;;  %v12458_v33 = vcombine.low %v3251_v15, %v3255_v16  ;;  %v12465_v34 = vcombine.high %v3258_v27, %v3262_v28  ;;  %v3303_v15 = vld [vmem:[#allocation14 + $0x528] sm:$0xff]  ;;  %v12496_v16 = vcombine.low %v3290_v2, %v3294_v4 }
 0x323   :  { %4734 = vmatprep.subr.bf16.mxu0 %v12417_v35  ;;  %4816 = vmatprep.subr.bf16.mxu1 %v12419_v36  ;;  %v12467_v35 = vcombine.high %v3259_v32, %v3263_v29  ;;  %v3266_v36 = vld [vmem:[#allocation14 + $0x400] sm:$0xff]  ;;  %v12506_v30 = vcombine.low %v3299_v13, %v3303_v15 }
 0x324   :  { %v12473_v43 = vcombine.high %v3266_v36, %v3270_v37 }
 0x326   :  { %4735 = vmatpush1.bf16.msra.mxu0 %v12416_v42  ;;  %4817 = vmatpush1.bf16.msra.mxu1 %v12418_v44  ;;  %v12464_v42 = vcombine.low %v3258_v27, %v3262_v28  ;;  %v12466_v44 = vcombine.low %v3259_v32, %v3263_v29  ;;  %v3310_v27 = vld [vmem:[#allocation14 + $0x560] sm:$0xff]  ;;  %v3307_v28 = vld [vmem:[#allocation14 + $0x548] sm:$0xff] }
 0x327   :  { %4736 = vmatprep.subr.bf16.mxu0 %v12425_v46  ;;  %4818 = vmatprep.subr.bf16.mxu1 %v12427_v48  ;;  %v12475_v46 = vcombine.high %v3267_v38, %v3271_v39  ;;  %v3274_v48 = vld [vmem:[#allocation14 + $0x440] sm:$0xff]  ;;  %v3311_v32 = vld [vmem:[#allocation14 + $0x568] sm:$0xff] }
 0x328   :  { %v12481_v61 = vcombine.high %v3274_v48, %v3278_v49 }
 0x32a   :  { %4737 = vmatpush1.bf16.msra.mxu0 %v12424_v53  ;;  %4819 = vmatpush1.bf16.msra.mxu1 %v12426_v54  ;;  %v12472_v53 = vcombine.low %v3266_v36, %v3270_v37  ;;  %v12474_v54 = vcombine.low %v3267_v38, %v3271_v39  ;;  %v3315_v36 = vld [vmem:[#allocation14 + $0x588] sm:$0xff]  ;;  %v12514_v39 = vcombine.low %v3307_v28, %v3311_v32 }
 0x32b   :  { %4738 = vmatprep.subr.bf16.mxu0 %v12433_v55  ;;  %4820 = vmatprep.subr.bf16.mxu1 %v12435_v56  ;;  %v12483_v55 = vcombine.high %v3275_v50, %v3279_v51  ;;  %v3282_v56 = vld [vmem:[#allocation14 + $0x480] sm:$0xff]  ;;  %v3319_v37 = vld [vmem:[#allocation14 + $0x5a8] sm:$0xff] }
 0x32c   :  { %v12488_v8 = vcombine.low %v3282_v56, %v3286_v57 }
 0x32e   :  { %4739 = vmatpush1.bf16.msra.mxu0 %v12432_v62  ;;  %4821 = vmatpush1.bf16.msra.mxu1 %v12434_v63  ;;  %v12480_v62 = vcombine.low %v3274_v48, %v3278_v49  ;;  %v12482_v63 = vcombine.low %v3275_v50, %v3279_v51  ;;  %v3327_v48 = vld [vmem:[#allocation14 + $0x5e8] sm:$0xff]  ;;  %v12522_v50 = vcombine.low %v3315_v36, %v3319_v37 }
 0x32f   :  { %4740 = vmatprep.subr.bf16.mxu0 %v12441_v0  ;;  %4822 = vmatprep.subr.bf16.mxu1 %v12443_v1  ;;  %v12489_v0 = vcombine.high %v3282_v56, %v3286_v57  ;;  %v12491_v1 = vcombine.high %v3283_v58, %v3287_v59  ;;  %v3335_v56 = vld [vmem:[#allocation14 + $0x628] sm:$0xff] }
 0x332   :  { %4741 = vmatpush1.bf16.msra.mxu0 %v12440_v7  ;;  %4823 = vmatpush1.bf16.msra.mxu1 %v12442_v9  ;;  %v12490_v7 = vcombine.low %v3283_v58, %v3287_v59  ;;  %v12497_v9 = vcombine.high %v3290_v2, %v3294_v4  ;;  %v3343_v2 = vld [vmem:[#allocation14 + $0x668] sm:$0xff] }
 0x333   :  { %4742 = vmatprep.subr.bf16.mxu0 %v12449_v10  ;;  %4824 = vmatprep.subr.bf16.mxu1 %v12451_v11  ;;  %v12499_v10 = vcombine.high %v3291_v5, %v3295_v6  ;;  %v3298_v11 = vld [vmem:[#allocation14 + $0x500] sm:$0xff] }
 0x334   :  { %v12504_v29 = vcombine.low %v3298_v11, %v3302_v12 }
 0x336   :  { %4743 = vmatpush1.bf16.msra.mxu0 %v12448_v17  ;;  %4825 = vmatpush1.bf16.msra.mxu1 %v12450_v18  ;;  %v12498_v17 = vcombine.low %v3291_v5, %v3295_v6  ;;  %v12505_v18 = vcombine.high %v3298_v11, %v3302_v12  ;;  %v3351_v11 = vld [vmem:[#allocation14 + $0x6a8] sm:$0xff] }
 0x337   :  { %4744 = vmatprep.subr.bf16.mxu0 %v12457_v20  ;;  %4826 = vmatprep.subr.bf16.mxu1 %v12459_v25  ;;  %v12507_v20 = vcombine.high %v3299_v13, %v3303_v15  ;;  %v3306_v25 = vld [vmem:[#allocation14 + $0x540] sm:$0xff] }
 0x338   :  { %v12512_v38 = vcombine.low %v3306_v25, %v3310_v27 }
 0x33a   :  { %4745 = vmatpush1.bf16.msra.mxu0 %v12456_v31  ;;  %4827 = vmatpush1.bf16.msra.mxu1 %v12458_v33  ;;  %v12513_v31 = vcombine.high %v3306_v25, %v3310_v27  ;;  %v12515_v33 = vcombine.high %v3307_v28, %v3311_v32  ;;  %v3359_v25 = vld [vmem:[#allocation14 + $0x6e8] sm:$0xff] }
 0x33b   :  { %4746 = vmatprep.subr.bf16.mxu0 %v12465_v34  ;;  %4828 = vmatprep.subr.bf16.mxu1 %v12467_v35  ;;  %v3314_v34 = vld [vmem:[#allocation14 + $0x580] sm:$0xff] }
 0x33c   :  { %v3318_v35 = vld [vmem:[#allocation14 + $0x5a0] sm:$0xff] }
 0x33d   :  { %v12521_v40 = vcombine.high %v3314_v34, %v3318_v35  ;;  %v12520_v49 = vcombine.low %v3314_v34, %v3318_v35  ;;  %v3367_v34 = vld [vmem:[#allocation14 + $0x728] sm:$0xff] }
 0x33e   :  { %4747 = vmatpush1.bf16.msra.mxu0 %v12464_v42  ;;  %4829 = vmatpush1.bf16.msra.mxu1 %v12466_v44  ;;  %v12523_v42 = vcombine.high %v3315_v36, %v3319_v37  ;;  %v3322_v44 = vld [vmem:[#allocation14 + $0x5c0] sm:$0xff] }
 0x33f   :  { %4757 = vmatprep.subr.bf16.mxu0 %v12473_v43  ;;  %4839 = vmatprep.subr.bf16.mxu1 %v12475_v46  ;;  %v3326_v43 = vld [vmem:[#allocation14 + $0x5e0] sm:$0xff]  ;;  %v3323_v46 = vld [vmem:[#allocation14 + $0x5c8] sm:$0xff] }
 0x340   :  { %v12529_v51 = vcombine.high %v3322_v44, %v3326_v43  ;;  %v12528_v57 = vcombine.low %v3322_v44, %v3326_v43  ;;  %v12530_v58 = vcombine.low %v3323_v46, %v3327_v48  ;;  %v3375_v44 = vld [vmem:[#allocation14 + $0x768] sm:$0xff] }
 0x341   :  { %4749 = vmatmul.mubr.bf16.vlgmr.msra.gmra.mrb[12].mxu0 %v15764_v52  ;;  %4831 = vmatmul.mubr.bf16.vlgmr.msra.gmra.mrb[12].mxu1 %v15764_v52 }
 0x342   :  { %4758 = vmatpush1.bf16.msra.mxu0 %v12472_v53  ;;  %4840 = vmatpush1.bf16.msra.mxu1 %v12474_v54  ;;  %v12531_v53 = vcombine.high %v3323_v46, %v3327_v48  ;;  %v3330_v54 = vld [vmem:[#allocation14 + $0x600] sm:$0xff] }
 0x343   :  { %4759 = vmatprep.subr.bf16.mxu0 %v12481_v61  ;;  %4841 = vmatprep.subr.bf16.mxu1 %v12483_v55  ;;  %v3334_v61 = vld [vmem:[#allocation14 + $0x620] sm:$0xff]  ;;  %v3331_v55 = vld [vmem:[#allocation14 + $0x608] sm:$0xff] }
 0x344   :  { %4789 = vmatprep.mubr.bf16.mxu0 %v15768_v60  ;;  %4871 = vmatprep.mubr.bf16.mxu1 %v15768_v60  ;;  %v12537_v59 = vcombine.high %v3330_v54, %v3334_v61  ;;  %v12536_v4 = vcombine.low %v3330_v54, %v3334_v61  ;;  %v12538_v5 = vcombine.low %v3331_v55, %v3335_v56  ;;  %v3383_v54 = vld [vmem:[#allocation14 + $0x7a8] sm:$0xff] }
 0x346   :  { %4760 = vmatpush1.bf16.msra.mxu0 %v12480_v62  ;;  %4842 = vmatpush1.bf16.msra.mxu1 %v12482_v63  ;;  %v12539_v62 = vcombine.high %v3331_v55, %v3335_v56  ;;  %v3338_v63 = vld [vmem:[#allocation14 + $0x640] sm:$0xff] }
 0x347   :  { %4761 = vmatprep.subr.bf16.mxu0 %v12489_v0  ;;  %4843 = vmatprep.subr.bf16.mxu1 %v12491_v1  ;;  %v3342_v0 = vld [vmem:[#allocation14 + $0x660] sm:$0xff]  ;;  %v3339_v1 = vld [vmem:[#allocation14 + $0x648] sm:$0xff] }
 0x348   :  { %v12545_v6 = vcombine.high %v3338_v63, %v3342_v0  ;;  %v12544_v12 = vcombine.low %v3338_v63, %v3342_v0  ;;  %v12546_v13 = vcombine.low %v3339_v1, %v3343_v2  ;;  %v3391_v63 = vld [vmem:[#allocation14 + $0x7e8] sm:$0xff] }
 0x34a   :  { %4762 = vmatpush1.bf16.msra.mxu0 %v12488_v8  ;;  %4844 = vmatpush1.bf16.msra.mxu1 %v12490_v7  ;;  %v12547_v8 = vcombine.high %v3339_v1, %v3343_v2  ;;  %v3346_v7 = vld [vmem:[#allocation14 + $0x680] sm:$0xff] }
 0x34b   :  { %4763 = vmatprep.subr.bf16.mxu0 %v12497_v9  ;;  %4845 = vmatprep.subr.bf16.mxu1 %v12499_v10  ;;  %v3350_v9 = vld [vmem:[#allocation14 + $0x6a0] sm:$0xff]  ;;  %v3347_v10 = vld [vmem:[#allocation14 + $0x688] sm:$0xff] }
 0x34c   :  { %v12553_v15 = vcombine.high %v3346_v7, %v3350_v9  ;;  %v12552_v27 = vcombine.low %v3346_v7, %v3350_v9  ;;  %v12554_v28 = vcombine.low %v3347_v10, %v3351_v11  ;;  %v3145_v7 = vld [vmem:[#allocation14 + $0x38] sm:$0xff] }
 0x34e   :  { %4764 = vmatpush1.bf16.msra.mxu0 %v12496_v16  ;;  %4846 = vmatpush1.bf16.msra.mxu1 %v12498_v17  ;;  %v12555_v16 = vcombine.high %v3347_v10, %v3351_v11  ;;  %v3354_v17 = vld [vmem:[#allocation14 + $0x6c0] sm:$0xff] }
 0x34f   :  { %4765 = vmatprep.subr.bf16.mxu0 %v12505_v18  ;;  %4847 = vmatprep.subr.bf16.mxu1 %v12507_v20  ;;  %v3358_v18 = vld [vmem:[#allocation14 + $0x6e0] sm:$0xff]  ;;  %v3355_v20 = vld [vmem:[#allocation14 + $0x6c8] sm:$0xff] }
 0x350   :  { %v12561_v32 = vcombine.high %v3354_v17, %v3358_v18  ;;  %v12560_v35 = vcombine.low %v3354_v17, %v3358_v18  ;;  %v12562_v36 = vcombine.low %v3355_v20, %v3359_v25  ;;  %v3153_v17 = vld [vmem:[#allocation14 + $0x78] sm:$0xff] }
 0x352   :  { %4766 = vmatpush1.bf16.msra.mxu0 %v12504_v29  ;;  %4848 = vmatpush1.bf16.msra.mxu1 %v12506_v30  ;;  %v12563_v29 = vcombine.high %v3355_v20, %v3359_v25  ;;  %v3362_v30 = vld [vmem:[#allocation14 + $0x700] sm:$0xff]  ;;  %v15776_v20 = vpack.c.bf16 %v15747_v3, %v15747_v3 }
 0x353   :  { %4767 = vmatprep.subr.bf16.mxu0 %v12513_v31  ;;  %4849 = vmatprep.subr.bf16.mxu1 %v12515_v33  ;;  %v3366_v31 = vld [vmem:[#allocation14 + $0x720] sm:$0xff]  ;;  %v3363_v33 = vld [vmem:[#allocation14 + $0x708] sm:$0xff] }
 0x354   :  { %v12569_v37 = vcombine.high %v3362_v30, %v3366_v31  ;;  %v12568_v43 = vcombine.low %v3362_v30, %v3366_v31  ;;  %v12570_v46 = vcombine.low %v3363_v33, %v3367_v34  ;;  %v3157_v30 = vld [vmem:[#allocation14 + $0x98] sm:$0xff] }
 0x355   :  { %v3161_v31 = vld [vmem:[#allocation14 + $0xb8] sm:$0xff] }
 0x356   :  { %4768 = vmatpush1.bf16.msra.mxu0 %v12512_v38  ;;  %4850 = vmatpush1.bf16.msra.mxu1 %v12514_v39  ;;  %v12571_v38 = vcombine.high %v3363_v33, %v3367_v34  ;;  %v3370_v39 = vld [vmem:[#allocation14 + $0x740] sm:$0xff] }
 0x357   :  { %4769 = vmatprep.subr.bf16.mxu0 %v12521_v40  ;;  %4851 = vmatprep.subr.bf16.mxu1 %v12523_v42  ;;  %v3374_v40 = vld [vmem:[#allocation14 + $0x760] sm:$0xff]  ;;  %v3371_v42 = vld [vmem:[#allocation14 + $0x748] sm:$0xff] }
 0x358   :  { %v12577_v48 = vcombine.high %v3370_v39, %v3374_v40  ;;  %v12576_v61 = vcombine.low %v3370_v39, %v3374_v40  ;;  %v12578_v55 = vcombine.low %v3371_v42, %v3375_v44  ;;  %v3169_v39 = vld [vmem:[#allocation14 + $0xf8] sm:$0xff] }
 0x35a   :  { %4770 = vmatpush1.bf16.msra.mxu0 %v12520_v49  ;;  %4852 = vmatpush1.bf16.msra.mxu1 %v12522_v50  ;;  %v12579_v49 = vcombine.high %v3371_v42, %v3375_v44  ;;  %v3378_v50 = vld [vmem:[#allocation14 + $0x780] sm:$0xff]  ;;  %v12366_v42 = vcombine.low %v3157_v30, %v3161_v31 }
 0x35b   :  { %4771 = vmatprep.subr.bf16.mxu0 %v12529_v51  ;;  %4853 = vmatprep.subr.bf16.mxu1 %v12531_v53  ;;  %v3382_v51 = vld [vmem:[#allocation14 + $0x7a0] sm:$0xff]  ;;  %v3379_v53 = vld [vmem:[#allocation14 + $0x788] sm:$0xff] }
 0x35c   :  { %v12585_v56 = vcombine.high %v3378_v50, %v3382_v51  ;;  %v12584_v0 = vcombine.low %v3378_v50, %v3382_v51  ;;  %v12586_v1 = vcombine.low %v3379_v53, %v3383_v54  ;;  %v3177_v50 = vld [vmem:[#allocation14 + $0x138] sm:$0xff] }
 0x35e   :  { %4772 = vmatpush1.bf16.msra.mxu0 %v12528_v57  ;;  %4854 = vmatpush1.bf16.msra.mxu1 %v12530_v58  ;;  %v12587_v57 = vcombine.high %v3379_v53, %v3383_v54  ;;  %v3386_v58 = vld [vmem:[#allocation14 + $0x7c0] sm:$0xff] }
 0x35f   :  { %4773 = vmatprep.subr.bf16.mxu0 %v12537_v59  ;;  %4855 = vmatprep.subr.bf16.mxu1 %v12539_v62  ;;  %v3390_v59 = vld [vmem:[#allocation14 + $0x7e0] sm:$0xff]  ;;  %v3387_v62 = vld [vmem:[#allocation14 + $0x7c8] sm:$0xff] }
 0x360   :  { %v12593_v2 = vcombine.high %v3386_v58, %v3390_v59  ;;  %v12592_v9 = vcombine.low %v3386_v58, %v3390_v59  ;;  %v12594_v10 = vcombine.low %v3387_v62, %v3391_v63  ;;  %v3185_v58 = vld [vmem:[#allocation14 + $0x178] sm:$0xff] }
 0x362   :  { %4774 = vmatpush1.bf16.msra.mxu0 %v12536_v4  ;;  %4856 = vmatpush1.bf16.msra.mxu1 %v12538_v5  ;;  %v12595_v4 = vcombine.high %v3387_v62, %v3391_v63  ;;  %v3140_v5 = vld [vmem:[#allocation14 + $0x10] sm:$0xff] }
 0x363   :  { %4775 = vmatprep.subr.bf16.mxu0 %v12545_v6  ;;  %4857 = vmatprep.subr.bf16.mxu1 %v12547_v8  ;;  %v3144_v6 = vld [vmem:[#allocation14 + $0x30] sm:$0xff]  ;;  %v3141_v8 = vld [vmem:[#allocation14 + $0x18] sm:$0xff] }
 0x364   :  { %v12349_v11 = vcombine.high %v3140_v5, %v3144_v6  ;;  %v12348_v18 = vcombine.low %v3140_v5, %v3144_v6  ;;  %v12350_v25 = vcombine.low %v3141_v8, %v3145_v7  ;;  %v3193_v5 = vld [vmem:[#allocation14 + $0x1b8] sm:$0xff] }
 0x366   :  { %4776 = vmatpush1.bf16.msra.mxu0 %v12544_v12  ;;  %4858 = vmatpush1.bf16.msra.mxu1 %v12546_v13  ;;  %v12351_v12 = vcombine.high %v3141_v8, %v3145_v7  ;;  %v3148_v13 = vld [vmem:[#allocation14 + $0x50] sm:$0xff] }
 0x367   :  { %4777 = vmatprep.subr.bf16.mxu0 %v12553_v15  ;;  %4859 = vmatprep.subr.bf16.mxu1 %v12555_v16  ;;  %v3152_v15 = vld [vmem:[#allocation14 + $0x70] sm:$0xff]  ;;  %v3149_v16 = vld [vmem:[#allocation14 + $0x58] sm:$0xff] }
 0x368   :  { %v12356_v33 = vcombine.low %v3148_v13, %v3152_v15  ;;  %v12358_v3 = vcombine.low %v3149_v16, %v3153_v17 }
 0x36a   :  { %4778 = vmatpush1.bf16.msra.mxu0 %v12552_v27  ;;  %4860 = vmatpush1.bf16.msra.mxu1 %v12554_v28  ;;  %v12357_v27 = vcombine.high %v3148_v13, %v3152_v15  ;;  %v12359_v28 = vcombine.high %v3149_v16, %v3153_v17  ;;  %v3201_v13 = vld [vmem:[#allocation14 + $0x1f8] sm:$0xff] }
 0x36b   :  { %4779 = vmatprep.subr.bf16.mxu0 %v12561_v32  ;;  %4861 = vmatprep.subr.bf16.mxu1 %v12563_v29  ;;  %v3156_v32 = vld [vmem:[#allocation14 + $0x90] sm:$0xff] }
 0x36c   :  { %v3160_v29 = vld [vmem:[#allocation14 + $0xb0] sm:$0xff] }
 0x36d   :  { %v12365_v34 = vcombine.high %v3156_v32, %v3160_v29  ;;  %v12364_v40 = vcombine.low %v3156_v32, %v3160_v29  ;;  %v3209_v32 = vld [vmem:[#allocation14 + $0x238] sm:$0xff] }
 0x36e   :  { %4780 = vmatpush1.bf16.msra.mxu0 %v12560_v35  ;;  %4862 = vmatpush1.bf16.msra.mxu1 %v12562_v36  ;;  %v12367_v35 = vcombine.high %v3157_v30, %v3161_v31  ;;  %v3164_v36 = vld [vmem:[#allocation14 + $0xd0] sm:$0xff] }
 0x36f   :  { %4781 = vmatprep.subr.bf16.mxu0 %v12569_v37  ;;  %4863 = vmatprep.subr.bf16.mxu1 %v12571_v38  ;;  %v3168_v37 = vld [vmem:[#allocation14 + $0xf0] sm:$0xff]  ;;  %v3165_v38 = vld [vmem:[#allocation14 + $0xd8] sm:$0xff] }
 0x370   :  { %v12373_v44 = vcombine.high %v3164_v36, %v3168_v37  ;;  %v12372_v51 = vcombine.low %v3164_v36, %v3168_v37  ;;  %v12374_v53 = vcombine.low %v3165_v38, %v3169_v39  ;;  %v3217_v36 = vld [vmem:[#allocation14 + $0x278] sm:$0xff] }
 0x372   :  { %4782 = vmatpush1.bf16.msra.mxu0 %v12568_v43  ;;  %4864 = vmatpush1.bf16.msra.mxu1 %v12570_v46  ;;  %v12375_v43 = vcombine.high %v3165_v38, %v3169_v39  ;;  %v3172_v46 = vld [vmem:[#allocation14 + $0x110] sm:$0xff] }
 0x373   :  { %4783 = vmatprep.subr.bf16.mxu0 %v12577_v48  ;;  %4865 = vmatprep.subr.bf16.mxu1 %v12579_v49  ;;  %v3176_v48 = vld [vmem:[#allocation14 + $0x130] sm:$0xff]  ;;  %v3173_v49 = vld [vmem:[#allocation14 + $0x118] sm:$0xff] }
 0x374   :  { %v12381_v54 = vcombine.high %v3172_v46, %v3176_v48  ;;  %v12380_v59 = vcombine.low %v3172_v46, %v3176_v48  ;;  %v12382_v62 = vcombine.low %v3173_v49, %v3177_v50  ;;  %v3225_v46 = vld [vmem:[#allocation14 + $0x2b8] sm:$0xff] }
 0x376   :  { %4784 = vmatpush1.bf16.msra.mxu0 %v12576_v61  ;;  %4866 = vmatpush1.bf16.msra.mxu1 %v12578_v55  ;;  %v12383_v61 = vcombine.high %v3173_v49, %v3177_v50  ;;  %v3180_v55 = vld [vmem:[#allocation14 + $0x150] sm:$0xff] }
 0x377   :  { %4785 = vmatprep.subr.bf16.mxu0 %v12585_v56  ;;  %4867 = vmatprep.subr.bf16.mxu1 %v12587_v57  ;;  %v3184_v56 = vld [vmem:[#allocation14 + $0x170] sm:$0xff]  ;;  %v3181_v57 = vld [vmem:[#allocation14 + $0x158] sm:$0xff] }
 0x378   :  { %v12389_v63 = vcombine.high %v3180_v55, %v3184_v56  ;;  %v12388_v6 = vcombine.low %v3180_v55, %v3184_v56  ;;  %v12390_v8 = vcombine.low %v3181_v57, %v3185_v58  ;;  %v3233_v55 = vld [vmem:[#allocation14 + $0x2f8] sm:$0xff] }
 0x37a   :  { %4786 = vmatpush1.bf16.msra.mxu0 %v12584_v0  ;;  %4868 = vmatpush1.bf16.msra.mxu1 %v12586_v1  ;;  %v12391_v0 = vcombine.high %v3181_v57, %v3185_v58  ;;  %v3188_v1 = vld [vmem:[#allocation14 + $0x190] sm:$0xff] }
 0x37b   :  { %4787 = vmatprep.subr.bf16.mxu0 %v12593_v2  ;;  %4869 = vmatprep.subr.bf16.mxu1 %v12595_v4  ;;  %v3192_v2 = vld [vmem:[#allocation14 + $0x1b0] sm:$0xff]  ;;  %v3189_v4 = vld [vmem:[#allocation14 + $0x198] sm:$0xff] }
 0x37c   :  { %v12397_v7 = vcombine.high %v3188_v1, %v3192_v2  ;;  %v12396_v15 = vcombine.low %v3188_v1, %v3192_v2  ;;  %v12398_v16 = vcombine.low %v3189_v4, %v3193_v5  ;;  %v3241_v1 = vld [vmem:[#allocation14 + $0x338] sm:$0xff] }
 0x37e   :  { %4788 = vmatpush1.bf16.msra.mxu0 %v12592_v9  ;;  %4870 = vmatpush1.bf16.msra.mxu1 %v12594_v10  ;;  %v12399_v9 = vcombine.high %v3189_v4, %v3193_v5  ;;  %v3196_v10 = vld [vmem:[#allocation14 + $0x1d0] sm:$0xff] }
 0x37f   :  { %4880 = vmatprep.subr.bf16.mxu0 %v12349_v11  ;;  %4962 = vmatprep.subr.bf16.mxu1 %v12351_v12  ;;  %v3200_v11 = vld [vmem:[#allocation14 + $0x1f0] sm:$0xff]  ;;  %v3197_v12 = vld [vmem:[#allocation14 + $0x1d8] sm:$0xff] }
 0x380   :  { %v12405_v17 = vcombine.high %v3196_v10, %v3200_v11  ;;  %v12404_v29 = vcombine.low %v3196_v10, %v3200_v11  ;;  %v12406_v30 = vcombine.low %v3197_v12, %v3201_v13  ;;  %v3249_v10 = vld [vmem:[#allocation14 + $0x378] sm:$0xff] }
 0x381   :  { %4790 = vmatmul.mubr.bf16.vlgmr.msra.gmra.mrb[12].mxu0 %v15776_v20  ;;  %4872 = vmatmul.mubr.bf16.vlgmr.msra.gmra.mrb[12].mxu1 %v15776_v20 }
 0x382   :  { %4881 = vmatpush1.bf16.msra.mxu0 %v12348_v18  ;;  %4912 = vmatprep.mubr.bf16.mxu0 %v15755_v26  ;;  %v12407_v18 = vcombine.high %v3197_v12, %v3201_v13 }
 0x383   :  { %4963 = vmatpush1.bf16.msra.mxu1 %v12350_v25  ;;  %4994 = vmatprep.mubr.bf16.mxu1 %v15755_v26  ;;  %v3204_v25 = vld [vmem:[#allocation14 + $0x210] sm:$0xff] }
 0x384   :  { %4882 = vmatprep.subr.bf16.mxu0 %v12357_v27  ;;  %4964 = vmatprep.subr.bf16.mxu1 %v12359_v28  ;;  %v3208_v27 = vld [vmem:[#allocation14 + $0x230] sm:$0xff]  ;;  %v3205_v28 = vld [vmem:[#allocation14 + $0x218] sm:$0xff] }
 0x385   :  { %v12413_v31 = vcombine.high %v3204_v25, %v3208_v27  ;;  %v12412_v37 = vcombine.low %v3204_v25, %v3208_v27  ;;  %v12414_v38 = vcombine.low %v3205_v28, %v3209_v32  ;;  %v3257_v25 = vld [vmem:[#allocation14 + $0x3b8] sm:$0xff] }
 0x386   :  { %4883 = vmatpush1.bf16.msra.mxu0 %v12356_v33  ;;  %v12415_v33 = vcombine.high %v3205_v28, %v3209_v32 }
 0x387   :  { %4965 = vmatpush1.bf16.msra.mxu1 %v12358_v3  ;;  %4884 = vmatprep.subr.bf16.mxu0 %v12365_v34  ;;  %v3212_v3 = vld [vmem:[#allocation14 + $0x250] sm:$0xff] }
 0x388   :  { %4966 = vmatprep.subr.bf16.mxu1 %v12367_v35  ;;  %v3216_v34 = vld [vmem:[#allocation14 + $0x270] sm:$0xff]  ;;  %v3213_v35 = vld [vmem:[#allocation14 + $0x258] sm:$0xff] }
 0x389   :  { %v12421_v39 = vcombine.high %v3212_v3, %v3216_v34  ;;  %v12420_v48 = vcombine.low %v3212_v3, %v3216_v34  ;;  %v12422_v49 = vcombine.low %v3213_v35, %v3217_v36  ;;  %v3265_v3 = vld [vmem:[#allocation14 + $0x3f8] sm:$0xff] }
 0x38a   :  { %4885 = vmatpush1.bf16.msra.mxu0 %v12364_v40  ;;  %v12423_v40 = vcombine.high %v3213_v35, %v3217_v36 }
 0x38b   :  { %4967 = vmatpush1.bf16.msra.mxu1 %v12366_v42  ;;  %4886 = vmatprep.subr.bf16.mxu0 %v12373_v44  ;;  %v3220_v42 = vld [vmem:[#allocation14 + $0x290] sm:$0xff] }
 0x38c   :  { %4968 = vmatprep.subr.bf16.mxu1 %v12375_v43  ;;  %v3224_v44 = vld [vmem:[#allocation14 + $0x2b0] sm:$0xff]  ;;  %v3221_v43 = vld [vmem:[#allocation14 + $0x298] sm:$0xff] }
 0x38d   :  { %v12429_v50 = vcombine.high %v3220_v42, %v3224_v44  ;;  %v12428_v56 = vcombine.low %v3220_v42, %v3224_v44  ;;  %v12430_v57 = vcombine.low %v3221_v43, %v3225_v46  ;;  %v3273_v42 = vld [vmem:[#allocation14 + $0x438] sm:$0xff] }
 0x38e   :  { %4887 = vmatpush1.bf16.msra.mxu0 %v12372_v51  ;;  %v12431_v51 = vcombine.high %v3221_v43, %v3225_v46 }
 0x38f   :  { %4969 = vmatpush1.bf16.msra.mxu1 %v12374_v53  ;;  %4888 = vmatprep.subr.bf16.mxu0 %v12381_v54  ;;  %v3228_v53 = vld [vmem:[#allocation14 + $0x2d0] sm:$0xff] }
 0x390   :  { %4970 = vmatprep.subr.bf16.mxu1 %v12383_v61  ;;  %v3232_v54 = vld [vmem:[#allocation14 + $0x2f0] sm:$0xff]  ;;  %v3229_v61 = vld [vmem:[#allocation14 + $0x2d8] sm:$0xff] }
 0x391   :  { %v12437_v58 = vcombine.high %v3228_v53, %v3232_v54  ;;  %v12436_v2 = vcombine.low %v3228_v53, %v3232_v54  ;;  %v12438_v4 = vcombine.low %v3229_v61, %v3233_v55  ;;  %v3277_v53 = vld [vmem:[#allocation14 + $0x458] sm:$0xff] }
 0x392   :  { %4889 = vmatpush1.bf16.msra.mxu0 %v12380_v59  ;;  %v12439_v59 = vcombine.high %v3229_v61, %v3233_v55  ;;  %v3281_v54 = vld [vmem:[#allocation14 + $0x478] sm:$0xff] }
 0x393   :  { %4971 = vmatpush1.bf16.msra.mxu1 %v12382_v62  ;;  %4890 = vmatprep.subr.bf16.mxu0 %v12389_v63  ;;  %v3236_v62 = vld [vmem:[#allocation14 + $0x310] sm:$0xff] }
 0x394   :  { %4972 = vmatprep.subr.bf16.mxu1 %v12391_v0  ;;  %v3240_v63 = vld [vmem:[#allocation14 + $0x330] sm:$0xff]  ;;  %v3237_v0 = vld [vmem:[#allocation14 + $0x318] sm:$0xff] }
 0x395   :  { %v12445_v5 = vcombine.high %v3236_v62, %v3240_v63  ;;  %v12444_v11 = vcombine.low %v3236_v62, %v3240_v63  ;;  %v12446_v12 = vcombine.low %v3237_v0, %v3241_v1  ;;  %v3289_v62 = vld [vmem:[#allocation14 + $0x4b8] sm:$0xff] }
 0x396   :  { %4891 = vmatpush1.bf16.msra.mxu0 %v12388_v6  ;;  %v12447_v6 = vcombine.high %v3237_v0, %v3241_v1  ;;  %v12486_v0 = vcombine.low %v3277_v53, %v3281_v54 }
 0x397   :  { %4973 = vmatpush1.bf16.msra.mxu1 %v12390_v8  ;;  %4892 = vmatprep.subr.bf16.mxu0 %v12397_v7  ;;  %v3244_v8 = vld [vmem:[#allocation14 + $0x350] sm:$0xff] }
 0x398   :  { %4974 = vmatprep.subr.bf16.mxu1 %v12399_v9  ;;  %v3248_v7 = vld [vmem:[#allocation14 + $0x370] sm:$0xff]  ;;  %v3245_v9 = vld [vmem:[#allocation14 + $0x358] sm:$0xff] }
 0x399   :  { %v12453_v13 = vcombine.high %v3244_v8, %v3248_v7  ;;  %v12452_v27 = vcombine.low %v3244_v8, %v3248_v7  ;;  %v12454_v28 = vcombine.low %v3245_v9, %v3249_v10  ;;  %v3297_v8 = vld [vmem:[#allocation14 + $0x4f8] sm:$0xff] }
 0x39a   :  { %4893 = vmatpush1.bf16.msra.mxu0 %v12396_v15  ;;  %v12455_v15 = vcombine.high %v3245_v9, %v3249_v10 }
 0x39b   :  { %4975 = vmatpush1.bf16.msra.mxu1 %v12398_v16  ;;  %4894 = vmatprep.subr.bf16.mxu0 %v12405_v17  ;;  %v3252_v16 = vld [vmem:[#allocation14 + $0x390] sm:$0xff] }
 0x39c   :  { %4976 = vmatprep.subr.bf16.mxu1 %v12407_v18  ;;  %v3256_v17 = vld [vmem:[#allocation14 + $0x3b0] sm:$0xff]  ;;  %v3253_v18 = vld [vmem:[#allocation14 + $0x398] sm:$0xff] }
 0x39d   :  { %v12461_v32 = vcombine.high %v3252_v16, %v3256_v17  ;;  %v12460_v34 = vcombine.low %v3252_v16, %v3256_v17  ;;  %v12462_v35 = vcombine.low %v3253_v18, %v3257_v25  ;;  %v3305_v16 = vld [vmem:[#allocation14 + $0x538] sm:$0xff] }
 0x39e   :  { %4895 = vmatpush1.bf16.msra.mxu0 %v12404_v29  ;;  %v12463_v29 = vcombine.high %v3253_v18, %v3257_v25 }
 0x39f   :  { %4977 = vmatpush1.bf16.msra.mxu1 %v12406_v30  ;;  %4896 = vmatprep.subr.bf16.mxu0 %v12413_v31  ;;  %v3260_v30 = vld [vmem:[#allocation14 + $0x3d0] sm:$0xff] }
 0x3a0   :  { %4978 = vmatprep.subr.bf16.mxu1 %v12415_v33  ;;  %v3264_v31 = vld [vmem:[#allocation14 + $0x3f0] sm:$0xff]  ;;  %v3261_v33 = vld [vmem:[#allocation14 + $0x3d8] sm:$0xff] }
 0x3a1   :  { %v12469_v36 = vcombine.high %v3260_v30, %v3264_v31  ;;  %v12468_v44 = vcombine.low %v3260_v30, %v3264_v31  ;;  %v12470_v43 = vcombine.low %v3261_v33, %v3265_v3  ;;  %v3313_v30 = vld [vmem:[#allocation14 + $0x578] sm:$0xff] }
 0x3a2   :  { %4897 = vmatpush1.bf16.msra.mxu0 %v12412_v37  ;;  %v12471_v37 = vcombine.high %v3261_v33, %v3265_v3  ;;  %v15789_v33 = vld [vmem:[%s16158_s7] sm:$0xf] }
 0x3a3   :  { %4979 = vmatpush1.bf16.msra.mxu1 %v12414_v38  ;;  %4898 = vmatprep.subr.bf16.mxu0 %v12421_v39  ;;  %v3268_v38 = vld [vmem:[#allocation14 + $0x410] sm:$0xff] }
 0x3a4   :  { %4980 = vmatprep.subr.bf16.mxu1 %v12423_v40  ;;  %v3272_v39 = vld [vmem:[#allocation14 + $0x430] sm:$0xff]  ;;  %v3269_v40 = vld [vmem:[#allocation14 + $0x418] sm:$0xff] }
 0x3a5   :  { %v12477_v46 = vcombine.high %v3268_v38, %v3272_v39  ;;  %v12478_v61 = vcombine.low %v3269_v40, %v3273_v42 }
 0x3a6   :  { %4899 = vmatpush1.bf16.msra.mxu0 %v12420_v48  ;;  %v12479_v48 = vcombine.high %v3269_v40, %v3273_v42  ;;  %v3321_v40 = vld [vmem:[#allocation14 + $0x5b8] sm:$0xff]  ;;  %v2325_v42 = vrot.slane %v15789_v33, %v15717_v24 }
 0x3a7   :  { %4981 = vmatpush1.bf16.msra.mxu1 %v12422_v49  ;;  %4900 = vmatprep.subr.bf16.mxu0 %v12429_v50  ;;  %v3276_v49 = vld [vmem:[#allocation14 + $0x450] sm:$0xff] }
 0x3a8   :  { %4982 = vmatprep.subr.bf16.mxu1 %v12431_v51  ;;  %v3280_v50 = vld [vmem:[#allocation14 + $0x470] sm:$0xff]  ;;  %v12476_v51 = vcombine.low %v3268_v38, %v3272_v39  ;;  %v2321_v38 = vrot.slane %v15789_v33, %v15711_v22  ;;  %v3317_v39 = vld [vmem:[#allocation14 + $0x598] sm:$0xff] }
 0x3a9   :  { %v12485_v55 = vcombine.high %v3276_v49, %v3280_v50  ;;  %v12484_v63 = vcombine.low %v3276_v49, %v3280_v50  ;;  %v12527_v50 = vcombine.high %v3317_v39, %v3321_v40 }
 0x3aa   :  { %4901 = vmatpush1.bf16.msra.mxu0 %v12428_v56  ;;  %v3284_v56 = vld [vmem:[#allocation14 + $0x490] sm:$0xff] }
 0x3ab   :  { %4983 = vmatpush1.bf16.msra.mxu1 %v12430_v57  ;;  %4902 = vmatprep.subr.bf16.mxu0 %v12437_v58  ;;  %v3288_v57 = vld [vmem:[#allocation14 + $0x4b0] sm:$0xff]  ;;  %v12487_v58 = vcombine.high %v3277_v53, %v3281_v54 }
 0x3ac   :  { %4984 = vmatprep.subr.bf16.mxu1 %v12439_v59  ;;  %v3285_v59 = vld [vmem:[#allocation14 + $0x498] sm:$0xff]  ;;  %v12493_v1 = vcombine.high %v3284_v56, %v3288_v57  ;;  %v12492_v7 = vcombine.low %v3284_v56, %v3288_v57  ;;  %v3328_v53 = vld [vmem:[#allocation14 + $0x5f0] sm:$0xff] }
 0x3ad   :  { %v12494_v9 = vcombine.low %v3285_v59, %v3289_v62  ;;  %v3325_v56 = vld [vmem:[#allocation14 + $0x5d8] sm:$0xff] }
 0x3ae   :  { %4903 = vmatpush1.bf16.msra.mxu0 %v12436_v2  ;;  %v12495_v2 = vcombine.high %v3285_v59, %v3289_v62  ;;  %v3329_v57 = vld [vmem:[#allocation14 + $0x5f8] sm:$0xff] }
 0x3af   :  { %4985 = vmatpush1.bf16.msra.mxu1 %v12438_v4  ;;  %4904 = vmatprep.subr.bf16.mxu0 %v12445_v5  ;;  %v3292_v4 = vld [vmem:[#allocation14 + $0x4d0] sm:$0xff] }
 0x3b0   :  { %4986 = vmatprep.subr.bf16.mxu1 %v12447_v6  ;;  %v3296_v5 = vld [vmem:[#allocation14 + $0x4f0] sm:$0xff]  ;;  %v3293_v6 = vld [vmem:[#allocation14 + $0x4d8] sm:$0xff] }
 0x3b1   :  { %v12501_v10 = vcombine.high %v3292_v4, %v3296_v5  ;;  %v12500_v17 = vcombine.low %v3292_v4, %v3296_v5  ;;  %v12502_v18 = vcombine.low %v3293_v6, %v3297_v8  ;;  %v12535_v5 = vcombine.high %v3325_v56, %v3329_v57 }
 0x3b2   :  { %4905 = vmatpush1.bf16.msra.mxu0 %v12444_v11  ;;  %v12503_v11 = vcombine.high %v3293_v6, %v3297_v8  ;;  %v3332_v6 = vld [vmem:[#allocation14 + $0x610] sm:$0xff] }
 0x3b3   :  { %4987 = vmatpush1.bf16.msra.mxu1 %v12446_v12  ;;  %4906 = vmatprep.subr.bf16.mxu0 %v12453_v13  ;;  %v3300_v12 = vld [vmem:[#allocation14 + $0x510] sm:$0xff] }
 0x3b4   :  { %4988 = vmatprep.subr.bf16.mxu1 %v12455_v15  ;;  %v3304_v13 = vld [vmem:[#allocation14 + $0x530] sm:$0xff]  ;;  %v3301_v15 = vld [vmem:[#allocation14 + $0x518] sm:$0xff] }
 0x3b5   :  { %v12509_v25 = vcombine.high %v3300_v12, %v3304_v13  ;;  %v12508_v31 = vcombine.low %v3300_v12, %v3304_v13  ;;  %v12510_v3 = vcombine.low %v3301_v15, %v3305_v16  ;;  %v3336_v8 = vld [vmem:[#allocation14 + $0x630] sm:$0xff] }
 0x3b6   :  { %4907 = vmatpush1.bf16.msra.mxu0 %v12452_v27  ;;  %v12511_v27 = vcombine.high %v3301_v15, %v3305_v16  ;;  %v12541_v12 = vcombine.high %v3332_v6, %v3336_v8  ;;  %v3340_v15 = vld [vmem:[#allocation14 + $0x650] sm:$0xff] }
 0x3b7   :  { %4989 = vmatpush1.bf16.msra.mxu1 %v12454_v28  ;;  %4908 = vmatprep.subr.bf16.mxu0 %v12461_v32  ;;  %v3308_v28 = vld [vmem:[#allocation14 + $0x550] sm:$0xff] }
 0x3b8   :  { %4990 = vmatprep.subr.bf16.mxu1 %v12463_v29  ;;  %v3312_v32 = vld [vmem:[#allocation14 + $0x570] sm:$0xff]  ;;  %v3309_v29 = vld [vmem:[#allocation14 + $0x558] sm:$0xff] }
 0x3b9   :  { %v3344_v16 = vld [vmem:[#allocation14 + $0x670] sm:$0xff] }
 0x3ba   :  { %4909 = vmatpush1.bf16.msra.mxu0 %v12460_v34  ;;  %v12517_v34 = vcombine.high %v3308_v28, %v3312_v32 }
 0x3bb   :  { %4991 = vmatpush1.bf16.msra.mxu1 %v12462_v35  ;;  %4910 = vmatprep.subr.bf16.mxu0 %v12469_v36  ;;  %v12519_v35 = vcombine.high %v3309_v29, %v3313_v30  ;;  %v3316_v36 = vld [vmem:[#allocation14 + $0x590] sm:$0xff] }
 0x3bc   :  { %4992 = vmatprep.subr.bf16.mxu1 %v12471_v37  ;;  %v3320_v37 = vld [vmem:[#allocation14 + $0x5b0] sm:$0xff] }
 0x3be   :  { %4911 = vmatpush1.bf16.msra.mxu0 %v12468_v44  ;;  %v12516_v44 = vcombine.low %v3308_v28, %v3312_v32  ;;  %v12549_v28 = vcombine.high %v3340_v15, %v3344_v16 }
 0x3bf   :  { %4993 = vmatpush1.bf16.msra.mxu1 %v12470_v43  ;;  %4921 = vmatprep.subr.bf16.mxu0 %v12477_v46  ;;  %v12518_v43 = vcombine.low %v3309_v29, %v3313_v30  ;;  %v12525_v46 = vcombine.high %v3316_v36, %v3320_v37  ;;  %v3348_v29 = vld [vmem:[#allocation14 + $0x690] sm:$0xff] }
 0x3c0   :  { %5003 = vmatprep.subr.bf16.mxu1 %v12479_v48  ;;  %v3352_v30 = vld [vmem:[#allocation14 + $0x6b0] sm:$0xff] }
 0x3c1   :  { %4913 = vmatmul.mubr.bf16.vlgmr.msra.gmra.mrb[16].mxu0 %v15764_v52 }
 0x3c2   :  { %4995 = vmatmul.mubr.bf16.vlgmr.msra.gmra.mrb[16].mxu1 %v15764_v52  ;;  %4922 = vmatpush1.bf16.msra.mxu0 %v12476_v51  ;;  %v3324_v51 = vld [vmem:[#allocation14 + $0x5d0] sm:$0xff] }
 0x3c3   :  { %4953 = vmatprep.mubr.bf16.mxu0 %v15768_v60  ;;  %5004 = vmatpush1.bf16.msra.mxu1 %v12478_v61  ;;  %v12533_v4 = vcombine.high %v3324_v51, %v3328_v53 }
 0x3c4   :  { %5035 = vmatprep.mubr.bf16.mxu1 %v15768_v60  ;;  %4923 = vmatprep.subr.bf16.mxu0 %v12485_v55 }
 0x3c5   :  { %5005 = vmatprep.subr.bf16.mxu1 %v12487_v58 }
 0x3c6   :  { %4924 = vmatpush1.bf16.msra.mxu0 %v12484_v63  ;;  %v12524_v63 = vcombine.low %v3316_v36, %v3320_v37  ;;  %v12557_v36 = vcombine.high %v3348_v29, %v3352_v30 }
 0x3c7   :  { %5006 = vmatpush1.bf16.msra.mxu1 %v12486_v0  ;;  %4925 = vmatprep.subr.bf16.mxu0 %v12493_v1 }
 0x3c8   :  { %5007 = vmatprep.subr.bf16.mxu1 %v12495_v2  ;;  %v12526_v2 = vcombine.low %v3317_v39, %v3321_v40  ;;  %v3360_v39 = vld [vmem:[#allocation14 + $0x6f0] sm:$0xff]  ;;  %v3357_v40 = vld [vmem:[#allocation14 + $0x6d8] sm:$0xff] }
 0x3ca   :  { %4926 = vmatpush1.bf16.msra.mxu0 %v12492_v7  ;;  %v3333_v7 = vld [vmem:[#allocation14 + $0x618] sm:$0xff] }
 0x3cb   :  { %5008 = vmatpush1.bf16.msra.mxu1 %v12494_v9  ;;  %4927 = vmatprep.subr.bf16.mxu0 %v12501_v10  ;;  %v3337_v9 = vld [vmem:[#allocation14 + $0x638] sm:$0xff]  ;;  %v12532_v10 = vcombine.low %v3324_v51, %v3328_v53  ;;  %v3368_v51 = vld [vmem:[#allocation14 + $0x730] sm:$0xff] }
 0x3cc   :  { %5009 = vmatprep.subr.bf16.mxu1 %v12503_v11  ;;  %v12534_v11 = vcombine.low %v3325_v56, %v3329_v57  ;;  %v12543_v13 = vcombine.high %v3333_v7, %v3337_v9  ;;  %v3365_v53 = vld [vmem:[#allocation14 + $0x718] sm:$0xff] }
 0x3ce   :  { %4928 = vmatpush1.bf16.msra.mxu0 %v12500_v17  ;;  %v3341_v17 = vld [vmem:[#allocation14 + $0x658] sm:$0xff] }
 0x3cf   :  { %5010 = vmatpush1.bf16.msra.mxu1 %v12502_v18  ;;  %4929 = vmatprep.subr.bf16.mxu0 %v12509_v25  ;;  %v3345_v18 = vld [vmem:[#allocation14 + $0x678] sm:$0xff]  ;;  %v12540_v25 = vcombine.low %v3332_v6, %v3336_v8 }
 0x3d0   :  { %5011 = vmatprep.subr.bf16.mxu1 %v12511_v27  ;;  %v12542_v27 = vcombine.low %v3333_v7, %v3337_v9  ;;  %v12551_v32 = vcombine.high %v3341_v17, %v3345_v18  ;;  %v3380_v7 = vld [vmem:[#allocation14 + $0x790] sm:$0xff] }
 0x3d1   :  { %v3384_v9 = vld [vmem:[#allocation14 + $0x7b0] sm:$0xff] }
 0x3d2   :  { %4930 = vmatpush1.bf16.msra.mxu0 %v12508_v31  ;;  %v3349_v31 = vld [vmem:[#allocation14 + $0x698] sm:$0xff] }
 0x3d3   :  { %5012 = vmatpush1.bf16.msra.mxu1 %v12510_v3  ;;  %4931 = vmatprep.subr.bf16.mxu0 %v12517_v34  ;;  %v3353_v3 = vld [vmem:[#allocation14 + $0x6b8] sm:$0xff]  ;;  %v12548_v34 = vcombine.low %v3340_v15, %v3344_v16  ;;  %v12589_v15 = vcombine.high %v3380_v7, %v3384_v9 }
 0x3d4   :  { %v15795_v48 = vpop.f32.mrb[8].mxu0  ;;  %v3127_v49 = vpop.f32.mrb[8].mxu1  ;;  %5013 = vmatprep.subr.bf16.mxu1 %v12519_v35  ;;  %v12550_v35 = vcombine.low %v3341_v17, %v3345_v18  ;;  %v12559_v37 = vcombine.high %v3349_v31, %v3353_v3  ;;  %v3388_v17 = vld [vmem:[#allocation14 + $0x7d0] sm:$0xff] }
 0x3d5   :  { %v15797_v54 = vadd.f32 %v3127_v49, %v2321_v38  ;;  %v15799_v61 = vpop.f32.mrb[9].mxu0  ;;  %v3129_v55 = vpop.f32.mrb[9].mxu1  ;;  %v3356_v38 = vld [vmem:[#allocation14 + $0x6d0] sm:$0xff] }
 0x3d6   :  { %v15801_v58 = vadd.f32 %v3129_v55, %v2325_v42  ;;  %v3049_v59 = vpop.f32.mrb[10].mxu0  ;;  %v3131_v62 = vpop.f32.mrb[10].mxu1  ;;  %4932 = vmatpush1.bf16.msra.mxu0 %v12516_v44  ;;  %v3361_v42 = vld [vmem:[#allocation14 + $0x6f8] sm:$0xff]  ;;  %v12556_v44 = vcombine.low %v3348_v29, %v3352_v30  ;;  %v12564_v56 = vcombine.low %v3356_v38, %v3360_v39  ;;  %v3392_v18 = vld [vmem:[#allocation14 + $0x7f0] sm:$0xff] }
 0x3d7   :  { %5014 = vmatpush1.bf16.msra.mxu1 %v12518_v43  ;;  %v3050_v0 = vpop.f32.mrb[11].mxu0  ;;  %v3132_v1 = vpop.f32.mrb[11].mxu1  ;;  %4933 = vmatprep.subr.bf16.mxu0 %v12525_v46  ;;  %v12558_v43 = vcombine.low %v3349_v31, %v3353_v3  ;;  %v12565_v46 = vcombine.high %v3356_v38, %v3360_v39  ;;  %v12567_v49 = vcombine.high %v3357_v40, %v3361_v42  ;;  %v3369_v55 = vld [vmem:[#allocation14 + $0x738] sm:$0xff] }
 0x3d8   :  { %5015 = vmatprep.subr.bf16.mxu1 %v12527_v50  ;;  %v3364_v50 = vld [vmem:[#allocation14 + $0x710] sm:$0xff]  ;;  %v12566_v57 = vcombine.low %v3357_v40, %v3361_v42  ;;  %v12575_v62 = vcombine.high %v3365_v53, %v3369_v55  ;;  %v3373_v1 = vld [vmem:[#allocation14 + $0x758] sm:$0xff]  ;;  %v12597_v29 = vcombine.high %v3388_v17, %v3392_v18  ;;  %v12596_v31 = vcombine.low %v3388_v17, %v3392_v18 }
 0x3d9   :  { %v12573_v59 = vcombine.high %v3364_v50, %v3368_v51  ;;  %v3376_v0 = vld [vmem:[#allocation14 + $0x770] sm:$0xff] }
 0x3da   :  { %4934 = vmatpush1.bf16.msra.mxu0 %v12524_v63  ;;  %v3372_v63 = vld [vmem:[#allocation14 + $0x750] sm:$0xff] }
 0x3db   :  { %5016 = vmatpush1.bf16.msra.mxu1 %v12526_v2  ;;  %4935 = vmatprep.subr.bf16.mxu0 %v12533_v4  ;;  %v3377_v2 = vld [vmem:[#allocation14 + $0x778] sm:$0xff]  ;;  %v12572_v4 = vcombine.low %v3364_v50, %v3368_v51  ;;  %v12581_v6 = vcombine.high %v3372_v63, %v3376_v0 }
 0x3dc   :  { %5017 = vmatprep.subr.bf16.mxu1 %v12535_v5  ;;  %v12574_v5 = vcombine.low %v3365_v53, %v3369_v55  ;;  %v12583_v8 = vcombine.high %v3373_v1, %v3377_v2 }
 0x3de   :  { %4936 = vmatpush1.bf16.msra.mxu0 %v12532_v10  ;;  %v3381_v10 = vld [vmem:[#allocation14 + $0x798] sm:$0xff] }
 0x3df   :  { %5018 = vmatpush1.bf16.msra.mxu1 %v12534_v11  ;;  %4937 = vmatprep.subr.bf16.mxu0 %v12541_v12  ;;  %v3385_v11 = vld [vmem:[#allocation14 + $0x7b8] sm:$0xff]  ;;  %v12580_v12 = vcombine.low %v3372_v63, %v3376_v0 }
 0x3e0   :  { %5019 = vmatprep.subr.bf16.mxu1 %v12543_v13  ;;  %v12582_v13 = vcombine.low %v3373_v1, %v3377_v2  ;;  %v12591_v16 = vcombine.high %v3381_v10, %v3385_v11  ;;  %v3414_v1 = vsub.s32 4, %v15705_v19 }
 0x3e2   :  { %4938 = vmatpush1.bf16.msra.mxu0 %v12540_v25  ;;  %v3389_v25 = vld [vmem:[#allocation14 + $0x7d8] sm:$0xff] }
 0x3e3   :  { %5020 = vmatpush1.bf16.msra.mxu1 %v12542_v27  ;;  %4939 = vmatprep.subr.bf16.mxu0 %v12549_v28  ;;  %v3393_v27 = vld [vmem:[#allocation14 + $0x7f8] sm:$0xff]  ;;  %v12588_v28 = vcombine.low %v3380_v7, %v3384_v9 }
 0x3e4   :  { %5021 = vmatprep.subr.bf16.mxu1 %v12551_v32  ;;  %v12590_v32 = vcombine.low %v3381_v10, %v3385_v11  ;;  %v12599_v30 = vcombine.high %v3389_v25, %v3393_v27  ;;  %v12598_v3 = vcombine.low %v3389_v25, %v3393_v27 }
 0x3e6   :  { %4940 = vmatpush1.bf16.msra.mxu0 %v12548_v34  ;;  %v15364_v34 = vmov 0.0  }
 0x3e7   :  { %5022 = vmatpush1.bf16.msra.mxu1 %v12550_v35  ;;  %4941 = vmatprep.subr.bf16.mxu0 %v12557_v36  ;;  %v15814_v35 = vld [vmem:[%s16160_s9] sm:$0xff] }
 0x3e8   :  { %5023 = vmatprep.subr.bf16.mxu1 %v12559_v37  ;;  %v3399_v36 = vrot.slane %v15814_v35, %v15708_v21  ;;  %v3403_v50 = vrot.slane %v15814_v35, %v15714_v23 }
 0x3ea   :  { %4942 = vmatpush1.bf16.msra.mxu0 %v12556_v44  ;;  %v2313_v44 = vrot.slane %v15789_v33, %v15708_v21 }
 0x3eb   :  { %5024 = vmatpush1.bf16.msra.mxu1 %v12558_v43  ;;  %4943 = vmatprep.subr.bf16.mxu0 %v12565_v46 }
 0x3ec   :  { %5025 = vmatprep.subr.bf16.mxu1 %v12567_v49  ;;  %v13508_v55 = vadd.f32 %v15795_v48, %v2313_v44  ;;  %v3415_v48 = vrot.slane %v15814_v35, %v3414_v1 }
 0x3ee   :  { %4944 = vmatpush1.bf16.msra.mxu0 %v12564_v56 }
 0x3ef   :  { %5026 = vmatpush1.bf16.msra.mxu1 %v12566_v57  ;;  %4945 = vmatprep.subr.bf16.mxu0 %v12573_v59  ;;  %v5044_v57 = vpack.c.bf16 %v13508_v55, %v13508_v55  ;;  %v2317_v59 = vrot.slane %v15789_v33, %v15714_v23  ;;  %v14208_v55 = vld [vmem:[#allocation16 + $0x140] ss:$16 sps:$4 sm:$0xff]  }
 0x3f0   :  { %5027 = vmatprep.subr.bf16.mxu1 %v12575_v62 }
 0x3f1   :  { %v13509_v63 = vadd.f32 %v15799_v61, %v2317_v59  ;;  %v14222_v59 = vld [vmem:[#allocation16 + $0x184] ss:$16 sps:$4 sm:$0xff]  }
 0x3f2   :  { %4946 = vmatpush1.bf16.msra.mxu0 %v12572_v4 }
 0x3f3   :  { %5028 = vmatpush1.bf16.msra.mxu1 %v12574_v5  ;;  %4947 = vmatprep.subr.bf16.mxu0 %v12581_v6  ;;  %v5180_v0 = vpack.c.bf16 %v13509_v63, %v13509_v63  ;;  %v14228_v63 = vld [vmem:[#allocation16 + $0x1a4] ss:$16 sps:$4 sm:$0xff]  }
 0x3f4   :  { %5029 = vmatprep.subr.bf16.mxu1 %v12583_v8 }
 0x3f6   :  { %4948 = vmatpush1.bf16.msra.mxu0 %v12580_v12 }
 0x3f7   :  { %5030 = vmatpush1.bf16.msra.mxu1 %v12582_v13  ;;  %4949 = vmatprep.subr.bf16.mxu0 %v12589_v15 }
 0x3f8   :  { %5031 = vmatprep.subr.bf16.mxu1 %v12591_v16 }
 0x3fa   :  { %4950 = vmatpush1.bf16.msra.mxu0 %v12588_v28 }
 0x3fb   :  { %5032 = vmatpush1.bf16.msra.mxu1 %v12590_v32  ;;  %4951 = vmatprep.subr.bf16.mxu0 %v12597_v29 }
 0x3fc   :  { %5033 = vmatprep.subr.bf16.mxu1 %v12599_v30 }
 0x3fe   :  { %4952 = vmatpush1.bf16.msra.mxu0 %v12596_v31 }
 0x3ff   :  { %5034 = vmatpush1.bf16.msra.mxu1 %v12598_v3  ;;  %13408 = vmatprep.subr.bf16.mxu0 %v15364_v34 }
 0x400   :  { %13414 = vmatprep.subr.bf16.mxu1 %v15364_v34 }
 0x401   :  { %4954 = vmatmul.mubr.bf16.vlgmr.msra.gmra.mrb[16].mxu0 %v15776_v20 }
 0x402   :  { %5036 = vmatmul.mubr.bf16.vlgmr.msra.gmra.mrb[16].mxu1 %v15776_v20  ;;  %13410 = vmatprep.mubr.msk.bf16.mxu0 %vm15365_vm0, %v15364_v34 }
 0x403   :  { %13416 = vmatprep.mubr.msk.bf16.mxu1 %vm15365_vm0, %v15364_v34 }
 0x454   :  { %v4791_v37 = vpop.f32.mrb[12].mxu0  ;;  %v15818_v38 = vpop.f32.mrb[12].mxu1 }
 0x455   :  { %v13512_v39 = vadd.f32 %v4791_v37, %v3399_v36  ;;  %v4793_v40 = vpop.f32.mrb[13].mxu0  ;;  %v15820_v42 = vpop.f32.mrb[13].mxu1 }
 0x456   :  { %v4795_v43 = vpop.f32.mrb[14].mxu0  ;;  %v4877_v46 = vpop.f32.mrb[14].mxu1  ;;  %v13513_v56 = vadd.f32 %v4793_v40, %v3403_v50  ;;  %v14204_v50 = vld [vmem:[#allocation16 + $0x124] ss:$16 sps:$4 sm:$0xff]  }
 0x457   :  { %v5045_v49 = vpack.c.bf16 %v13512_v39, %v13512_v39  ;;  %v4796_v51 = vpop.f32.mrb[15].mxu0  ;;  %v4878_v53 = vpop.f32.mrb[15].mxu1  ;;  %v14196_v46 = vld [vmem:[#allocation16 + $0x100] ss:$16 sps:$4 sm:$0xff]  }
 0x458   :  { %v5181_v62 = vpack.c.bf16 %v13513_v56, %v13513_v56  ;;  %v14202_v51 = vld [vmem:[#allocation16 + $0x120] ss:$16 sps:$4 sm:$0xff]   ;;  %v14210_v53 = vld [vmem:[#allocation16 + $0x144] ss:$16 sps:$4 sm:$0xff]  }
 0x459   :  { %13409 = vmatpush3.bf16.xpose.msra.mxu0 %v5045_v49  ;;  %v14198_v49 = vld [vmem:[#allocation16 + $0x104] ss:$16 sps:$4 sm:$0xff]  }
 0x45a   :  { %13420 = vmatprep.subr.bf16.mxu0 %v15364_v34  ;;  %v14216_v56 = vld [vmem:[#allocation16 + $0x164] ss:$16 sps:$4 sm:$0xff]  }
 0x460   :  { %13411 = vmatmul.mubr.bf16.vlgmr.msra.gmra.mrb[20].mxu0 %v5044_v57  ;;  %v14214_v57 = vld [vmem:[#allocation16 + $0x160] ss:$16 sps:$4 sm:$0xff]  }
 0x461   :  { %13421 = vmatpush3.bf16.xpose.msra.mxu0 %v5181_v62  ;;  %13422 = vmatprep.mubr.msk.bf16.mxu0 %vm15365_vm0, %v15364_v34  ;;  %v14220_v62 = vld [vmem:[#allocation16 + $0x180] ss:$16 sps:$4 sm:$0xff]  }
 0x462   :  { %5474 = vmatprep.subr.bf16.mxu0 %v14198_v49  ;;  %v14238_v49 = vld [vmem:[#allocation16 + $0x1e0] ss:$16 sps:$4 sm:$0xff]  }
 0x468   :  { %13423 = vmatmul.mubr.bf16.vlgmr.msra.gmra.mrb[24].mxu0 %v5180_v0  ;;  %v14226_v0 = vld [vmem:[#allocation16 + $0x1a0] ss:$16 sps:$4 sm:$0xff]  }
 0x469   :  { %5475 = vmatpush1.bf16.msra.mxu0 %v14196_v46  ;;  %v14243_v46 = vld [vmem:[#allocation16 + $0x1ec] ss:$16 sps:$4 sm:$0xff]  }
 0x46a   :  { %5476 = vmatprep.subr.bf16.mxu0 %v14204_v50  ;;  %v14241_v50 = vld [vmem:[#allocation16 + $0x1e8] ss:$16 sps:$4 sm:$0xff]  }
 0x46d   :  { %5477 = vmatpush1.bf16.msra.mxu0 %v14202_v51  ;;  %v14246_v51 = vld [vmem:[#allocation16 + $0x4] ss:$16 sps:$4 sm:$0xff]  }
 0x46e   :  { %5478 = vmatprep.subr.bf16.mxu0 %v14210_v53  ;;  %v15366_v53 = vmov 0  }
 0x46f   :  { %5506 = vmatprep.mubr.bf16.mxu0 %v15366_v53 }
 0x471   :  { %5479 = vmatpush1.bf16.msra.mxu0 %v14208_v55  ;;  %v14249_v55 = vld [vmem:[#allocation16 + $0xc] ss:$16 sps:$4 sm:$0xff]  }
 0x472   :  { %5480 = vmatprep.subr.bf16.mxu0 %v14216_v56 }
 0x475   :  { %5481 = vmatpush1.bf16.msra.mxu0 %v14214_v57 }
 0x476   :  { %5482 = vmatprep.subr.bf16.mxu0 %v14222_v59 }
 0x479   :  { %5483 = vmatpush1.bf16.msra.mxu0 %v14220_v62 }
 0x47a   :  { %5484 = vmatprep.subr.bf16.mxu0 %v14228_v63 }
 0x47d   :  { %5485 = vmatpush1.bf16.msra.mxu0 %v14226_v0  ;;  %v14244_v0 = vld [vmem:[#allocation16] ss:$16 sps:$4 sm:$0xff]  }
 0x4d4   :  { %v4955_v2 = vpop.f32.mrb[16].mxu0 }
 0x4d5   :  { %v13516_v4 = vadd.f32 %v4955_v2, %v3415_v48  ;;  %v15837_v5 = vpop.f32.mrb[16].mxu1  ;;  %v15839_v33 = vpop.f32.mrb[17].mxu0  ;;  %v3418_v48 = vsub.s32 5, %v15705_v19 }
 0x4d6   :  { %v15841_v6 = vpop.f32.mrb[17].mxu1  ;;  %v4959_v8 = vpop.f32.mrb[18].mxu0 }
 0x4d7   :  { %v5099_v7 = vpack.c.bf16 %v13516_v4, %v13516_v4  ;;  %v5041_v61 = vpop.f32.mrb[18].mxu1  ;;  %v4960_v9 = vpop.f32.mrb[19].mxu0  ;;  %v3419_v4 = vrot.slane %v15814_v35, %v3418_v48 }
 0x4d8   :  { %v5042_v10 = vpop.f32.mrb[19].mxu1 }
 0x4d9   :  { %v5105_v11 = vsel %vm5103_vm1, %v5099_v7, 0  ;;  %v13517_v8 = vadd.f32 %v15839_v33, %v3419_v4 }
 0x4da   :  { %13415 = vmatpush3.bf16.msra.mxu1 %v5105_v11 }
 0x4db   :  { %13426 = vmatprep.subr.bf16.mxu1 %v15364_v34  ;;  %v5234_v9 = vpack.c.bf16 %v13517_v8, %v13517_v8 }
 0x533   :  { %v5080_v12 = vpop.f32.mrb[20].mxu0 }
 0x534   :  { %v13412_v13 = vpop.f32.mrb[21].mxu0  ;;  %v5087_v15 = vsel %vm5086_vm2, %v5080_v12, -inf }
 0x535   :  { %5088 = vmax.xlane.f32.xlu0 %v5087_v15  ;;  %v5083_v16 = vpop.f32.mrb[22].mxu0  ;;  %v5239_v13 = vsel %vm5103_vm1, %v5234_v9, 0 }
 0x536   :  { %v13413_v17 = vpop.f32.mrb[23].mxu0 }
 0x537   :  { %v14199_v17 = vld [vmem:[#allocation16 + $0x108] ss:$16 sps:$4 sm:$0xff]  }
 0x53b   :  { %v5216_v18 = vpop.f32.mrb[24].mxu0 }
 0x53c   :  { %v13424_v25 = vpop.f32.mrb[25].mxu0  ;;  %v5222_v27 = vsel %vm5086_vm2, %v5216_v18, -inf }
 0x53d   :  { %5223 = vmax.xlane.f32.xlu0 %v5222_v27  ;;  %v5219_v28 = vpop.f32.mrb[26].mxu0  ;;  %v14205_v25 = vld [vmem:[#allocation16 + $0x128] ss:$16 sps:$4 sm:$0xff]   ;;  %v14213_v27 = vld [vmem:[#allocation16 + $0x14c] ss:$16 sps:$4 sm:$0xff]  }
 0x53e   :  { %v13425_v32 = vpop.f32.mrb[27].mxu0  ;;  %v14211_v28 = vld [vmem:[#allocation16 + $0x148] ss:$16 sps:$4 sm:$0xff]  }
 0x53f   :  { %v14219_v32 = vld [vmem:[#allocation16 + $0x16c] ss:$16 sps:$4 sm:$0xff]  }
 0x5c2   :  { %v5089_v29 = vpop.xlane.xlu0 %5088 }
 0x5c3   :  { %v5090_v30 = vsub.f32 %v5080_v12, %v5089_v29  ;;  %v14201_v12 = vld [vmem:[#allocation16 + $0x10c] ss:$16 sps:$4 sm:$0xff]   ;;  %v14217_v29 = vld [vmem:[#allocation16 + $0x168] ss:$16 sps:$4 sm:$0xff]  }
 0x5c5   :  { %v5091_v31 = vmul.f32 1.442695, %v5090_v30  ;;  %v14225_v30 = vld [vmem:[#allocation16 + $0x18c] ss:$16 sps:$4 sm:$0xff]  }
 0x5c7   :  { %14964 = vpow2.f32 %v5091_v31  ;;  %v14223_v31 = vld [vmem:[#allocation16 + $0x188] ss:$16 sps:$4 sm:$0xff]  }
 0x5ca   :  { %v5224_v3 = vpop.xlane.xlu0 %5223 }
 0x5cb   :  { %v5225_v36 = vsub.f32 %v5216_v18, %v5224_v3  ;;  %v14207_v18 = vld [vmem:[#allocation16 + $0x12c] ss:$16 sps:$4 sm:$0xff]  }
 0x5cc   :  { %v14231_v3 = vld [vmem:[#allocation16 + $0x1ac] ss:$16 sps:$4 sm:$0xff]  }
 0x5cd   :  { %v5226_v37 = vmul.f32 1.442695, %v5225_v36  ;;  %v14229_v36 = vld [vmem:[#allocation16 + $0x1a8] ss:$16 sps:$4 sm:$0xff]  }
 0x5cf   :  { %14966 = vpow2.f32 %v5226_v37  ;;  %v14232_v37 = vld [vmem:[#allocation16 + $0x1c0] ss:$16 sps:$4 sm:$0xff]  }
 0x5d1   :  { %v14965_v39 = vpop.eup %14964 }
 0x5d2   :  { %v5093_v40 = vsel %vm5086_vm2, %v14965_v39, 0.0 }
 0x5d3   :  { %5094 = vadd.xlane.f32.xlu1 %v5093_v40  ;;  %v14235_v40 = vld [vmem:[#allocation16 + $0x1c8] ss:$16 sps:$4 sm:$0xff]  }
 0x5d9   :  { %v14967_v44 = vpop.eup %14966 }
 0x5da   :  { %v5228_v43 = vsel %vm5086_vm2, %v14967_v44, 0.0 }
 0x5db   :  { %5229 = vadd.xlane.f32.xlu1 %v5228_v43  ;;  %v14240_v43 = vld [vmem:[#allocation16 + $0x1e4] ss:$16 sps:$4 sm:$0xff]  }
 0x660   :  { %v5095_v2 = vpop.xlane.xlu1 %5094 }
 0x661   :  { %14968 = vrcp.f32 %v5095_v2  ;;  %v14247_v2 = vld [vmem:[#allocation16 + $0x8] ss:$16 sps:$4 sm:$0xff]  }
 0x668   :  { %v5230_v7 = vpop.xlane.xlu1 %5229 }
 0x669   :  { %14970 = vrcp.f32 %v5230_v7  ;;  %v14252_v7 = vld [vmem:[#allocation16 + $0x24] ss:$16 sps:$4 sm:$0xff]  }
 0x66b   :  { %v14969_v61 = vpop.eup %14968 }
 0x66c   :  { %v5097_v10 = vmul.f32 %v14969_v61, %v14965_v39  ;;  %v14234_v39 = vld [vmem:[#allocation16 + $0x1c4] ss:$16 sps:$4 sm:$0xff]   ;;  %v14255_v61 = vld [vmem:[#allocation16 + $0x2c] ss:$16 sps:$4 sm:$0xff]  }
 0x66d   :  { %5486 = vmatprep.subr.bf16.mxu0 %v14234_v39  ;;  %v14277_v39 = vld [vmem:[#allocation16 + $0xa8] ss:$16 sps:$4 sm:$0xff]  }
 0x66e   :  { %v5098_v11 = vpack.c.bf16 %v5097_v10, %v5097_v10  ;;  %5487 = vmatpush1.bf16.msra.mxu0 %v14232_v37  ;;  %v14274_v37 = vld [vmem:[#allocation16 + $0xa0] ss:$16 sps:$4 sm:$0xff]  }
 0x66f   :  { %5488 = vmatprep.subr.bf16.mxu0 %v14240_v43 }
 0x670   :  { %13417 = vmatmul.mubr.msk.bf16.vlgmr.msra.gmra.mrb[20].mxu1 %vm5086_vm2, %v5098_v11  ;;  %v14250_v11 = vld [vmem:[#allocation16 + $0x20] ss:$16 sps:$4 sm:$0xff]  }
 0x671   :  { %13427 = vmatpush3.bf16.msra.mxu1 %v5239_v13  ;;  %13428 = vmatprep.mubr.msk.bf16.mxu1 %vm15365_vm0, %v15364_v34  ;;  %v14258_v13 = vld [vmem:[#allocation16 + $0x44] ss:$16 sps:$4 sm:$0xff]  }
 0x672   :  { %5515 = vmatprep.subr.bf16.mxu1 %v14201_v12  ;;  %5489 = vmatpush1.bf16.msra.mxu0 %v14238_v49  ;;  %v14253_v12 = vld [vmem:[#allocation16 + $0x28] ss:$16 sps:$4 sm:$0xff]  }
 0x673   :  { %v14971_v15 = vpop.eup %14970  ;;  %5716 = vmatprep.subr.bf16.mxu0 %v14246_v51  ;;  %v14283_v49 = vld [vmem:[#allocation16 + $0xc8] ss:$16 sps:$4 sm:$0xff]   ;;  %v14291_v51 = vld [vmem:[#allocation16 + $0xec] ss:$16 sps:$4 sm:$0xff]  }
 0x674   :  { %v5232_v16 = vmul.f32 %v14971_v15, %v14967_v44  ;;  %v14237_v44 = vld [vmem:[#allocation16 + $0x1cc] ss:$16 sps:$4 sm:$0xff]  }
 0x675   :  { %v14261_v15 = vld [vmem:[#allocation16 + $0x4c] ss:$16 sps:$4 sm:$0xff]  }
 0x676   :  { %v5233_v33 = vpack.c.bf16 %v5232_v16, %v5232_v16  ;;  %v14256_v16 = vld [vmem:[#allocation16 + $0x40] ss:$16 sps:$4 sm:$0xff]  }
 0x678   :  { %13429 = vmatmul.mubr.msk.bf16.vlgmr.msra.gmra.mrb[24].mxu1 %vm5086_vm2, %v5233_v33  ;;  %v14264_v33 = vld [vmem:[#allocation16 + $0x64] ss:$16 sps:$4 sm:$0xff]  }
 0x679   :  { %5516 = vmatpush1.bf16.msra.mxu1 %v14199_v17  ;;  %5547 = vmatprep.mubr.bf16.mxu1 %v15366_v53  ;;  %v14259_v17 = vld [vmem:[#allocation16 + $0x48] ss:$16 sps:$4 sm:$0xff]  }
 0x67a   :  { %5517 = vmatprep.subr.bf16.mxu1 %v14207_v18  ;;  %v14267_v18 = vld [vmem:[#allocation16 + $0x6c] ss:$16 sps:$4 sm:$0xff]  }
 0x67d   :  { %5518 = vmatpush1.bf16.msra.mxu1 %v14205_v25  ;;  %v14262_v25 = vld [vmem:[#allocation16 + $0x60] ss:$16 sps:$4 sm:$0xff]  }
 0x67e   :  { %5519 = vmatprep.subr.bf16.mxu1 %v14213_v27  ;;  %v14265_v27 = vld [vmem:[#allocation16 + $0x68] ss:$16 sps:$4 sm:$0xff]  }
 0x681   :  { %5520 = vmatpush1.bf16.msra.mxu1 %v14211_v28  ;;  %v14270_v28 = vld [vmem:[#allocation16 + $0x84] ss:$16 sps:$4 sm:$0xff]  }
 0x682   :  { %5521 = vmatprep.subr.bf16.mxu1 %v14219_v32  ;;  %v14273_v32 = vld [vmem:[#allocation16 + $0x8c] ss:$16 sps:$4 sm:$0xff]  }
 0x685   :  { %5522 = vmatpush1.bf16.msra.mxu1 %v14217_v29  ;;  %v14268_v29 = vld [vmem:[#allocation16 + $0x80] ss:$16 sps:$4 sm:$0xff]  }
 0x686   :  { %5523 = vmatprep.subr.bf16.mxu1 %v14225_v30  ;;  %v14271_v30 = vld [vmem:[#allocation16 + $0x88] ss:$16 sps:$4 sm:$0xff]  }
 0x689   :  { %5524 = vmatpush1.bf16.msra.mxu1 %v14223_v31  ;;  %v14276_v31 = vld [vmem:[#allocation16 + $0xa4] ss:$16 sps:$4 sm:$0xff]  }
 0x68a   :  { %5525 = vmatprep.subr.bf16.mxu1 %v14231_v3  ;;  %v14279_v3 = vld [vmem:[#allocation16 + $0xac] ss:$16 sps:$4 sm:$0xff]  }
 0x68d   :  { %5526 = vmatpush1.bf16.msra.mxu1 %v14229_v36  ;;  %v3422_v36 = vsub.s32 6, %v15705_v19 }
 0x68e   :  { %5527 = vmatprep.subr.bf16.mxu1 %v14237_v44  ;;  %v14285_v44 = vld [vmem:[#allocation16 + $0xcc] ss:$16 sps:$4 sm:$0xff]  }
 0x68f   :  { %v3423_v43 = vrot.slane %v15814_v35, %v3422_v36 }
 0x691   :  { %5528 = vmatpush1.bf16.msra.mxu1 %v14235_v40  ;;  %v14282_v40 = vld [vmem:[#allocation16 + $0xc4] ss:$16 sps:$4 sm:$0xff]  }
 0x692   :  { %5529 = vmatprep.subr.bf16.mxu1 %v14243_v46  ;;  %v14280_v46 = vld [vmem:[#allocation16 + $0xc0] ss:$16 sps:$4 sm:$0xff]  }
 0x695   :  { %5530 = vmatpush1.bf16.msra.mxu1 %v14241_v50  ;;  %v14288_v50 = vld [vmem:[#allocation16 + $0xe4] ss:$16 sps:$4 sm:$0xff]  }
 0x696   :  { %5757 = vmatprep.subr.bf16.mxu1 %v14249_v55  ;;  %v13518_v55 = vadd.f32 %v15837_v5, %v3423_v43 }
 0x743   :  { %v15861_v56 = vpop.f32.mrb[20].mxu1 }
 0x744   :  { %v13418_v57 = vpop.f32.mrb[21].mxu1 }
 0x745   :  { %v5144_v59 = vpop.f32.mrb[22].mxu1  ;;  %v14286_v57 = vld [vmem:[#allocation16 + $0xe0] ss:$16 sps:$4 sm:$0xff]  }
 0x746   :  { %v13419_v62 = vpop.f32.mrb[23].mxu1  ;;  %v14289_v59 = vld [vmem:[#allocation16 + $0xe8] ss:$16 sps:$4 sm:$0xff]  }
 0x747   :  { %v3407_v62 = vrot.slane %v15814_v35, %v15711_v22 }
 0x749   :  { %v13514_v5 = vadd.f32 %v15818_v38, %v3407_v62  ;;  %v14303_v62 = vld [vmem:[#allocation16 + $0x244] ss:$16 sps:$4 sm:$0xff]  }
 0x74b   :  { %v5275_v63 = vpop.f32.mrb[24].mxu1 }
 0x74c   :  { %v5281_v4 = vpack.c.bf16 %v5275_v63, %v5275_v63  ;;  %v13430_v8 = vpop.f32.mrb[25].mxu1  ;;  %v5852_v63 = vpack.c.bf16 %v13518_v55, %v13518_v55  ;;  %v14297_v55 = vld [vmem:[#allocation16 + $0x224] ss:$16 sps:$4 sm:$0xff]  }
 0x74d   :  { %v5278_v9 = vpop.f32.mrb[26].mxu1 }
 0x74e   :  { %v13431_v10 = vpop.f32.mrb[27].mxu1  ;;  %5507 = vmatmul.mubr.bf16.vlgmr.msra.gmra.mrb[28].mxu0 %v5281_v4  ;;  %5548 = vmatmul.mubr.bf16.vlgmr.msra.gmra.mrb[28].mxu1 %v5281_v4  ;;  %v5799_v4 = vpack.c.bf16 %v13514_v5, %v13514_v5  ;;  %v14307_v5 = vld [vmem:[#allocation16 + $0x260] ss:$16 sps:$4 sm:$0xff]  }
 0x74f   :  { %5717 = vmatpush1.bf16.msra.mxu0 %v14244_v0  ;;  %5758 = vmatpush1.bf16.msra.mxu1 %v14247_v2  ;;  %v5147_v0 = vpack.c.bf16 %v15861_v56, %v15861_v56  ;;  %v5857_v2 = vsel %vm5103_vm1, %v5852_v63, 0  ;;  %v5798_v56 = vpack.c.bf16 %v15797_v54, %v15797_v54  ;;  %v14301_v63 = vld [vmem:[#allocation16 + $0x240] ss:$16 sps:$4 sm:$0xff]  }
 0x750   :  { %5718 = vmatprep.subr.bf16.mxu0 %v14252_v7  ;;  %5759 = vmatprep.subr.bf16.mxu1 %v14255_v61 }
 0x751   :  { %5748 = vmatprep.mubr.bf16.mxu0 %v15366_v53  ;;  %5789 = vmatprep.mubr.bf16.mxu1 %v15366_v53 }
 0x753   :  { %5719 = vmatpush1.bf16.msra.mxu0 %v14250_v11  ;;  %5760 = vmatpush1.bf16.msra.mxu1 %v14253_v12 }
 0x754   :  { %5720 = vmatprep.subr.bf16.mxu0 %v14258_v13  ;;  %5761 = vmatprep.subr.bf16.mxu1 %v14261_v15 }
 0x757   :  { %5721 = vmatpush1.bf16.msra.mxu0 %v14256_v16  ;;  %5762 = vmatpush1.bf16.msra.mxu1 %v14259_v17 }
 0x758   :  { %5722 = vmatprep.subr.bf16.mxu0 %v14264_v33  ;;  %5763 = vmatprep.subr.bf16.mxu1 %v14267_v18 }
 0x75b   :  { %5723 = vmatpush1.bf16.msra.mxu0 %v14262_v25  ;;  %5764 = vmatpush1.bf16.msra.mxu1 %v14265_v27 }
 0x75c   :  { %5724 = vmatprep.subr.bf16.mxu0 %v14270_v28  ;;  %5765 = vmatprep.subr.bf16.mxu1 %v14273_v32 }
 0x75f   :  { %5725 = vmatpush1.bf16.msra.mxu0 %v14268_v29  ;;  %5766 = vmatpush1.bf16.msra.mxu1 %v14271_v30 }
 0x760   :  { %5726 = vmatprep.subr.bf16.mxu0 %v14276_v31  ;;  %5767 = vmatprep.subr.bf16.mxu1 %v14279_v3 }
 0x763   :  { %5727 = vmatpush1.bf16.msra.mxu0 %v14274_v37  ;;  %5768 = vmatpush1.bf16.msra.mxu1 %v14277_v39 }
 0x764   :  { %5728 = vmatprep.subr.bf16.mxu0 %v14282_v40  ;;  %5769 = vmatprep.subr.bf16.mxu1 %v14285_v44 }
 0x767   :  { %5729 = vmatpush1.bf16.msra.mxu0 %v14280_v46  ;;  %5770 = vmatpush1.bf16.msra.mxu1 %v14283_v49 }
 0x768   :  { %5730 = vmatprep.subr.bf16.mxu0 %v14288_v50  ;;  %5771 = vmatprep.subr.bf16.mxu1 %v14291_v51  ;;  %v14292_v50 = vld [vmem:[#allocation16 + $0x200] ss:$16 sps:$4 sm:$0xff]   ;;  %v14294_v51 = vld [vmem:[#allocation16 + $0x204] ss:$16 sps:$4 sm:$0xff]  }
 0x76b   :  { %5731 = vmatpush1.bf16.msra.mxu0 %v14286_v57  ;;  %5772 = vmatpush1.bf16.msra.mxu1 %v14289_v59  ;;  %v14300_v57 = vld [vmem:[#allocation16 + $0x20c] ss:$16 sps:$4 sm:$0xff]   ;;  %v14295_v59 = vld [vmem:[#allocation16 + $0x220] ss:$16 sps:$4 sm:$0xff]  }
 0x76c   :  { %13438 = vmatprep.subr.bf16.mxu1 %v15364_v34  ;;  %13432 = vmatprep.subr.bf16.mxu0 %v15364_v34 }
 0x76e   :  { %5749 = vmatmul.mubr.bf16.vlgmr.msra.gmra.mrb[32].mxu0 %v5147_v0  ;;  %5790 = vmatmul.mubr.bf16.vlgmr.msra.gmra.mrb[32].mxu1 %v5147_v0  ;;  %v14309_v0 = vld [vmem:[#allocation16 + $0x264] ss:$16 sps:$4 sm:$0xff]  }
 0x76f   :  { %13439 = vmatpush3.bf16.msra.mxu1 %v5857_v2  ;;  %13434 = vmatprep.mubr.msk.bf16.mxu0 %vm15365_vm0, %v15364_v34  ;;  %v14315_v2 = vld [vmem:[#allocation16 + $0x284] ss:$16 sps:$4 sm:$0xff]  }
 0x770   :  { %13440 = vmatprep.mubr.msk.bf16.mxu1 %vm15365_vm0, %v15364_v34  ;;  %6133 = vmatprep.subr.bf16.mxu1 %v14300_v57 }
 0x774   :  { %13433 = vmatpush3.bf16.xpose.msra.mxu0 %v5799_v4  ;;  %v14313_v4 = vld [vmem:[#allocation16 + $0x280] ss:$16 sps:$4 sm:$0xff]  }
 0x775   :  { %6092 = vmatprep.subr.bf16.mxu0 %v14294_v51 }
 0x77b   :  { %13435 = vmatmul.mubr.bf16.vlgmr.msra.gmra.mrb[36].mxu0 %v5798_v56  ;;  %v14321_v56 = vld [vmem:[#allocation16 + $0x2a4] ss:$16 sps:$4 sm:$0xff]  }
 0x77c   :  { %6124 = vmatprep.mubr.bf16.mxu0 %v15366_v53  ;;  %6093 = vmatpush1.bf16.msra.mxu0 %v14292_v50  ;;  %v3411_v50 = vrot.slane %v15814_v35, %v15717_v24 }
 0x77d   :  { %6094 = vmatprep.subr.bf16.mxu0 %v14297_v55 }
 0x77e   :  { %v13515_v55 = vadd.f32 %v15820_v42, %v3411_v50  ;;  %v14372_v50 = vld [vmem:[#allocation16 + $0x3a4] ss:$16 sps:$4 sm:$0xff]  }
 0x780   :  { %6095 = vmatpush1.bf16.msra.mxu0 %v14295_v59 }
 0x781   :  { %6096 = vmatprep.subr.bf16.mxu0 %v14303_v62 }
 0x784   :  { %6097 = vmatpush1.bf16.msra.mxu0 %v14301_v63 }
 0x785   :  { %6098 = vmatprep.subr.bf16.mxu0 %v14309_v0  ;;  %v6179_v0 = vpack.c.bf16 %v13515_v55, %v13515_v55  ;;  %v14378_v55 = vld [vmem:[#allocation16 + $0x3c4] ss:$16 sps:$4 sm:$0xff]  }
 0x788   :  { %6099 = vmatpush1.bf16.msra.mxu0 %v14307_v5 }
 0x789   :  { %6100 = vmatprep.subr.bf16.mxu0 %v14315_v2 }
 0x78c   :  { %6101 = vmatpush1.bf16.msra.mxu0 %v14313_v4 }
 0x78d   :  { %6102 = vmatprep.subr.bf16.mxu0 %v14321_v56 }
 0x821   :  { %v5508_v38 = vpop.f32.mrb[28].mxu0  ;;  %v5549_v8 = vpop.f32.mrb[28].mxu1 }
 0x822   :  { %v5510_v7 = vpop.f32.mrb[29].mxu0  ;;  %v5551_v61 = vpop.f32.mrb[29].mxu1 }
 0x823   :  { %v5512_v9 = vpop.f32.mrb[30].mxu0  ;;  %v5553_v10 = vpop.f32.mrb[30].mxu1 }
 0x824   :  { %v5513_v11 = vpop.f32.mrb[31].mxu0  ;;  %v5554_v12 = vpop.f32.mrb[31].mxu1  ;;  %v14331_v9 = vld [vmem:[#allocation16 + $0x2e0] ss:$16 sps:$4 sm:$0xff]  }
 0x841   :  { %v5750_v13 = vpop.f32.mrb[32].mxu0  ;;  %v5791_v15 = vpop.f32.mrb[32].mxu1 }
 0x842   :  { %v15885_v16 = vadd.f32 %v5750_v13, %v5508_v38  ;;  %v15887_v17 = vadd.f32 %v5791_v15, %v5549_v8  ;;  %v5752_v33 = vpop.f32.mrb[33].mxu0  ;;  %v5793_v18 = vpop.f32.mrb[33].mxu1  ;;  %v14319_v38 = vld [vmem:[#allocation16 + $0x2a0] ss:$16 sps:$4 sm:$0xff]   ;;  %v14327_v8 = vld [vmem:[#allocation16 + $0x2c4] ss:$16 sps:$4 sm:$0xff]  }
 0x843   :  { %v15889_v54 = vadd.f32 %v5752_v33, %v5510_v7  ;;  %v15891_v25 = vadd.f32 %v5793_v18, %v5551_v61  ;;  %v5754_v27 = vpop.f32.mrb[34].mxu0  ;;  %v5795_v28 = vpop.f32.mrb[34].mxu1  ;;  %6103 = vmatpush1.bf16.msra.mxu0 %v14319_v38  ;;  %v14325_v7 = vld [vmem:[#allocation16 + $0x2c0] ss:$16 sps:$4 sm:$0xff]   ;;  %v14333_v61 = vld [vmem:[#allocation16 + $0x2e4] ss:$16 sps:$4 sm:$0xff]  }
 0x844   :  { %v5755_v32 = vpop.f32.mrb[35].mxu0  ;;  %v5796_v29 = vpop.f32.mrb[35].mxu1  ;;  %6104 = vmatprep.subr.bf16.mxu0 %v14327_v8  ;;  %v14298_v13 = vld [vmem:[#allocation16 + $0x208] ss:$16 sps:$4 sm:$0xff]   ;;  %v14306_v33 = vld [vmem:[#allocation16 + $0x22c] ss:$16 sps:$4 sm:$0xff]  }
 0x845   :  { %v14304_v18 = vld [vmem:[#allocation16 + $0x228] ss:$16 sps:$4 sm:$0xff]   ;;  %v14312_v27 = vld [vmem:[#allocation16 + $0x24c] ss:$16 sps:$4 sm:$0xff]  }
 0x846   :  { %v14310_v28 = vld [vmem:[#allocation16 + $0x248] ss:$16 sps:$4 sm:$0xff]   ;;  %v14318_v32 = vld [vmem:[#allocation16 + $0x26c] ss:$16 sps:$4 sm:$0xff]  }
 0x847   :  { %6105 = vmatpush1.bf16.msra.mxu0 %v14325_v7  ;;  %v14316_v29 = vld [vmem:[#allocation16 + $0x268] ss:$16 sps:$4 sm:$0xff]  }
 0x848   :  { %6106 = vmatprep.subr.bf16.mxu0 %v14333_v61 }
 0x84b   :  { %6107 = vmatpush1.bf16.msra.mxu0 %v14331_v9 }
 0x84c   :  { %13444 = vmatprep.subr.bf16.mxu0 %v15364_v34 }
 0x84e   :  { %v5834_v30 = vpop.f32.mrb[36].mxu0 }
 0x84f   :  { %v13436_v31 = vpop.f32.mrb[37].mxu0  ;;  %v5840_v3 = vsel %vm5086_vm2, %v5834_v30, -inf }
 0x850   :  { %5841 = vmax.xlane.f32.xlu0 %v5840_v3  ;;  %v5837_v37 = vpop.f32.mrb[38].mxu0  ;;  %v14322_v31 = vld [vmem:[#allocation16 + $0x288] ss:$16 sps:$4 sm:$0xff]   ;;  %v14330_v3 = vld [vmem:[#allocation16 + $0x2ac] ss:$16 sps:$4 sm:$0xff]  }
 0x851   :  { %v13437_v39 = vpop.f32.mrb[39].mxu0  ;;  %v14328_v37 = vld [vmem:[#allocation16 + $0x2a8] ss:$16 sps:$4 sm:$0xff]  }
 0x852   :  { %v14336_v39 = vld [vmem:[#allocation16 + $0x2cc] ss:$16 sps:$4 sm:$0xff]  }
 0x8dd   :  { %v5842_v40 = vpop.xlane.xlu0 %5841 }
 0x8de   :  { %v5843_v44 = vsub.f32 %v5834_v30, %v5842_v40  ;;  %v14324_v30 = vld [vmem:[#allocation16 + $0x28c] ss:$16 sps:$4 sm:$0xff]   ;;  %v14334_v40 = vld [vmem:[#allocation16 + $0x2c8] ss:$16 sps:$4 sm:$0xff]  }
 0x8e0   :  { %v5844_v43 = vmul.f32 1.442695, %v5843_v44  ;;  %v14339_v44 = vld [vmem:[#allocation16 + $0x2ec] ss:$16 sps:$4 sm:$0xff]  }
 0x8e2   :  { %14972 = vpow2.f32 %v5844_v43  ;;  %v14337_v43 = vld [vmem:[#allocation16 + $0x2e8] ss:$16 sps:$4 sm:$0xff]  }
 0x8ec   :  { %v14973_v46 = vpop.eup %14972 }
 0x8ed   :  { %v5846_v49 = vsel %vm5086_vm2, %v14973_v46, 0.0 }
 0x8ee   :  { %5847 = vadd.xlane.f32.xlu1 %v5846_v49 }
 0x97b   :  { %v5848_v10 = vpop.xlane.xlu1 %5847 }
 0x97c   :  { %14974 = vrcp.f32 %v5848_v10 }
 0x986   :  { %v14975_v11 = vpop.eup %14974 }
 0x987   :  { %v5850_v12 = vmul.f32 %v14975_v11, %v14973_v46  ;;  %v3426_v46 = vsub.s32 7, %v15705_v19 }
 0x989   :  { %v5851_v15 = vpack.c.bf16 %v5850_v12, %v5850_v12  ;;  %v3427_v49 = vrot.slane %v15814_v35, %v3426_v46  ;;  %v6178_v35 = vpack.c.bf16 %v15801_v58, %v15801_v58 }
 0x98b   :  { %13441 = vmatmul.mubr.msk.bf16.vlgmr.msra.gmra.mrb[36].mxu1 %vm5086_vm2, %v5851_v15  ;;  %v13519_v51 = vadd.f32 %v15841_v6, %v3427_v49  ;;  %v14364_v49 = vld [vmem:[#allocation16 + $0x380] ss:$16 sps:$4 sm:$0xff]  }
 0x98c   :  { %6134 = vmatpush1.bf16.msra.mxu1 %v14298_v13  ;;  %6165 = vmatprep.mubr.bf16.mxu1 %v15366_v53 }
 0x98d   :  { %6135 = vmatprep.subr.bf16.mxu1 %v14306_v33  ;;  %v6232_v57 = vpack.c.bf16 %v13519_v51, %v13519_v51  ;;  %v14370_v51 = vld [vmem:[#allocation16 + $0x3a0] ss:$16 sps:$4 sm:$0xff]  }
 0x98f   :  { %v6237_v2 = vsel %vm5103_vm1, %v6232_v57, 0  ;;  %v14376_v57 = vld [vmem:[#allocation16 + $0x3c0] ss:$16 sps:$4 sm:$0xff]  }
 0x990   :  { %6136 = vmatpush1.bf16.msra.mxu1 %v14304_v18 }
 0x991   :  { %6137 = vmatprep.subr.bf16.mxu1 %v14312_v27 }
 0x994   :  { %6138 = vmatpush1.bf16.msra.mxu1 %v14310_v28 }
 0x995   :  { %6139 = vmatprep.subr.bf16.mxu1 %v14318_v32 }
 0x998   :  { %6140 = vmatpush1.bf16.msra.mxu1 %v14316_v29  ;;  %v14342_v29 = vld [vmem:[#allocation16 + $0x304] ss:$16 sps:$4 sm:$0xff]  }
 0x999   :  { %6141 = vmatprep.subr.bf16.mxu1 %v14324_v30  ;;  %v14345_v30 = vld [vmem:[#allocation16 + $0x30c] ss:$16 sps:$4 sm:$0xff]  }
 0x99c   :  { %6142 = vmatpush1.bf16.msra.mxu1 %v14322_v31  ;;  %v14348_v31 = vld [vmem:[#allocation16 + $0x324] ss:$16 sps:$4 sm:$0xff]  }
 0x99d   :  { %6143 = vmatprep.subr.bf16.mxu1 %v14330_v3  ;;  %v14346_v3 = vld [vmem:[#allocation16 + $0x320] ss:$16 sps:$4 sm:$0xff]  }
 0x9a0   :  { %6144 = vmatpush1.bf16.msra.mxu1 %v14328_v37  ;;  %v14354_v37 = vld [vmem:[#allocation16 + $0x344] ss:$16 sps:$4 sm:$0xff]  }
 0x9a1   :  { %6145 = vmatprep.subr.bf16.mxu1 %v14336_v39  ;;  %v14352_v39 = vld [vmem:[#allocation16 + $0x340] ss:$16 sps:$4 sm:$0xff]  }
 0x9a4   :  { %6146 = vmatpush1.bf16.msra.mxu1 %v14334_v40  ;;  %v14360_v40 = vld [vmem:[#allocation16 + $0x364] ss:$16 sps:$4 sm:$0xff]  }
 0x9a5   :  { %6147 = vmatprep.subr.bf16.mxu1 %v14339_v44  ;;  %v14358_v44 = vld [vmem:[#allocation16 + $0x360] ss:$16 sps:$4 sm:$0xff]  }
 0x9a8   :  { %6148 = vmatpush1.bf16.msra.mxu1 %v14337_v43  ;;  %v14366_v43 = vld [vmem:[#allocation16 + $0x384] ss:$16 sps:$4 sm:$0xff]  }
 0x9a9   :  { %13450 = vmatprep.subr.bf16.mxu1 %v15364_v34 }
 0xa5e   :  { %v5893_v59 = vpop.f32.mrb[36].mxu1 }
 0xa5f   :  { %v5899_v62 = vpack.c.bf16 %v5893_v59, %v5893_v59  ;;  %v13442_v63 = vpop.f32.mrb[37].mxu1  ;;  %v14384_v59 = vld [vmem:[#allocation16 + $0x3e4] ss:$16 sps:$4 sm:$0xff]  }
 0xa60   :  { %v5896_v5 = vpop.f32.mrb[38].mxu1 }
 0xa61   :  { %v13443_v4 = vpop.f32.mrb[39].mxu1  ;;  %6125 = vmatmul.mubr.bf16.vlgmr.msra.gmra.mrb[40].mxu0 %v5899_v62  ;;  %6166 = vmatmul.mubr.bf16.vlgmr.msra.gmra.mrb[40].mxu1 %v5899_v62  ;;  %v14382_v62 = vld [vmem:[#allocation16 + $0x3e0] ss:$16 sps:$4 sm:$0xff]  }
 0xa62   :  { %13445 = vmatpush3.bf16.xpose.msra.mxu0 %v6179_v0  ;;  %13451 = vmatpush3.bf16.msra.mxu1 %v6237_v2  ;;  %v14343_v2 = vld [vmem:[#allocation16 + $0x308] ss:$16 sps:$4 sm:$0xff]  }
 0xa63   :  { %13446 = vmatprep.mubr.msk.bf16.mxu0 %vm15365_vm0, %v15364_v34  ;;  %13452 = vmatprep.mubr.msk.bf16.mxu1 %vm15365_vm0, %v15364_v34 }
 0xa64   :  { %6472 = vmatprep.subr.bf16.mxu0 %v14342_v29  ;;  %6513 = vmatprep.subr.bf16.mxu1 %v14345_v30 }
 0xa69   :  { %13447 = vmatmul.mubr.bf16.vlgmr.msra.gmra.mrb[44].mxu0 %v6178_v35  ;;  %v14351_v35 = vld [vmem:[#allocation16 + $0x32c] ss:$16 sps:$4 sm:$0xff]  }
 0xa6a   :  { %6504 = vmatprep.mubr.bf16.mxu0 %v15366_v53 }
 0xb34   :  { %v6126_v42 = vpop.f32.mrb[40].mxu0  ;;  %v6167_v6 = vpop.f32.mrb[40].mxu1 }
 0xb35   :  { %v15916_v56 = vadd.f32 %v6126_v42, %v15885_v16  ;;  %v15919_v38 = vadd.f32 %v6167_v6, %v15887_v17  ;;  %v6128_v8 = vpop.f32.mrb[41].mxu0  ;;  %v6169_v7 = vpop.f32.mrb[41].mxu1  ;;  %v14349_v42 = vld [vmem:[#allocation16 + $0x328] ss:$16 sps:$4 sm:$0xff]   ;;  %v14357_v6 = vld [vmem:[#allocation16 + $0x34c] ss:$16 sps:$4 sm:$0xff]  }
 0xb36   :  { %v15922_v61 = vadd.f32 %v6128_v8, %v15889_v54  ;;  %v15925_v9 = vadd.f32 %v6169_v7, %v15891_v25  ;;  %v6130_v58 = vpop.f32.mrb[42].mxu0  ;;  %v6171_v10 = vpop.f32.mrb[42].mxu1  ;;  %v14340_v25 = vld [vmem:[#allocation16 + $0x300] ss:$16 sps:$4 sm:$0xff]   ;;  %v14355_v8 = vld [vmem:[#allocation16 + $0x348] ss:$16 sps:$4 sm:$0xff]  }
 0xb37   :  { %v6131_v11 = vpop.f32.mrb[43].mxu0  ;;  %v6172_v12 = vpop.f32.mrb[43].mxu1  ;;  %6473 = vmatpush1.bf16.msra.mxu0 %v14340_v25  ;;  %v14363_v7 = vld [vmem:[#allocation16 + $0x36c] ss:$16 sps:$4 sm:$0xff]   ;;  %v14361_v58 = vld [vmem:[#allocation16 + $0x368] ss:$16 sps:$4 sm:$0xff]  }
 0xb38   :  { %6474 = vmatprep.subr.bf16.mxu0 %v14348_v31  ;;  %v14369_v10 = vld [vmem:[#allocation16 + $0x38c] ss:$16 sps:$4 sm:$0xff]   ;;  %v14367_v11 = vld [vmem:[#allocation16 + $0x388] ss:$16 sps:$4 sm:$0xff]   ;;  %v14396_v31 = vld [vmem:[#allocation17 + $0x24] ss:$16 sps:$4 sm:$0xff]  }
 0xb39   :  { %v14375_v12 = vld [vmem:[#allocation16 + $0x3ac] ss:$16 sps:$4 sm:$0xff]  }
 0xb3b   :  { %6475 = vmatpush1.bf16.msra.mxu0 %v14346_v3  ;;  %v14399_v3 = vld [vmem:[#allocation17 + $0x2c] ss:$16 sps:$4 sm:$0xff]  }
 0xb3c   :  { %v6214_v13 = vpop.f32.mrb[44].mxu0  ;;  %6476 = vmatprep.subr.bf16.mxu0 %v14354_v37 }
 0xb3d   :  { %v13448_v15 = vpop.f32.mrb[45].mxu0  ;;  %v6220_v16 = vsel %vm5086_vm2, %v6214_v13, -inf }
 0xb3e   :  { %6221 = vmax.xlane.f32.xlu0 %v6220_v16  ;;  %v6217_v33 = vpop.f32.mrb[46].mxu0  ;;  %v14381_v15 = vld [vmem:[#allocation16 + $0x3cc] ss:$16 sps:$4 sm:$0xff]   ;;  %v14379_v16 = vld [vmem:[#allocation16 + $0x3c8] ss:$16 sps:$4 sm:$0xff]  }
 0xb3f   :  { %v13449_v17 = vpop.f32.mrb[47].mxu0  ;;  %6477 = vmatpush1.bf16.msra.mxu0 %v14352_v39  ;;  %v14387_v33 = vld [vmem:[#allocation16 + $0x3ec] ss:$16 sps:$4 sm:$0xff]   ;;  %v14394_v39 = vld [vmem:[#allocation17 + $0x20] ss:$16 sps:$4 sm:$0xff]  }
 0xb40   :  { %6478 = vmatprep.subr.bf16.mxu0 %v14360_v40  ;;  %v14385_v17 = vld [vmem:[#allocation16 + $0x3e8] ss:$16 sps:$4 sm:$0xff]  }
 0xb41   :  { %v14397_v40 = vld [vmem:[#allocation17 + $0x28] ss:$16 sps:$4 sm:$0xff]  }
 0xb43   :  { %6479 = vmatpush1.bf16.msra.mxu0 %v14358_v44  ;;  %v14402_v44 = vld [vmem:[#allocation17 + $0x44] ss:$16 sps:$4 sm:$0xff]  }
 0xb44   :  { %6480 = vmatprep.subr.bf16.mxu0 %v14366_v43  ;;  %v14405_v43 = vld [vmem:[#allocation17 + $0x4c] ss:$16 sps:$4 sm:$0xff]  }
 0xb47   :  { %6481 = vmatpush1.bf16.msra.mxu0 %v14364_v49  ;;  %v14400_v49 = vld [vmem:[#allocation17 + $0x40] ss:$16 sps:$4 sm:$0xff]  }
 0xb48   :  { %6482 = vmatprep.subr.bf16.mxu0 %v14372_v50  ;;  %v14403_v50 = vld [vmem:[#allocation17 + $0x48] ss:$16 sps:$4 sm:$0xff]  }
 0xb4b   :  { %6483 = vmatpush1.bf16.msra.mxu0 %v14370_v51  ;;  %v14408_v51 = vld [vmem:[#allocation17 + $0x64] ss:$16 sps:$4 sm:$0xff]  }
 0xb4c   :  { %6484 = vmatprep.subr.bf16.mxu0 %v14378_v55  ;;  %v14411_v55 = vld [vmem:[#allocation17 + $0x6c] ss:$16 sps:$4 sm:$0xff]  }
 0xb4f   :  { %6485 = vmatpush1.bf16.msra.mxu0 %v14376_v57  ;;  %v14406_v57 = vld [vmem:[#allocation17 + $0x60] ss:$16 sps:$4 sm:$0xff]  }
 0xb50   :  { %6486 = vmatprep.subr.bf16.mxu0 %v14384_v59  ;;  %v14409_v59 = vld [vmem:[#allocation17 + $0x68] ss:$16 sps:$4 sm:$0xff]  }
 0xb53   :  { %6487 = vmatpush1.bf16.msra.mxu0 %v14382_v62  ;;  %v14414_v62 = vld [vmem:[#allocation17 + $0x84] ss:$16 sps:$4 sm:$0xff]  }
 0xbcb   :  { %v6222_v18 = vpop.xlane.xlu0 %6221 }
 0xbcc   :  { %v6223_v27 = vsub.f32 %v6214_v13, %v6222_v18  ;;  %v14373_v13 = vld [vmem:[#allocation16 + $0x3a8] ss:$16 sps:$4 sm:$0xff]   ;;  %v14390_v18 = vld [vmem:[#allocation17 + $0x4] ss:$16 sps:$4 sm:$0xff]  }
 0xbcd   :  { %7374 = vmatprep.subr.bf16.mxu0 %v14390_v18  ;;  %v14447_v18 = vld [vmem:[#allocation17 + $0x12c] ss:$16 sps:$4 sm:$0xff]  }
 0xbce   :  { %v6224_v28 = vmul.f32 1.442695, %v6223_v27  ;;  %v14393_v27 = vld [vmem:[#allocation17 + $0xc] ss:$16 sps:$4 sm:$0xff]  }
 0xbd0   :  { %14976 = vpow2.f32 %v6224_v28 }
 0xbda   :  { %v14977_v54 = vpop.eup %14976 }
 0xbdb   :  { %v6226_v32 = vsel %vm5086_vm2, %v14977_v54, 0.0 }
 0xbdc   :  { %6227 = vadd.xlane.f32.xlu1 %v6226_v32  ;;  %v14391_v32 = vld [vmem:[#allocation17 + $0x8] ss:$16 sps:$4 sm:$0xff]  }
 0xc69   :  { %v6228_v63 = vpop.xlane.xlu1 %6227 }
 0xc6a   :  { %14978 = vrcp.f32 %v6228_v63  ;;  %v14412_v63 = vld [vmem:[#allocation17 + $0x80] ss:$16 sps:$4 sm:$0xff]  }
 0xc74   :  { %v14979_v0 = vpop.eup %14978 }
 0xc75   :  { %v6230_v5 = vmul.f32 %v14979_v0, %v14977_v54  ;;  %v14388_v54 = vld [vmem:[#allocation17] ss:$16 sps:$4 sm:$0xff]   ;;  %v14415_v0 = vld [vmem:[#allocation17 + $0x88] ss:$16 sps:$4 sm:$0xff]  }
 0xc77   :  { %v6231_v4 = vpack.c.bf16 %v6230_v5, %v6230_v5  ;;  %v14420_v5 = vld [vmem:[#allocation17 + $0xa4] ss:$16 sps:$4 sm:$0xff]  }
 0xc79   :  { %13453 = vmatmul.mubr.msk.bf16.vlgmr.msra.gmra.mrb[44].mxu1 %vm5086_vm2, %v6231_v4  ;;  %v14418_v4 = vld [vmem:[#allocation17 + $0xa0] ss:$16 sps:$4 sm:$0xff]  }
 0xc7a   :  { %6514 = vmatpush1.bf16.msra.mxu1 %v14343_v2  ;;  %6545 = vmatprep.mubr.bf16.mxu1 %v15366_v53  ;;  %v14423_v2 = vld [vmem:[#allocation17 + $0xac] ss:$16 sps:$4 sm:$0xff]  }
 0xc7b   :  { %6515 = vmatprep.subr.bf16.mxu1 %v14351_v35  ;;  %v14421_v35 = vld [vmem:[#allocation17 + $0xa8] ss:$16 sps:$4 sm:$0xff]  }
 0xc7e   :  { %6516 = vmatpush1.bf16.msra.mxu1 %v14349_v42  ;;  %v14426_v42 = vld [vmem:[#allocation17 + $0xc4] ss:$16 sps:$4 sm:$0xff]  }
 0xc7f   :  { %6517 = vmatprep.subr.bf16.mxu1 %v14357_v6  ;;  %v14429_v6 = vld [vmem:[#allocation17 + $0xcc] ss:$16 sps:$4 sm:$0xff]  }
 0xc82   :  { %6518 = vmatpush1.bf16.msra.mxu1 %v14355_v8  ;;  %v14424_v8 = vld [vmem:[#allocation17 + $0xc0] ss:$16 sps:$4 sm:$0xff]  }
 0xc83   :  { %6519 = vmatprep.subr.bf16.mxu1 %v14363_v7  ;;  %v14427_v7 = vld [vmem:[#allocation17 + $0xc8] ss:$16 sps:$4 sm:$0xff]  }
 0xc86   :  { %6520 = vmatpush1.bf16.msra.mxu1 %v14361_v58  ;;  %v14432_v58 = vld [vmem:[#allocation17 + $0xe4] ss:$16 sps:$4 sm:$0xff]  }
 0xc87   :  { %6521 = vmatprep.subr.bf16.mxu1 %v14369_v10  ;;  %v14435_v10 = vld [vmem:[#allocation17 + $0xec] ss:$16 sps:$4 sm:$0xff]  }
 0xc8a   :  { %6522 = vmatpush1.bf16.msra.mxu1 %v14367_v11  ;;  %v14430_v11 = vld [vmem:[#allocation17 + $0xe0] ss:$16 sps:$4 sm:$0xff]  }
 0xc8b   :  { %6523 = vmatprep.subr.bf16.mxu1 %v14375_v12  ;;  %v14433_v12 = vld [vmem:[#allocation17 + $0xe8] ss:$16 sps:$4 sm:$0xff]  }
 0xc8e   :  { %6524 = vmatpush1.bf16.msra.mxu1 %v14373_v13  ;;  %v14438_v13 = vld [vmem:[#allocation17 + $0x104] ss:$16 sps:$4 sm:$0xff]  }
 0xc8f   :  { %6525 = vmatprep.subr.bf16.mxu1 %v14381_v15  ;;  %v14441_v15 = vld [vmem:[#allocation17 + $0x10c] ss:$16 sps:$4 sm:$0xff]  }
 0xc92   :  { %6526 = vmatpush1.bf16.msra.mxu1 %v14379_v16  ;;  %v14436_v16 = vld [vmem:[#allocation17 + $0x100] ss:$16 sps:$4 sm:$0xff]  }
 0xc93   :  { %6527 = vmatprep.subr.bf16.mxu1 %v14387_v33  ;;  %v14439_v33 = vld [vmem:[#allocation17 + $0x108] ss:$16 sps:$4 sm:$0xff]  }
 0xc96   :  { %6528 = vmatpush1.bf16.msra.mxu1 %v14385_v17  ;;  %v14444_v17 = vld [vmem:[#allocation17 + $0x124] ss:$16 sps:$4 sm:$0xff]  }
 0xc97   :  { %7456 = vmatprep.subr.bf16.mxu1 %v14393_v27  ;;  %v14442_v27 = vld [vmem:[#allocation17 + $0x120] ss:$16 sps:$4 sm:$0xff]  }
 0xd4c   :  { %v6273_v28 = vpop.f32.mrb[44].mxu1 }
 0xd4d   :  { %v6279_v25 = vpack.c.bf16 %v6273_v28, %v6273_v28  ;;  %v13454_v29 = vpop.f32.mrb[45].mxu1  ;;  %v14445_v28 = vld [vmem:[#allocation17 + $0x128] ss:$16 sps:$4 sm:$0xff]  }
 0xd4e   :  { %v6276_v30 = vpop.f32.mrb[46].mxu1  ;;  %v14451_v29 = vld [vmem:[#allocation17 + $0x148] ss:$16 sps:$4 sm:$0xff]  }
 0xd4f   :  { %v13455_v37 = vpop.f32.mrb[47].mxu1  ;;  %6505 = vmatmul.mubr.bf16.vlgmr.msra.gmra.mrb[48].mxu0 %v6279_v25  ;;  %6546 = vmatmul.mubr.bf16.vlgmr.msra.gmra.mrb[48].mxu1 %v6279_v25  ;;  %v14448_v25 = vld [vmem:[#allocation17 + $0x140] ss:$16 sps:$4 sm:$0xff]   ;;  %v14456_v30 = vld [vmem:[#allocation17 + $0x164] ss:$16 sps:$4 sm:$0xff]  }
 0xd50   :  { %7375 = vmatpush1.bf16.msra.mxu0 %v14388_v54  ;;  %7457 = vmatpush1.bf16.msra.mxu1 %v14391_v32  ;;  %v14450_v54 = vld [vmem:[#allocation17 + $0x144] ss:$16 sps:$4 sm:$0xff]   ;;  %v14453_v32 = vld [vmem:[#allocation17 + $0x14c] ss:$16 sps:$4 sm:$0xff]   ;;  %v14457_v37 = vld [vmem:[#allocation17 + $0x168] ss:$16 sps:$4 sm:$0xff]  }
 0xd51   :  { %7406 = vmatprep.mubr.bf16.mxu0 %v15755_v26  ;;  %7488 = vmatprep.mubr.bf16.mxu1 %v15755_v26  ;;  %v14417_v26 = vld [vmem:[#allocation17 + $0x8c] ss:$16 sps:$4 sm:$0xff]  }
 0xd52   :  { %7376 = vmatprep.subr.bf16.mxu0 %v14396_v31  ;;  %7458 = vmatprep.subr.bf16.mxu1 %v14399_v3  ;;  %v14459_v31 = vld [vmem:[#allocation17 + $0x16c] ss:$16 sps:$4 sm:$0xff]   ;;  %v14454_v3 = vld [vmem:[#allocation17 + $0x160] ss:$16 sps:$4 sm:$0xff]  }
 0xd54   :  { %7377 = vmatpush1.bf16.msra.mxu0 %v14394_v39  ;;  %7459 = vmatpush1.bf16.msra.mxu1 %v14397_v40  ;;  %v14462_v39 = vld [vmem:[#allocation17 + $0x184] ss:$16 sps:$4 sm:$0xff]   ;;  %v14465_v40 = vld [vmem:[#allocation17 + $0x18c] ss:$16 sps:$4 sm:$0xff]  }
 0xd55   :  { %7378 = vmatprep.subr.bf16.mxu0 %v14402_v44  ;;  %7460 = vmatprep.subr.bf16.mxu1 %v14405_v43  ;;  %v14460_v44 = vld [vmem:[#allocation17 + $0x180] ss:$16 sps:$4 sm:$0xff]   ;;  %v14463_v43 = vld [vmem:[#allocation17 + $0x188] ss:$16 sps:$4 sm:$0xff]  }
 0xd58   :  { %7379 = vmatpush1.bf16.msra.mxu0 %v14400_v49  ;;  %7461 = vmatpush1.bf16.msra.mxu1 %v14403_v50  ;;  %v14468_v49 = vld [vmem:[#allocation17 + $0x1a4] ss:$16 sps:$4 sm:$0xff]   ;;  %v14471_v50 = vld [vmem:[#allocation17 + $0x1ac] ss:$16 sps:$4 sm:$0xff]  }
 0xd59   :  { %7380 = vmatprep.subr.bf16.mxu0 %v14408_v51  ;;  %7462 = vmatprep.subr.bf16.mxu1 %v14411_v55  ;;  %v14466_v51 = vld [vmem:[#allocation17 + $0x1a0] ss:$16 sps:$4 sm:$0xff]   ;;  %v14469_v55 = vld [vmem:[#allocation17 + $0x1a8] ss:$16 sps:$4 sm:$0xff]  }
 0xd5c   :  { %7381 = vmatpush1.bf16.msra.mxu0 %v14406_v57  ;;  %7463 = vmatpush1.bf16.msra.mxu1 %v14409_v59  ;;  %v14474_v57 = vld [vmem:[#allocation17 + $0x1c4] ss:$16 sps:$4 sm:$0xff]   ;;  %v14477_v59 = vld [vmem:[#allocation17 + $0x1cc] ss:$16 sps:$4 sm:$0xff]  }
 0xd5d   :  { %7382 = vmatprep.subr.bf16.mxu0 %v14414_v62  ;;  %7464 = vmatprep.subr.bf16.mxu1 %v14417_v26  ;;  %v14472_v62 = vld [vmem:[#allocation17 + $0x1c0] ss:$16 sps:$4 sm:$0xff]   ;;  %v14475_v26 = vld [vmem:[#allocation17 + $0x1c8] ss:$16 sps:$4 sm:$0xff]  }
 0xd60   :  { %7383 = vmatpush1.bf16.msra.mxu0 %v14412_v63  ;;  %7465 = vmatpush1.bf16.msra.mxu1 %v14415_v0  ;;  %v14480_v63 = vld [vmem:[#allocation17 + $0x1e4] ss:$16 sps:$4 sm:$0xff]   ;;  %v14483_v0 = vld [vmem:[#allocation17 + $0x1ec] ss:$16 sps:$4 sm:$0xff]  }
 0xd61   :  { %7384 = vmatprep.subr.bf16.mxu0 %v14420_v5  ;;  %7466 = vmatprep.subr.bf16.mxu1 %v14423_v2  ;;  %v14478_v5 = vld [vmem:[#allocation17 + $0x1e0] ss:$16 sps:$4 sm:$0xff]   ;;  %v14481_v2 = vld [vmem:[#allocation17 + $0x1e8] ss:$16 sps:$4 sm:$0xff]  }
 0xd64   :  { %7385 = vmatpush1.bf16.msra.mxu0 %v14418_v4  ;;  %7467 = vmatpush1.bf16.msra.mxu1 %v14421_v35  ;;  %v14486_v4 = vld [vmem:[#allocation17 + $0x204] ss:$16 sps:$4 sm:$0xff]   ;;  %v14489_v35 = vld [vmem:[#allocation17 + $0x20c] ss:$16 sps:$4 sm:$0xff]  }
 0xd65   :  { %7386 = vmatprep.subr.bf16.mxu0 %v14426_v42  ;;  %7468 = vmatprep.subr.bf16.mxu1 %v14429_v6  ;;  %v14484_v42 = vld [vmem:[#allocation17 + $0x200] ss:$16 sps:$4 sm:$0xff]   ;;  %v14487_v6 = vld [vmem:[#allocation17 + $0x208] ss:$16 sps:$4 sm:$0xff]  }
 0xd68   :  { %7387 = vmatpush1.bf16.msra.mxu0 %v14424_v8  ;;  %7469 = vmatpush1.bf16.msra.mxu1 %v14427_v7  ;;  %v14492_v8 = vld [vmem:[#allocation17 + $0x224] ss:$16 sps:$4 sm:$0xff]   ;;  %v14495_v7 = vld [vmem:[#allocation17 + $0x22c] ss:$16 sps:$4 sm:$0xff]  }
 0xd69   :  { %7388 = vmatprep.subr.bf16.mxu0 %v14432_v58  ;;  %7470 = vmatprep.subr.bf16.mxu1 %v14435_v10  ;;  %v14490_v58 = vld [vmem:[#allocation17 + $0x220] ss:$16 sps:$4 sm:$0xff]   ;;  %v14493_v10 = vld [vmem:[#allocation17 + $0x228] ss:$16 sps:$4 sm:$0xff]  }
 0xd6c   :  { %7389 = vmatpush1.bf16.msra.mxu0 %v14430_v11  ;;  %7471 = vmatpush1.bf16.msra.mxu1 %v14433_v12  ;;  %v14498_v11 = vld [vmem:[#allocation17 + $0x244] ss:$16 sps:$4 sm:$0xff]   ;;  %v14501_v12 = vld [vmem:[#allocation17 + $0x24c] ss:$16 sps:$4 sm:$0xff]  }
 0xd6d   :  { %7390 = vmatprep.subr.bf16.mxu0 %v14438_v13  ;;  %7472 = vmatprep.subr.bf16.mxu1 %v14441_v15  ;;  %v14496_v13 = vld [vmem:[#allocation17 + $0x240] ss:$16 sps:$4 sm:$0xff]   ;;  %v14499_v15 = vld [vmem:[#allocation17 + $0x248] ss:$16 sps:$4 sm:$0xff]  }
 0xd70   :  { %7391 = vmatpush1.bf16.msra.mxu0 %v14436_v16  ;;  %7473 = vmatpush1.bf16.msra.mxu1 %v14439_v33  ;;  %v14504_v16 = vld [vmem:[#allocation17 + $0x264] ss:$16 sps:$4 sm:$0xff]   ;;  %v14502_v33 = vld [vmem:[#allocation17 + $0x260] ss:$16 sps:$4 sm:$0xff]  }
 0xd71   :  { %7392 = vmatprep.subr.bf16.mxu0 %v14444_v17  ;;  %7474 = vmatprep.subr.bf16.mxu1 %v14447_v18  ;;  %v14505_v17 = vld [vmem:[#allocation17 + $0x268] ss:$16 sps:$4 sm:$0xff]   ;;  %v14510_v18 = vld [vmem:[#allocation17 + $0x284] ss:$16 sps:$4 sm:$0xff]  }
 0xd74   :  { %7393 = vmatpush1.bf16.msra.mxu0 %v14442_v27  ;;  %7475 = vmatpush1.bf16.msra.mxu1 %v14445_v28  ;;  %v14508_v27 = vld [vmem:[#allocation17 + $0x280] ss:$16 sps:$4 sm:$0xff]   ;;  %v14511_v28 = vld [vmem:[#allocation17 + $0x288] ss:$16 sps:$4 sm:$0xff]  }
 0xd75   :  { %7394 = vmatprep.subr.bf16.mxu0 %v14450_v54  ;;  %7476 = vmatprep.subr.bf16.mxu1 %v14453_v32  ;;  %v14516_v54 = vld [vmem:[#allocation17 + $0x2a4] ss:$16 sps:$4 sm:$0xff]   ;;  %v14519_v32 = vld [vmem:[#allocation17 + $0x2ac] ss:$16 sps:$4 sm:$0xff]  }
 0xd78   :  { %7395 = vmatpush1.bf16.msra.mxu0 %v14448_v25  ;;  %7477 = vmatpush1.bf16.msra.mxu1 %v14451_v29  ;;  %v14514_v25 = vld [vmem:[#allocation17 + $0x2a0] ss:$16 sps:$4 sm:$0xff]   ;;  %v14517_v29 = vld [vmem:[#allocation17 + $0x2a8] ss:$16 sps:$4 sm:$0xff]  }
 0xd79   :  { %7396 = vmatprep.subr.bf16.mxu0 %v14456_v30  ;;  %7478 = vmatprep.subr.bf16.mxu1 %v14459_v31  ;;  %v14522_v30 = vld [vmem:[#allocation17 + $0x2c4] ss:$16 sps:$4 sm:$0xff]   ;;  %v14525_v31 = vld [vmem:[#allocation17 + $0x2cc] ss:$16 sps:$4 sm:$0xff]  }
 0xd7c   :  { %7397 = vmatpush1.bf16.msra.mxu0 %v14454_v3  ;;  %7479 = vmatpush1.bf16.msra.mxu1 %v14457_v37  ;;  %v14520_v3 = vld [vmem:[#allocation17 + $0x2c0] ss:$16 sps:$4 sm:$0xff]   ;;  %v14523_v37 = vld [vmem:[#allocation17 + $0x2c8] ss:$16 sps:$4 sm:$0xff]  }
 0xd7d   :  { %7398 = vmatprep.subr.bf16.mxu0 %v14462_v39  ;;  %7480 = vmatprep.subr.bf16.mxu1 %v14465_v40  ;;  %v14528_v39 = vld [vmem:[#allocation17 + $0x2e4] ss:$16 sps:$4 sm:$0xff]   ;;  %v14531_v40 = vld [vmem:[#allocation17 + $0x2ec] ss:$16 sps:$4 sm:$0xff]  }
 0xd80   :  { %7399 = vmatpush1.bf16.msra.mxu0 %v14460_v44  ;;  %7481 = vmatpush1.bf16.msra.mxu1 %v14463_v43  ;;  %v14526_v44 = vld [vmem:[#allocation17 + $0x2e0] ss:$16 sps:$4 sm:$0xff]   ;;  %v14529_v43 = vld [vmem:[#allocation17 + $0x2e8] ss:$16 sps:$4 sm:$0xff]  }
 0xd81   :  { %7400 = vmatprep.subr.bf16.mxu0 %v14468_v49  ;;  %7482 = vmatprep.subr.bf16.mxu1 %v14471_v50  ;;  %v14534_v49 = vld [vmem:[#allocation17 + $0x304] ss:$16 sps:$4 sm:$0xff]   ;;  %v14537_v50 = vld [vmem:[#allocation17 + $0x30c] ss:$16 sps:$4 sm:$0xff]  }
 0xd84   :  { %7401 = vmatpush1.bf16.msra.mxu0 %v14466_v51  ;;  %7483 = vmatpush1.bf16.msra.mxu1 %v14469_v55  ;;  %v14532_v51 = vld [vmem:[#allocation17 + $0x300] ss:$16 sps:$4 sm:$0xff]   ;;  %v14535_v55 = vld [vmem:[#allocation17 + $0x308] ss:$16 sps:$4 sm:$0xff]  }
 0xd85   :  { %7402 = vmatprep.subr.bf16.mxu0 %v14474_v57  ;;  %7484 = vmatprep.subr.bf16.mxu1 %v14477_v59  ;;  %v14540_v57 = vld [vmem:[#allocation17 + $0x324] ss:$16 sps:$4 sm:$0xff]   ;;  %v14543_v59 = vld [vmem:[#allocation17 + $0x32c] ss:$16 sps:$4 sm:$0xff]  }
 0xd88   :  { %7403 = vmatpush1.bf16.msra.mxu0 %v14472_v62  ;;  %7485 = vmatpush1.bf16.msra.mxu1 %v14475_v26  ;;  %v14538_v62 = vld [vmem:[#allocation17 + $0x320] ss:$16 sps:$4 sm:$0xff]   ;;  %v14541_v26 = vld [vmem:[#allocation17 + $0x328] ss:$16 sps:$4 sm:$0xff]  }
 0xd89   :  { %7404 = vmatprep.subr.bf16.mxu0 %v14480_v63  ;;  %7486 = vmatprep.subr.bf16.mxu1 %v14483_v0  ;;  %v14546_v63 = vld [vmem:[#allocation17 + $0x344] ss:$16 sps:$4 sm:$0xff]   ;;  %v14549_v0 = vld [vmem:[#allocation17 + $0x34c] ss:$16 sps:$4 sm:$0xff]  }
 0xd8c   :  { %7405 = vmatpush1.bf16.msra.mxu0 %v14478_v5  ;;  %7487 = vmatpush1.bf16.msra.mxu1 %v14481_v2  ;;  %v14544_v5 = vld [vmem:[#allocation17 + $0x340] ss:$16 sps:$4 sm:$0xff]   ;;  %v14547_v2 = vld [vmem:[#allocation17 + $0x348] ss:$16 sps:$4 sm:$0xff]  }
 0xd8d   :  { %7415 = vmatprep.subr.bf16.mxu0 %v14486_v4  ;;  %7497 = vmatprep.subr.bf16.mxu1 %v14489_v35  ;;  %v14552_v4 = vld [vmem:[#allocation17 + $0x364] ss:$16 sps:$4 sm:$0xff]   ;;  %v14555_v35 = vld [vmem:[#allocation17 + $0x36c] ss:$16 sps:$4 sm:$0xff]  }
 0xd8f   :  { %7407 = vmatmul.mubr.bf16.vlgmr.msra.gmra.mrb[52].mxu0 %v15764_v52  ;;  %7489 = vmatmul.mubr.bf16.vlgmr.msra.gmra.mrb[52].mxu1 %v15764_v52  ;;  %v14507_v52 = vld [vmem:[#allocation17 + $0x26c] ss:$16 sps:$4 sm:$0xff]  }
 0xd90   :  { %7416 = vmatpush1.bf16.msra.mxu0 %v14484_v42  ;;  %7447 = vmatprep.mubr.bf16.mxu0 %v15768_v60  ;;  %v14550_v42 = vld [vmem:[#allocation17 + $0x360] ss:$16 sps:$4 sm:$0xff]  }
 0xd91   :  { %7498 = vmatpush1.bf16.msra.mxu1 %v14487_v6  ;;  %7529 = vmatprep.mubr.bf16.mxu1 %v15768_v60  ;;  %v14513_v60 = vld [vmem:[#allocation17 + $0x28c] ss:$16 sps:$4 sm:$0xff]   ;;  %v14553_v6 = vld [vmem:[#allocation17 + $0x368] ss:$16 sps:$4 sm:$0xff]  }
 0xd92   :  { %7417 = vmatprep.subr.bf16.mxu0 %v14492_v8  ;;  %7499 = vmatprep.subr.bf16.mxu1 %v14495_v7  ;;  %v14558_v8 = vld [vmem:[#allocation17 + $0x384] ss:$16 sps:$4 sm:$0xff]   ;;  %v14561_v7 = vld [vmem:[#allocation17 + $0x38c] ss:$16 sps:$4 sm:$0xff]  }
 0xd94   :  { %7418 = vmatpush1.bf16.msra.mxu0 %v14490_v58  ;;  %v14556_v58 = vld [vmem:[#allocation17 + $0x380] ss:$16 sps:$4 sm:$0xff]  }
 0xd95   :  { %7500 = vmatpush1.bf16.msra.mxu1 %v14493_v10  ;;  %7419 = vmatprep.subr.bf16.mxu0 %v14498_v11  ;;  %v14559_v10 = vld [vmem:[#allocation17 + $0x388] ss:$16 sps:$4 sm:$0xff]   ;;  %v14564_v11 = vld [vmem:[#allocation17 + $0x3a4] ss:$16 sps:$4 sm:$0xff]  }
 0xd96   :  { %7501 = vmatprep.subr.bf16.mxu1 %v14501_v12  ;;  %v14567_v12 = vld [vmem:[#allocation17 + $0x3ac] ss:$16 sps:$4 sm:$0xff]  }
 0xd98   :  { %7420 = vmatpush1.bf16.msra.mxu0 %v14496_v13  ;;  %v14562_v13 = vld [vmem:[#allocation17 + $0x3a0] ss:$16 sps:$4 sm:$0xff]  }
 0xd99   :  { %7502 = vmatpush1.bf16.msra.mxu1 %v14499_v15  ;;  %7421 = vmatprep.subr.bf16.mxu0 %v14504_v16  ;;  %v14565_v15 = vld [vmem:[#allocation17 + $0x3a8] ss:$16 sps:$4 sm:$0xff]   ;;  %v14570_v16 = vld [vmem:[#allocation17 + $0x3c4] ss:$16 sps:$4 sm:$0xff]  }
 0xd9a   :  { %7503 = vmatprep.subr.bf16.mxu1 %v14507_v52  ;;  %v14573_v52 = vld [vmem:[#allocation17 + $0x3cc] ss:$16 sps:$4 sm:$0xff]  }
 0xd9c   :  { %7422 = vmatpush1.bf16.msra.mxu0 %v14502_v33  ;;  %v14568_v33 = vld [vmem:[#allocation17 + $0x3c0] ss:$16 sps:$4 sm:$0xff]  }
 0xd9d   :  { %7504 = vmatpush1.bf16.msra.mxu1 %v14505_v17  ;;  %7423 = vmatprep.subr.bf16.mxu0 %v14510_v18  ;;  %v14571_v17 = vld [vmem:[#allocation17 + $0x3c8] ss:$16 sps:$4 sm:$0xff]   ;;  %v14576_v18 = vld [vmem:[#allocation17 + $0x3e4] ss:$16 sps:$4 sm:$0xff]  }
 0xd9e   :  { %7505 = vmatprep.subr.bf16.mxu1 %v14513_v60  ;;  %v14579_v60 = vld [vmem:[#allocation17 + $0x3ec] ss:$16 sps:$4 sm:$0xff]  }
 0xda0   :  { %7424 = vmatpush1.bf16.msra.mxu0 %v14508_v27  ;;  %v7538_v27 = vld [vmem:[#allocation19] sm:$0xff] }
 0xda1   :  { %7506 = vmatpush1.bf16.msra.mxu1 %v14511_v28  ;;  %7425 = vmatprep.subr.bf16.mxu0 %v14516_v54  ;;  %v7542_v28 = vld [vmem:[#allocation19 + $0x20] sm:$0xff]  ;;  %v7539_v54 = vld [vmem:[#allocation19 + $0x8] sm:$0xff] }
 0xda2   :  { %7507 = vmatprep.subr.bf16.mxu1 %v14519_v32  ;;  %v7543_v32 = vld [vmem:[#allocation19 + $0x28] sm:$0xff] }
 0xda4   :  { %7426 = vmatpush1.bf16.msra.mxu0 %v14514_v25  ;;  %v14574_v25 = vld [vmem:[#allocation17 + $0x3e0] ss:$16 sps:$4 sm:$0xff]  }
 0xda5   :  { %7508 = vmatpush1.bf16.msra.mxu1 %v14517_v29  ;;  %7427 = vmatprep.subr.bf16.mxu0 %v14522_v30  ;;  %v14577_v29 = vld [vmem:[#allocation17 + $0x3e8] ss:$16 sps:$4 sm:$0xff]   ;;  %v12861_v30 = vcombine.high %v7538_v27, %v7542_v28 }
 0xda6   :  { %7509 = vmatprep.subr.bf16.mxu1 %v14525_v31  ;;  %v12863_v31 = vcombine.high %v7539_v54, %v7543_v32 }
 0xda8   :  { %7428 = vmatpush1.bf16.msra.mxu0 %v14520_v3  ;;  %v7546_v3 = vld [vmem:[#allocation19 + $0x40] sm:$0xff] }
 0xda9   :  { %7510 = vmatpush1.bf16.msra.mxu1 %v14523_v37  ;;  %7429 = vmatprep.subr.bf16.mxu0 %v14528_v39  ;;  %v7550_v37 = vld [vmem:[#allocation19 + $0x60] sm:$0xff]  ;;  %v12860_v39 = vcombine.low %v7538_v27, %v7542_v28 }
 0xdaa   :  { %7511 = vmatprep.subr.bf16.mxu1 %v14531_v40  ;;  %v7547_v40 = vld [vmem:[#allocation19 + $0x48] sm:$0xff] }
 0xdac   :  { %7430 = vmatpush1.bf16.msra.mxu0 %v14526_v44  ;;  %v7551_v44 = vld [vmem:[#allocation19 + $0x68] sm:$0xff] }
 0xdad   :  { %7512 = vmatpush1.bf16.msra.mxu1 %v14529_v43  ;;  %7431 = vmatprep.subr.bf16.mxu0 %v14534_v49  ;;  %v12862_v43 = vcombine.low %v7539_v54, %v7543_v32  ;;  %v12869_v49 = vcombine.high %v7546_v3, %v7550_v37  ;;  %v7586_v32 = vld [vmem:[#allocation19 + $0x180] sm:$0xff] }
 0xdae   :  { %7513 = vmatprep.subr.bf16.mxu1 %v14537_v50  ;;  %v7554_v50 = vld [vmem:[#allocation19 + $0x80] sm:$0xff] }
 0xdb0   :  { %7432 = vmatpush1.bf16.msra.mxu0 %v14532_v51  ;;  %v7558_v51 = vld [vmem:[#allocation19 + $0xa0] sm:$0xff] }
 0xdb1   :  { %7514 = vmatpush1.bf16.msra.mxu1 %v14535_v55  ;;  %7433 = vmatprep.subr.bf16.mxu0 %v14540_v57  ;;  %v12871_v55 = vcombine.high %v7547_v40, %v7551_v44  ;;  %v7555_v57 = vld [vmem:[#allocation19 + $0x88] sm:$0xff] }
 0xdb2   :  { %7515 = vmatprep.subr.bf16.mxu1 %v14543_v59  ;;  %v7559_v59 = vld [vmem:[#allocation19 + $0xa8] sm:$0xff] }
 0xdb4   :  { %7434 = vmatpush1.bf16.msra.mxu0 %v14538_v62  ;;  %v12868_v62 = vcombine.low %v7546_v3, %v7550_v37 }
 0xdb5   :  { %7516 = vmatpush1.bf16.msra.mxu1 %v14541_v26  ;;  %7435 = vmatprep.subr.bf16.mxu0 %v14546_v63  ;;  %v12870_v26 = vcombine.low %v7547_v40, %v7551_v44  ;;  %v12877_v63 = vcombine.high %v7554_v50, %v7558_v51  ;;  %v7594_v40 = vld [vmem:[#allocation19 + $0x1c0] sm:$0xff] }
 0xdb6   :  { %7517 = vmatprep.subr.bf16.mxu1 %v14549_v0  ;;  %v12879_v0 = vcombine.high %v7555_v57, %v7559_v59  ;;  %v7598_v44 = vld [vmem:[#allocation19 + $0x1e0] sm:$0xff] }
 0xdb8   :  { %7436 = vmatpush1.bf16.msra.mxu0 %v14544_v5  ;;  %v7562_v5 = vld [vmem:[#allocation19 + $0xc0] sm:$0xff] }
 0xdb9   :  { %7518 = vmatpush1.bf16.msra.mxu1 %v14547_v2  ;;  %7437 = vmatprep.subr.bf16.mxu0 %v14552_v4  ;;  %v7566_v2 = vld [vmem:[#allocation19 + $0xe0] sm:$0xff]  ;;  %v7563_v4 = vld [vmem:[#allocation19 + $0xc8] sm:$0xff] }
 0xdba   :  { %7519 = vmatprep.subr.bf16.mxu1 %v14555_v35  ;;  %v7567_v35 = vld [vmem:[#allocation19 + $0xe8] sm:$0xff] }
 0xdbc   :  { %7438 = vmatpush1.bf16.msra.mxu0 %v14550_v42  ;;  %v12876_v42 = vcombine.low %v7554_v50, %v7558_v51 }
 0xdbd   :  { %7520 = vmatpush1.bf16.msra.mxu1 %v14553_v6  ;;  %7439 = vmatprep.subr.bf16.mxu0 %v14558_v8  ;;  %v12885_v6 = vcombine.high %v7562_v5, %v7566_v2  ;;  %v12887_v8 = vcombine.high %v7563_v4, %v7567_v35 }
 0xdbe   :  { %7521 = vmatprep.subr.bf16.mxu1 %v14561_v7  ;;  %v7570_v7 = vld [vmem:[#allocation19 + $0x100] sm:$0xff] }
 0xdc0   :  { %7440 = vmatpush1.bf16.msra.mxu0 %v14556_v58  ;;  %v7574_v58 = vld [vmem:[#allocation19 + $0x120] sm:$0xff] }
 0xdc1   :  { %7522 = vmatpush1.bf16.msra.mxu1 %v14559_v10  ;;  %7441 = vmatprep.subr.bf16.mxu0 %v14564_v11  ;;  %v7571_v10 = vld [vmem:[#allocation19 + $0x108] sm:$0xff] }
 0xdc2   :  { %7523 = vmatprep.subr.bf16.mxu1 %v14567_v12  ;;  %v7575_v11 = vld [vmem:[#allocation19 + $0x128] sm:$0xff]  ;;  %v12884_v12 = vcombine.low %v7562_v5, %v7566_v2 }
 0xdc3   :  { %v12894_v27 = vcombine.low %v7571_v10, %v7575_v11 }
 0xdc4   :  { %7442 = vmatpush1.bf16.msra.mxu0 %v14562_v13  ;;  %v12886_v13 = vcombine.low %v7563_v4, %v7567_v35  ;;  %v7610_v35 = vld [vmem:[#allocation19 + $0x240] sm:$0xff] }
 0xdc5   :  { %7524 = vmatpush1.bf16.msra.mxu1 %v14565_v15  ;;  %7443 = vmatprep.subr.bf16.mxu0 %v14570_v16  ;;  %v12893_v15 = vcombine.high %v7570_v7, %v7574_v58  ;;  %v12895_v16 = vcombine.high %v7571_v10, %v7575_v11  ;;  %v7618_v11 = vld [vmem:[#allocation19 + $0x280] sm:$0xff] }
 0xdc6   :  { %7525 = vmatprep.subr.bf16.mxu1 %v14573_v52  ;;  %v7578_v52 = vld [vmem:[#allocation19 + $0x140] sm:$0xff] }
 0xdc8   :  { %7444 = vmatpush1.bf16.msra.mxu0 %v14568_v33  ;;  %v7582_v33 = vld [vmem:[#allocation19 + $0x160] sm:$0xff] }
 0xdc9   :  { %7526 = vmatpush1.bf16.msra.mxu1 %v14571_v17  ;;  %7445 = vmatprep.subr.bf16.mxu0 %v14576_v18  ;;  %v7579_v17 = vld [vmem:[#allocation19 + $0x148] sm:$0xff]  ;;  %v12901_v28 = vcombine.high %v7578_v52, %v7582_v33 }
 0xdca   :  { %7527 = vmatprep.subr.bf16.mxu1 %v14579_v60  ;;  %v7583_v18 = vld [vmem:[#allocation19 + $0x168] sm:$0xff]  ;;  %v12892_v60 = vcombine.low %v7570_v7, %v7574_v58 }
 0xdcb   :  { %v12903_v54 = vcombine.high %v7579_v17, %v7583_v18  ;;  %v12902_v3 = vcombine.low %v7579_v17, %v7583_v18  ;;  %v7626_v18 = vld [vmem:[#allocation19 + $0x2c0] sm:$0xff] }
 0xdcc   :  { %7446 = vmatpush1.bf16.msra.mxu0 %v14574_v25  ;;  %v7590_v25 = vld [vmem:[#allocation19 + $0x1a0] sm:$0xff] }
 0xdcd   :  { %7528 = vmatpush1.bf16.msra.mxu1 %v14577_v29  ;;  %9116 = vmatprep.subr.bf16.mxu0 %v12861_v30  ;;  %v7587_v29 = vld [vmem:[#allocation19 + $0x188] sm:$0xff]  ;;  %v12909_v37 = vcombine.high %v7586_v32, %v7590_v25  ;;  %v12908_v50 = vcombine.low %v7586_v32, %v7590_v25 }
 0xdce   :  { %9198 = vmatprep.subr.bf16.mxu1 %v12863_v31  ;;  %v7591_v30 = vld [vmem:[#allocation19 + $0x1a8] sm:$0xff]  ;;  %v12900_v31 = vcombine.low %v7578_v52, %v7582_v33 }
 0xdcf   :  { %7448 = vmatmul.mubr.bf16.vlgmr.msra.gmra.mrb[52].mxu0 %v15776_v20  ;;  %v12910_v51 = vcombine.low %v7587_v29, %v7591_v30 }
 0xdd0   :  { %7530 = vmatmul.mubr.bf16.vlgmr.msra.gmra.mrb[52].mxu1 %v15776_v20  ;;  %9117 = vmatpush1.bf16.msra.mxu0 %v12860_v39  ;;  %v12878_v20 = vcombine.low %v7555_v57, %v7559_v59  ;;  %v12911_v39 = vcombine.high %v7587_v29, %v7591_v30  ;;  %v7602_v59 = vld [vmem:[#allocation19 + $0x200] sm:$0xff] }
 0xdd1   :  { %9148 = vmatprep.mubr.bf16.mxu0 %v15725_v41  ;;  %9199 = vmatpush1.bf16.msra.mxu1 %v12862_v43  ;;  %v7595_v43 = vld [vmem:[#allocation19 + $0x1c8] sm:$0xff]  ;;  %v7634_v30 = vld [vmem:[#allocation19 + $0x300] sm:$0xff] }
 0xdd2   :  { %9230 = vmatprep.mubr.bf16.mxu1 %v15725_v41  ;;  %9118 = vmatprep.subr.bf16.mxu0 %v12869_v49  ;;  %v7599_v49 = vld [vmem:[#allocation19 + $0x1e8] sm:$0xff] }
 0xdd3   :  { %9200 = vmatprep.subr.bf16.mxu1 %v12871_v55  ;;  %v12917_v55 = vcombine.high %v7594_v40, %v7598_v44  ;;  %v12919_v57 = vcombine.high %v7595_v43, %v7599_v49  ;;  %v12918_v5 = vcombine.low %v7595_v43, %v7599_v49  ;;  %v7642_v49 = vld [vmem:[#allocation19 + $0x340] sm:$0xff] }
 0xdd4   :  { %9119 = vmatpush1.bf16.msra.mxu0 %v12868_v62  ;;  %v7606_v62 = vld [vmem:[#allocation19 + $0x220] sm:$0xff] }
 0xdd5   :  { %9201 = vmatpush1.bf16.msra.mxu1 %v12870_v26  ;;  %9120 = vmatprep.subr.bf16.mxu0 %v12877_v63  ;;  %v7603_v26 = vld [vmem:[#allocation19 + $0x208] sm:$0xff]  ;;  %v12925_v2 = vcombine.high %v7602_v59, %v7606_v62 }
 0xdd6   :  { %9202 = vmatprep.subr.bf16.mxu1 %v12879_v0  ;;  %v7607_v63 = vld [vmem:[#allocation19 + $0x228] sm:$0xff]  ;;  %v12916_v0 = vcombine.low %v7594_v40, %v7598_v44 }
 0xdd7   :  { %v12927_v4 = vcombine.high %v7603_v26, %v7607_v63  ;;  %v12926_v7 = vcombine.low %v7603_v26, %v7607_v63  ;;  %v7650_v63 = vld [vmem:[#allocation19 + $0x380] sm:$0xff] }
 0xdd8   :  { %9121 = vmatpush1.bf16.msra.mxu0 %v12876_v42  ;;  %v7614_v42 = vld [vmem:[#allocation19 + $0x260] sm:$0xff] }
 0xdd9   :  { %9203 = vmatpush1.bf16.msra.mxu1 %v12878_v20  ;;  %9122 = vmatprep.subr.bf16.mxu0 %v12885_v6  ;;  %v7611_v20 = vld [vmem:[#allocation19 + $0x248] sm:$0xff]  ;;  %v12933_v58 = vcombine.high %v7610_v35, %v7614_v42 }
 0xdda   :  { %9204 = vmatprep.subr.bf16.mxu1 %v12887_v8  ;;  %v7615_v6 = vld [vmem:[#allocation19 + $0x268] sm:$0xff]  ;;  %v12924_v8 = vcombine.low %v7602_v59, %v7606_v62 }
 0xddb   :  { %v12935_v10 = vcombine.high %v7611_v20, %v7615_v6  ;;  %v12934_v52 = vcombine.low %v7611_v20, %v7615_v6  ;;  %v7658_v6 = vld [vmem:[#allocation19 + $0x3c0] sm:$0xff] }
 0xddc   :  { %9123 = vmatpush1.bf16.msra.mxu0 %v12884_v12  ;;  %v7622_v12 = vld [vmem:[#allocation19 + $0x2a0] sm:$0xff] }
 0xddd   :  { %9205 = vmatpush1.bf16.msra.mxu1 %v12886_v13  ;;  %9124 = vmatprep.subr.bf16.mxu0 %v12893_v15  ;;  %v7619_v13 = vld [vmem:[#allocation19 + $0x288] sm:$0xff]  ;;  %v12941_v33 = vcombine.high %v7618_v11, %v7622_v12 }
 0xdde   :  { %9206 = vmatprep.subr.bf16.mxu1 %v12895_v16  ;;  %v7623_v15 = vld [vmem:[#allocation19 + $0x2a8] sm:$0xff]  ;;  %v12932_v16 = vcombine.low %v7610_v35, %v7614_v42 }
 0xddf   :  { %v12943_v17 = vcombine.high %v7619_v13, %v7623_v15  ;;  %v12942_v32 = vcombine.low %v7619_v13, %v7623_v15  ;;  %v7666_v15 = vld [vmem:[#allocation19 + $0x400] sm:$0xff] }
 0xde0   :  { %9125 = vmatpush1.bf16.msra.mxu0 %v12892_v60  ;;  %v7630_v60 = vld [vmem:[#allocation19 + $0x2e0] sm:$0xff] }
 0xde1   :  { %9207 = vmatpush1.bf16.msra.mxu1 %v12894_v27  ;;  %9126 = vmatprep.subr.bf16.mxu0 %v12901_v28  ;;  %v7627_v27 = vld [vmem:[#allocation19 + $0x2c8] sm:$0xff]  ;;  %v12949_v25 = vcombine.high %v7626_v18, %v7630_v60 }
 0xde2   :  { %9208 = vmatprep.subr.bf16.mxu1 %v12903_v54  ;;  %v7631_v28 = vld [vmem:[#allocation19 + $0x2e8] sm:$0xff]  ;;  %v12940_v54 = vcombine.low %v7618_v11, %v7622_v12 }
 0xde3   :  { %v12951_v29 = vcombine.high %v7627_v27, %v7631_v28  ;;  %v12950_v40 = vcombine.low %v7627_v27, %v7631_v28  ;;  %v7674_v28 = vld [vmem:[#allocation19 + $0x440] sm:$0xff] }
 0xde4   :  { %9127 = vmatpush1.bf16.msra.mxu0 %v12900_v31  ;;  %v7638_v31 = vld [vmem:[#allocation19 + $0x320] sm:$0xff] }
 0xde5   :  { %9209 = vmatpush1.bf16.msra.mxu1 %v12902_v3  ;;  %9128 = vmatprep.subr.bf16.mxu0 %v12909_v37  ;;  %v7635_v3 = vld [vmem:[#allocation19 + $0x308] sm:$0xff]  ;;  %v12957_v44 = vcombine.high %v7634_v30, %v7638_v31 }
 0xde6   :  { %9210 = vmatprep.subr.bf16.mxu1 %v12911_v39  ;;  %v7639_v37 = vld [vmem:[#allocation19 + $0x328] sm:$0xff]  ;;  %v12948_v39 = vcombine.low %v7626_v18, %v7630_v60 }
 0xde7   :  { %v12959_v43 = vcombine.high %v7635_v3, %v7639_v37  ;;  %v12958_v59 = vcombine.low %v7635_v3, %v7639_v37  ;;  %v7682_v3 = vld [vmem:[#allocation19 + $0x480] sm:$0xff] }
 0xde8   :  { %9129 = vmatpush1.bf16.msra.mxu0 %v12908_v50  ;;  %v7646_v50 = vld [vmem:[#allocation19 + $0x360] sm:$0xff] }
 0xde9   :  { %9211 = vmatpush1.bf16.msra.mxu1 %v12910_v51  ;;  %9130 = vmatprep.subr.bf16.mxu0 %v12917_v55  ;;  %v7643_v51 = vld [vmem:[#allocation19 + $0x348] sm:$0xff]  ;;  %v12965_v62 = vcombine.high %v7642_v49, %v7646_v50  ;;  %v7686_v37 = vld [vmem:[#allocation19 + $0x4a0] sm:$0xff] }
 0xdea   :  { %9212 = vmatprep.subr.bf16.mxu1 %v12919_v57  ;;  %v7647_v55 = vld [vmem:[#allocation19 + $0x368] sm:$0xff]  ;;  %v12956_v57 = vcombine.low %v7634_v30, %v7638_v31 }
 0xdeb   :  { %v12967_v26 = vcombine.high %v7643_v51, %v7647_v55  ;;  %v12966_v35 = vcombine.low %v7643_v51, %v7647_v55  ;;  %v7690_v55 = vld [vmem:[#allocation19 + $0x4c0] sm:$0xff] }
 0xdec   :  { %9131 = vmatpush1.bf16.msra.mxu0 %v12916_v0  ;;  %v7654_v0 = vld [vmem:[#allocation19 + $0x3a0] sm:$0xff] }
 0xded   :  { %9213 = vmatpush1.bf16.msra.mxu1 %v12918_v5  ;;  %9132 = vmatprep.subr.bf16.mxu0 %v12925_v2  ;;  %v7651_v5 = vld [vmem:[#allocation19 + $0x388] sm:$0xff]  ;;  %v12973_v42 = vcombine.high %v7650_v63, %v7654_v0 }
 0xdee   :  { %9214 = vmatprep.subr.bf16.mxu1 %v12927_v4  ;;  %v7655_v2 = vld [vmem:[#allocation19 + $0x3a8] sm:$0xff]  ;;  %v12964_v4 = vcombine.low %v7642_v49, %v7646_v50  ;;  %v13005_v50 = vcombine.high %v7682_v3, %v7686_v37 }
 0xdef   :  { %v12975_v20 = vcombine.high %v7651_v5, %v7655_v2  ;;  %v12974_v11 = vcombine.low %v7651_v5, %v7655_v2  ;;  %v7698_v2 = vld [vmem:[#allocation19 + $0x500] sm:$0xff] }
 0xdf0   :  { %9133 = vmatpush1.bf16.msra.mxu0 %v12924_v8  ;;  %v7662_v8 = vld [vmem:[#allocation19 + $0x3e0] sm:$0xff] }
 0xdf1   :  { %9215 = vmatpush1.bf16.msra.mxu1 %v12926_v7  ;;  %9134 = vmatprep.subr.bf16.mxu0 %v12933_v58  ;;  %v7659_v7 = vld [vmem:[#allocation19 + $0x3c8] sm:$0xff]  ;;  %v12981_v12 = vcombine.high %v7658_v6, %v7662_v8 }
 0xdf2   :  { %9216 = vmatprep.subr.bf16.mxu1 %v12935_v10  ;;  %v7663_v58 = vld [vmem:[#allocation19 + $0x3e8] sm:$0xff]  ;;  %v12972_v10 = vcombine.low %v7650_v63, %v7654_v0 }
 0xdf3   :  { %v12983_v13 = vcombine.high %v7659_v7, %v7663_v58  ;;  %v12982_v18 = vcombine.low %v7659_v7, %v7663_v58  ;;  %v7706_v58 = vld [vmem:[#allocation19 + $0x540] sm:$0xff] }
 0xdf4   :  { %9135 = vmatpush1.bf16.msra.mxu0 %v12932_v16  ;;  %v7670_v16 = vld [vmem:[#allocation19 + $0x420] sm:$0xff] }
 0xdf5   :  { %9217 = vmatpush1.bf16.msra.mxu1 %v12934_v52  ;;  %9136 = vmatprep.subr.bf16.mxu0 %v12941_v33  ;;  %v7667_v52 = vld [vmem:[#allocation19 + $0x408] sm:$0xff]  ;;  %v12989_v60 = vcombine.high %v7666_v15, %v7670_v16 }
 0xdf6   :  { %9218 = vmatprep.subr.bf16.mxu1 %v12943_v17  ;;  %v7671_v33 = vld [vmem:[#allocation19 + $0x428] sm:$0xff]  ;;  %v12980_v17 = vcombine.low %v7658_v6, %v7662_v8 }
 0xdf7   :  { %v12991_v27 = vcombine.high %v7667_v52, %v7671_v33  ;;  %v12990_v30 = vcombine.low %v7667_v52, %v7671_v33  ;;  %v7714_v33 = vld [vmem:[#allocation19 + $0x580] sm:$0xff] }
 0xdf8   :  { %9137 = vmatpush1.bf16.msra.mxu0 %v12940_v54  ;;  %v7678_v54 = vld [vmem:[#allocation19 + $0x460] sm:$0xff] }
 0xdf9   :  { %9219 = vmatpush1.bf16.msra.mxu1 %v12942_v32  ;;  %9138 = vmatprep.subr.bf16.mxu0 %v12949_v25  ;;  %v12988_v32 = vcombine.low %v7666_v15, %v7670_v16  ;;  %v7675_v25 = vld [vmem:[#allocation19 + $0x448] sm:$0xff]  ;;  %v12997_v31 = vcombine.high %v7674_v28, %v7678_v54 }
 0xdfa   :  { %9220 = vmatprep.subr.bf16.mxu1 %v12951_v29  ;;  %v7679_v29 = vld [vmem:[#allocation19 + $0x468] sm:$0xff] }
 0xdfb   :  { %v12998_v49 = vcombine.low %v7675_v25, %v7679_v29 }
 0xdfc   :  { %9139 = vmatpush1.bf16.msra.mxu0 %v12948_v39  ;;  %v12999_v39 = vcombine.high %v7675_v25, %v7679_v29 }
 0xdfd   :  { %9221 = vmatpush1.bf16.msra.mxu1 %v12950_v40  ;;  %9140 = vmatprep.subr.bf16.mxu0 %v12957_v44  ;;  %v7683_v40 = vld [vmem:[#allocation19 + $0x488] sm:$0xff] }
 0xdfe   :  { %9222 = vmatprep.subr.bf16.mxu1 %v12959_v43  ;;  %v7687_v44 = vld [vmem:[#allocation19 + $0x4a8] sm:$0xff]  ;;  %v12996_v43 = vcombine.low %v7674_v28, %v7678_v54 }
 0xdff   :  { %v13007_v51 = vcombine.high %v7683_v40, %v7687_v44  ;;  %v13006_v63 = vcombine.low %v7683_v40, %v7687_v44  ;;  %v7723_v44 = vld [vmem:[#allocation19 + $0x5c8] sm:$0xff] }
 0xe00   :  { %9141 = vmatpush1.bf16.msra.mxu0 %v12956_v57  ;;  %v7694_v57 = vld [vmem:[#allocation19 + $0x4e0] sm:$0xff] }
 0xe01   :  { %9223 = vmatpush1.bf16.msra.mxu1 %v12958_v59  ;;  %9142 = vmatprep.subr.bf16.mxu0 %v12965_v62  ;;  %v7691_v59 = vld [vmem:[#allocation19 + $0x4c8] sm:$0xff]  ;;  %v13013_v0 = vcombine.high %v7690_v55, %v7694_v57 }
 0xe02   :  { %9224 = vmatprep.subr.bf16.mxu1 %v12967_v26  ;;  %v7695_v62 = vld [vmem:[#allocation19 + $0x4e8] sm:$0xff]  ;;  %v13004_v26 = vcombine.low %v7682_v3, %v7686_v37 }
 0xe03   :  { %v13015_v5 = vcombine.high %v7691_v59, %v7695_v62  ;;  %v13014_v6 = vcombine.low %v7691_v59, %v7695_v62 }
 0xe04   :  { %9143 = vmatpush1.bf16.msra.mxu0 %v12964_v4  ;;  %v7702_v4 = vld [vmem:[#allocation19 + $0x520] sm:$0xff] }
 0xe05   :  { %9225 = vmatpush1.bf16.msra.mxu1 %v12966_v35  ;;  %9144 = vmatprep.subr.bf16.mxu0 %v12973_v42  ;;  %v7699_v35 = vld [vmem:[#allocation19 + $0x508] sm:$0xff]  ;;  %v13021_v8 = vcombine.high %v7698_v2, %v7702_v4 }
 0xe06   :  { %9226 = vmatprep.subr.bf16.mxu1 %v12975_v20  ;;  %v7703_v42 = vld [vmem:[#allocation19 + $0x528] sm:$0xff]  ;;  %v13012_v20 = vcombine.low %v7690_v55, %v7694_v57 }
 0xe07   :  { %v13023_v7 = vcombine.high %v7699_v35, %v7703_v42  ;;  %v13022_v15 = vcombine.low %v7699_v35, %v7703_v42  ;;  %v7738_v42 = vld [vmem:[#allocation19 + $0x640] sm:$0xff] }
 0xe08   :  { %9145 = vmatpush1.bf16.msra.mxu0 %v12972_v10  ;;  %v7710_v10 = vld [vmem:[#allocation19 + $0x560] sm:$0xff] }
 0xe09   :  { %9227 = vmatpush1.bf16.msra.mxu1 %v12974_v11  ;;  %9146 = vmatprep.subr.bf16.mxu0 %v12981_v12  ;;  %v7707_v11 = vld [vmem:[#allocation19 + $0x548] sm:$0xff]  ;;  %v13029_v16 = vcombine.high %v7706_v58, %v7710_v10 }
 0xe0a   :  { %9228 = vmatprep.subr.bf16.mxu1 %v12983_v13  ;;  %v7711_v12 = vld [vmem:[#allocation19 + $0x568] sm:$0xff]  ;;  %v13020_v13 = vcombine.low %v7698_v2, %v7702_v4 }
 0xe0b   :  { %v13031_v52 = vcombine.high %v7707_v11, %v7711_v12  ;;  %v13030_v28 = vcombine.low %v7707_v11, %v7711_v12  ;;  %v7746_v12 = vld [vmem:[#allocation19 + $0x680] sm:$0xff] }
 0xe0c   :  { %9147 = vmatpush1.bf16.msra.mxu0 %v12980_v17  ;;  %v7718_v17 = vld [vmem:[#allocation19 + $0x5a0] sm:$0xff] }
 0xe0d   :  { %9229 = vmatpush1.bf16.msra.mxu1 %v12982_v18  ;;  %9157 = vmatprep.subr.bf16.mxu0 %v12989_v60  ;;  %v7715_v18 = vld [vmem:[#allocation19 + $0x588] sm:$0xff]  ;;  %v13037_v54 = vcombine.high %v7714_v33, %v7718_v17  ;;  %v13036_v57 = vcombine.low %v7714_v33, %v7718_v17 }
 0xe0e   :  { %9239 = vmatprep.subr.bf16.mxu1 %v12991_v27  ;;  %v7719_v60 = vld [vmem:[#allocation19 + $0x5a8] sm:$0xff]  ;;  %v13028_v27 = vcombine.low %v7706_v58, %v7710_v10 }
 0xe0f   :  { %9149 = vmatmul.mubr.bf16.vlgmr.msra.gmra.mrb[56].mxu0 %v15727_v45  ;;  %v13039_v29 = vcombine.high %v7715_v18, %v7719_v60 }
 0xe10   :  { %9231 = vmatmul.mubr.bf16.vlgmr.msra.gmra.mrb[56].mxu1 %v15727_v45  ;;  %9158 = vmatpush1.bf16.msra.mxu0 %v12988_v32 }
 0xe11   :  { %9189 = vmatprep.mubr.bf16.mxu0 %v15731_v47  ;;  %9240 = vmatpush1.bf16.msra.mxu1 %v12990_v30  ;;  %v7722_v30 = vld [vmem:[#allocation19 + $0x5c0] sm:$0xff] }
 0xe12   :  { %9271 = vmatprep.mubr.bf16.mxu1 %v15731_v47  ;;  %9159 = vmatprep.subr.bf16.mxu0 %v12997_v31  ;;  %v7726_v31 = vld [vmem:[#allocation19 + $0x5e0] sm:$0xff] }
 0xe13   :  { %9241 = vmatprep.subr.bf16.mxu1 %v12999_v39  ;;  %v13045_v62 = vcombine.high %v7722_v30, %v7726_v31  ;;  %v13044_v2 = vcombine.low %v7722_v30, %v7726_v31  ;;  %v7762_v31 = vld [vmem:[#allocation19 + $0x700] sm:$0xff] }
 0xe14   :  { %9160 = vmatpush1.bf16.msra.mxu0 %v12996_v43  ;;  %v7727_v43 = vld [vmem:[#allocation19 + $0x5e8] sm:$0xff] }
 0xe15   :  { %9242 = vmatpush1.bf16.msra.mxu1 %v12998_v49  ;;  %9161 = vmatprep.subr.bf16.mxu0 %v13005_v50 }
 0xe16   :  { %9243 = vmatprep.subr.bf16.mxu1 %v13007_v51 }
 0xe18   :  { %9162 = vmatpush1.bf16.msra.mxu0 %v13004_v26  ;;  %v13047_v26 = vcombine.high %v7723_v44, %v7727_v43 }
 0xe19   :  { %9244 = vmatpush1.bf16.msra.mxu1 %v13006_v63  ;;  %9163 = vmatprep.subr.bf16.mxu0 %v13013_v0  ;;  %v7730_v63 = vld [vmem:[#allocation19 + $0x600] sm:$0xff] }
 0xe1a   :  { %9245 = vmatprep.subr.bf16.mxu1 %v13015_v5  ;;  %v7734_v0 = vld [vmem:[#allocation19 + $0x620] sm:$0xff]  ;;  %v7731_v5 = vld [vmem:[#allocation19 + $0x608] sm:$0xff] }
 0xe1b   :  { %v13053_v4 = vcombine.high %v7730_v63, %v7734_v0 }
 0xe1c   :  { %9164 = vmatpush1.bf16.msra.mxu0 %v13012_v20  ;;  %v7742_v20 = vld [vmem:[#allocation19 + $0x660] sm:$0xff] }
 0xe1d   :  { %9246 = vmatpush1.bf16.msra.mxu1 %v13014_v6  ;;  %9165 = vmatprep.subr.bf16.mxu0 %v13021_v8  ;;  %v7739_v6 = vld [vmem:[#allocation19 + $0x648] sm:$0xff]  ;;  %v13061_v10 = vcombine.high %v7738_v42, %v7742_v20 }
 0xe1e   :  { %9247 = vmatprep.subr.bf16.mxu1 %v13023_v7  ;;  %v7743_v8 = vld [vmem:[#allocation19 + $0x668] sm:$0xff]  ;;  %v13052_v7 = vcombine.low %v7730_v63, %v7734_v0 }
 0xe1f   :  { %v13063_v11 = vcombine.high %v7739_v6, %v7743_v8  ;;  %v13062_v33 = vcombine.low %v7739_v6, %v7743_v8  ;;  %v7786_v8 = vld [vmem:[#allocation19 + $0x7c0] sm:$0xff] }
 0xe20   :  { %9166 = vmatpush1.bf16.msra.mxu0 %v13020_v13  ;;  %v7750_v13 = vld [vmem:[#allocation19 + $0x6a0] sm:$0xff] }
 0xe21   :  { %9248 = vmatpush1.bf16.msra.mxu1 %v13022_v15  ;;  %9167 = vmatprep.subr.bf16.mxu0 %v13029_v16  ;;  %v7747_v15 = vld [vmem:[#allocation19 + $0x688] sm:$0xff]  ;;  %v13069_v17 = vcombine.high %v7746_v12, %v7750_v13 }
 0xe22   :  { %v6506_v32 = vpop.f32.mrb[48].mxu0  ;;  %v6547_v25 = vpop.f32.mrb[48].mxu1  ;;  %9249 = vmatprep.subr.bf16.mxu1 %v13031_v52  ;;  %v7751_v16 = vld [vmem:[#allocation19 + $0x6a8] sm:$0xff]  ;;  %v13060_v52 = vcombine.low %v7738_v42, %v7742_v20 }
 0xe23   :  { %v15946_v3 = vadd.f32 %v6506_v32, %v15916_v56  ;;  %v15949_v37 = vadd.f32 %v6547_v25, %v15919_v38  ;;  %v6508_v39 = vpop.f32.mrb[49].mxu0  ;;  %v6549_v40 = vpop.f32.mrb[49].mxu1  ;;  %v13038_v38 = vcombine.low %v7715_v18, %v7719_v60  ;;  %v13071_v18 = vcombine.high %v7747_v15, %v7751_v16  ;;  %v7754_v60 = vld [vmem:[#allocation19 + $0x6c0] sm:$0xff] }
 0xe24   :  { %v15952_v49 = vadd.f32 %v6508_v39, %v15922_v61  ;;  %v15955_v50 = vadd.f32 %v6549_v40, %v15925_v9  ;;  %9168 = vmatpush1.bf16.msra.mxu0 %v13028_v27  ;;  %v6510_v51 = vpop.f32.mrb[50].mxu0  ;;  %v6551_v55 = vpop.f32.mrb[50].mxu1  ;;  %v7735_v61 = vld [vmem:[#allocation19 + $0x628] sm:$0xff]  ;;  %v13046_v9 = vcombine.low %v7723_v44, %v7727_v43  ;;  %v7758_v27 = vld [vmem:[#allocation19 + $0x6e0] sm:$0xff]  ;;  %v13068_v32 = vcombine.low %v7746_v12, %v7750_v13 }
 0xe25   :  { %9250 = vmatpush1.bf16.msra.mxu1 %v13030_v28  ;;  %v6511_v56 = vpop.f32.mrb[51].mxu0  ;;  %v6552_v59 = vpop.f32.mrb[51].mxu1  ;;  %9169 = vmatprep.subr.bf16.mxu0 %v13037_v54  ;;  %v13055_v35 = vcombine.high %v7731_v5, %v7735_v61  ;;  %v13054_v58 = vcombine.low %v7731_v5, %v7735_v61  ;;  %v7755_v28 = vld [vmem:[#allocation19 + $0x6c8] sm:$0xff]  ;;  %v13070_v25 = vcombine.low %v7747_v15, %v7751_v16  ;;  %v7766_v39 = vld [vmem:[#allocation19 + $0x720] sm:$0xff]  ;;  %v7540_v16 = vld [vmem:[#allocation19 + $0x10] sm:$0xff] }
 0xe26   :  { %9251 = vmatprep.subr.bf16.mxu1 %v13039_v29  ;;  %v7759_v54 = vld [vmem:[#allocation19 + $0x6e8] sm:$0xff]  ;;  %v13077_v29 = vcombine.high %v7754_v60, %v7758_v27  ;;  %v13076_v43 = vcombine.low %v7754_v60, %v7758_v27  ;;  %v13085_v55 = vcombine.high %v7762_v31, %v7766_v39  ;;  %v7770_v56 = vld [vmem:[#allocation19 + $0x740] sm:$0xff] }
 0xe27   :  { %v13079_v30 = vcombine.high %v7755_v28, %v7759_v54  ;;  %v7763_v40 = vld [vmem:[#allocation19 + $0x708] sm:$0xff]  ;;  %v13078_v51 = vcombine.low %v7755_v28, %v7759_v54  ;;  %v7774_v59 = vld [vmem:[#allocation19 + $0x760] sm:$0xff]  ;;  %v7548_v54 = vld [vmem:[#allocation19 + $0x50] sm:$0xff] }
 0xe28   :  { %9170 = vmatpush1.bf16.msra.mxu0 %v13036_v57  ;;  %v7767_v44 = vld [vmem:[#allocation19 + $0x728] sm:$0xff]  ;;  %v13093_v0 = vcombine.high %v7770_v56, %v7774_v59  ;;  %v7778_v61 = vld [vmem:[#allocation19 + $0x780] sm:$0xff] }
 0xe29   :  { %9252 = vmatpush1.bf16.msra.mxu1 %v13038_v38  ;;  %9171 = vmatprep.subr.bf16.mxu0 %v13045_v62  ;;  %v13087_v57 = vcombine.high %v7763_v40, %v7767_v44  ;;  %v7771_v38 = vld [vmem:[#allocation19 + $0x748] sm:$0xff]  ;;  %v13086_v63 = vcombine.low %v7763_v40, %v7767_v44  ;;  %v7556_v40 = vld [vmem:[#allocation19 + $0x90] sm:$0xff] }
 0xe2a   :  { %9253 = vmatprep.subr.bf16.mxu1 %v13047_v26  ;;  %v7775_v62 = vld [vmem:[#allocation19 + $0x768] sm:$0xff]  ;;  %v13084_v26 = vcombine.low %v7762_v31, %v7766_v39  ;;  %v7560_v44 = vld [vmem:[#allocation19 + $0xb0] sm:$0xff] }
 0xe2b   :  { %v13095_v5 = vcombine.high %v7771_v38, %v7775_v62  ;;  %v13094_v42 = vcombine.low %v7771_v38, %v7775_v62  ;;  %v7564_v62 = vld [vmem:[#allocation19 + $0xd0] sm:$0xff] }
 0xe2c   :  { %9172 = vmatpush1.bf16.msra.mxu0 %v13044_v2  ;;  %v7782_v2 = vld [vmem:[#allocation19 + $0x7a0] sm:$0xff] }
 0xe2d   :  { %9254 = vmatpush1.bf16.msra.mxu1 %v13046_v9  ;;  %9173 = vmatprep.subr.bf16.mxu0 %v13053_v4  ;;  %v7779_v9 = vld [vmem:[#allocation19 + $0x788] sm:$0xff]  ;;  %v13101_v20 = vcombine.high %v7778_v61, %v7782_v2 }
 0xe2e   :  { %9255 = vmatprep.subr.bf16.mxu1 %v13055_v35  ;;  %v7783_v4 = vld [vmem:[#allocation19 + $0x7a8] sm:$0xff]  ;;  %v13092_v35 = vcombine.low %v7770_v56, %v7774_v59  ;;  %v12881_v59 = vcombine.high %v7556_v40, %v7560_v44 }
 0xe2f   :  { %v13103_v6 = vcombine.high %v7779_v9, %v7783_v4  ;;  %v13102_v12 = vcombine.low %v7779_v9, %v7783_v4  ;;  %v7572_v4 = vld [vmem:[#allocation19 + $0x110] sm:$0xff] }
 0xe30   :  { %9174 = vmatpush1.bf16.msra.mxu0 %v13052_v7  ;;  %v7790_v7 = vld [vmem:[#allocation19 + $0x7e0] sm:$0xff] }
 0xe31   :  { %9256 = vmatpush1.bf16.msra.mxu1 %v13054_v58  ;;  %9175 = vmatprep.subr.bf16.mxu0 %v13061_v10  ;;  %v7787_v58 = vld [vmem:[#allocation19 + $0x7c8] sm:$0xff]  ;;  %v13109_v13 = vcombine.high %v7786_v8, %v7790_v7 }
 0xe32   :  { %9257 = vmatprep.subr.bf16.mxu1 %v13063_v11  ;;  %v7791_v10 = vld [vmem:[#allocation19 + $0x7e8] sm:$0xff]  ;;  %v13100_v11 = vcombine.low %v7778_v61, %v7782_v2 }
 0xe33   :  { %v13111_v15 = vcombine.high %v7787_v58, %v7791_v10  ;;  %v13110_v60 = vcombine.low %v7787_v58, %v7791_v10  ;;  %v7580_v58 = vld [vmem:[#allocation19 + $0x150] sm:$0xff] }
 0xe34   :  { %9176 = vmatpush1.bf16.msra.mxu0 %v13060_v52  ;;  %v7544_v52 = vld [vmem:[#allocation19 + $0x30] sm:$0xff] }
 0xe35   :  { %9258 = vmatpush1.bf16.msra.mxu1 %v13062_v33  ;;  %9177 = vmatprep.subr.bf16.mxu0 %v13069_v17  ;;  %v7541_v33 = vld [vmem:[#allocation19 + $0x18] sm:$0xff]  ;;  %v12865_v27 = vcombine.high %v7540_v16, %v7544_v52  ;;  %v7584_v10 = vld [vmem:[#allocation19 + $0x170] sm:$0xff] }
 0xe36   :  { %9259 = vmatprep.subr.bf16.mxu1 %v13071_v18  ;;  %v7545_v17 = vld [vmem:[#allocation19 + $0x38] sm:$0xff]  ;;  %v13108_v18 = vcombine.low %v7786_v8, %v7790_v7 }
 0xe37   :  { %v12867_v28 = vcombine.high %v7541_v33, %v7545_v17  ;;  %v12866_v31 = vcombine.low %v7541_v33, %v7545_v17  ;;  %v7588_v33 = vld [vmem:[#allocation19 + $0x190] sm:$0xff] }
 0xe38   :  { %9178 = vmatpush1.bf16.msra.mxu0 %v13068_v32  ;;  %v7552_v32 = vld [vmem:[#allocation19 + $0x70] sm:$0xff] }
 0xe39   :  { %9260 = vmatpush1.bf16.msra.mxu1 %v13070_v25  ;;  %9179 = vmatprep.subr.bf16.mxu0 %v13077_v29  ;;  %v12864_v25 = vcombine.low %v7540_v16, %v7544_v52  ;;  %v7549_v29 = vld [vmem:[#allocation19 + $0x58] sm:$0xff]  ;;  %v12873_v39 = vcombine.high %v7548_v54, %v7552_v32  ;;  %v12905_v16 = vcombine.high %v7580_v58, %v7584_v10  ;;  %v7592_v17 = vld [vmem:[#allocation19 + $0x1b0] sm:$0xff] }
 0xe3a   :  { %9261 = vmatprep.subr.bf16.mxu1 %v13079_v30  ;;  %v7553_v30 = vld [vmem:[#allocation19 + $0x78] sm:$0xff] }
 0xe3b   :  { %v12874_v56 = vcombine.low %v7549_v29, %v7553_v30 }
 0xe3c   :  { %9180 = vmatpush1.bf16.msra.mxu0 %v13076_v43  ;;  %v12875_v43 = vcombine.high %v7549_v29, %v7553_v30  ;;  %v7600_v29 = vld [vmem:[#allocation19 + $0x1f0] sm:$0xff]  ;;  %v7597_v30 = vld [vmem:[#allocation19 + $0x1d8] sm:$0xff] }
 0xe3d   :  { %9262 = vmatpush1.bf16.msra.mxu1 %v13078_v51  ;;  %9181 = vmatprep.subr.bf16.mxu0 %v13085_v55  ;;  %v7557_v51 = vld [vmem:[#allocation19 + $0x98] sm:$0xff] }
 0xe3e   :  { %9263 = vmatprep.subr.bf16.mxu1 %v13087_v57  ;;  %v7561_v55 = vld [vmem:[#allocation19 + $0xb8] sm:$0xff]  ;;  %v12872_v57 = vcombine.low %v7548_v54, %v7552_v32  ;;  %v12913_v54 = vcombine.high %v7588_v33, %v7592_v17 }
 0xe3f   :  { %v12883_v38 = vcombine.high %v7557_v51, %v7561_v55  ;;  %v12882_v61 = vcombine.low %v7557_v51, %v7561_v55  ;;  %v7604_v51 = vld [vmem:[#allocation19 + $0x210] sm:$0xff] }
 0xe40   :  { %9182 = vmatpush1.bf16.msra.mxu0 %v13084_v26  ;;  %v7568_v26 = vld [vmem:[#allocation19 + $0xf0] sm:$0xff] }
 0xe41   :  { %9264 = vmatpush1.bf16.msra.mxu1 %v13086_v63  ;;  %9183 = vmatprep.subr.bf16.mxu0 %v13093_v0  ;;  %v7565_v63 = vld [vmem:[#allocation19 + $0xd8] sm:$0xff]  ;;  %v12889_v2 = vcombine.high %v7564_v62, %v7568_v26  ;;  %v7608_v55 = vld [vmem:[#allocation19 + $0x230] sm:$0xff] }
 0xe42   :  { %9265 = vmatprep.subr.bf16.mxu1 %v13095_v5  ;;  %v7569_v0 = vld [vmem:[#allocation19 + $0xf8] sm:$0xff]  ;;  %v12880_v5 = vcombine.low %v7556_v40, %v7560_v44 }
 0xe43   :  { %v12891_v9 = vcombine.high %v7565_v63, %v7569_v0 }
 0xe44   :  { %9184 = vmatpush1.bf16.msra.mxu0 %v13092_v35  ;;  %v7576_v35 = vld [vmem:[#allocation19 + $0x130] sm:$0xff] }
 0xe45   :  { %9266 = vmatpush1.bf16.msra.mxu1 %v13094_v42  ;;  %9185 = vmatprep.subr.bf16.mxu0 %v13101_v20  ;;  %v7573_v42 = vld [vmem:[#allocation19 + $0x118] sm:$0xff]  ;;  %v12897_v8 = vcombine.high %v7572_v4, %v7576_v35 }
 0xe46   :  { %9267 = vmatprep.subr.bf16.mxu1 %v13103_v6  ;;  %v7577_v20 = vld [vmem:[#allocation19 + $0x138] sm:$0xff]  ;;  %v12890_v6 = vcombine.low %v7565_v63, %v7569_v0  ;;  %v7612_v63 = vld [vmem:[#allocation19 + $0x250] sm:$0xff] }
 0xe47   :  { %v12899_v7 = vcombine.high %v7573_v42, %v7577_v20  ;;  %v7616_v0 = vld [vmem:[#allocation19 + $0x270] sm:$0xff] }
 0xe48   :  { %9186 = vmatpush1.bf16.msra.mxu0 %v13100_v11  ;;  %v7581_v11 = vld [vmem:[#allocation19 + $0x158] sm:$0xff] }
 0xe49   :  { %9268 = vmatpush1.bf16.msra.mxu1 %v13102_v12  ;;  %9187 = vmatprep.subr.bf16.mxu0 %v13109_v13  ;;  %v7585_v12 = vld [vmem:[#allocation19 + $0x178] sm:$0xff]  ;;  %v12896_v13 = vcombine.low %v7572_v4, %v7576_v35  ;;  %v12937_v4 = vcombine.high %v7612_v63, %v7616_v0 }
 0xe4a   :  { %9269 = vmatprep.subr.bf16.mxu1 %v13111_v15  ;;  %v12898_v15 = vcombine.low %v7573_v42, %v7577_v20  ;;  %v12907_v52 = vcombine.high %v7581_v11, %v7585_v12  ;;  %v7620_v42 = vld [vmem:[#allocation19 + $0x290] sm:$0xff] }
 0xe4b   :  { %v7624_v20 = vld [vmem:[#allocation19 + $0x2b0] sm:$0xff] }
 0xe4c   :  { %9188 = vmatpush1.bf16.msra.mxu0 %v13108_v18  ;;  %v7589_v18 = vld [vmem:[#allocation19 + $0x198] sm:$0xff] }
 0xe4d   :  { %9270 = vmatpush1.bf16.msra.mxu1 %v13110_v60  ;;  %9280 = vmatprep.subr.bf16.mxu0 %v12865_v27  ;;  %v7593_v60 = vld [vmem:[#allocation19 + $0x1b8] sm:$0xff]  ;;  %v12904_v27 = vcombine.low %v7580_v58, %v7584_v10  ;;  %v12945_v58 = vcombine.high %v7620_v42, %v7624_v20 }
 0xe4e   :  { %9362 = vmatprep.subr.bf16.mxu1 %v12867_v28  ;;  %v12906_v28 = vcombine.low %v7581_v11, %v7585_v12  ;;  %v12915_v32 = vcombine.high %v7589_v18, %v7593_v60  ;;  %v12914_v40 = vcombine.low %v7589_v18, %v7593_v60  ;;  %v7628_v11 = vld [vmem:[#allocation19 + $0x2d0] sm:$0xff] }
 0xe4f   :  { %9190 = vmatmul.mubr.bf16.vlgmr.msra.gmra.mrb[56].mxu0 %v15753_v14  ;;  %v7632_v12 = vld [vmem:[#allocation19 + $0x2f0] sm:$0xff] }
 0xe50   :  { %9272 = vmatmul.mubr.bf16.vlgmr.msra.gmra.mrb[56].mxu1 %v15753_v14  ;;  %9281 = vmatpush1.bf16.msra.mxu0 %v12864_v25  ;;  %v7596_v25 = vld [vmem:[#allocation19 + $0x1d0] sm:$0xff] }
 0xe51   :  { %9312 = vmatprep.mubr.bf16.mxu0 %v15725_v41  ;;  %9363 = vmatpush1.bf16.msra.mxu1 %v12866_v31  ;;  %v7601_v31 = vld [vmem:[#allocation19 + $0x1f8] sm:$0xff]  ;;  %v12921_v44 = vcombine.high %v7596_v25, %v7600_v29  ;;  %v7636_v18 = vld [vmem:[#allocation19 + $0x310] sm:$0xff] }
 0xe52   :  { %9394 = vmatprep.mubr.bf16.mxu1 %v15725_v41  ;;  %9282 = vmatprep.subr.bf16.mxu0 %v12873_v39  ;;  %v12888_v41 = vcombine.low %v7564_v62, %v7568_v26  ;;  %v12912_v39 = vcombine.low %v7588_v33, %v7592_v17  ;;  %v12929_v62 = vcombine.high %v7604_v51, %v7608_v55  ;;  %v7640_v60 = vld [vmem:[#allocation19 + $0x330] sm:$0xff] }
 0xe53   :  { %9364 = vmatprep.subr.bf16.mxu1 %v12875_v43  ;;  %v12923_v43 = vcombine.high %v7597_v30, %v7601_v31  ;;  %v12953_v33 = vcombine.high %v7628_v11, %v7632_v12 }
 0xe54   :  { %9283 = vmatpush1.bf16.msra.mxu0 %v12872_v57  ;;  %v7605_v57 = vld [vmem:[#allocation19 + $0x218] sm:$0xff] }
 0xe55   :  { %9365 = vmatpush1.bf16.msra.mxu1 %v12874_v56  ;;  %9284 = vmatprep.subr.bf16.mxu0 %v12881_v59  ;;  %v7609_v56 = vld [vmem:[#allocation19 + $0x238] sm:$0xff]  ;;  %v12920_v59 = vcombine.low %v7596_v25, %v7600_v29  ;;  %v12961_v25 = vcombine.high %v7636_v18, %v7640_v60 }
 0xe56   :  { %9366 = vmatprep.subr.bf16.mxu1 %v12883_v38  ;;  %v12922_v38 = vcombine.low %v7597_v30, %v7601_v31  ;;  %v12931_v26 = vcombine.high %v7605_v57, %v7609_v56  ;;  %v7644_v30 = vld [vmem:[#allocation19 + $0x350] sm:$0xff] }
 0xe57   :  { %v7648_v31 = vld [vmem:[#allocation19 + $0x370] sm:$0xff] }
 0xe58   :  { %9285 = vmatpush1.bf16.msra.mxu0 %v12880_v5  ;;  %v7613_v5 = vld [vmem:[#allocation19 + $0x258] sm:$0xff] }
 0xe59   :  { %9367 = vmatpush1.bf16.msra.mxu1 %v12882_v61  ;;  %9286 = vmatprep.subr.bf16.mxu0 %v12889_v2  ;;  %v7617_v61 = vld [vmem:[#allocation19 + $0x278] sm:$0xff]  ;;  %v12928_v2 = vcombine.low %v7604_v51, %v7608_v55  ;;  %v12969_v51 = vcombine.high %v7644_v30, %v7648_v31 }
 0xe5a   :  { %9368 = vmatprep.subr.bf16.mxu1 %v12891_v9  ;;  %v12930_v9 = vcombine.low %v7605_v57, %v7609_v56  ;;  %v12939_v35 = vcombine.high %v7613_v5, %v7617_v61  ;;  %v7652_v57 = vld [vmem:[#allocation19 + $0x390] sm:$0xff] }
 0xe5b   :  { %v7656_v56 = vld [vmem:[#allocation19 + $0x3b0] sm:$0xff] }
 0xe5c   :  { %9287 = vmatpush1.bf16.msra.mxu0 %v12888_v41  ;;  %v7621_v41 = vld [vmem:[#allocation19 + $0x298] sm:$0xff] }
 0xe5d   :  { %9369 = vmatpush1.bf16.msra.mxu1 %v12890_v6  ;;  %9288 = vmatprep.subr.bf16.mxu0 %v12897_v8  ;;  %v7625_v6 = vld [vmem:[#allocation19 + $0x2b8] sm:$0xff]  ;;  %v12936_v8 = vcombine.low %v7612_v63, %v7616_v0  ;;  %v12977_v63 = vcombine.high %v7652_v57, %v7656_v56 }
 0xe5e   :  { %9370 = vmatprep.subr.bf16.mxu1 %v12899_v7  ;;  %v12938_v7 = vcombine.low %v7613_v5, %v7617_v61  ;;  %v12947_v10 = vcombine.high %v7621_v41, %v7625_v6  ;;  %v7660_v5 = vld [vmem:[#allocation19 + $0x3d0] sm:$0xff] }
 0xe5f   :  { %v7664_v61 = vld [vmem:[#allocation19 + $0x3f0] sm:$0xff] }
 0xe60   :  { %9289 = vmatpush1.bf16.msra.mxu0 %v12896_v13  ;;  %v7629_v13 = vld [vmem:[#allocation19 + $0x2d8] sm:$0xff] }
 0xe61   :  { %9371 = vmatpush1.bf16.msra.mxu1 %v12898_v15  ;;  %9290 = vmatprep.subr.bf16.mxu0 %v12905_v16  ;;  %v7633_v15 = vld [vmem:[#allocation19 + $0x2f8] sm:$0xff]  ;;  %v12944_v16 = vcombine.low %v7620_v42, %v7624_v20  ;;  %v12985_v42 = vcombine.high %v7660_v5, %v7664_v61 }
 0xe62   :  { %9372 = vmatprep.subr.bf16.mxu1 %v12907_v52  ;;  %v12946_v52 = vcombine.low %v7621_v41, %v7625_v6  ;;  %v12955_v17 = vcombine.high %v7629_v13, %v7633_v15  ;;  %v7668_v41 = vld [vmem:[#allocation19 + $0x410] sm:$0xff] }
 0xe63   :  { %v7672_v6 = vld [vmem:[#allocation19 + $0x430] sm:$0xff] }
 0xe64   :  { %9291 = vmatpush1.bf16.msra.mxu0 %v12904_v27  ;;  %v7637_v27 = vld [vmem:[#allocation19 + $0x318] sm:$0xff] }
 0xe65   :  { %9373 = vmatpush1.bf16.msra.mxu1 %v12906_v28  ;;  %9292 = vmatprep.subr.bf16.mxu0 %v12913_v54  ;;  %v7641_v28 = vld [vmem:[#allocation19 + $0x338] sm:$0xff]  ;;  %v12952_v54 = vcombine.low %v7628_v11, %v7632_v12  ;;  %v12993_v11 = vcombine.high %v7668_v41, %v7672_v6 }
 0xe66   :  { %9374 = vmatprep.subr.bf16.mxu1 %v12915_v32  ;;  %v12954_v32 = vcombine.low %v7629_v13, %v7633_v15  ;;  %v12963_v29 = vcombine.high %v7637_v27, %v7641_v28  ;;  %v7676_v13 = vld [vmem:[#allocation19 + $0x450] sm:$0xff] }
 0xe67   :  { %v7680_v15 = vld [vmem:[#allocation19 + $0x470] sm:$0xff] }
 0xe68   :  { %9293 = vmatpush1.bf16.msra.mxu0 %v12912_v39  ;;  %v7645_v39 = vld [vmem:[#allocation19 + $0x358] sm:$0xff] }
 0xe69   :  { %9375 = vmatpush1.bf16.msra.mxu1 %v12914_v40  ;;  %9294 = vmatprep.subr.bf16.mxu0 %v12921_v44  ;;  %v7649_v40 = vld [vmem:[#allocation19 + $0x378] sm:$0xff]  ;;  %v12960_v44 = vcombine.low %v7636_v18, %v7640_v60  ;;  %v13001_v18 = vcombine.high %v7676_v13, %v7680_v15  ;;  %v7684_v60 = vld [vmem:[#allocation19 + $0x490] sm:$0xff] }
 0xe6a   :  { %9376 = vmatprep.subr.bf16.mxu1 %v12923_v43  ;;  %v12962_v43 = vcombine.low %v7637_v27, %v7641_v28  ;;  %v12971_v55 = vcombine.high %v7645_v39, %v7649_v40  ;;  %v7688_v27 = vld [vmem:[#allocation19 + $0x4b0] sm:$0xff] }
 0xe6c   :  { %9295 = vmatpush1.bf16.msra.mxu0 %v12920_v59  ;;  %v7653_v59 = vld [vmem:[#allocation19 + $0x398] sm:$0xff] }
 0xe6d   :  { %9377 = vmatpush1.bf16.msra.mxu1 %v12922_v38  ;;  %9296 = vmatprep.subr.bf16.mxu0 %v12929_v62  ;;  %v7657_v38 = vld [vmem:[#allocation19 + $0x3b8] sm:$0xff]  ;;  %v12968_v62 = vcombine.low %v7644_v30, %v7648_v31  ;;  %v13009_v30 = vcombine.high %v7684_v60, %v7688_v27 }
 0xe6e   :  { %9378 = vmatprep.subr.bf16.mxu1 %v12931_v26  ;;  %v12970_v26 = vcombine.low %v7645_v39, %v7649_v40  ;;  %v12979_v0 = vcombine.high %v7653_v59, %v7657_v38  ;;  %v7692_v39 = vld [vmem:[#allocation19 + $0x4d0] sm:$0xff] }
 0xe6f   :  { %v7696_v40 = vld [vmem:[#allocation19 + $0x4f0] sm:$0xff] }
 0xe70   :  { %9297 = vmatpush1.bf16.msra.mxu0 %v12928_v2  ;;  %v7661_v2 = vld [vmem:[#allocation19 + $0x3d8] sm:$0xff] }
 0xe71   :  { %9379 = vmatpush1.bf16.msra.mxu1 %v12930_v9  ;;  %9298 = vmatprep.subr.bf16.mxu0 %v12937_v4  ;;  %v7665_v9 = vld [vmem:[#allocation19 + $0x3f8] sm:$0xff]  ;;  %v12976_v4 = vcombine.low %v7652_v57, %v7656_v56  ;;  %v7700_v56 = vld [vmem:[#allocation19 + $0x510] sm:$0xff] }
 0xe72   :  { %9380 = vmatprep.subr.bf16.mxu1 %v12939_v35  ;;  %v12978_v35 = vcombine.low %v7653_v59, %v7657_v38  ;;  %v12987_v20 = vcombine.high %v7661_v2, %v7665_v9  ;;  %v7704_v59 = vld [vmem:[#allocation19 + $0x530] sm:$0xff]  ;;  %v7701_v38 = vld [vmem:[#allocation19 + $0x518] sm:$0xff] }
 0xe74   :  { %9299 = vmatpush1.bf16.msra.mxu0 %v12936_v8  ;;  %v7669_v8 = vld [vmem:[#allocation19 + $0x418] sm:$0xff] }
 0xe75   :  { %9381 = vmatpush1.bf16.msra.mxu1 %v12938_v7  ;;  %9300 = vmatprep.subr.bf16.mxu0 %v12945_v58  ;;  %v7673_v7 = vld [vmem:[#allocation19 + $0x438] sm:$0xff]  ;;  %v12984_v58 = vcombine.low %v7660_v5, %v7664_v61  ;;  %v7708_v5 = vld [vmem:[#allocation19 + $0x550] sm:$0xff] }
 0xe76   :  { %9382 = vmatprep.subr.bf16.mxu1 %v12947_v10  ;;  %v12986_v10 = vcombine.low %v7661_v2, %v7665_v9  ;;  %v12995_v12 = vcombine.high %v7669_v8, %v7673_v7  ;;  %v7712_v61 = vld [vmem:[#allocation19 + $0x570] sm:$0xff]  ;;  %v7709_v2 = vld [vmem:[#allocation19 + $0x558] sm:$0xff] }
 0xe77   :  { %v7713_v9 = vld [vmem:[#allocation19 + $0x578] sm:$0xff] }
 0xe78   :  { %9301 = vmatpush1.bf16.msra.mxu0 %v12944_v16  ;;  %v12992_v16 = vcombine.low %v7668_v41, %v7672_v6  ;;  %v13035_v41 = vcombine.high %v7709_v2, %v7713_v9  ;;  %v7716_v6 = vld [vmem:[#allocation19 + $0x590] sm:$0xff] }
 0xe79   :  { %9383 = vmatpush1.bf16.msra.mxu1 %v12946_v52  ;;  %9302 = vmatprep.subr.bf16.mxu0 %v12953_v33  ;;  %v7677_v52 = vld [vmem:[#allocation19 + $0x458] sm:$0xff] }
 0xe7a   :  { %9384 = vmatprep.subr.bf16.mxu1 %v12955_v17  ;;  %v7681_v33 = vld [vmem:[#allocation19 + $0x478] sm:$0xff]  ;;  %v12994_v17 = vcombine.low %v7669_v8, %v7673_v7  ;;  %v7720_v8 = vld [vmem:[#allocation19 + $0x5b0] sm:$0xff] }
 0xe7b   :  { %v13003_v28 = vcombine.high %v7677_v52, %v7681_v33  ;;  %v7717_v7 = vld [vmem:[#allocation19 + $0x598] sm:$0xff] }
 0xe7c   :  { %9303 = vmatpush1.bf16.msra.mxu0 %v12952_v54  ;;  %v7685_v54 = vld [vmem:[#allocation19 + $0x498] sm:$0xff] }
 0xe7d   :  { %9385 = vmatpush1.bf16.msra.mxu1 %v12954_v32  ;;  %9304 = vmatprep.subr.bf16.mxu0 %v12961_v25  ;;  %v7689_v32 = vld [vmem:[#allocation19 + $0x4b8] sm:$0xff]  ;;  %v13000_v25 = vcombine.low %v7676_v13, %v7680_v15  ;;  %v13034_v13 = vcombine.low %v7709_v2, %v7713_v9  ;;  %v13041_v15 = vcombine.high %v7716_v6, %v7720_v8 }
 0xe7e   :  { %9386 = vmatprep.subr.bf16.mxu1 %v12963_v29  ;;  %v13002_v29 = vcombine.low %v7677_v52, %v7681_v33  ;;  %v13011_v31 = vcombine.high %v7685_v54, %v7689_v32  ;;  %v7724_v33 = vld [vmem:[#allocation19 + $0x5d0] sm:$0xff] }
 0xe80   :  { %9305 = vmatpush1.bf16.msra.mxu0 %v12960_v44  ;;  %v7693_v44 = vld [vmem:[#allocation19 + $0x4d8] sm:$0xff] }
 0xe81   :  { %9387 = vmatpush1.bf16.msra.mxu1 %v12962_v43  ;;  %9306 = vmatprep.subr.bf16.mxu0 %v12969_v51  ;;  %v7697_v43 = vld [vmem:[#allocation19 + $0x4f8] sm:$0xff]  ;;  %v13008_v51 = vcombine.low %v7684_v60, %v7688_v27 }
 0xe82   :  { %9388 = vmatprep.subr.bf16.mxu1 %v12971_v55  ;;  %v13017_v55 = vcombine.high %v7692_v39, %v7696_v40  ;;  %v13019_v57 = vcombine.high %v7693_v44, %v7697_v43  ;;  %v7725_v27 = vld [vmem:[#allocation19 + $0x5d8] sm:$0xff] }
 0xe84   :  { %9307 = vmatpush1.bf16.msra.mxu0 %v12968_v62  ;;  %v7705_v62 = vld [vmem:[#allocation19 + $0x538] sm:$0xff] }
 0xe85   :  { %9389 = vmatpush1.bf16.msra.mxu1 %v12970_v26  ;;  %9308 = vmatprep.subr.bf16.mxu0 %v12977_v63  ;;  %v13018_v26 = vcombine.low %v7693_v44, %v7697_v43  ;;  %v13025_v63 = vcombine.high %v7700_v56, %v7704_v59 }
 0xe86   :  { %9390 = vmatprep.subr.bf16.mxu1 %v12979_v0  ;;  %v13027_v0 = vcombine.high %v7701_v38, %v7705_v62 }
 0xe88   :  { %9309 = vmatpush1.bf16.msra.mxu0 %v12976_v4  ;;  %v13024_v4 = vcombine.low %v7700_v56, %v7704_v59  ;;  %v7737_v56 = vld [vmem:[#allocation19 + $0x638] sm:$0xff] }
 0xe89   :  { %9391 = vmatpush1.bf16.msra.mxu1 %v12978_v35  ;;  %9310 = vmatprep.subr.bf16.mxu0 %v12985_v42  ;;  %v13026_v35 = vcombine.low %v7701_v38, %v7705_v62  ;;  %v15968_v42 = vld [vmem:[%s16164_s13] sm:$0xf] }
 0xe8a   :  { %9392 = vmatprep.subr.bf16.mxu1 %v12987_v20  ;;  %v13033_v20 = vcombine.high %v7708_v5, %v7712_v61 }
 0xe8c   :  { %9311 = vmatpush1.bf16.msra.mxu0 %v12984_v58  ;;  %v7721_v58 = vld [vmem:[#allocation19 + $0x5b8] sm:$0xff] }
 0xe8d   :  { %9393 = vmatpush1.bf16.msra.mxu1 %v12986_v10  ;;  %9321 = vmatprep.subr.bf16.mxu0 %v12993_v11  ;;  %v6725_v10 = vrot.slane %v15968_v42, %v15711_v22  ;;  %v13032_v11 = vcombine.low %v7708_v5, %v7712_v61  ;;  %v13043_v52 = vcombine.high %v7717_v7, %v7721_v58  ;;  %v7745_v5 = vld [vmem:[#allocation19 + $0x678] sm:$0xff] }
 0xe8e   :  { %9403 = vmatprep.subr.bf16.mxu1 %v12995_v12  ;;  %v6729_v12 = vrot.slane %v15968_v42, %v15717_v24 }
 0xe8f   :  { %9313 = vmatmul.mubr.bf16.vlgmr.msra.gmra.mrb[60].mxu0 %v15727_v45 }
 0xe90   :  { %9395 = vmatmul.mubr.bf16.vlgmr.msra.gmra.mrb[60].mxu1 %v15727_v45  ;;  %9322 = vmatpush1.bf16.msra.mxu0 %v12992_v16  ;;  %v13010_v45 = vcombine.low %v7685_v54, %v7689_v32 }
 0xe91   :  { %9353 = vmatprep.mubr.bf16.mxu0 %v15731_v47  ;;  %9404 = vmatpush1.bf16.msra.mxu1 %v12994_v17  ;;  %v7728_v17 = vld [vmem:[#allocation19 + $0x5f0] sm:$0xff] }
 0xe92   :  { %9435 = vmatprep.mubr.bf16.mxu1 %v15731_v47  ;;  %9323 = vmatprep.subr.bf16.mxu0 %v13001_v18  ;;  %v13016_v47 = vcombine.low %v7692_v39, %v7696_v40  ;;  %v13042_v40 = vcombine.low %v7717_v7, %v7721_v58  ;;  %v13049_v44 = vcombine.high %v7724_v33, %v7728_v17 }
 0xe93   :  { %9405 = vmatprep.subr.bf16.mxu1 %v13003_v28  ;;  %v7729_v28 = vld [vmem:[#allocation19 + $0x5f8] sm:$0xff]  ;;  %v13048_v59 = vcombine.low %v7724_v33, %v7728_v17 }
 0xe94   :  { %9324 = vmatpush1.bf16.msra.mxu0 %v13000_v25  ;;  %v13050_v38 = vcombine.low %v7725_v27, %v7729_v28 }
 0xe95   :  { %9406 = vmatpush1.bf16.msra.mxu1 %v13002_v29  ;;  %9325 = vmatprep.subr.bf16.mxu0 %v13009_v30  ;;  %v13040_v29 = vcombine.low %v7716_v6, %v7720_v8  ;;  %v7753_v6 = vld [vmem:[#allocation19 + $0x6b8] sm:$0xff] }
 0xe96   :  { %9407 = vmatprep.subr.bf16.mxu1 %v13011_v31 }
 0xe98   :  { %9326 = vmatpush1.bf16.msra.mxu0 %v13008_v51  ;;  %v13051_v51 = vcombine.high %v7725_v27, %v7729_v28  ;;  %v7764_v27 = vld [vmem:[#allocation19 + $0x710] sm:$0xff] }
 0xe99   :  { %9408 = vmatpush1.bf16.msra.mxu1 %v13010_v45  ;;  %9327 = vmatprep.subr.bf16.mxu0 %v13017_v55  ;;  %v7732_v45 = vld [vmem:[#allocation19 + $0x610] sm:$0xff] }
 0xe9a   :  { %9409 = vmatprep.subr.bf16.mxu1 %v13019_v57  ;;  %v7736_v55 = vld [vmem:[#allocation19 + $0x630] sm:$0xff]  ;;  %v7733_v57 = vld [vmem:[#allocation19 + $0x618] sm:$0xff] }
 0xe9b   :  { %v13057_v62 = vcombine.high %v7732_v45, %v7736_v55  ;;  %v13056_v61 = vcombine.low %v7732_v45, %v7736_v55  ;;  %v13058_v2 = vcombine.low %v7733_v57, %v7737_v56  ;;  %v7768_v28 = vld [vmem:[#allocation19 + $0x730] sm:$0xff]  ;;  %v7777_v45 = vld [vmem:[#allocation19 + $0x778] sm:$0xff] }
 0xe9c   :  { %9328 = vmatpush1.bf16.msra.mxu0 %v13016_v47  ;;  %v13059_v47 = vcombine.high %v7733_v57, %v7737_v56  ;;  %v13088_v55 = vcombine.low %v7764_v27, %v7768_v28 }
 0xe9d   :  { %9410 = vmatpush1.bf16.msra.mxu1 %v13018_v26  ;;  %9329 = vmatprep.subr.bf16.mxu0 %v13025_v63  ;;  %v7740_v26 = vld [vmem:[#allocation19 + $0x650] sm:$0xff] }
 0xe9e   :  { %9411 = vmatprep.subr.bf16.mxu1 %v13027_v0  ;;  %v7744_v63 = vld [vmem:[#allocation19 + $0x670] sm:$0xff]  ;;  %v7741_v0 = vld [vmem:[#allocation19 + $0x658] sm:$0xff] }
 0xe9f   :  { %v13065_v9 = vcombine.high %v7740_v26, %v7744_v63  ;;  %v13064_v8 = vcombine.low %v7740_v26, %v7744_v63  ;;  %v13066_v7 = vcombine.low %v7741_v0, %v7745_v5  ;;  %v7785_v26 = vld [vmem:[#allocation19 + $0x7b8] sm:$0xff] }
 0xea0   :  { %9330 = vmatpush1.bf16.msra.mxu0 %v13024_v4  ;;  %v13067_v4 = vcombine.high %v7741_v0, %v7745_v5 }
 0xea1   :  { %9412 = vmatpush1.bf16.msra.mxu1 %v13026_v35  ;;  %9331 = vmatprep.subr.bf16.mxu0 %v13033_v20  ;;  %v7748_v35 = vld [vmem:[#allocation19 + $0x690] sm:$0xff] }
 0xea2   :  { %v15974_v16 = vpop.f32.mrb[52].mxu0  ;;  %9413 = vmatprep.subr.bf16.mxu1 %v13035_v41  ;;  %v7752_v20 = vld [vmem:[#allocation19 + $0x6b0] sm:$0xff]  ;;  %v7749_v41 = vld [vmem:[#allocation19 + $0x698] sm:$0xff] }
 0xea3   :  { %v7531_v18 = vpop.f32.mrb[52].mxu1  ;;  %v15976_v60 = vpop.f32.mrb[53].mxu0  ;;  %v13073_v58 = vcombine.high %v7748_v35, %v7752_v20  ;;  %v13074_v33 = vcombine.low %v7749_v41, %v7753_v6 }
 0xea4   :  { %v15978_v54 = vadd.f32 %v7531_v18, %v6725_v10  ;;  %v7533_v32 = vpop.f32.mrb[53].mxu1  ;;  %v7453_v25 = vpop.f32.mrb[54].mxu0  ;;  %9332 = vmatpush1.bf16.msra.mxu0 %v13032_v11  ;;  %v13075_v10 = vcombine.high %v7749_v41, %v7753_v6  ;;  %v7756_v11 = vld [vmem:[#allocation19 + $0x6d0] sm:$0xff] }
 0xea5   :  { %v15980_v30 = vadd.f32 %v7533_v32, %v6729_v12  ;;  %v7535_v31 = vpop.f32.mrb[54].mxu1  ;;  %9414 = vmatpush1.bf16.msra.mxu1 %v13034_v13  ;;  %v7454_v39 = vpop.f32.mrb[55].mxu0  ;;  %9333 = vmatprep.subr.bf16.mxu0 %v13041_v15  ;;  %v7760_v12 = vld [vmem:[#allocation19 + $0x6f0] sm:$0xff]  ;;  %v7757_v13 = vld [vmem:[#allocation19 + $0x6d8] sm:$0xff] }
 0xea6   :  { %v7536_v43 = vpop.f32.mrb[55].mxu1  ;;  %9415 = vmatprep.subr.bf16.mxu1 %v13043_v52  ;;  %v7761_v15 = vld [vmem:[#allocation19 + $0x6f8] sm:$0xff]  ;;  %v13072_v52 = vcombine.low %v7748_v35, %v7752_v20  ;;  %v13081_v17 = vcombine.high %v7756_v11, %v7760_v12  ;;  %v13089_v39 = vcombine.high %v7764_v27, %v7768_v28 }
 0xea7   :  { %v13083_v18 = vcombine.high %v7757_v13, %v7761_v15  ;;  %v7765_v32 = vld [vmem:[#allocation19 + $0x718] sm:$0xff]  ;;  %v13082_v31 = vcombine.low %v7757_v13, %v7761_v15  ;;  %v7776_v43 = vld [vmem:[#allocation19 + $0x770] sm:$0xff]  ;;  %v10576_v19 = vpack.c.bf16 %v15980_v30, %v15980_v30 }
 0xea8   :  { %9334 = vmatpush1.bf16.msra.mxu0 %v13040_v29  ;;  %v7769_v25 = vld [vmem:[#allocation19 + $0x738] sm:$0xff]  ;;  %v13080_v29 = vcombine.low %v7756_v11, %v7760_v12 }
 0xea9   :  { %9416 = vmatpush1.bf16.msra.mxu1 %v13042_v40  ;;  %9335 = vmatprep.subr.bf16.mxu0 %v13049_v44  ;;  %v13091_v40 = vcombine.high %v7765_v32, %v7769_v25  ;;  %v7772_v44 = vld [vmem:[#allocation19 + $0x750] sm:$0xff]  ;;  %v13090_v57 = vcombine.low %v7765_v32, %v7769_v25  ;;  %v7793_v35 = vld [vmem:[#allocation19 + $0x7f8] sm:$0xff] }
 0xeaa   :  { %9417 = vmatprep.subr.bf16.mxu1 %v13051_v51  ;;  %v7773_v51 = vld [vmem:[#allocation19 + $0x758] sm:$0xff]  ;;  %v13097_v56 = vcombine.high %v7772_v44, %v7776_v43  ;;  %v13096_v63 = vcombine.low %v7772_v44, %v7776_v43 }
 0xeab   :  { %v13098_v0 = vcombine.low %v7773_v51, %v7777_v45 }
 0xeac   :  { %9336 = vmatpush1.bf16.msra.mxu0 %v13048_v59  ;;  %v13099_v59 = vcombine.high %v7773_v51, %v7777_v45 }
 0xead   :  { %9418 = vmatpush1.bf16.msra.mxu1 %v13050_v38  ;;  %9337 = vmatprep.subr.bf16.mxu0 %v13057_v62  ;;  %v7780_v38 = vld [vmem:[#allocation19 + $0x790] sm:$0xff] }
 0xeae   :  { %9419 = vmatprep.subr.bf16.mxu1 %v13059_v47  ;;  %v7784_v62 = vld [vmem:[#allocation19 + $0x7b0] sm:$0xff]  ;;  %v7781_v47 = vld [vmem:[#allocation19 + $0x798] sm:$0xff] }
 0xeaf   :  { %v13105_v5 = vcombine.high %v7780_v38, %v7784_v62  ;;  %v13104_v20 = vcombine.low %v7780_v38, %v7784_v62  ;;  %v13106_v41 = vcombine.low %v7781_v47, %v7785_v26 }
 0xeb0   :  { %9338 = vmatpush1.bf16.msra.mxu0 %v13056_v61  ;;  %v13107_v61 = vcombine.high %v7781_v47, %v7785_v26 }
 0xeb1   :  { %9420 = vmatpush1.bf16.msra.mxu1 %v13058_v2  ;;  %9339 = vmatprep.subr.bf16.mxu0 %v13065_v9  ;;  %v7788_v2 = vld [vmem:[#allocation19 + $0x7d0] sm:$0xff] }
 0xeb2   :  { %9421 = vmatprep.subr.bf16.mxu1 %v13067_v4  ;;  %v7792_v9 = vld [vmem:[#allocation19 + $0x7f0] sm:$0xff]  ;;  %v7789_v4 = vld [vmem:[#allocation19 + $0x7d8] sm:$0xff] }
 0xeb3   :  { %v13113_v6 = vcombine.high %v7788_v2, %v7792_v9 }
 0xeb4   :  { %9340 = vmatpush1.bf16.msra.mxu0 %v13064_v8  ;;  %v13115_v8 = vcombine.high %v7789_v4, %v7793_v35 }
 0xeb5   :  { %9422 = vmatpush1.bf16.msra.mxu1 %v13066_v7  ;;  %9341 = vmatprep.subr.bf16.mxu0 %v13073_v58  ;;  %v13112_v7 = vcombine.low %v7788_v2, %v7792_v9  ;;  %v13114_v58 = vcombine.low %v7789_v4, %v7793_v35 }
 0xeb6   :  { %9423 = vmatprep.subr.bf16.mxu1 %v13075_v10  ;;  %v15993_v10 = vld [vmem:[%s16166_s15] sm:$0xff] }
 0xeb7   :  { %v7799_v11 = vrot.slane %v15993_v10, %v15708_v21  ;;  %v7803_v27 = vrot.slane %v15993_v10, %v15714_v23 }
 0xeb8   :  { %9342 = vmatpush1.bf16.msra.mxu0 %v13072_v52 }
 0xeb9   :  { %9424 = vmatpush1.bf16.msra.mxu1 %v13074_v33  ;;  %9343 = vmatprep.subr.bf16.mxu0 %v13081_v17 }
 0xeba   :  { %9425 = vmatprep.subr.bf16.mxu1 %v13083_v18 }
 0xebc   :  { %9344 = vmatpush1.bf16.msra.mxu0 %v13080_v29 }
 0xebd   :  { %9426 = vmatpush1.bf16.msra.mxu1 %v13082_v31  ;;  %9345 = vmatprep.subr.bf16.mxu0 %v13089_v39 }
 0xebe   :  { %9427 = vmatprep.subr.bf16.mxu1 %v13091_v40  ;;  %v6721_v40 = vrot.slane %v15968_v42, %v15714_v23 }
 0xec0   :  { %9346 = vmatpush1.bf16.msra.mxu0 %v13088_v55  ;;  %v13521_v43 = vadd.f32 %v15976_v60, %v6721_v40  ;;  %v14604_v40 = vld [vmem:[#allocation20 + $0x180] ss:$16 sps:$4 sm:$0xff]  }
 0xec1   :  { %9428 = vmatpush1.bf16.msra.mxu1 %v13090_v57  ;;  %9347 = vmatprep.subr.bf16.mxu0 %v13097_v56 }
 0xec2   :  { %9429 = vmatprep.subr.bf16.mxu1 %v13099_v59  ;;  %v9578_v51 = vpack.c.bf16 %v13521_v43, %v13521_v43  ;;  %v14610_v43 = vld [vmem:[#allocation20 + $0x1a0] ss:$16 sps:$4 sm:$0xff]  }
 0xec4   :  { %9348 = vmatpush1.bf16.msra.mxu0 %v13096_v63 }
 0xec5   :  { %9430 = vmatpush1.bf16.msra.mxu1 %v13098_v0  ;;  %9349 = vmatprep.subr.bf16.mxu0 %v13105_v5 }
 0xec6   :  { %9431 = vmatprep.subr.bf16.mxu1 %v13107_v61 }
 0xec8   :  { %9350 = vmatpush1.bf16.msra.mxu0 %v13104_v20 }
 0xec9   :  { %9432 = vmatpush1.bf16.msra.mxu1 %v13106_v41  ;;  %9351 = vmatprep.subr.bf16.mxu0 %v13113_v6 }
 0xeca   :  { %9433 = vmatprep.subr.bf16.mxu1 %v13115_v8 }
 0xecc   :  { %9352 = vmatpush1.bf16.msra.mxu0 %v13112_v7 }
 0xecd   :  { %9434 = vmatpush1.bf16.msra.mxu1 %v13114_v58  ;;  %13456 = vmatprep.subr.bf16.mxu0 %v15364_v34 }
 0xece   :  { %13462 = vmatprep.subr.bf16.mxu1 %v15364_v34 }
 0xecf   :  { %9354 = vmatmul.mubr.bf16.vlgmr.msra.gmra.mrb[60].mxu0 %v15753_v14 }
 0xed0   :  { %9436 = vmatmul.mubr.bf16.vlgmr.msra.gmra.mrb[60].mxu1 %v15753_v14  ;;  %13458 = vmatprep.mubr.msk.bf16.mxu0 %vm15365_vm0, %v15364_v34  ;;  %v6717_v14 = vrot.slane %v15968_v42, %v15708_v21 }
 0xed1   :  { %13464 = vmatprep.mubr.msk.bf16.mxu1 %vm15365_vm0, %v15364_v34 }
 0xed2   :  { %v13520_v29 = vadd.f32 %v15974_v16, %v6717_v14  ;;  %v7815_v16 = vrot.slane %v15993_v10, %v3414_v1 }
 0xed4   :  { %v9444_v39 = vpack.c.bf16 %v13520_v29, %v13520_v29  ;;  %v14600_v29 = vld [vmem:[#allocation20 + $0x164] ss:$16 sps:$4 sm:$0xff]  }
 0xf22   :  { %v9191_v12 = vpop.f32.mrb[56].mxu0 }
 0xf23   :  { %v13524_v13 = vadd.f32 %v9191_v12, %v7799_v11  ;;  %v15997_v15 = vpop.f32.mrb[56].mxu1  ;;  %v9193_v52 = vpop.f32.mrb[57].mxu0 }
 0xf24   :  { %v16001_v33 = vpop.f32.mrb[57].mxu1  ;;  %v9195_v17 = vpop.f32.mrb[58].mxu0  ;;  %v13525_v31 = vadd.f32 %v9193_v52, %v7803_v27  ;;  %v14588_v27 = vld [vmem:[#allocation20 + $0x124] ss:$16 sps:$4 sm:$0xff]  }
 0xf25   :  { %v9445_v18 = vpack.c.bf16 %v13524_v13, %v13524_v13  ;;  %v9277_v28 = vpop.f32.mrb[58].mxu1  ;;  %v9196_v32 = vpop.f32.mrb[59].mxu0  ;;  %v14580_v17 = vld [vmem:[#allocation20 + $0x100] ss:$16 sps:$4 sm:$0xff]  }
 0xf26   :  { %v9278_v25 = vpop.f32.mrb[59].mxu1  ;;  %v9579_v44 = vpack.c.bf16 %v13525_v31, %v13525_v31  ;;  %v14586_v28 = vld [vmem:[#allocation20 + $0x120] ss:$16 sps:$4 sm:$0xff]   ;;  %v14594_v32 = vld [vmem:[#allocation20 + $0x144] ss:$16 sps:$4 sm:$0xff]  }
 0xf27   :  { %13457 = vmatpush3.bf16.xpose.msra.mxu0 %v9445_v18  ;;  %v14582_v18 = vld [vmem:[#allocation20 + $0x104] ss:$16 sps:$4 sm:$0xff]   ;;  %v14592_v25 = vld [vmem:[#allocation20 + $0x140] ss:$16 sps:$4 sm:$0xff]  }
 0xf28   :  { %13468 = vmatprep.subr.bf16.mxu0 %v15364_v34  ;;  %v14598_v31 = vld [vmem:[#allocation20 + $0x160] ss:$16 sps:$4 sm:$0xff]  }
 0xf2e   :  { %13459 = vmatmul.mubr.bf16.vlgmr.msra.gmra.mrb[64].mxu0 %v9444_v39  ;;  %v14606_v39 = vld [vmem:[#allocation20 + $0x184] ss:$16 sps:$4 sm:$0xff]  }
 0xf2f   :  { %13469 = vmatpush3.bf16.xpose.msra.mxu0 %v9579_v44  ;;  %13470 = vmatprep.mubr.msk.bf16.mxu0 %vm15365_vm0, %v15364_v34  ;;  %v14612_v44 = vld [vmem:[#allocation20 + $0x1a4] ss:$16 sps:$4 sm:$0xff]  }
 0xf30   :  { %9872 = vmatprep.subr.bf16.mxu0 %v14582_v18  ;;  %v14633_v18 = vld [vmem:[#allocation20 + $0xc] ss:$16 sps:$4 sm:$0xff]  }
 0xf36   :  { %13471 = vmatmul.mubr.bf16.vlgmr.msra.gmra.mrb[68].mxu0 %v9578_v51 }
 0xf37   :  { %9904 = vmatprep.mubr.bf16.mxu0 %v15366_v53  ;;  %9873 = vmatpush1.bf16.msra.mxu0 %v14580_v17  ;;  %v14630_v17 = vld [vmem:[#allocation20 + $0x4] ss:$16 sps:$4 sm:$0xff]  }
 0xf38   :  { %9874 = vmatprep.subr.bf16.mxu0 %v14588_v27 }
 0xf3b   :  { %9875 = vmatpush1.bf16.msra.mxu0 %v14586_v28 }
 0xf3c   :  { %9876 = vmatprep.subr.bf16.mxu0 %v14594_v32 }
 0xf3f   :  { %9877 = vmatpush1.bf16.msra.mxu0 %v14592_v25 }
 0xf40   :  { %9878 = vmatprep.subr.bf16.mxu0 %v14600_v29 }
 0xf43   :  { %9879 = vmatpush1.bf16.msra.mxu0 %v14598_v31  ;;  %v14628_v31 = vld [vmem:[#allocation20] ss:$16 sps:$4 sm:$0xff]  }
 0xf44   :  { %9880 = vmatprep.subr.bf16.mxu0 %v14606_v39  ;;  %v14631_v39 = vld [vmem:[#allocation20 + $0x8] ss:$16 sps:$4 sm:$0xff]  }
 0xf47   :  { %9881 = vmatpush1.bf16.msra.mxu0 %v14604_v40 }
 0xf48   :  { %9882 = vmatprep.subr.bf16.mxu0 %v14612_v44 }
 0xf4b   :  { %9883 = vmatpush1.bf16.msra.mxu0 %v14610_v43  ;;  %v14636_v43 = vld [vmem:[#allocation20 + $0x24] ss:$16 sps:$4 sm:$0xff]  }
 0xfa2   :  { %v9355_v45 = vpop.f32.mrb[60].mxu0 }
 0xfa3   :  { %v13528_v55 = vadd.f32 %v9355_v45, %v7815_v16  ;;  %v16016_v57 = vpop.f32.mrb[60].mxu1  ;;  %v16018_v42 = vpop.f32.mrb[61].mxu0  ;;  %v7819_v16 = vrot.slane %v15993_v10, %v3418_v48 }
 0xfa4   :  { %v16020_v56 = vpop.f32.mrb[61].mxu1  ;;  %v9359_v59 = vpop.f32.mrb[62].mxu0 }
 0xfa5   :  { %v9498_v38 = vpack.c.bf16 %v13528_v55, %v13528_v55  ;;  %v9441_v62 = vpop.f32.mrb[62].mxu1  ;;  %v9360_v60 = vpop.f32.mrb[63].mxu0  ;;  %v13529_v45 = vadd.f32 %v16018_v42, %v7819_v16 }
 0xfa6   :  { %v9442_v47 = vpop.f32.mrb[63].mxu1 }
 0xfa7   :  { %v9503_v26 = vsel %vm5103_vm1, %v9498_v38, 0  ;;  %v9632_v38 = vpack.c.bf16 %v13529_v45, %v13529_v45  ;;  %v14585_v47 = vld [vmem:[#allocation20 + $0x10c] ss:$16 sps:$4 sm:$0xff]  }
 0xfa8   :  { %13463 = vmatpush3.bf16.msra.mxu1 %v9503_v26 }
 0xfa9   :  { %13474 = vmatprep.subr.bf16.mxu1 %v15364_v34  ;;  %v9637_v26 = vsel %vm5103_vm1, %v9632_v38, 0  ;;  %v14642_v38 = vld [vmem:[#allocation20 + $0x44] ss:$16 sps:$4 sm:$0xff]  }
0x1001   :  { %v9480_v63 = vpop.f32.mrb[64].mxu0 }
0x1002   :  { %v13460_v1 = vpop.f32.mrb[65].mxu0  ;;  %v9486_v0 = vsel %vm5086_vm2, %v9480_v63, -inf }
0x1003   :  { %9487 = vmax.xlane.f32.xlu0 %v9486_v0  ;;  %v9483_v5 = vpop.f32.mrb[66].mxu0  ;;  %v14583_v1 = vld [vmem:[#allocation20 + $0x108] ss:$16 sps:$4 sm:$0xff]   ;;  %v14591_v0 = vld [vmem:[#allocation20 + $0x12c] ss:$16 sps:$4 sm:$0xff]  }
0x1004   :  { %v13461_v61 = vpop.f32.mrb[67].mxu0  ;;  %v14589_v5 = vld [vmem:[#allocation20 + $0x128] ss:$16 sps:$4 sm:$0xff]  }
0x1005   :  { %v14597_v61 = vld [vmem:[#allocation20 + $0x14c] ss:$16 sps:$4 sm:$0xff]  }
0x1009   :  { %v9614_v2 = vpop.f32.mrb[68].mxu0 }
0x100a   :  { %v13472_v9 = vpop.f32.mrb[69].mxu0  ;;  %v9620_v4 = vsel %vm5086_vm2, %v9614_v2, -inf }
0x100b   :  { %9621 = vmax.xlane.f32.xlu1 %v9620_v4  ;;  %v9617_v35 = vpop.f32.mrb[70].mxu0  ;;  %v14603_v9 = vld [vmem:[#allocation20 + $0x16c] ss:$16 sps:$4 sm:$0xff]   ;;  %v14601_v4 = vld [vmem:[#allocation20 + $0x168] ss:$16 sps:$4 sm:$0xff]  }
0x100c   :  { %v13473_v20 = vpop.f32.mrb[71].mxu0  ;;  %v14609_v35 = vld [vmem:[#allocation20 + $0x18c] ss:$16 sps:$4 sm:$0xff]  }
0x100d   :  { %v14607_v20 = vld [vmem:[#allocation20 + $0x188] ss:$16 sps:$4 sm:$0xff]  }
0x1090   :  { %v9488_v41 = vpop.xlane.xlu0 %9487 }
0x1091   :  { %v9489_v6 = vsub.f32 %v9480_v63, %v9488_v41  ;;  %v14615_v41 = vld [vmem:[#allocation20 + $0x1ac] ss:$16 sps:$4 sm:$0xff]  }
0x1093   :  { %v9490_v8 = vmul.f32 1.442695, %v9489_v6  ;;  %v14613_v6 = vld [vmem:[#allocation20 + $0x1a8] ss:$16 sps:$4 sm:$0xff]  }
0x1095   :  { %14980 = vpow2.f32 %v9490_v8  ;;  %v14616_v8 = vld [vmem:[#allocation20 + $0x1c0] ss:$16 sps:$4 sm:$0xff]  }
0x1098   :  { %v9622_v7 = vpop.xlane.xlu1 %9621 }
0x1099   :  { %v9623_v58 = vsub.f32 %v9614_v2, %v9622_v7  ;;  %v14595_v2 = vld [vmem:[#allocation20 + $0x148] ss:$16 sps:$4 sm:$0xff]   ;;  %v14618_v7 = vld [vmem:[#allocation20 + $0x1c4] ss:$16 sps:$4 sm:$0xff]  }
0x109a   :  { %9884 = vmatprep.subr.bf16.mxu0 %v14618_v7  ;;  %v14667_v7 = vld [vmem:[#allocation20 + $0xc8] ss:$16 sps:$4 sm:$0xff]  }
0x109b   :  { %v9624_v11 = vmul.f32 1.442695, %v9623_v58  ;;  %v14619_v58 = vld [vmem:[#allocation20 + $0x1c8] ss:$16 sps:$4 sm:$0xff]   ;;  %9885 = vmatpush1.bf16.msra.mxu0 %v14616_v8  ;;  %v14664_v8 = vld [vmem:[#allocation20 + $0xc0] ss:$16 sps:$4 sm:$0xff]  }
0x109d   :  { %14982 = vpow2.f32 %v9624_v11  ;;  %v14621_v11 = vld [vmem:[#allocation20 + $0x1cc] ss:$16 sps:$4 sm:$0xff]  }
0x109f   :  { %v14981_v12 = vpop.eup %14980 }
0x10a0   :  { %v9492_v13 = vsel %vm5086_vm2, %v14981_v12, 0.0 }
0x10a1   :  { %9493 = vadd.xlane.f32.xlu0 %v9492_v13  ;;  %v14627_v13 = vld [vmem:[#allocation20 + $0x1ec] ss:$16 sps:$4 sm:$0xff]  }
0x10a7   :  { %v14983_v52 = vpop.eup %14982 }
0x10a8   :  { %v9626_v14 = vsel %vm5086_vm2, %v14983_v52, 0.0 }
0x10a9   :  { %9627 = vadd.xlane.f32.xlu1 %v9626_v14  ;;  %v14625_v14 = vld [vmem:[#allocation20 + $0x1e8] ss:$16 sps:$4 sm:$0xff]  }
0x112e   :  { %v9494_v51 = vpop.xlane.xlu0 %9493 }
0x112f   :  { %14984 = vrcp.f32 %v9494_v51  ;;  %v14639_v51 = vld [vmem:[#allocation20 + $0x2c] ss:$16 sps:$4 sm:$0xff]  }
0x1136   :  { %v9628_v55 = vpop.xlane.xlu1 %9627 }
0x1137   :  { %14986 = vrcp.f32 %v9628_v55  ;;  %v14634_v55 = vld [vmem:[#allocation20 + $0x20] ss:$16 sps:$4 sm:$0xff]  }
0x1139   :  { %v14985_v59 = vpop.eup %14984 }
0x113a   :  { %v9496_v62 = vmul.f32 %v14985_v59, %v14981_v12  ;;  %v14624_v12 = vld [vmem:[#allocation20 + $0x1e4] ss:$16 sps:$4 sm:$0xff]   ;;  %v14637_v59 = vld [vmem:[#allocation20 + $0x28] ss:$16 sps:$4 sm:$0xff]  }
0x113b   :  { %9886 = vmatprep.subr.bf16.mxu0 %v14624_v12 }
0x113c   :  { %v9497_v60 = vpack.c.bf16 %v9496_v62, %v9496_v62  ;;  %v14645_v62 = vld [vmem:[#allocation20 + $0x4c] ss:$16 sps:$4 sm:$0xff]  }
0x113e   :  { %13465 = vmatmul.mubr.msk.bf16.vlgmr.msra.gmra.mrb[64].mxu1 %vm5086_vm2, %v9497_v60  ;;  %v14640_v60 = vld [vmem:[#allocation20 + $0x40] ss:$16 sps:$4 sm:$0xff]  }
0x113f   :  { %13475 = vmatpush3.bf16.msra.mxu1 %v9637_v26  ;;  %13476 = vmatprep.mubr.msk.bf16.mxu1 %vm15365_vm0, %v15364_v34  ;;  %v14648_v26 = vld [vmem:[#allocation20 + $0x64] ss:$16 sps:$4 sm:$0xff]  }
0x1140   :  { %9913 = vmatprep.subr.bf16.mxu1 %v14585_v47  ;;  %v14643_v47 = vld [vmem:[#allocation20 + $0x48] ss:$16 sps:$4 sm:$0xff]  }
0x1141   :  { %v14987_v63 = vpop.eup %14986 }
0x1142   :  { %v9630_v48 = vmul.f32 %v14987_v63, %v14983_v52  ;;  %v14622_v52 = vld [vmem:[#allocation20 + $0x1e0] ss:$16 sps:$4 sm:$0xff]   ;;  %v14651_v63 = vld [vmem:[#allocation20 + $0x6c] ss:$16 sps:$4 sm:$0xff]  }
0x1143   :  { %9887 = vmatpush1.bf16.msra.mxu0 %v14622_v52  ;;  %v14673_v52 = vld [vmem:[#allocation20 + $0xe8] ss:$16 sps:$4 sm:$0xff]  }
0x1144   :  { %v9631_v42 = vpack.c.bf16 %v9630_v48, %v9630_v48  ;;  %10114 = vmatprep.subr.bf16.mxu0 %v14630_v17  ;;  %v14646_v48 = vld [vmem:[#allocation20 + $0x60] ss:$16 sps:$4 sm:$0xff]  }
0x1146   :  { %13477 = vmatmul.mubr.msk.bf16.vlgmr.msra.gmra.mrb[68].mxu1 %vm5086_vm2, %v9631_v42  ;;  %v14654_v42 = vld [vmem:[#allocation20 + $0x84] ss:$16 sps:$4 sm:$0xff]  }
0x1147   :  { %9914 = vmatpush1.bf16.msra.mxu1 %v14583_v1  ;;  %9945 = vmatprep.mubr.bf16.mxu1 %v15366_v53  ;;  %v14649_v1 = vld [vmem:[#allocation20 + $0x68] ss:$16 sps:$4 sm:$0xff]  }
0x1148   :  { %9915 = vmatprep.subr.bf16.mxu1 %v14591_v0  ;;  %v14657_v0 = vld [vmem:[#allocation20 + $0x8c] ss:$16 sps:$4 sm:$0xff]  }
0x114b   :  { %9916 = vmatpush1.bf16.msra.mxu1 %v14589_v5  ;;  %v14652_v5 = vld [vmem:[#allocation20 + $0x80] ss:$16 sps:$4 sm:$0xff]  }
0x114c   :  { %9917 = vmatprep.subr.bf16.mxu1 %v14597_v61  ;;  %v14655_v61 = vld [vmem:[#allocation20 + $0x88] ss:$16 sps:$4 sm:$0xff]  }
0x114f   :  { %9918 = vmatpush1.bf16.msra.mxu1 %v14595_v2  ;;  %v14660_v2 = vld [vmem:[#allocation20 + $0xa4] ss:$16 sps:$4 sm:$0xff]  }
0x1150   :  { %9919 = vmatprep.subr.bf16.mxu1 %v14603_v9  ;;  %v14663_v9 = vld [vmem:[#allocation20 + $0xac] ss:$16 sps:$4 sm:$0xff]  }
0x1153   :  { %9920 = vmatpush1.bf16.msra.mxu1 %v14601_v4  ;;  %v14658_v4 = vld [vmem:[#allocation20 + $0xa0] ss:$16 sps:$4 sm:$0xff]  }
0x1154   :  { %9921 = vmatprep.subr.bf16.mxu1 %v14609_v35  ;;  %v14661_v35 = vld [vmem:[#allocation20 + $0xa8] ss:$16 sps:$4 sm:$0xff]  }
0x1157   :  { %9922 = vmatpush1.bf16.msra.mxu1 %v14607_v20  ;;  %v14666_v20 = vld [vmem:[#allocation20 + $0xc4] ss:$16 sps:$4 sm:$0xff]  }
0x1158   :  { %9923 = vmatprep.subr.bf16.mxu1 %v14615_v41  ;;  %v14669_v41 = vld [vmem:[#allocation20 + $0xcc] ss:$16 sps:$4 sm:$0xff]  }
0x115b   :  { %9924 = vmatpush1.bf16.msra.mxu1 %v14613_v6  ;;  %v7823_v6 = vrot.slane %v15993_v10, %v3422_v36 }
0x115c   :  { %9925 = vmatprep.subr.bf16.mxu1 %v14621_v11  ;;  %v14675_v11 = vld [vmem:[#allocation20 + $0xec] ss:$16 sps:$4 sm:$0xff]  }
0x115d   :  { %v13530_v12 = vadd.f32 %v16016_v57, %v7823_v6  ;;  %v14684_v6 = vld [vmem:[#allocation20 + $0x20c] ss:$16 sps:$4 sm:$0xff]  }
0x115f   :  { %9926 = vmatpush1.bf16.msra.mxu1 %v14619_v58  ;;  %v14672_v58 = vld [vmem:[#allocation20 + $0xe4] ss:$16 sps:$4 sm:$0xff]   ;;  %v10250_v36 = vpack.c.bf16 %v13530_v12, %v13530_v12  ;;  %v14691_v12 = vld [vmem:[#allocation20 + $0x260] ss:$16 sps:$4 sm:$0xff]  }
0x1160   :  { %9927 = vmatprep.subr.bf16.mxu1 %v14627_v13  ;;  %v14670_v13 = vld [vmem:[#allocation20 + $0xe0] ss:$16 sps:$4 sm:$0xff]  }
0x1163   :  { %9928 = vmatpush1.bf16.msra.mxu1 %v14625_v14  ;;  %v7807_v14 = vrot.slane %v15993_v10, %v15711_v22 }
0x1164   :  { %10155 = vmatprep.subr.bf16.mxu1 %v14633_v18  ;;  %v10255_v18 = vsel %vm5103_vm1, %v10250_v36, 0  ;;  %v14703_v36 = vld [vmem:[#allocation20 + $0x2a0] ss:$16 sps:$4 sm:$0xff]  }
0x1165   :  { %v13526_v57 = vadd.f32 %v15997_v15, %v7807_v14  ;;  %v14705_v14 = vld [vmem:[#allocation20 + $0x2a4] ss:$16 sps:$4 sm:$0xff]  }
0x1211   :  { %v16038_v27 = vpop.f32.mrb[64].mxu1 }
0x1212   :  { %v13466_v28 = vpop.f32.mrb[65].mxu1  ;;  %v9545_v17 = vpack.c.bf16 %v16038_v27, %v16038_v27  ;;  %v10196_v27 = vpack.c.bf16 %v15978_v54, %v15978_v54 }
0x1213   :  { %v9542_v32 = vpop.f32.mrb[66].mxu1  ;;  %v10197_v28 = vpack.c.bf16 %v13526_v57, %v13526_v57  ;;  %v14709_v57 = vld [vmem:[#allocation20 + $0x2c0] ss:$16 sps:$4 sm:$0xff]  }
0x1214   :  { %v13467_v25 = vpop.f32.mrb[67].mxu1 }
0x1219   :  { %v9673_v29 = vpop.f32.mrb[68].mxu1 }
0x121a   :  { %v9679_v40 = vpack.c.bf16 %v9673_v29, %v9673_v29  ;;  %v13478_v44 = vpop.f32.mrb[69].mxu1 }
0x121b   :  { %v9676_v16 = vpop.f32.mrb[70].mxu1 }
0x121c   :  { %v13479_v45 = vpop.f32.mrb[71].mxu1  ;;  %9905 = vmatmul.mubr.bf16.vlgmr.msra.gmra.mrb[72].mxu0 %v9679_v40  ;;  %9946 = vmatmul.mubr.bf16.vlgmr.msra.gmra.mrb[72].mxu1 %v9679_v40 }
0x121d   :  { %10115 = vmatpush1.bf16.msra.mxu0 %v14628_v31  ;;  %10156 = vmatpush1.bf16.msra.mxu1 %v14631_v39 }
0x121e   :  { %10116 = vmatprep.subr.bf16.mxu0 %v14636_v43  ;;  %10157 = vmatprep.subr.bf16.mxu1 %v14639_v51 }
0x121f   :  { %10146 = vmatprep.mubr.bf16.mxu0 %v15366_v53  ;;  %10187 = vmatprep.mubr.bf16.mxu1 %v15366_v53 }
0x1221   :  { %10117 = vmatpush1.bf16.msra.mxu0 %v14634_v55  ;;  %10158 = vmatpush1.bf16.msra.mxu1 %v14637_v59 }
0x1222   :  { %10118 = vmatprep.subr.bf16.mxu0 %v14642_v38  ;;  %10159 = vmatprep.subr.bf16.mxu1 %v14645_v62 }
0x1225   :  { %10119 = vmatpush1.bf16.msra.mxu0 %v14640_v60  ;;  %10160 = vmatpush1.bf16.msra.mxu1 %v14643_v47 }
0x1226   :  { %10120 = vmatprep.subr.bf16.mxu0 %v14648_v26  ;;  %10161 = vmatprep.subr.bf16.mxu1 %v14651_v63 }
0x1229   :  { %10121 = vmatpush1.bf16.msra.mxu0 %v14646_v48  ;;  %10162 = vmatpush1.bf16.msra.mxu1 %v14649_v1 }
0x122a   :  { %10122 = vmatprep.subr.bf16.mxu0 %v14654_v42  ;;  %10163 = vmatprep.subr.bf16.mxu1 %v14657_v0 }
0x122d   :  { %10123 = vmatpush1.bf16.msra.mxu0 %v14652_v5  ;;  %10164 = vmatpush1.bf16.msra.mxu1 %v14655_v61 }
0x122e   :  { %10124 = vmatprep.subr.bf16.mxu0 %v14660_v2  ;;  %10165 = vmatprep.subr.bf16.mxu1 %v14663_v9 }
0x1231   :  { %10125 = vmatpush1.bf16.msra.mxu0 %v14658_v4  ;;  %10166 = vmatpush1.bf16.msra.mxu1 %v14661_v35  ;;  %v14676_v35 = vld [vmem:[#allocation20 + $0x200] ss:$16 sps:$4 sm:$0xff]  }
0x1232   :  { %10126 = vmatprep.subr.bf16.mxu0 %v14666_v20  ;;  %10167 = vmatprep.subr.bf16.mxu1 %v14669_v41  ;;  %v14678_v20 = vld [vmem:[#allocation20 + $0x204] ss:$16 sps:$4 sm:$0xff]  }
0x1233   :  { %v14681_v41 = vld [vmem:[#allocation20 + $0x224] ss:$16 sps:$4 sm:$0xff]  }
0x1235   :  { %10127 = vmatpush1.bf16.msra.mxu0 %v14664_v8  ;;  %10168 = vmatpush1.bf16.msra.mxu1 %v14667_v7  ;;  %v14679_v8 = vld [vmem:[#allocation20 + $0x220] ss:$16 sps:$4 sm:$0xff]   ;;  %v14687_v7 = vld [vmem:[#allocation20 + $0x244] ss:$16 sps:$4 sm:$0xff]  }
0x1236   :  { %10128 = vmatprep.subr.bf16.mxu0 %v14672_v58  ;;  %10169 = vmatprep.subr.bf16.mxu1 %v14675_v11  ;;  %v14685_v58 = vld [vmem:[#allocation20 + $0x240] ss:$16 sps:$4 sm:$0xff]   ;;  %v14693_v11 = vld [vmem:[#allocation20 + $0x264] ss:$16 sps:$4 sm:$0xff]  }
0x1239   :  { %10129 = vmatpush1.bf16.msra.mxu0 %v14670_v13  ;;  %10170 = vmatpush1.bf16.msra.mxu1 %v14673_v52  ;;  %v14699_v13 = vld [vmem:[#allocation20 + $0x284] ss:$16 sps:$4 sm:$0xff]   ;;  %v14697_v52 = vld [vmem:[#allocation20 + $0x280] ss:$16 sps:$4 sm:$0xff]  }
0x123a   :  { %13486 = vmatprep.subr.bf16.mxu1 %v15364_v34  ;;  %13480 = vmatprep.subr.bf16.mxu0 %v15364_v34 }
0x123c   :  { %10147 = vmatmul.mubr.bf16.vlgmr.msra.gmra.mrb[76].mxu0 %v9545_v17  ;;  %10188 = vmatmul.mubr.bf16.vlgmr.msra.gmra.mrb[76].mxu1 %v9545_v17  ;;  %v14711_v17 = vld [vmem:[#allocation20 + $0x2c4] ss:$16 sps:$4 sm:$0xff]  }
0x123d   :  { %13487 = vmatpush3.bf16.msra.mxu1 %v10255_v18  ;;  %13482 = vmatprep.mubr.msk.bf16.mxu0 %vm15365_vm0, %v15364_v34  ;;  %v14717_v18 = vld [vmem:[#allocation20 + $0x2e4] ss:$16 sps:$4 sm:$0xff]  }
0x123e   :  { %13488 = vmatprep.mubr.msk.bf16.mxu1 %vm15365_vm0, %v15364_v34  ;;  %10531 = vmatprep.subr.bf16.mxu1 %v14684_v6 }
0x1242   :  { %13481 = vmatpush3.bf16.xpose.msra.mxu0 %v10197_v28  ;;  %v14715_v28 = vld [vmem:[#allocation20 + $0x2e0] ss:$16 sps:$4 sm:$0xff]  }
0x1243   :  { %10490 = vmatprep.subr.bf16.mxu0 %v14678_v20 }
0x1249   :  { %13483 = vmatmul.mubr.bf16.vlgmr.msra.gmra.mrb[80].mxu0 %v10196_v27 }
0x124a   :  { %10522 = vmatprep.mubr.bf16.mxu0 %v15366_v53  ;;  %10491 = vmatpush1.bf16.msra.mxu0 %v14676_v35 }
0x124b   :  { %10492 = vmatprep.subr.bf16.mxu0 %v14681_v41 }
0x124e   :  { %10493 = vmatpush1.bf16.msra.mxu0 %v14679_v8 }
0x124f   :  { %10494 = vmatprep.subr.bf16.mxu0 %v14687_v7 }
0x1252   :  { %10495 = vmatpush1.bf16.msra.mxu0 %v14685_v58 }
0x1253   :  { %10496 = vmatprep.subr.bf16.mxu0 %v14693_v11 }
0x1256   :  { %10497 = vmatpush1.bf16.msra.mxu0 %v14691_v12 }
0x1257   :  { %10498 = vmatprep.subr.bf16.mxu0 %v14699_v13 }
0x125a   :  { %10499 = vmatpush1.bf16.msra.mxu0 %v14697_v52 }
0x125b   :  { %10500 = vmatprep.subr.bf16.mxu0 %v14705_v14 }
0x125e   :  { %10501 = vmatpush1.bf16.msra.mxu0 %v14703_v36 }
0x125f   :  { %10502 = vmatprep.subr.bf16.mxu0 %v14711_v17 }
0x1262   :  { %10503 = vmatpush1.bf16.msra.mxu0 %v14709_v57 }
0x1263   :  { %10504 = vmatprep.subr.bf16.mxu0 %v14717_v18 }
0x1266   :  { %10505 = vmatpush1.bf16.msra.mxu0 %v14715_v28 }
0x1267   :  { %13492 = vmatprep.subr.bf16.mxu0 %v15364_v34 }
0x12ef   :  { %v9906_v15 = vpop.f32.mrb[72].mxu0  ;;  %v9947_v32 = vpop.f32.mrb[72].mxu1 }
0x12f0   :  { %v9908_v25 = vpop.f32.mrb[73].mxu0  ;;  %v9949_v29 = vpop.f32.mrb[73].mxu1 }
0x12f1   :  { %v9910_v31 = vpop.f32.mrb[74].mxu0  ;;  %v9951_v39 = vpop.f32.mrb[74].mxu1 }
0x12f2   :  { %v9911_v40 = vpop.f32.mrb[75].mxu0  ;;  %v9952_v44 = vpop.f32.mrb[75].mxu1  ;;  %v14690_v31 = vld [vmem:[#allocation20 + $0x22c] ss:$16 sps:$4 sm:$0xff]   ;;  %v14688_v39 = vld [vmem:[#allocation20 + $0x228] ss:$16 sps:$4 sm:$0xff]  }
0x12f3   :  { %v14696_v40 = vld [vmem:[#allocation20 + $0x24c] ss:$16 sps:$4 sm:$0xff]   ;;  %v14694_v44 = vld [vmem:[#allocation20 + $0x248] ss:$16 sps:$4 sm:$0xff]  }
0x130f   :  { %v10148_v43 = vpop.f32.mrb[76].mxu0  ;;  %v10189_v51 = vpop.f32.mrb[76].mxu1 }
0x1310   :  { %v16061_v16 = vadd.f32 %v10148_v43, %v9906_v15  ;;  %v16063_v45 = vadd.f32 %v10189_v51, %v9947_v32  ;;  %v10150_v55 = vpop.f32.mrb[77].mxu0  ;;  %v10191_v59 = vpop.f32.mrb[77].mxu1  ;;  %v14702_v43 = vld [vmem:[#allocation20 + $0x26c] ss:$16 sps:$4 sm:$0xff]   ;;  %v14700_v51 = vld [vmem:[#allocation20 + $0x268] ss:$16 sps:$4 sm:$0xff]  }
0x1311   :  { %v16065_v54 = vadd.f32 %v10150_v55, %v9908_v25  ;;  %v16067_v38 = vadd.f32 %v10191_v59, %v9949_v29  ;;  %v10152_v62 = vpop.f32.mrb[78].mxu0  ;;  %v10193_v60 = vpop.f32.mrb[78].mxu1  ;;  %v14682_v25 = vld [vmem:[#allocation20 + $0x208] ss:$16 sps:$4 sm:$0xff]   ;;  %v14708_v55 = vld [vmem:[#allocation20 + $0x28c] ss:$16 sps:$4 sm:$0xff]  }
0x1312   :  { %v10153_v47 = vpop.f32.mrb[79].mxu0  ;;  %v10194_v26 = vpop.f32.mrb[79].mxu1  ;;  %v14706_v59 = vld [vmem:[#allocation20 + $0x288] ss:$16 sps:$4 sm:$0xff]   ;;  %v14714_v62 = vld [vmem:[#allocation20 + $0x2ac] ss:$16 sps:$4 sm:$0xff]  }
0x1313   :  { %v14712_v60 = vld [vmem:[#allocation20 + $0x2a8] ss:$16 sps:$4 sm:$0xff]   ;;  %v14720_v47 = vld [vmem:[#allocation20 + $0x2cc] ss:$16 sps:$4 sm:$0xff]  }
0x1314   :  { %v14718_v26 = vld [vmem:[#allocation20 + $0x2c8] ss:$16 sps:$4 sm:$0xff]  }
0x131c   :  { %v10232_v63 = vpop.f32.mrb[80].mxu0 }
0x131d   :  { %v13484_v48 = vpop.f32.mrb[81].mxu0  ;;  %v10238_v1 = vsel %vm5086_vm2, %v10232_v63, -inf }
0x131e   :  { %10239 = vmax.xlane.f32.xlu0 %v10238_v1  ;;  %v10235_v42 = vpop.f32.mrb[82].mxu0  ;;  %v14721_v48 = vld [vmem:[#allocation20 + $0x2e8] ss:$16 sps:$4 sm:$0xff]   ;;  %v7827_v1 = vrot.slane %v15993_v10, %v3426_v46 }
0x131f   :  { %v13485_v0 = vpop.f32.mrb[83].mxu0  ;;  %v7811_v42 = vrot.slane %v15993_v10, %v15717_v24 }
0x1320   :  { %v13531_v0 = vadd.f32 %v16020_v56, %v7827_v1  ;;  %v14727_v1 = vld [vmem:[#allocation20 + $0x308] ss:$16 sps:$4 sm:$0xff]  }
0x13ab   :  { %v10240_v5 = vpop.xlane.xlu0 %10239 }
0x13ac   :  { %v10241_v61 = vsub.f32 %v10232_v63, %v10240_v5  ;;  %v14723_v63 = vld [vmem:[#allocation20 + $0x2ec] ss:$16 sps:$4 sm:$0xff]   ;;  %v13527_v5 = vadd.f32 %v16001_v33, %v7811_v42 }
0x13ae   :  { %v10242_v2 = vmul.f32 1.442695, %v10241_v61  ;;  %v10630_v61 = vpack.c.bf16 %v13531_v0, %v13531_v0  ;;  %v10577_v35 = vpack.c.bf16 %v13527_v5, %v13527_v5  ;;  %v14735_v0 = vld [vmem:[#allocation20 + $0x32c] ss:$16 sps:$4 sm:$0xff]   ;;  %v14733_v5 = vld [vmem:[#allocation20 + $0x328] ss:$16 sps:$4 sm:$0xff]  }
0x13b0   :  { %14988 = vpow2.f32 %v10242_v2  ;;  %v10635_v41 = vsel %vm5103_vm1, %v10630_v61, 0  ;;  %v14741_v61 = vld [vmem:[#allocation20 + $0x34c] ss:$16 sps:$4 sm:$0xff]  }
0x13ba   :  { %v14989_v9 = vpop.eup %14988 }
0x13bb   :  { %v10244_v4 = vsel %vm5086_vm2, %v14989_v9, 0.0 }
0x13bc   :  { %10245 = vadd.xlane.f32.xlu1 %v10244_v4 }
0x1449   :  { %v10246_v27 = vpop.xlane.xlu1 %10245 }
0x144a   :  { %14990 = vrcp.f32 %v10246_v27  ;;  %v14726_v27 = vld [vmem:[#allocation20 + $0x304] ss:$16 sps:$4 sm:$0xff]  }
0x1454   :  { %v14991_v15 = vpop.eup %14990 }
0x1455   :  { %v10248_v32 = vmul.f32 %v14991_v15, %v14989_v9  ;;  %v14729_v15 = vld [vmem:[#allocation20 + $0x30c] ss:$16 sps:$4 sm:$0xff]  }
0x1457   :  { %v10249_v29 = vpack.c.bf16 %v10248_v32, %v10248_v32  ;;  %v14732_v32 = vld [vmem:[#allocation20 + $0x324] ss:$16 sps:$4 sm:$0xff]  }
0x1459   :  { %13489 = vmatmul.mubr.msk.bf16.vlgmr.msra.gmra.mrb[80].mxu1 %vm5086_vm2, %v10249_v29  ;;  %v14738_v29 = vld [vmem:[#allocation20 + $0x344] ss:$16 sps:$4 sm:$0xff]  }
0x145a   :  { %10532 = vmatpush1.bf16.msra.mxu1 %v14682_v25  ;;  %10563 = vmatprep.mubr.bf16.mxu1 %v15366_v53  ;;  %v14730_v25 = vld [vmem:[#allocation20 + $0x320] ss:$16 sps:$4 sm:$0xff]  }
0x145b   :  { %10533 = vmatprep.subr.bf16.mxu1 %v14690_v31  ;;  %v14736_v31 = vld [vmem:[#allocation20 + $0x340] ss:$16 sps:$4 sm:$0xff]  }
0x145e   :  { %10534 = vmatpush1.bf16.msra.mxu1 %v14688_v39  ;;  %v14744_v39 = vld [vmem:[#allocation20 + $0x364] ss:$16 sps:$4 sm:$0xff]  }
0x145f   :  { %10535 = vmatprep.subr.bf16.mxu1 %v14696_v40  ;;  %v14742_v40 = vld [vmem:[#allocation20 + $0x360] ss:$16 sps:$4 sm:$0xff]  }
0x1462   :  { %10536 = vmatpush1.bf16.msra.mxu1 %v14694_v44  ;;  %v14750_v44 = vld [vmem:[#allocation20 + $0x384] ss:$16 sps:$4 sm:$0xff]  }
0x1463   :  { %10537 = vmatprep.subr.bf16.mxu1 %v14702_v43  ;;  %v14748_v43 = vld [vmem:[#allocation20 + $0x380] ss:$16 sps:$4 sm:$0xff]  }
0x1466   :  { %10538 = vmatpush1.bf16.msra.mxu1 %v14700_v51  ;;  %v14756_v51 = vld [vmem:[#allocation20 + $0x3a4] ss:$16 sps:$4 sm:$0xff]  }
0x1467   :  { %10539 = vmatprep.subr.bf16.mxu1 %v14708_v55  ;;  %v14754_v55 = vld [vmem:[#allocation20 + $0x3a0] ss:$16 sps:$4 sm:$0xff]  }
0x146a   :  { %10540 = vmatpush1.bf16.msra.mxu1 %v14706_v59  ;;  %v14762_v59 = vld [vmem:[#allocation20 + $0x3c4] ss:$16 sps:$4 sm:$0xff]  }
0x146b   :  { %10541 = vmatprep.subr.bf16.mxu1 %v14714_v62  ;;  %v14760_v62 = vld [vmem:[#allocation20 + $0x3c0] ss:$16 sps:$4 sm:$0xff]  }
0x146e   :  { %10542 = vmatpush1.bf16.msra.mxu1 %v14712_v60  ;;  %v14768_v60 = vld [vmem:[#allocation20 + $0x3e4] ss:$16 sps:$4 sm:$0xff]  }
0x146f   :  { %10543 = vmatprep.subr.bf16.mxu1 %v14720_v47  ;;  %v14766_v47 = vld [vmem:[#allocation20 + $0x3e0] ss:$16 sps:$4 sm:$0xff]  }
0x1472   :  { %10544 = vmatpush1.bf16.msra.mxu1 %v14718_v26 }
0x1473   :  { %10545 = vmatprep.subr.bf16.mxu1 %v14723_v63 }
0x1476   :  { %10546 = vmatpush1.bf16.msra.mxu1 %v14721_v48 }
0x1477   :  { %13498 = vmatprep.subr.bf16.mxu1 %v15364_v34 }
0x152c   :  { %v10291_v2 = vpop.f32.mrb[80].mxu1 }
0x152d   :  { %v10297_v9 = vpack.c.bf16 %v10291_v2, %v10291_v2  ;;  %v13490_v4 = vpop.f32.mrb[81].mxu1  ;;  %v14739_v2 = vld [vmem:[#allocation20 + $0x348] ss:$16 sps:$4 sm:$0xff]  }
0x152e   :  { %v10294_v20 = vpop.f32.mrb[82].mxu1  ;;  %v14745_v4 = vld [vmem:[#allocation20 + $0x368] ss:$16 sps:$4 sm:$0xff]  }
0x152f   :  { %v13491_v6 = vpop.f32.mrb[83].mxu1  ;;  %10523 = vmatmul.mubr.bf16.vlgmr.msra.gmra.mrb[84].mxu0 %v10297_v9  ;;  %10564 = vmatmul.mubr.bf16.vlgmr.msra.gmra.mrb[84].mxu1 %v10297_v9  ;;  %v14747_v9 = vld [vmem:[#allocation20 + $0x36c] ss:$16 sps:$4 sm:$0xff]   ;;  %v14751_v20 = vld [vmem:[#allocation20 + $0x388] ss:$16 sps:$4 sm:$0xff]  }
0x1530   :  { %13493 = vmatpush3.bf16.xpose.msra.mxu0 %v10577_v35  ;;  %13499 = vmatpush3.bf16.msra.mxu1 %v10635_v41  ;;  %v14753_v35 = vld [vmem:[#allocation20 + $0x38c] ss:$16 sps:$4 sm:$0xff]   ;;  %v14757_v6 = vld [vmem:[#allocation20 + $0x3a8] ss:$16 sps:$4 sm:$0xff]  }
0x1531   :  { %13494 = vmatprep.mubr.msk.bf16.mxu0 %vm15365_vm0, %v15364_v34  ;;  %13500 = vmatprep.mubr.msk.bf16.mxu1 %vm15365_vm0, %v15364_v34  ;;  %v14759_v41 = vld [vmem:[#allocation20 + $0x3ac] ss:$16 sps:$4 sm:$0xff]  }
0x1532   :  { %10870 = vmatprep.subr.bf16.mxu0 %v14726_v27  ;;  %10911 = vmatprep.subr.bf16.mxu1 %v14729_v15  ;;  %v14792_v27 = vld [vmem:[#allocation23 + $0x34] ss:$8 sps:$4 sm:$0xff]  }
0x1533   :  { %v14795_v15 = vld [vmem:[#allocation23 + $0x134] ss:$8 sps:$4 sm:$0xff]  }
0x1537   :  { %13495 = vmatmul.mubr.bf16.vlgmr.msra.gmra.mrb[88].mxu0 %v10576_v19  ;;  %v14765_v19 = vld [vmem:[#allocation20 + $0x3cc] ss:$16 sps:$4 sm:$0xff]  }
0x1538   :  { %10902 = vmatprep.mubr.bf16.mxu0 %v15366_v53 }
0x1602   :  { %v10524_v46 = vpop.f32.mrb[84].mxu0  ;;  %v10565_v10 = vpop.f32.mrb[84].mxu1 }
0x1603   :  { %v16091_v33 = vadd.f32 %v10524_v46, %v16061_v16  ;;  %v16094_v56 = vadd.f32 %v10565_v10, %v16063_v45  ;;  %v10526_v8 = vpop.f32.mrb[85].mxu0  ;;  %v10567_v7 = vpop.f32.mrb[85].mxu1  ;;  %v14771_v46 = vld [vmem:[#allocation20 + $0x3ec] ss:$16 sps:$4 sm:$0xff]   ;;  %v14769_v10 = vld [vmem:[#allocation20 + $0x3e8] ss:$16 sps:$4 sm:$0xff]  }
0x1604   :  { %v16097_v58 = vadd.f32 %v10526_v8, %v16065_v54  ;;  %v16100_v34 = vadd.f32 %v10567_v7, %v16067_v38  ;;  %v10528_v30 = vpop.f32.mrb[86].mxu0  ;;  %v10569_v11 = vpop.f32.mrb[86].mxu1  ;;  %v14724_v38 = vld [vmem:[#allocation20 + $0x300] ss:$16 sps:$4 sm:$0xff]   ;;  %v14774_v8 = vld [vmem:[#allocation23 + $0x4] ss:$8 sps:$4 sm:$0xff]  }
0x1605   :  { %v10529_v12 = vpop.f32.mrb[87].mxu0  ;;  %v10570_v13 = vpop.f32.mrb[87].mxu1  ;;  %10871 = vmatpush1.bf16.msra.mxu0 %v14724_v38  ;;  %v14777_v7 = vld [vmem:[#allocation23 + $0x104] ss:$8 sps:$4 sm:$0xff]   ;;  %v14772_v11 = vld [vmem:[#allocation23] ss:$8 sps:$4 sm:$0xff]  }
0x1606   :  { %10872 = vmatprep.subr.bf16.mxu0 %v14732_v32  ;;  %v14775_v12 = vld [vmem:[#allocation23 + $0x100] ss:$8 sps:$4 sm:$0xff]   ;;  %v14790_v32 = vld [vmem:[#allocation23 + $0x30] ss:$8 sps:$4 sm:$0xff]  }
0x1607   :  { %v14787_v38 = vld [vmem:[#allocation23 + $0x120] ss:$8 sps:$4 sm:$0xff]  }
0x1609   :  { %10873 = vmatpush1.bf16.msra.mxu0 %v14730_v25  ;;  %v14793_v25 = vld [vmem:[#allocation23 + $0x130] ss:$8 sps:$4 sm:$0xff]  }
0x160a   :  { %v10612_v52 = vpop.f32.mrb[88].mxu0  ;;  %10874 = vmatprep.subr.bf16.mxu0 %v14738_v29  ;;  %v14798_v29 = vld [vmem:[#allocation23 + $0x44] ss:$8 sps:$4 sm:$0xff]  }
0x160b   :  { %v13496_v14 = vpop.f32.mrb[89].mxu0  ;;  %v10618_v16 = vsel %vm5086_vm2, %v10612_v52, -inf }
0x160c   :  { %10619 = vmax.xlane.f32.xlu0 %v10618_v16  ;;  %v10615_v36 = vpop.f32.mrb[90].mxu0  ;;  %v14780_v14 = vld [vmem:[#allocation23 + $0x14] ss:$8 sps:$4 sm:$0xff]  }
0x160d   :  { %v13497_v45 = vpop.f32.mrb[91].mxu0  ;;  %10875 = vmatpush1.bf16.msra.mxu0 %v14736_v31  ;;  %v14783_v16 = vld [vmem:[#allocation23 + $0x114] ss:$8 sps:$4 sm:$0xff]   ;;  %v14801_v31 = vld [vmem:[#allocation23 + $0x144] ss:$8 sps:$4 sm:$0xff]  }
0x160e   :  { %10876 = vmatprep.subr.bf16.mxu0 %v14744_v39  ;;  %v14796_v39 = vld [vmem:[#allocation23 + $0x40] ss:$8 sps:$4 sm:$0xff]  }
0x1611   :  { %10877 = vmatpush1.bf16.msra.mxu0 %v14742_v40  ;;  %v14799_v40 = vld [vmem:[#allocation23 + $0x140] ss:$8 sps:$4 sm:$0xff]  }
0x1612   :  { %10878 = vmatprep.subr.bf16.mxu0 %v14750_v44  ;;  %v14804_v44 = vld [vmem:[#allocation23 + $0x54] ss:$8 sps:$4 sm:$0xff]  }
0x1615   :  { %10879 = vmatpush1.bf16.msra.mxu0 %v14748_v43  ;;  %v14807_v43 = vld [vmem:[#allocation23 + $0x154] ss:$8 sps:$4 sm:$0xff]  }
0x1616   :  { %10880 = vmatprep.subr.bf16.mxu0 %v14756_v51  ;;  %v14802_v51 = vld [vmem:[#allocation23 + $0x50] ss:$8 sps:$4 sm:$0xff]  }
0x1619   :  { %10881 = vmatpush1.bf16.msra.mxu0 %v14754_v55  ;;  %v14805_v55 = vld [vmem:[#allocation23 + $0x150] ss:$8 sps:$4 sm:$0xff]  }
0x161a   :  { %10882 = vmatprep.subr.bf16.mxu0 %v14762_v59  ;;  %v14810_v59 = vld [vmem:[#allocation23 + $0x64] ss:$8 sps:$4 sm:$0xff]  }
0x161d   :  { %10883 = vmatpush1.bf16.msra.mxu0 %v14760_v62  ;;  %v14813_v62 = vld [vmem:[#allocation23 + $0x164] ss:$8 sps:$4 sm:$0xff]  }
0x161e   :  { %10884 = vmatprep.subr.bf16.mxu0 %v14768_v60  ;;  %v14808_v60 = vld [vmem:[#allocation23 + $0x60] ss:$8 sps:$4 sm:$0xff]  }
0x1621   :  { %10885 = vmatpush1.bf16.msra.mxu0 %v14766_v47  ;;  %v14811_v47 = vld [vmem:[#allocation23 + $0x160] ss:$8 sps:$4 sm:$0xff]  }
0x1622   :  { %11438 = vmatprep.subr.bf16.mxu0 %v14774_v8  ;;  %v14841_v8 = vld [vmem:[#allocation23 + $0x1b0] ss:$8 sps:$4 sm:$0xff]  }
0x1699   :  { %v10620_v17 = vpop.xlane.xlu0 %10619 }
0x169a   :  { %v10621_v57 = vsub.f32 %v10612_v52, %v10620_v17  ;;  %v14778_v17 = vld [vmem:[#allocation23 + $0x10] ss:$8 sps:$4 sm:$0xff]  }
0x169c   :  { %v10622_v18 = vmul.f32 1.442695, %v10621_v57  ;;  %v14781_v57 = vld [vmem:[#allocation23 + $0x110] ss:$8 sps:$4 sm:$0xff]  }
0x169e   :  { %14992 = vpow2.f32 %v10622_v18  ;;  %v14786_v18 = vld [vmem:[#allocation23 + $0x24] ss:$8 sps:$4 sm:$0xff]  }
0x16a8   :  { %v14993_v54 = vpop.eup %14992 }
0x16a9   :  { %v10624_v28 = vsel %vm5086_vm2, %v14993_v54, 0.0 }
0x16aa   :  { %10625 = vadd.xlane.f32.xlu1 %v10624_v28  ;;  %v14784_v28 = vld [vmem:[#allocation23 + $0x20] ss:$8 sps:$4 sm:$0xff]  }
0x1737   :  { %v10626_v26 = vpop.xlane.xlu1 %10625 }
0x1738   :  { %14994 = vrcp.f32 %v10626_v26  ;;  %v14816_v26 = vld [vmem:[#allocation23 + $0x74] ss:$8 sps:$4 sm:$0xff]  }
0x1742   :  { %v14995_v63 = vpop.eup %14994 }
0x1743   :  { %v10628_v48 = vmul.f32 %v14995_v63, %v14993_v54  ;;  %v14789_v54 = vld [vmem:[#allocation23 + $0x124] ss:$8 sps:$4 sm:$0xff]   ;;  %v14819_v63 = vld [vmem:[#allocation23 + $0x174] ss:$8 sps:$4 sm:$0xff]  }
0x1745   :  { %v10629_v42 = vpack.c.bf16 %v10628_v48, %v10628_v48  ;;  %v14814_v48 = vld [vmem:[#allocation23 + $0x70] ss:$8 sps:$4 sm:$0xff]  }
0x1747   :  { %13501 = vmatmul.mubr.msk.bf16.vlgmr.msra.gmra.mrb[88].mxu1 %vm5086_vm2, %v10629_v42  ;;  %v14822_v42 = vld [vmem:[#allocation23 + $0x84] ss:$8 sps:$4 sm:$0xff]  }
0x1748   :  { %10912 = vmatpush1.bf16.msra.mxu1 %v14727_v1  ;;  %10943 = vmatprep.mubr.bf16.mxu1 %v15366_v53  ;;  %v14763_v53 = vld [vmem:[#allocation20 + $0x3c8] ss:$16 sps:$4 sm:$0xff]  }
0x1749   :  { %10913 = vmatprep.subr.bf16.mxu1 %v14735_v0  ;;  %v14817_v1 = vld [vmem:[#allocation23 + $0x170] ss:$8 sps:$4 sm:$0xff]   ;;  %v14825_v0 = vld [vmem:[#allocation23 + $0x184] ss:$8 sps:$4 sm:$0xff]  }
0x174c   :  { %10914 = vmatpush1.bf16.msra.mxu1 %v14733_v5  ;;  %v14820_v5 = vld [vmem:[#allocation23 + $0x80] ss:$8 sps:$4 sm:$0xff]  }
0x174d   :  { %10915 = vmatprep.subr.bf16.mxu1 %v14741_v61  ;;  %v14823_v61 = vld [vmem:[#allocation23 + $0x180] ss:$8 sps:$4 sm:$0xff]  }
0x1750   :  { %10916 = vmatpush1.bf16.msra.mxu1 %v14739_v2  ;;  %v14828_v2 = vld [vmem:[#allocation23 + $0x94] ss:$8 sps:$4 sm:$0xff]  }
0x1751   :  { %10917 = vmatprep.subr.bf16.mxu1 %v14747_v9  ;;  %v14831_v9 = vld [vmem:[#allocation23 + $0x194] ss:$8 sps:$4 sm:$0xff]  }
0x1754   :  { %10918 = vmatpush1.bf16.msra.mxu1 %v14745_v4  ;;  %v14826_v4 = vld [vmem:[#allocation23 + $0x90] ss:$8 sps:$4 sm:$0xff]  }
0x1755   :  { %10919 = vmatprep.subr.bf16.mxu1 %v14753_v35  ;;  %v14829_v35 = vld [vmem:[#allocation23 + $0x190] ss:$8 sps:$4 sm:$0xff]  }
0x1758   :  { %10920 = vmatpush1.bf16.msra.mxu1 %v14751_v20  ;;  %v14834_v20 = vld [vmem:[#allocation23 + $0xa4] ss:$8 sps:$4 sm:$0xff]  }
0x1759   :  { %10921 = vmatprep.subr.bf16.mxu1 %v14759_v41  ;;  %v14837_v41 = vld [vmem:[#allocation23 + $0x1a4] ss:$8 sps:$4 sm:$0xff]  }
0x175c   :  { %10922 = vmatpush1.bf16.msra.mxu1 %v14757_v6  ;;  %v14832_v6 = vld [vmem:[#allocation23 + $0xa0] ss:$8 sps:$4 sm:$0xff]  }
0x175d   :  { %10923 = vmatprep.subr.bf16.mxu1 %v14765_v19  ;;  %v14835_v19 = vld [vmem:[#allocation23 + $0x1a0] ss:$8 sps:$4 sm:$0xff]  }
0x1760   :  { %10924 = vmatpush1.bf16.msra.mxu1 %v14763_v53  ;;  %v14840_v53 = vld [vmem:[#allocation23 + $0xb4] ss:$8 sps:$4 sm:$0xff]  }
0x1761   :  { %10925 = vmatprep.subr.bf16.mxu1 %v14771_v46  ;;  %v14843_v46 = vld [vmem:[#allocation23 + $0x1b4] ss:$8 sps:$4 sm:$0xff]  }
0x1764   :  { %10926 = vmatpush1.bf16.msra.mxu1 %v14769_v10  ;;  %v14838_v10 = vld [vmem:[#allocation23 + $0xb0] ss:$8 sps:$4 sm:$0xff]  }
0x1765   :  { %11479 = vmatprep.subr.bf16.mxu1 %v14777_v7  ;;  %v14846_v7 = vld [vmem:[#allocation23 + $0xc4] ss:$8 sps:$4 sm:$0xff]  }
0x181a   :  { %v10671_v30 = vpop.f32.mrb[88].mxu1 }
0x181b   :  { %v10677_v13 = vpack.c.bf16 %v10671_v30, %v10671_v30  ;;  %v13502_v52 = vpop.f32.mrb[89].mxu1  ;;  %v14849_v30 = vld [vmem:[#allocation23 + $0x1c4] ss:$8 sps:$4 sm:$0xff]  }
0x181c   :  { %v10674_v36 = vpop.f32.mrb[90].mxu1  ;;  %v14855_v52 = vld [vmem:[#allocation23 + $0x1d4] ss:$8 sps:$4 sm:$0xff]  }
0x181d   :  { %v13503_v45 = vpop.f32.mrb[91].mxu1  ;;  %10903 = vmatmul.mubr.bf16.vlgmr.msra.gmra.mrb[92].mxu0 %v10677_v13  ;;  %10944 = vmatmul.mubr.bf16.vlgmr.msra.gmra.mrb[92].mxu1 %v10677_v13  ;;  %v14852_v13 = vld [vmem:[#allocation23 + $0xd4] ss:$8 sps:$4 sm:$0xff]   ;;  %v14858_v36 = vld [vmem:[#allocation23 + $0xe4] ss:$8 sps:$4 sm:$0xff]  }
0x181e   :  { %11439 = vmatpush1.bf16.msra.mxu0 %v14772_v11  ;;  %11480 = vmatpush1.bf16.msra.mxu1 %v14775_v12  ;;  %v14844_v11 = vld [vmem:[#allocation23 + $0xc0] ss:$8 sps:$4 sm:$0xff]   ;;  %v14861_v45 = vld [vmem:[#allocation23 + $0x1e4] ss:$8 sps:$4 sm:$0xff]  }
0x181f   :  { %11440 = vmatprep.subr.bf16.mxu0 %v14780_v14  ;;  %11481 = vmatprep.subr.bf16.mxu1 %v14783_v16  ;;  %v14847_v12 = vld [vmem:[#allocation23 + $0x1c0] ss:$8 sps:$4 sm:$0xff]   ;;  %v14850_v14 = vld [vmem:[#allocation23 + $0xd0] ss:$8 sps:$4 sm:$0xff]  }
0x1820   :  { %v14853_v16 = vld [vmem:[#allocation23 + $0x1d0] ss:$8 sps:$4 sm:$0xff]  }
0x1822   :  { %11441 = vmatpush1.bf16.msra.mxu0 %v14778_v17  ;;  %11482 = vmatpush1.bf16.msra.mxu1 %v14781_v57  ;;  %v14856_v17 = vld [vmem:[#allocation23 + $0xe0] ss:$8 sps:$4 sm:$0xff]  }
0x1823   :  { %11442 = vmatprep.subr.bf16.mxu0 %v14786_v18  ;;  %11483 = vmatprep.subr.bf16.mxu1 %v14789_v54  ;;  %v14859_v57 = vld [vmem:[#allocation23 + $0x1e0] ss:$8 sps:$4 sm:$0xff]   ;;  %v14864_v18 = vld [vmem:[#allocation23 + $0xf4] ss:$8 sps:$4 sm:$0xff]  }
0x1824   :  { %v14867_v54 = vld [vmem:[#allocation23 + $0x1f4] ss:$8 sps:$4 sm:$0xff]  }
0x1826   :  { %11443 = vmatpush1.bf16.msra.mxu0 %v14784_v28  ;;  %11484 = vmatpush1.bf16.msra.mxu1 %v14787_v38  ;;  %v14862_v28 = vld [vmem:[#allocation23 + $0xf0] ss:$8 sps:$4 sm:$0xff]  }
0x1827   :  { %11444 = vmatprep.subr.bf16.mxu0 %v14792_v27  ;;  %11485 = vmatprep.subr.bf16.mxu1 %v14795_v15  ;;  %v14865_v38 = vld [vmem:[#allocation23 + $0x1f0] ss:$8 sps:$4 sm:$0xff]   ;;  %v14870_v27 = vld [vmem:[#allocation22 + $0x4] ss:$8 sps:$4 sm:$0xff]  }
0x1828   :  { %v14873_v15 = vld [vmem:[#allocation22 + $0x104] ss:$8 sps:$4 sm:$0xff]  }
0x182a   :  { %11445 = vmatpush1.bf16.msra.mxu0 %v14790_v32  ;;  %11486 = vmatpush1.bf16.msra.mxu1 %v14793_v25  ;;  %v10956_v32 = vld [vmem:[%s16168_s17] sm:$0xf] }
0x182b   :  { %11446 = vmatprep.subr.bf16.mxu0 %v14798_v29  ;;  %11487 = vmatprep.subr.bf16.mxu1 %v14801_v31  ;;  %v16112_v25 = vld [vmem:[%s16162_s11] sm:$0xf]  ;;  %v10961_v29 = vrot.slane %v10956_v32, %v15708_v21  ;;  %v10969_v31 = vrot.slane %v10956_v32, %v15711_v22 }
0x182e   :  { %11447 = vmatpush1.bf16.msra.mxu0 %v14796_v39  ;;  %11488 = vmatpush1.bf16.msra.mxu1 %v14799_v40 }
0x182f   :  { %11448 = vmatprep.subr.bf16.mxu0 %v14804_v44  ;;  %11489 = vmatprep.subr.bf16.mxu1 %v14807_v43  ;;  %v10965_v44 = vrot.slane %v10956_v32, %v15714_v23  ;;  %v10973_v43 = vrot.slane %v10956_v32, %v15717_v24  ;;  %v14915_v32 = vld [vmem:[#allocation22 + $0x174] ss:$8 sps:$4 sm:$0xff]  }
0x1832   :  { %11449 = vmatpush1.bf16.msra.mxu0 %v14802_v51  ;;  %11490 = vmatpush1.bf16.msra.mxu1 %v14805_v55  ;;  %v6567_v51 = vrot.slane %v16112_v25, %v15714_v23  ;;  %v6575_v55 = vrot.slane %v16112_v25, %v15717_v24 }
0x1833   :  { %11450 = vmatprep.subr.bf16.mxu0 %v14810_v59  ;;  %11491 = vmatprep.subr.bf16.mxu1 %v14813_v62 }
0x1834   :  { %v6581_v24 = vadd.f32 %v6567_v51, %v15952_v49  ;;  %v14877_v49 = vld [vmem:[#allocation22 + $0x110] ss:$8 sps:$4 sm:$0xff]   ;;  %v14924_v51 = vld [vmem:[#allocation22 + $0x94] ss:$8 sps:$4 sm:$0xff]  }
0x1836   :  { %11451 = vmatpush1.bf16.msra.mxu0 %v14808_v60  ;;  %11492 = vmatpush1.bf16.msra.mxu1 %v14811_v47 }
0x1837   :  { %11452 = vmatprep.subr.bf16.mxu0 %v14816_v26  ;;  %11493 = vmatprep.subr.bf16.mxu1 %v14819_v63 }
0x183a   :  { %11453 = vmatpush1.bf16.msra.mxu0 %v14814_v48  ;;  %11494 = vmatpush1.bf16.msra.mxu1 %v14817_v1 }
0x183b   :  { %11454 = vmatprep.subr.bf16.mxu0 %v14822_v42  ;;  %11495 = vmatprep.subr.bf16.mxu1 %v14825_v0 }
0x183e   :  { %11455 = vmatpush1.bf16.msra.mxu0 %v14820_v5  ;;  %11496 = vmatpush1.bf16.msra.mxu1 %v14823_v61 }
0x183f   :  { %11456 = vmatprep.subr.bf16.mxu0 %v14828_v2  ;;  %11497 = vmatprep.subr.bf16.mxu1 %v14831_v9 }
0x1842   :  { %11457 = vmatpush1.bf16.msra.mxu0 %v14826_v4  ;;  %11498 = vmatpush1.bf16.msra.mxu1 %v14829_v35  ;;  %v14868_v35 = vld [vmem:[#allocation22] ss:$8 sps:$4 sm:$0xff]  }
0x1843   :  { %11458 = vmatprep.subr.bf16.mxu0 %v14834_v20  ;;  %11499 = vmatprep.subr.bf16.mxu1 %v14837_v41  ;;  %v14871_v20 = vld [vmem:[#allocation22 + $0x100] ss:$8 sps:$4 sm:$0xff]  }
0x1846   :  { %11459 = vmatpush1.bf16.msra.mxu0 %v14832_v6  ;;  %11500 = vmatpush1.bf16.msra.mxu1 %v14835_v19  ;;  %v14879_v6 = vld [vmem:[#allocation22 + $0x114] ss:$8 sps:$4 sm:$0xff]   ;;  %v10983_v19 = vpack.c.bf16 %v6581_v24, %v6581_v24 }
0x1847   :  { %11460 = vmatprep.subr.bf16.mxu0 %v14840_v53  ;;  %11501 = vmatprep.subr.bf16.mxu1 %v14843_v46  ;;  %v14874_v46 = vld [vmem:[#allocation22 + $0x10] ss:$8 sps:$4 sm:$0xff]   ;;  %v14948_v24 = vld [vmem:[#allocation22 + $0xd4] ss:$8 sps:$4 sm:$0xff]  }
0x184a   :  { %11461 = vmatpush1.bf16.msra.mxu0 %v14838_v10  ;;  %11502 = vmatpush1.bf16.msra.mxu1 %v14841_v8  ;;  %v14885_v10 = vld [vmem:[#allocation22 + $0x124] ss:$8 sps:$4 sm:$0xff]   ;;  %v14880_v8 = vld [vmem:[#allocation22 + $0x20] ss:$8 sps:$4 sm:$0xff]  }
0x184b   :  { %11462 = vmatprep.subr.bf16.mxu0 %v14846_v7  ;;  %11503 = vmatprep.subr.bf16.mxu1 %v14849_v30  ;;  %v14883_v7 = vld [vmem:[#allocation22 + $0x120] ss:$8 sps:$4 sm:$0xff]   ;;  %v14888_v30 = vld [vmem:[#allocation22 + $0x34] ss:$8 sps:$4 sm:$0xff]  }
0x184e   :  { %11463 = vmatpush1.bf16.msra.mxu0 %v14844_v11  ;;  %11504 = vmatpush1.bf16.msra.mxu1 %v14847_v12  ;;  %v14891_v11 = vld [vmem:[#allocation22 + $0x134] ss:$8 sps:$4 sm:$0xff]   ;;  %v14886_v12 = vld [vmem:[#allocation22 + $0x30] ss:$8 sps:$4 sm:$0xff]  }
0x184f   :  { %11464 = vmatprep.subr.bf16.mxu0 %v14852_v13  ;;  %11505 = vmatprep.subr.bf16.mxu1 %v14855_v52  ;;  %v14889_v13 = vld [vmem:[#allocation22 + $0x130] ss:$8 sps:$4 sm:$0xff]   ;;  %v14894_v52 = vld [vmem:[#allocation22 + $0x44] ss:$8 sps:$4 sm:$0xff]  }
0x1852   :  { %11465 = vmatpush1.bf16.msra.mxu0 %v14850_v14  ;;  %11506 = vmatpush1.bf16.msra.mxu1 %v14853_v16  ;;  %v14897_v14 = vld [vmem:[#allocation22 + $0x144] ss:$8 sps:$4 sm:$0xff]   ;;  %v14892_v16 = vld [vmem:[#allocation22 + $0x40] ss:$8 sps:$4 sm:$0xff]  }
0x1853   :  { %11466 = vmatprep.subr.bf16.mxu0 %v14858_v36  ;;  %11507 = vmatprep.subr.bf16.mxu1 %v14861_v45  ;;  %v14895_v36 = vld [vmem:[#allocation22 + $0x140] ss:$8 sps:$4 sm:$0xff]   ;;  %v14900_v45 = vld [vmem:[#allocation22 + $0x54] ss:$8 sps:$4 sm:$0xff]  }
0x1856   :  { %11467 = vmatpush1.bf16.msra.mxu0 %v14856_v17  ;;  %11508 = vmatpush1.bf16.msra.mxu1 %v14859_v57  ;;  %v14903_v17 = vld [vmem:[#allocation22 + $0x154] ss:$8 sps:$4 sm:$0xff]   ;;  %v14898_v57 = vld [vmem:[#allocation22 + $0x50] ss:$8 sps:$4 sm:$0xff]  }
0x1857   :  { %11468 = vmatprep.subr.bf16.mxu0 %v14864_v18  ;;  %11509 = vmatprep.subr.bf16.mxu1 %v14867_v54  ;;  %v14901_v18 = vld [vmem:[#allocation22 + $0x150] ss:$8 sps:$4 sm:$0xff]   ;;  %v14906_v54 = vld [vmem:[#allocation22 + $0x64] ss:$8 sps:$4 sm:$0xff]  }
0x185a   :  { %11469 = vmatpush1.bf16.msra.mxu0 %v14862_v28  ;;  %11510 = vmatpush1.bf16.msra.mxu1 %v14865_v38  ;;  %v14909_v28 = vld [vmem:[#allocation22 + $0x164] ss:$8 sps:$4 sm:$0xff]   ;;  %v14904_v38 = vld [vmem:[#allocation22 + $0x60] ss:$8 sps:$4 sm:$0xff]  }
0x185b   :  { %11840 = vmatprep.subr.bf16.mxu0 %v14870_v27  ;;  %11881 = vmatprep.subr.bf16.mxu1 %v14873_v15  ;;  %v14907_v27 = vld [vmem:[#allocation22 + $0x160] ss:$8 sps:$4 sm:$0xff]   ;;  %v14912_v15 = vld [vmem:[#allocation22 + $0x74] ss:$8 sps:$4 sm:$0xff]  }
0x18f0   :  { %v10904_v39 = vpop.f32.mrb[92].mxu0  ;;  %v10945_v40 = vpop.f32.mrb[92].mxu1 }
0x18f1   :  { %v10952_v59 = vadd.f32 %v10904_v39, %v16091_v33  ;;  %v10954_v62 = vadd.f32 %v10945_v40, %v16094_v56  ;;  %v10906_v60 = vpop.f32.mrb[93].mxu0  ;;  %v10947_v47 = vpop.f32.mrb[93].mxu1  ;;  %v6583_v33 = vadd.f32 %v6575_v55, %v15955_v50  ;;  %v14882_v50 = vld [vmem:[#allocation22 + $0x24] ss:$8 sps:$4 sm:$0xff]   ;;  %v14927_v55 = vld [vmem:[#allocation22 + $0x194] ss:$8 sps:$4 sm:$0xff]  }
0x18f2   :  { %v10953_v26 = vadd.f32 %v10906_v60, %v16097_v58  ;;  %v10955_v63 = vadd.f32 %v10947_v47, %v16100_v34  ;;  %v10908_v48 = vpop.f32.mrb[94].mxu0  ;;  %v10949_v1 = vpop.f32.mrb[94].mxu1  ;;  %v14876_v34 = vld [vmem:[#allocation22 + $0x14] ss:$8 sps:$4 sm:$0xff]   ;;  %v14918_v39 = vld [vmem:[#allocation22 + $0x84] ss:$8 sps:$4 sm:$0xff]  }
0x18f3   :  { %v10978_v42 = vadd.f32 %v10961_v29, %v10952_v59  ;;  %v10980_v0 = vadd.f32 %v10969_v31, %v10954_v62  ;;  %v10909_v5 = vpop.f32.mrb[95].mxu0  ;;  %v10950_v61 = vpop.f32.mrb[95].mxu1  ;;  %v10985_v53 = vpack.c.bf16 %v6583_v33, %v6583_v33  ;;  %v14910_v29 = vld [vmem:[#allocation22 + $0x70] ss:$8 sps:$4 sm:$0xff]   ;;  %v14921_v40 = vld [vmem:[#allocation22 + $0x184] ss:$8 sps:$4 sm:$0xff]  }
0x18f4   :  { %v10979_v2 = vadd.f32 %v10965_v44, %v10953_v26  ;;  %v10981_v9 = vadd.f32 %v10973_v43, %v10955_v63  ;;  %v14913_v31 = vld [vmem:[#allocation22 + $0x170] ss:$8 sps:$4 sm:$0xff]   ;;  %v14916_v44 = vld [vmem:[#allocation22 + $0x80] ss:$8 sps:$4 sm:$0xff]   ;;  %v14930_v60 = vld [vmem:[#allocation22 + $0xa4] ss:$8 sps:$4 sm:$0xff]  }
0x18f5   :  { %v11050_v41 = vpack.c.bf16 %v10978_v42, %v10978_v42  ;;  %v11052_v58 = vpack.c.bf16 %v10980_v0, %v10980_v0  ;;  %v14919_v43 = vld [vmem:[#allocation22 + $0x180] ss:$8 sps:$4 sm:$0xff]   ;;  %v14922_v59 = vld [vmem:[#allocation22 + $0x90] ss:$8 sps:$4 sm:$0xff]   ;;  %v14933_v47 = vld [vmem:[#allocation22 + $0x1a4] ss:$8 sps:$4 sm:$0xff]  }
0x18f6   :  { %v11051_v4 = vpack.c.bf16 %v10979_v2, %v10979_v2  ;;  %v11053_v56 = vpack.c.bf16 %v10981_v9, %v10981_v9  ;;  %v14925_v62 = vld [vmem:[#allocation22 + $0x190] ss:$8 sps:$4 sm:$0xff]   ;;  %v14928_v26 = vld [vmem:[#allocation22 + $0xa0] ss:$8 sps:$4 sm:$0xff]   ;;  %v14936_v48 = vld [vmem:[#allocation22 + $0xb4] ss:$8 sps:$4 sm:$0xff]  }
0x18f7   :  { %v14931_v63 = vld [vmem:[#allocation22 + $0x1a0] ss:$8 sps:$4 sm:$0xff]   ;;  %v14939_v1 = vld [vmem:[#allocation22 + $0x1b4] ss:$8 sps:$4 sm:$0xff]   ;;  %v14934_v42 = vld [vmem:[#allocation22 + $0xb0] ss:$8 sps:$4 sm:$0xff]  }
0x18f8   :  { %11470 = vmatprep.mubr.bf16.mxu0 %v11051_v4  ;;  %11511 = vmatprep.mubr.bf16.mxu1 %v11053_v56  ;;  %v14937_v0 = vld [vmem:[#allocation22 + $0x1b0] ss:$8 sps:$4 sm:$0xff]   ;;  %v14942_v5 = vld [vmem:[#allocation22 + $0xc4] ss:$8 sps:$4 sm:$0xff]   ;;  %v14940_v2 = vld [vmem:[#allocation22 + $0xc0] ss:$8 sps:$4 sm:$0xff]  }
0x18f9   :  { %11471 = vmatmul.mubr.bf16.vlgmr.msra.gmra.mrb[96].mxu0 %v11050_v41  ;;  %11512 = vmatmul.mubr.bf16.vlgmr.msra.gmra.mrb[96].mxu1 %v11052_v58  ;;  %v14945_v61 = vld [vmem:[#allocation22 + $0x1c4] ss:$8 sps:$4 sm:$0xff]   ;;  %v14943_v9 = vld [vmem:[#allocation22 + $0x1c0] ss:$8 sps:$4 sm:$0xff]   ;;  %v14951_v33 = vld [vmem:[#allocation22 + $0x1d4] ss:$8 sps:$4 sm:$0xff]  }
0x18fa   :  { %11841 = vmatpush1.bf16.msra.mxu0 %v14868_v35  ;;  %11882 = vmatpush1.bf16.msra.mxu1 %v14871_v20  ;;  %v14946_v4 = vld [vmem:[#allocation22 + $0xd0] ss:$8 sps:$4 sm:$0xff]   ;;  %v14954_v35 = vld [vmem:[#allocation22 + $0xe4] ss:$8 sps:$4 sm:$0xff]   ;;  %v14952_v41 = vld [vmem:[#allocation22 + $0xe0] ss:$8 sps:$4 sm:$0xff]  }
0x18fb   :  { %11872 = vmatprep.mubr.bf16.mxu0 %v10983_v19  ;;  %11913 = vmatprep.mubr.bf16.mxu1 %v10985_v53  ;;  %v14949_v56 = vld [vmem:[#allocation22 + $0x1d0] ss:$8 sps:$4 sm:$0xff]   ;;  %v14957_v20 = vld [vmem:[#allocation22 + $0x1e4] ss:$8 sps:$4 sm:$0xff]   ;;  %v14955_v58 = vld [vmem:[#allocation22 + $0x1e0] ss:$8 sps:$4 sm:$0xff]  }
0x18fc   :  { %11842 = vmatprep.subr.bf16.mxu0 %v14876_v34  ;;  %11883 = vmatprep.subr.bf16.mxu1 %v14879_v6  ;;  %v6563_v34 = vrot.slane %v16112_v25, %v15708_v21  ;;  %v6571_v6 = vrot.slane %v16112_v25, %v15711_v22  ;;  %v14960_v19 = vld [vmem:[#allocation22 + $0xf4] ss:$8 sps:$4 sm:$0xff]  }
0x18fd   :  { %v14963_v53 = vld [vmem:[#allocation22 + $0x1f4] ss:$8 sps:$4 sm:$0xff]  }
0x18fe   :  { %11843 = vmatpush1.bf16.msra.mxu0 %v14874_v46  ;;  %11884 = vmatpush1.bf16.msra.mxu1 %v14877_v49  ;;  %v14958_v46 = vld [vmem:[#allocation22 + $0xf0] ss:$8 sps:$4 sm:$0xff]  }
0x18ff   :  { %11844 = vmatprep.subr.bf16.mxu0 %v14882_v50  ;;  %11885 = vmatprep.subr.bf16.mxu1 %v14885_v10  ;;  %v14961_v49 = vld [vmem:[#allocation22 + $0x1f0] ss:$8 sps:$4 sm:$0xff]   ;;  %v6580_v50 = vadd.f32 %v6563_v34, %v15946_v3  ;;  %v6582_v10 = vadd.f32 %v6571_v6, %v15949_v37 }
0x1900   :  { %v11922_v37 = vld [vmem:[%s16171_s20] sm:$0x3]  ;;  %s15304_s20 = scalar_lea.vmem %s11945_s4, 256 }
0x1901   :  { %p15305_p0 = scmp.ne.s32.totalorder %s11945_s4, %s15304_s20  ;;  %p15310_p2 = scmp.lt.s32.totalorder %s15304_s20, %s15304_s20 }
0x1902   :  { %11845 = vmatpush1.bf16.msra.mxu0 %v14880_v8  ;;  %11886 = vmatpush1.bf16.msra.mxu1 %v14883_v7  ;;  %v10982_v8 = vpack.c.bf16 %v6580_v50, %v6580_v50  ;;  %v10984_v7 = vpack.c.bf16 %v6582_v10, %v6582_v10 }
0x1903   :  { %11846 = vmatprep.subr.bf16.mxu0 %v14888_v30  ;;  %11887 = vmatprep.subr.bf16.mxu1 %v14891_v11  ;;  %p15311_p3 = por %p15310_p2, %p15309_p1 }
0x1905   :  { %p15312_p4 = pnand %p15311_p3, %p15305_p0 }
0x1906   :  { %11847 = vmatpush1.bf16.msra.mxu0 %v14886_v12  ;;  %11888 = vmatpush1.bf16.msra.mxu1 %v14889_v13 }
0x1907   :  { %11848 = vmatprep.subr.bf16.mxu0 %v14894_v52  ;;  %11889 = vmatprep.subr.bf16.mxu1 %v14897_v14 }
0x190a   :  { %11849 = vmatpush1.bf16.msra.mxu0 %v14892_v16  ;;  %11890 = vmatpush1.bf16.msra.mxu1 %v14895_v36 }
0x190b   :  { %11850 = vmatprep.subr.bf16.mxu0 %v14900_v45  ;;  %11891 = vmatprep.subr.bf16.mxu1 %v14903_v17 }
0x190e   :  { %11851 = vmatpush1.bf16.msra.mxu0 %v14898_v57  ;;  %11892 = vmatpush1.bf16.msra.mxu1 %v14901_v18  ;;  %v11927_v57 = vrot.slane %v11922_v37, %v15708_v21 }
0x190f   :  { %11852 = vmatprep.subr.bf16.mxu0 %v14906_v54  ;;  %11893 = vmatprep.subr.bf16.mxu1 %v14909_v28 }
0x1912   :  { %11853 = vmatpush1.bf16.msra.mxu0 %v14904_v38  ;;  %11894 = vmatpush1.bf16.msra.mxu1 %v14907_v27  ;;  %v11931_v38 = vrot.slane %v11922_v37, %v15714_v23 }
0x1913   :  { %11854 = vmatprep.subr.bf16.mxu0 %v14912_v15  ;;  %11895 = vmatprep.subr.bf16.mxu1 %v14915_v32 }
0x1916   :  { %11855 = vmatpush1.bf16.msra.mxu0 %v14910_v29  ;;  %11896 = vmatpush1.bf16.msra.mxu1 %v14913_v31 }
0x1917   :  { %11856 = vmatprep.subr.bf16.mxu0 %v14918_v39  ;;  %11897 = vmatprep.subr.bf16.mxu1 %v14921_v40 }
0x191a   :  { %11857 = vmatpush1.bf16.msra.mxu0 %v14916_v44  ;;  %11898 = vmatpush1.bf16.msra.mxu1 %v14919_v43 }
0x191b   :  { %11858 = vmatprep.subr.bf16.mxu0 %v14924_v51  ;;  %11899 = vmatprep.subr.bf16.mxu1 %v14927_v55 }
0x191e   :  { %11859 = vmatpush1.bf16.msra.mxu0 %v14922_v59  ;;  %11900 = vmatpush1.bf16.msra.mxu1 %v14925_v62 }
0x191f   :  { %11860 = vmatprep.subr.bf16.mxu0 %v14930_v60  ;;  %11901 = vmatprep.subr.bf16.mxu1 %v14933_v47 }
0x1922   :  { %11861 = vmatpush1.bf16.msra.mxu0 %v14928_v26  ;;  %11902 = vmatpush1.bf16.msra.mxu1 %v14931_v63 }
0x1923   :  { %11862 = vmatprep.subr.bf16.mxu0 %v14936_v48  ;;  %11903 = vmatprep.subr.bf16.mxu1 %v14939_v1 }
0x1926   :  { %11863 = vmatpush1.bf16.msra.mxu0 %v14934_v42  ;;  %11904 = vmatpush1.bf16.msra.mxu1 %v14937_v0 }
0x1927   :  { %11864 = vmatprep.subr.bf16.mxu0 %v14942_v5  ;;  %11905 = vmatprep.subr.bf16.mxu1 %v14945_v61 }
0x192a   :  { %11865 = vmatpush1.bf16.msra.mxu0 %v14940_v2  ;;  %11906 = vmatpush1.bf16.msra.mxu1 %v14943_v9 }
0x192b   :  { %11866 = vmatprep.subr.bf16.mxu0 %v14948_v24  ;;  %11907 = vmatprep.subr.bf16.mxu1 %v14951_v33 }
0x192e   :  { %11867 = vmatpush1.bf16.msra.mxu0 %v14946_v4  ;;  %11908 = vmatpush1.bf16.msra.mxu1 %v14949_v56 }
0x192f   :  { %11868 = vmatprep.subr.bf16.mxu0 %v14954_v35  ;;  %11909 = vmatprep.subr.bf16.mxu1 %v14957_v20 }
0x1932   :  { %11869 = vmatpush1.bf16.msra.mxu0 %v14952_v41  ;;  %11910 = vmatpush1.bf16.msra.mxu1 %v14955_v58 }
0x1933   :  { %11870 = vmatprep.subr.bf16.mxu0 %v14960_v19  ;;  %11911 = vmatprep.subr.bf16.mxu1 %v14963_v53 }
0x1936   :  { %11871 = vmatpush1.bf16.msra.mxu0 %v14958_v46  ;;  %11912 = vmatpush1.bf16.msra.mxu1 %v14961_v49 }
0x1939   :  { %11873 = vmatmul.mubr.bf16.vlgmr.msra.gmra.mrb[100].mxu0 %v10982_v8  ;;  %11914 = vmatmul.mubr.bf16.vlgmr.msra.gmra.mrb[100].mxu1 %v10984_v7 }
0x19cc   :  { %v11472_v22 = vpop.f32.mrb[96].mxu0  ;;  %v11513_v25 = vpop.f32.mrb[96].mxu1 }
0x19cd   :  { %v11514_v30 = vadd.f32 %v11513_v25, %v11472_v22  ;;  %v11474_v11 = vpop.f32.mrb[97].mxu0  ;;  %v11515_v12 = vpop.f32.mrb[97].mxu1 }
0x19ce   :  { %v11516_v13 = vadd.f32 %v11515_v12, %v11474_v11  ;;  %v11476_v52 = vpop.f32.mrb[98].mxu0  ;;  %v11517_v14 = vpop.f32.mrb[98].mxu1 }
0x19cf   :  { %v11477_v16 = vpop.f32.mrb[99].mxu0  ;;  %v11518_v3 = vpop.f32.mrb[99].mxu1 }
0x1a0c   :  { %v11874_v36 = vpop.f32.mrb[100].mxu0  ;;  %v11915_v45 = vpop.f32.mrb[100].mxu1 }
0x1a0d   :  { %v11875_v17 = vadd.f32 %v11874_v36, %v11514_v30  ;;  %v11876_v18 = vpop.f32.mrb[101].mxu0  ;;  %v11917_v54 = vpop.f32.mrb[101].mxu1 }
0x1a0e   :  { %v11877_v28 = vadd.f32 %v11876_v18, %v11516_v13  ;;  %v11878_v27 = vpop.f32.mrb[102].mxu0  ;;  %v11919_v15 = vpop.f32.mrb[102].mxu1 }
0x1a0f   :  { %v11916_v32 = vadd.f32 %v11915_v45, %v11875_v17  ;;  %v11879_v29 = vpop.f32.mrb[103].mxu0  ;;  %v11920_v31 = vpop.f32.mrb[103].mxu1 }
0x1a10   :  { %v11918_v39 = vadd.f32 %v11917_v54, %v11877_v28 }
0x1a11   :  { %v11934_v40 = vadd.f32 %v11927_v57, %v11916_v32 }
0x1a12   :  { %v11935_v44 = vadd.f32 %v11931_v38, %v11918_v39 }
0x1a13   :  { %11936 = vst [vmem:[#allocation25] sm:$0xff] %v11934_v40 }
0x1a14   :  { %11937 = vst [vmem:[#allocation25 + $0x8] sm:$0xff] %v11935_v44 }
0x1a15   :  { %15315 = shalt.err (!%p15312_p4)
}
0x1a16   :  { %s16195_s28 = sld [smem:[#allocation41_spill]] }
0x1a1c   :  { %s15316_s25 = scalar_lea.hbm %s16195_s28, 256 }
0x1a1d   :  { %p15317_p5 = scmp.ne.s32.totalorder %s16195_s28, %s15316_s25  ;;  %p15320_p6 = scmp.lt.u32.totalorder %s15316_s25, %s16195_s28 }
0x1a1f   :  { %p15322_p7 = pnand %p15320_p6, %p15317_p5 }
0x1a21   :  { %15325 = shalt.err (!%p15322_p7)
}
0x1a22   :  { %11947 = dma.vmem_to_hbm [thread:$0]  %s11945_s4, 256, %s16195_s28, [#allocation4]  }
0x1a23   :  { %15342 = dma.done.wait [#allocation4], 256  }
0x1a24   :  { %15343 = vsyncadd [#allocation4], 4294967040 }
0x1a25   :  { %11951 = vsyncpa [#allocation3], 1 }
0x1a26   :  { %11952 = vsyncpa [#allocation6], 1 }
0x1a27   :  { %11953 = vsyncpa [#allocation9], 1 }
0x1a28   :  { %11954 = vsyncpa [#allocation12], 1 }
0x1a29   :  { %11955 = vsyncpa [#allocation15], 1 }
0x1a2a   :  { %11956 = vsyncpa [#allocation18], 1 }
0x1a2b   :  { %11957 = vsyncpa [#allocation21], 1 }
0x1a2c   :  { %11958 = vsyncpa [#allocation24], 1 }
0x1a2d   :  { %11959 = vsyncpa [#allocation4], 1 }

</bundles_post_ra>
